<compile_context>
chip_gen: v6e
topology: v6e:2x2x1
jax: 0.10.0
libtpu: 0.0.40
codegen_flags: <defaults>
</compile_context>

<pallas_src>
import functools

import numpy as np

import jax
import jax.numpy as jnp
from jax.experimental import pallas as pl
from jax.experimental.pallas import tpu as pltpu

NEG_SLOPE = 0.1  # nn.LeakyReLU(0.1) everywhere in the reference module


# ----------------------------------------------------------------------------
# small helpers
# ----------------------------------------------------------------------------
def _leaky_f32(x):
    return jnp.where(x >= 0, x, NEG_SLOPE * x)


def _compiler_params():
    return pltpu.CompilerParams(
        dimension_semantics=("parallel",),        # batch grid axis is independent
        vmem_limit_bytes=32 * 1024 * 1024,        # explicit budget (<= v7x 64 MiB)
    )


def _batch_spec(shape):
    nd = len(shape)
    return pl.BlockSpec((1,) + tuple(shape[1:]),
                        lambda n, _nd=nd: (n,) + (0,) * (_nd - 1))


def _const_spec(shape):
    nd = len(shape)
    return pl.BlockSpec(tuple(shape), lambda n, _nd=nd: (0,) * _nd)


def _pad_flatten(x, pad):
    """x: (N, H, W, C) -> (N, Hp*Wp, C) padded + row-flattened (row stride = Wp)."""
    N, H, W, C = x.shape
    xp = jnp.pad(x, ((0, 0), (pad, pad), (pad, pad), (0, 0)))
    Hp, Wp = H + 2 * pad, W + 2 * pad
    return xp.reshape(N, Hp * Wp, C), Hp, Wp


def _phase_split(x):
    """x: (N, H, W, C) (H, W even) -> (N, 4, Hh*Wh, C) with phase p = sy*2+sx,
    ps[n, p, r*Wh+c, :] = xpad[n, 2r+sy, 2c+sx, :] where xpad has spatial pad 1."""
    N, H, W, C = x.shape
    xp = jnp.pad(x, ((0, 0), (1, 1), (1, 1), (0, 0)))
    Hh, Wh = (H + 2) // 2, (W + 2) // 2
    ps = xp.reshape(N, Hh, 2, Wh, 2, C).transpose(0, 2, 4, 1, 3, 5)
    return ps.reshape(N, 4, Hh * Wh, C), Hh, Wh


def _unflatten(yflat, Ho, Wo, S):
    """yflat: (B, L, C) with row stride S and L = (Ho-1)*S + Wo -> (B, Ho, Wo, C)."""
    B, L, C = yflat.shape
    yfull = jnp.pad(yflat, ((0, 0), (0, Ho * S - L), (0, 0)))
    return yfull.reshape(B, Ho, S, C)[:, :, :Wo, :]


# ----------------------------------------------------------------------------
# Pallas kernels
# ----------------------------------------------------------------------------
def _conv_flat_kernel(*refs, taps, L, has_bias, act):
    """Generic 3x3 conv (stride 1 or 2) on a flattened padded input.

    taps: tuple of (phase_index, flat_offset); the conv is
        acc(L, Cout) = sum_i  x[phase_i, off_i : off_i + L, :] @ w[i]
    followed by optional bias and LeakyReLU.  All dots hit the MXU (bf16 x bf16,
    f32 accumulate); im2col never touches HBM.
    """
    if has_bias:
        x_ref, w_ref, b_ref, o_ref = refs
    else:
        x_ref, w_ref, o_ref = refs
        b_ref = None
    cout = o_ref.shape[-1]
    acc = jnp.zeros((L, cout), jnp.float32)
    for i, (p, t) in enumerate(taps):
        sl = x_ref[0, p, pl.ds(t, L), :]                      # (L, Cin) bf16
        acc = acc + jnp.dot(sl, w_ref[i], preferred_element_type=jnp.float32)
    if has_bias:
        acc = acc + b_ref[...].astype(jnp.float32)
    if act:
        acc = _leaky_f32(acc)
    o_ref[0] = acc.astype(o_ref.dtype)


def _down_block_kernel(x_ref, w1_ref, w2_ref, o_ref, scr_ref, *,
                       taps1, L1, Ho, Wo, Wh, taps2, L2):
    """Fused DownSample (3x3 s2, no bias) + LeakyReLU + Conv_Block (3x3 s1, no bias)
    + LeakyReLU.  The intermediate activation never leaves VMEM (scratch)."""
    c1 = w1_ref.shape[-1]
    c2 = o_ref.shape[-1]
    wp2 = Wo + 2

    # --- stage 1: stride-2 conv from the 4-phase input ---
    acc1 = jnp.zeros((L1, c1), jnp.float32)
    for i, (p, t) in enumerate(taps1):
        sl = x_ref[0, p, pl.ds(t, L1), :]
        acc1 = acc1 + jnp.dot(sl, w1_ref[i], preferred_element_type=jnp.float32)
    h = _leaky_f32(acc1).astype(scr_ref.dtype)                # (L1, c1), row stride Wh

    # --- stash stage-1 result in a zero-padded VMEM scratch (row stride Wo+2) ---
    scr_ref[...] = jnp.zeros_like(scr_ref)
    for q in range(Ho):
        scr_ref[pl.ds((q + 1) * wp2 + 1, Wo), :] = h[q * Wh:q * Wh + Wo, :]

    # --- stage 2: stride-1 conv on the scratch ---
    acc2 = jnp.zeros((L2, c2), jnp.float32)
    for i, t in enumerate(taps2):
        sl = scr_ref[pl.ds(t, L2), :]
        acc2 = acc2 + jnp.dot(sl, w2_ref[i], preferred_element_type=jnp.float32)
    o_ref[0] = _leaky_f32(acc2).astype(o_ref.dtype)


def _up_kernel(x_ref, w_ref, b_ref, o_ref, *, Wp, Lu):
    """ConvTranspose2d(k=4, s=2, p=1) + bias + LeakyReLU via 4-phase (sub-pixel)
    decomposition: each output phase (py, px) is a 2x2 stride-1 conv over the
    pad-1 input (no zero-dilation, 4x fewer MACs)."""
    cout = o_ref.shape[-1]
    bias = b_ref[...].astype(jnp.float32)                     # (1, Cout)
    for py in range(2):
        for px in range(2):
            acc = jnp.zeros((Lu, cout), jnp.float32)
            for dy in range(2):
                for dx in range(2):
                    t = (py + dy) * Wp + (px + dx)
                    wi = py * 8 + px * 4 + dy * 2 + dx
                    sl = x_ref[0, 0, pl.ds(t, Lu), :]
                    acc = acc + jnp.dot(sl, w_ref[wi],
                                        preferred_element_type=jnp.float32)
            acc = _leaky_f32(acc + bias)
            o_ref[0, py * 2 + px] = acc.astype(o_ref.dtype)


# ----------------------------------------------------------------------------
# layer wrappers (pallas_call + layout glue only)
# ----------------------------------------------------------------------------
def conv3x3(x, w9, b, *, stride, act, out_dtype):
    """x: (N, H, W, Cin) bf16; w9: (9, Cin, Cout) bf16 (tap-major, ky*3+kx);
    b: (Cout,) f32 or None."""
    N, H, W, Cin = x.shape
    Cout = w9.shape[-1]
    if stride == 1:
        xf, _, Wp = _pad_flatten(x, 1)
        xf = xf.reshape(N, 1, -1, Cin)
        Ho, Wo, S = H, W, Wp
        taps = tuple((0, dy * Wp + dx) for dy in range(3) for dx in range(3))
    else:
        assert H % 2 == 0 and W % 2 == 0
        xf, _, Wh = _phase_split(x)
        Ho, Wo, S = H // 2, W // 2, Wh
        taps = tuple(((ky % 2) * 2 + (kx % 2), (ky // 2) * Wh + (kx // 2))
                     for ky in range(3) for kx in range(3))
    L = (Ho - 1) * S + Wo
    has_bias = b is not None
    args = [xf, w9]
    in_specs = [_batch_spec(xf.shape), _const_spec(w9.shape)]
    if has_bias:
        b2 = b.reshape(1, Cout).astype(jnp.float32)
        args.append(b2)
        in_specs.append(_const_spec(b2.shape))
    kern = functools.partial(_conv_flat_kernel, taps=taps, L=L,
                             has_bias=has_bias, act=act)
    yflat = pl.pallas_call(
        kern,
        grid=(N,),
        in_specs=in_specs,
        out_specs=_batch_spec((N, L, Cout)),
        out_shape=jax.ShapeDtypeStruct((N, L, Cout), out_dtype),
        compiler_params=_compiler_params(),
    )(*args)
    return _unflatten(yflat, Ho, Wo, S)


def down_block(x, w_down, w_conv, *, out_dtype):
    """Fused DownSample(3x3 s2 p1, no bias)+LeakyReLU + Conv_Block(3x3 s1 p1)+LeakyReLU."""
    N, H, W, Cin = x.shape
    assert H % 2 == 0 and W % 2 == 0
    C1, C2 = w_down.shape[-1], w_conv.shape[-1]
    xf, _, Wh = _phase_split(x)
    Ho, Wo = H // 2, W // 2
    L1 = (Ho - 1) * Wh + Wo
    taps1 = tuple(((ky % 2) * 2 + (kx % 2), (ky // 2) * Wh + (kx // 2))
                  for ky in range(3) for kx in range(3))
    Wp2 = Wo + 2
    L2 = (Ho - 1) * Wp2 + Wo
    taps2 = tuple(dy * Wp2 + dx for dy in range(3) for dx in range(3))
    kern = functools.partial(_down_block_kernel, taps1=taps1, L1=L1,
                             Ho=Ho, Wo=Wo, Wh=Wh, taps2=taps2, L2=L2)
    yflat = pl.pallas_call(
        kern,
        grid=(N,),
        in_specs=[_batch_spec(xf.shape), _const_spec(w_down.shape),
                  _const_spec(w_conv.shape)],
        out_specs=_batch_spec((N, L2, C2)),
        out_shape=jax.ShapeDtypeStruct((N, L2, C2), out_dtype),
        scratch_shapes=[pltpu.VMEM(((Ho + 2) * Wp2, C1), jnp.bfloat16)],
        compiler_params=_compiler_params(),
    )(xf, w_down, w_conv)
    return _unflatten(yflat, Ho, Wo, Wp2)


def up_conv_t(x, w16, b, *, out_dtype):
    """ConvTranspose2d(k=4, s=2, p=1) + bias + LeakyReLU.  x: (N,H,W,Cin) -> (N,2H,2W,Cout)."""
    N, H, W, Cin = x.shape
    Cout = w16.shape[-1]
    xf, _, Wp = _pad_flatten(x, 1)
    xf = xf.reshape(N, 1, -1, Cin)
    Lu = (H - 1) * Wp + W
    b2 = b.reshape(1, Cout).astype(jnp.float32)
    kern = functools.partial(_up_kernel, Wp=Wp, Lu=Lu)
    yflat = pl.pallas_call(
        kern,
        grid=(N,),
        in_specs=[_batch_spec(xf.shape), _const_spec(w16.shape), _const_spec(b2.shape)],
        out_specs=_batch_spec((N, 4, Lu, Cout)),
        out_shape=jax.ShapeDtypeStruct((N, 4, Lu, Cout), out_dtype),
        compiler_params=_compiler_params(),
    )(xf, w16, b2)
    # un-flatten each phase, then interleave phases back to full resolution
    ph = _unflatten(yflat.reshape(N * 4, Lu, Cout), H, W, Wp)       # (N*4, H, W, C)
    ph = ph.reshape(N, 2, 2, H, W, Cout)                            # [n, py, px, q, r, c]
    return ph.transpose(0, 3, 1, 4, 2, 5).reshape(N, 2 * H, 2 * W, Cout)


# ----------------------------------------------------------------------------
# UNet_2d forward (Pallas path)
# ----------------------------------------------------------------------------
def unet2d_forward(x_nchw, p):
    bf = jnp.bfloat16
    x = jnp.transpose(x_nchw, (0, 2, 3, 1)).astype(bf)              # NCHW -> NHWC bf16
    # DownSample(k3, s2, p1, bias=False) + LeakyReLU(0.1)
    R1 = conv3x3(x, p["down1_w"], None, stride=2, act=True, out_dtype=bf)
    # Fused DownSample + Conv_Block (intermediate stays in VMEM)
    R2 = down_block(R1, p["down2_w"], p["conv2_w"], out_dtype=bf)
    R3 = down_block(R2, p["down3_w"], p["conv3_w"], out_dtype=bf)
    # UpSample: ConvTranspose2d(k4, s2, p1, bias) + LeakyReLU, then cat(out, skip)
    O2 = jnp.concatenate([up_conv_t(R3, p["up1_w"], p["up1_b"], out_dtype=bf), R2], axis=-1)
    O1 = jnp.concatenate([up_conv_t(O2, p["up2_w"], p["up2_b"], out_dtype=bf), R1], axis=-1)
    O0 = jnp.concatenate([up_conv_t(O1, p["up3_w"], p["up3_b"], out_dtype=bf), x], axis=-1)
    # out: Conv2d(2C -> C, k3, p1, bias=True), no activation
    y = conv3x3(O0, p["out_w"], p["out_b"], stride=1, act=False, out_dtype=jnp.float32)
    return jnp.transpose(y, (0, 3, 1, 2))                           # NHWC -> NCHW


# ----------------------------------------------------------------------------
# parameters: raw PyTorch-layout init + one-time packing into kernel layout
# ----------------------------------------------------------------------------
def init_raw_params(key, C):
    ks = jax.random.split(key, 13)

    def w_conv(k, cout, cin):
        return 0.1 * jax.random.normal(k, (cout, cin, 3, 3), jnp.float32)     # OIHW

    def w_convt(k, cin, cout):
        return 0.1 * jax.random.normal(k, (cin, cout, 4, 4), jnp.float32)     # IOHW

    def bias(k, cout):
        return 0.05 * jax.random.normal(k, (cout,), jnp.float32)

    return {
        "down1_w": w_conv(ks[0], C, C),
        "down2_w": w_conv(ks[1], C, C), "conv2_w": w_conv(ks[2], C, C),
        "down3_w": w_conv(ks[3], C, C), "conv3_w": w_conv(ks[4], C, C),
        "up1_w": w_convt(ks[5], C, C),      "up1_b": bias(ks[6], C),
        "up2_w": w_convt(ks[7], 2 * C, C),  "up2_b": bias(ks[8], C),
        "up3_w": w_convt(ks[9], 2 * C, C),  "up3_b": bias(ks[10], C),
        "out_w": w_conv(ks[11], C, 2 * C),  "out_b": bias(ks[12], C),
    }


def _pack_conv3(w_oihw):
    """OIHW (Cout,Cin,3,3) -> (9, Cin, Cout) bf16, tap index ky*3+kx."""
    Cout, Cin, _, _ = w_oihw.shape
    return jnp.transpose(w_oihw, (2, 3, 1, 0)).reshape(9, Cin, Cout).astype(jnp.bfloat16)


def _pack_convt4(w_iohw):
    """IOHW (Cin,Cout,4,4) -> (16, Cin, Cout) bf16 indexed py*8+px*4+dy*2+dx,
    where the tap multiplies w[:, :, 3-(2*dy+py), 3-(2*dx+px)] (phase decomposition)."""
    wt = jnp.transpose(w_iohw, (2, 3, 0, 1))                 # (4, 4, Cin, Cout)
    taps = []
    for py in range(2):
        for px in range(2):
            for dy in range(2):
                for dx in range(2):
                    taps.append(wt[3 - (2 * dy + py), 3 - (2 * dx + px)])
    return jnp.stack(taps).astype(jnp.bfloat16)


def pack_params(raw):
    packed = {}
    for name in ("down1_w", "down2_w", "conv2_w", "down3_w", "conv3_w", "out_w"):
        packed[name] = _pack_conv3(raw[name])
    for name in ("up1_w", "up2_w", "up3_w"):
        packed[name] = _pack_convt4(raw[name])
    for name in ("up1_b", "up2_b", "up3_b", "out_b"):
        packed[name] = raw[name].astype(jnp.float32)
    return packed


# ----------------------------------------------------------------------------
# pure-JAX (XLA) reference, f32, PyTorch semantics -- for correctness check only
# ----------------------------------------------------------------------------
def _conv_ref(x, w, b, stride):
    y = jax.lax.conv_general_dilated(x, w, (stride, stride), ((1, 1), (1, 1)),
                                     dimension_numbers=("NCHW", "OIHW", "NCHW"))
    return y if b is None else y + b[None, :, None, None]


def _convt_ref(x, w_iohw, b):
    w_eq = jnp.transpose(jnp.flip(w_iohw, (2, 3)), (1, 0, 2, 3))     # -> OIHW
    y = jax.lax.conv_general_dilated(x, w_eq, (1, 1), ((2, 2), (2, 2)),
                                     lhs_dilation=(2, 2),
                                     dimension_numbers=("NCHW", "OIHW", "NCHW"))
    return y + b[None, :, None, None]


def unet2d_reference(x, rp):
    lk = _leaky_f32
    R1 = lk(_conv_ref(x, rp["down1_w"], None, 2))
    R2 = lk(_conv_ref(lk(_conv_ref(R1, rp["down2_w"], None, 2)), rp["conv2_w"], None, 1))
    R3 = lk(_conv_ref(lk(_conv_ref(R2, rp["down3_w"], None, 2)), rp["conv3_w"], None, 1))
    O2 = jnp.concatenate([lk(_convt_ref(R3, rp["up1_w"], rp["up1_b"])), R2], axis=1)
    O1 = jnp.concatenate([lk(_convt_ref(O2, rp["up2_w"], rp["up2_b"])), R1], axis=1)
    O0 = jnp.concatenate([lk(_convt_ref(O1, rp["up3_w"], rp["up3_b"])), x], axis=1)
    return _conv_ref(O0, rp["out_w"], rp["out_b"], 1)


# ----------------------------------------------------------------------------
if __name__ == "__main__":
    key = jax.random.PRNGKey(0)
    k_x, k_p = jax.random.split(key)

    N, C, H, W = 2, 4, 16, 16
    x = jax.random.normal(k_x, (N, C, H, W), jnp.float32)     # NCHW, like PyTorch

    raw_params = init_raw_params(k_p, C)
    packed_params = pack_params(raw_params)                   # one-time weight packing

    fwd = jax.jit(unet2d_forward)
    out = fwd(x, packed_params)
    out = jax.block_until_ready(out)
    assert out.shape == (N, C, H, W), out.shape

    # loose tolerance: Pallas path uses bf16 matmul operands with f32 accumulation
    ref = unet2d_reference(x, raw_params)
    np.testing.assert_allclose(np.asarray(out, dtype=np.float32),
                               np.asarray(ref, dtype=np.float32),
                               rtol=1e-1, atol=1e-1)

    print("KERNEL_OK")
</pallas_src>

<mosaic_0001>
module attributes {stable_mosaic.version = 11 : i64} {
  func.func @_conv_flat_kernel(%arg0: i32, %arg1: memref<1x4x81x4xbf16, #tpu.memory_space<vmem>>, %arg2: memref<9x4x4xbf16, #tpu.memory_space<vmem>>, %arg3: memref<1x71x4xbf16, #tpu.memory_space<vmem>>) attributes {dimension_semantics = [#tpu.dimension_semantics<parallel>], iteration_bounds = array<i64: 2>, scalar_prefetch = 0 : i64, scratch_operands = 0 : i64, tpu.core_type = #tpu.core_type<tc>, window_params = [{transform_indices = @transform_0, window_bounds = array<i64: 1, 4, 81, 4>}, {pipeline_mode = #tpu.pipeline_mode<synchronous>, transform_indices = @transform_1, window_bounds = array<i64: 9, 4, 4>}, {transform_indices = @transform_2, window_bounds = array<i64: 1, 71, 4>}]} {
    %cst = arith.constant 0.000000e+00 : f32
    %0 = vector.broadcast %cst : f32 to vector<71x4xf32>
    %c0 = arith.constant 0 : index
    %c0_0 = arith.constant 0 : index
    %c0_1 = arith.constant 0 : index
    %c0_2 = arith.constant 0 : index
    %1 = vector.load %arg1[%c0, %c0_0, %c0_1, %c0_2] : memref<1x4x81x4xbf16, #tpu.memory_space<vmem>>, vector<1x1x71x4xbf16>
    %2 = vector.shape_cast %1 : vector<1x1x71x4xbf16> to vector<71x4xbf16>
    %c0_3 = arith.constant 0 : index
    %c0_4 = arith.constant 0 : index
    %c0_5 = arith.constant 0 : index
    %3 = vector.load %arg2[%c0_3, %c0_4, %c0_5] : memref<9x4x4xbf16, #tpu.memory_space<vmem>>, vector<1x4x4xbf16>
    %4 = vector.shape_cast %3 : vector<1x4x4xbf16> to vector<4x4xbf16>
    %cst_6 = arith.constant dense<0.000000e+00> : vector<71x4xf32>
    %5 = tpu.matmul %2, %4, %cst_6 {dimension_numbers = #tpu.dot_dimension_numbers<[1], [0], [0], [1], [0, 0, 1, 1], [], []>} : vector<71x4xbf16>, vector<4x4xbf16>, vector<71x4xf32> -> vector<71x4xf32>
    %6 = arith.addf %0, %5 : vector<71x4xf32>
    %c0_7 = arith.constant 0 : index
    %c1 = arith.constant 1 : index
    %c0_8 = arith.constant 0 : index
    %c0_9 = arith.constant 0 : index
    %7 = vector.load %arg1[%c0_7, %c1, %c0_8, %c0_9] : memref<1x4x81x4xbf16, #tpu.memory_space<vmem>>, vector<1x1x71x4xbf16>
    %8 = vector.shape_cast %7 : vector<1x1x71x4xbf16> to vector<71x4xbf16>
    %c1_10 = arith.constant 1 : index
    %c0_11 = arith.constant 0 : index
    %c0_12 = arith.constant 0 : index
    %9 = vector.load %arg2[%c1_10, %c0_11, %c0_12] : memref<9x4x4xbf16, #tpu.memory_space<vmem>>, vector<1x4x4xbf16>
    %10 = vector.shape_cast %9 : vector<1x4x4xbf16> to vector<4x4xbf16>
    %cst_13 = arith.constant dense<0.000000e+00> : vector<71x4xf32>
    %11 = tpu.matmul %8, %10, %cst_13 {dimension_numbers = #tpu.dot_dimension_numbers<[1], [0], [0], [1], [0, 0, 1, 1], [], []>} : vector<71x4xbf16>, vector<4x4xbf16>, vector<71x4xf32> -> vector<71x4xf32>
    %12 = arith.addf %6, %11 : vector<71x4xf32>
    %c0_14 = arith.constant 0 : index
    %c0_15 = arith.constant 0 : index
    %c1_16 = arith.constant 1 : index
    %c0_17 = arith.constant 0 : index
    %13 = vector.load %arg1[%c0_14, %c0_15, %c1_16, %c0_17] : memref<1x4x81x4xbf16, #tpu.memory_space<vmem>>, vector<1x1x71x4xbf16>
    %14 = vector.shape_cast %13 : vector<1x1x71x4xbf16> to vector<71x4xbf16>
    %c2 = arith.constant 2 : index
    %c0_18 = arith.constant 0 : index
    %c0_19 = arith.constant 0 : index
    %15 = vector.load %arg2[%c2, %c0_18, %c0_19] : memref<9x4x4xbf16, #tpu.memory_space<vmem>>, vector<1x4x4xbf16>
    %16 = vector.shape_cast %15 : vector<1x4x4xbf16> to vector<4x4xbf16>
    %cst_20 = arith.constant dense<0.000000e+00> : vector<71x4xf32>
    %17 = tpu.matmul %14, %16, %cst_20 {dimension_numbers = #tpu.dot_dimension_numbers<[1], [0], [0], [1], [0, 0, 1, 1], [], []>} : vector<71x4xbf16>, vector<4x4xbf16>, vector<71x4xf32> -> vector<71x4xf32>
    %18 = arith.addf %12, %17 : vector<71x4xf32>
    %c0_21 = arith.constant 0 : index
    %c2_22 = arith.constant 2 : index
    %c0_23 = arith.constant 0 : index
    %c0_24 = arith.constant 0 : index
    %19 = vector.load %arg1[%c0_21, %c2_22, %c0_23, %c0_24] : memref<1x4x81x4xbf16, #tpu.memory_space<vmem>>, vector<1x1x71x4xbf16>
    %20 = vector.shape_cast %19 : vector<1x1x71x4xbf16> to vector<71x4xbf16>
    %c3 = arith.constant 3 : index
    %c0_25 = arith.constant 0 : index
    %c0_26 = arith.constant 0 : index
    %21 = vector.load %arg2[%c3, %c0_25, %c0_26] : memref<9x4x4xbf16, #tpu.memory_space<vmem>>, vector<1x4x4xbf16>
    %22 = vector.shape_cast %21 : vector<1x4x4xbf16> to vector<4x4xbf16>
    %cst_27 = arith.constant dense<0.000000e+00> : vector<71x4xf32>
    %23 = tpu.matmul %20, %22, %cst_27 {dimension_numbers = #tpu.dot_dimension_numbers<[1], [0], [0], [1], [0, 0, 1, 1], [], []>} : vector<71x4xbf16>, vector<4x4xbf16>, vector<71x4xf32> -> vector<71x4xf32>
    %24 = arith.addf %18, %23 : vector<71x4xf32>
    %c0_28 = arith.constant 0 : index
    %c3_29 = arith.constant 3 : index
    %c0_30 = arith.constant 0 : index
    %c0_31 = arith.constant 0 : index
    %25 = vector.load %arg1[%c0_28, %c3_29, %c0_30, %c0_31] : memref<1x4x81x4xbf16, #tpu.memory_space<vmem>>, vector<1x1x71x4xbf16>
    %26 = vector.shape_cast %25 : vector<1x1x71x4xbf16> to vector<71x4xbf16>
    %c4 = arith.constant 4 : index
    %c0_32 = arith.constant 0 : index
    %c0_33 = arith.constant 0 : index
    %27 = vector.load %arg2[%c4, %c0_32, %c0_33] : memref<9x4x4xbf16, #tpu.memory_space<vmem>>, vector<1x4x4xbf16>
    %28 = vector.shape_cast %27 : vector<1x4x4xbf16> to vector<4x4xbf16>
    %cst_34 = arith.constant dense<0.000000e+00> : vector<71x4xf32>
    %29 = tpu.matmul %26, %28, %cst_34 {dimension_numbers = #tpu.dot_dimension_numbers<[1], [0], [0], [1], [0, 0, 1, 1], [], []>} : vector<71x4xbf16>, vector<4x4xbf16>, vector<71x4xf32> -> vector<71x4xf32>
    %30 = arith.addf %24, %29 : vector<71x4xf32>
    %c0_35 = arith.constant 0 : index
    %c2_36 = arith.constant 2 : index
    %c1_37 = arith.constant 1 : index
    %c0_38 = arith.constant 0 : index
    %31 = vector.load %arg1[%c0_35, %c2_36, %c1_37, %c0_38] : memref<1x4x81x4xbf16, #tpu.memory_space<vmem>>, vector<1x1x71x4xbf16>
    %32 = vector.shape_cast %31 : vector<1x1x71x4xbf16> to vector<71x4xbf16>
    %c5 = arith.constant 5 : index
    %c0_39 = arith.constant 0 : index
    %c0_40 = arith.constant 0 : index
    %33 = vector.load %arg2[%c5, %c0_39, %c0_40] : memref<9x4x4xbf16, #tpu.memory_space<vmem>>, vector<1x4x4xbf16>
    %34 = vector.shape_cast %33 : vector<1x4x4xbf16> to vector<4x4xbf16>
    %cst_41 = arith.constant dense<0.000000e+00> : vector<71x4xf32>
    %35 = tpu.matmul %32, %34, %cst_41 {dimension_numbers = #tpu.dot_dimension_numbers<[1], [0], [0], [1], [0, 0, 1, 1], [], []>} : vector<71x4xbf16>, vector<4x4xbf16>, vector<71x4xf32> -> vector<71x4xf32>
    %36 = arith.addf %30, %35 : vector<71x4xf32>
    %c0_42 = arith.constant 0 : index
    %c0_43 = arith.constant 0 : index
    %c9 = arith.constant 9 : index
    %c0_44 = arith.constant 0 : index
    %37 = vector.load %arg1[%c0_42, %c0_43, %c9, %c0_44] : memref<1x4x81x4xbf16, #tpu.memory_space<vmem>>, vector<1x1x71x4xbf16>
    %38 = vector.shape_cast %37 : vector<1x1x71x4xbf16> to vector<71x4xbf16>
    %c6 = arith.constant 6 : index
    %c0_45 = arith.constant 0 : index
    %c0_46 = arith.constant 0 : index
    %39 = vector.load %arg2[%c6, %c0_45, %c0_46] : memref<9x4x4xbf16, #tpu.memory_space<vmem>>, vector<1x4x4xbf16>
    %40 = vector.shape_cast %39 : vector<1x4x4xbf16> to vector<4x4xbf16>
    %cst_47 = arith.constant dense<0.000000e+00> : vector<71x4xf32>
    %41 = tpu.matmul %38, %40, %cst_47 {dimension_numbers = #tpu.dot_dimension_numbers<[1], [0], [0], [1], [0, 0, 1, 1], [], []>} : vector<71x4xbf16>, vector<4x4xbf16>, vector<71x4xf32> -> vector<71x4xf32>
    %42 = arith.addf %36, %41 : vector<71x4xf32>
    %c0_48 = arith.constant 0 : index
    %c1_49 = arith.constant 1 : index
    %c9_50 = arith.constant 9 : index
    %c0_51 = arith.constant 0 : index
    %43 = vector.load %arg1[%c0_48, %c1_49, %c9_50, %c0_51] : memref<1x4x81x4xbf16, #tpu.memory_space<vmem>>, vector<1x1x71x4xbf16>
    %44 = vector.shape_cast %43 : vector<1x1x71x4xbf16> to vector<71x4xbf16>
    %c7 = arith.constant 7 : index
    %c0_52 = arith.constant 0 : index
    %c0_53 = arith.constant 0 : index
    %45 = vector.load %arg2[%c7, %c0_52, %c0_53] : memref<9x4x4xbf16, #tpu.memory_space<vmem>>, vector<1x4x4xbf16>
    %46 = vector.shape_cast %45 : vector<1x4x4xbf16> to vector<4x4xbf16>
    %cst_54 = arith.constant dense<0.000000e+00> : vector<71x4xf32>
    %47 = tpu.matmul %44, %46, %cst_54 {dimension_numbers = #tpu.dot_dimension_numbers<[1], [0], [0], [1], [0, 0, 1, 1], [], []>} : vector<71x4xbf16>, vector<4x4xbf16>, vector<71x4xf32> -> vector<71x4xf32>
    %48 = arith.addf %42, %47 : vector<71x4xf32>
    %c0_55 = arith.constant 0 : index
    %c0_56 = arith.constant 0 : index
    %c10 = arith.constant 10 : index
    %c0_57 = arith.constant 0 : index
    %49 = vector.load %arg1[%c0_55, %c0_56, %c10, %c0_57] : memref<1x4x81x4xbf16, #tpu.memory_space<vmem>>, vector<1x1x71x4xbf16>
    %50 = vector.shape_cast %49 : vector<1x1x71x4xbf16> to vector<71x4xbf16>
    %c8 = arith.constant 8 : index
    %c0_58 = arith.constant 0 : index
    %c0_59 = arith.constant 0 : index
    %51 = vector.load %arg2[%c8, %c0_58, %c0_59] : memref<9x4x4xbf16, #tpu.memory_space<vmem>>, vector<1x4x4xbf16>
    %52 = vector.shape_cast %51 : vector<1x4x4xbf16> to vector<4x4xbf16>
    %cst_60 = arith.constant dense<0.000000e+00> : vector<71x4xf32>
    %53 = tpu.matmul %50, %52, %cst_60 {dimension_numbers = #tpu.dot_dimension_numbers<[1], [0], [0], [1], [0, 0, 1, 1], [], []>} : vector<71x4xbf16>, vector<4x4xbf16>, vector<71x4xf32> -> vector<71x4xf32>
    %54 = arith.addf %48, %53 : vector<71x4xf32>
    %cst_61 = arith.constant 0.000000e+00 : f32
    %55 = vector.broadcast %cst_61 : f32 to vector<71x4xf32>
    %56 = arith.cmpf oge, %54, %55 : vector<71x4xf32>
    %cst_62 = arith.constant 1.000000e-01 : f32
    %57 = vector.broadcast %cst_62 : f32 to vector<71x4xf32>
    %58 = arith.mulf %57, %54 : vector<71x4xf32>
    %59 = arith.select %56, %54, %58 : vector<71x4xi1>, vector<71x4xf32>
    %60 = arith.truncf %59 : vector<71x4xf32> to vector<71x4xbf16>
    %c0_63 = arith.constant 0 : index
    %c0_64 = arith.constant 0 : index
    %c0_65 = arith.constant 0 : index
    %61 = vector.load %arg3[%c0_63, %c0_64, %c0_65] : memref<1x71x4xbf16, #tpu.memory_space<vmem>>, vector<1x71x4xbf16>
    %62 = vector.shape_cast %61 : vector<1x71x4xbf16> to vector<71x4xbf16>
    %63 = vector.shape_cast %60 : vector<71x4xbf16> to vector<1x71x4xbf16>
    tpu.vector_store %arg3[%c0_63, %c0_64, %c0_65], %63 {strides = array<i32>} : memref<1x71x4xbf16, #tpu.memory_space<vmem>>, vector<1x71x4xbf16>,
    return
  }
  func.func @transform_0(%arg0: i32) -> (i32, i32, i32, i32) {
    %c0_i32 = arith.constant 0 : i32
    %c0_i32_0 = arith.constant 0 : i32
    %c0_i32_1 = arith.constant 0 : i32
    %c0_i32_2 = arith.constant 0 : i32
    return %arg0, %c0_i32, %c0_i32_0, %c0_i32_1 : i32, i32, i32, i32
  }
  func.func @transform_1(%arg0: i32) -> (i32, i32, i32) {
    %c0_i32 = arith.constant 0 : i32
    %c0_i32_0 = arith.constant 0 : i32
    %c0_i32_1 = arith.constant 0 : i32
    %c0_i32_2 = arith.constant 0 : i32
    return %c0_i32, %c0_i32_0, %c0_i32_1 : i32, i32, i32
  }
  func.func @transform_2(%arg0: i32) -> (i32, i32, i32) {
    %c0_i32 = arith.constant 0 : i32
    %c0_i32_0 = arith.constant 0 : i32
    %c0_i32_1 = arith.constant 0 : i32
    return %arg0, %c0_i32, %c0_i32_0 : i32, i32, i32
  }
}

module attributes {stable_mosaic.version = 11 : i64} {
  func.func @_down_block_kernel(%arg0: i32, %arg1: memref<1x4x25x4xbf16, #tpu.memory_space<vmem>>, %arg2: memref<9x4x4xbf16, #tpu.memory_space<vmem>>, %arg3: memref<9x4x4xbf16, #tpu.memory_space<vmem>>, %arg4: memref<1x22x4xbf16, #tpu.memory_space<vmem>>, %arg5: memref<36x4xbf16, #tpu.memory_space<vmem>>) attributes {dimension_semantics = [#tpu.dimension_semantics<parallel>], iteration_bounds = array<i64: 2>, scalar_prefetch = 0 : i64, scratch_operands = 1 : i64, tpu.core_type = #tpu.core_type<tc>, window_params = [{transform_indices = @transform_0, window_bounds = array<i64: 1, 4, 25, 4>}, {pipeline_mode = #tpu.pipeline_mode<synchronous>, transform_indices = @transform_1, window_bounds = array<i64: 9, 4, 4>}, {pipeline_mode = #tpu.pipeline_mode<synchronous>, transform_indices = @transform_2, window_bounds = array<i64: 9, 4, 4>}, {transform_indices = @transform_3, window_bounds = array<i64: 1, 22, 4>}]} {
    %cst = arith.constant 0.000000e+00 : f32
    %0 = vector.broadcast %cst : f32 to vector<19x4xf32>
    %c0 = arith.constant 0 : index
    %c0_0 = arith.constant 0 : index
    %c0_1 = arith.constant 0 : index
    %c0_2 = arith.constant 0 : index
    %1 = vector.load %arg1[%c0, %c0_0, %c0_1, %c0_2] : memref<1x4x25x4xbf16, #tpu.memory_space<vmem>>, vector<1x1x19x4xbf16>
    %2 = vector.shape_cast %1 : vector<1x1x19x4xbf16> to vector<19x4xbf16>
    %c0_3 = arith.constant 0 : index
    %c0_4 = arith.constant 0 : index
    %c0_5 = arith.constant 0 : index
    %3 = vector.load %arg2[%c0_3, %c0_4, %c0_5] : memref<9x4x4xbf16, #tpu.memory_space<vmem>>, vector<1x4x4xbf16>
    %4 = vector.shape_cast %3 : vector<1x4x4xbf16> to vector<4x4xbf16>
    %cst_6 = arith.constant dense<0.000000e+00> : vector<19x4xf32>
    %5 = tpu.matmul %2, %4, %cst_6 {dimension_numbers = #tpu.dot_dimension_numbers<[1], [0], [0], [1], [0, 0, 1, 1], [], []>} : vector<19x4xbf16>, vector<4x4xbf16>, vector<19x4xf32> -> vector<19x4xf32>
    %6 = arith.addf %0, %5 : vector<19x4xf32>
    %c0_7 = arith.constant 0 : index
    %c1 = arith.constant 1 : index
    %c0_8 = arith.constant 0 : index
    %c0_9 = arith.constant 0 : index
    %7 = vector.load %arg1[%c0_7, %c1, %c0_8, %c0_9] : memref<1x4x25x4xbf16, #tpu.memory_space<vmem>>, vector<1x1x19x4xbf16>
    %8 = vector.shape_cast %7 : vector<1x1x19x4xbf16> to vector<19x4xbf16>
    %c1_10 = arith.constant 1 : index
    %c0_11 = arith.constant 0 : index
    %c0_12 = arith.constant 0 : index
    %9 = vector.load %arg2[%c1_10, %c0_11, %c0_12] : memref<9x4x4xbf16, #tpu.memory_space<vmem>>, vector<1x4x4xbf16>
    %10 = vector.shape_cast %9 : vector<1x4x4xbf16> to vector<4x4xbf16>
    %cst_13 = arith.constant dense<0.000000e+00> : vector<19x4xf32>
    %11 = tpu.matmul %8, %10, %cst_13 {dimension_numbers = #tpu.dot_dimension_numbers<[1], [0], [0], [1], [0, 0, 1, 1], [], []>} : vector<19x4xbf16>, vector<4x4xbf16>, vector<19x4xf32> -> vector<19x4xf32>
    %12 = arith.addf %6, %11 : vector<19x4xf32>
    %c0_14 = arith.constant 0 : index
    %c0_15 = arith.constant 0 : index
    %c1_16 = arith.constant 1 : index
    %c0_17 = arith.constant 0 : index
    %13 = vector.load %arg1[%c0_14, %c0_15, %c1_16, %c0_17] : memref<1x4x25x4xbf16, #tpu.memory_space<vmem>>, vector<1x1x19x4xbf16>
    %14 = vector.shape_cast %13 : vector<1x1x19x4xbf16> to vector<19x4xbf16>
    %c2 = arith.constant 2 : index
    %c0_18 = arith.constant 0 : index
    %c0_19 = arith.constant 0 : index
    %15 = vector.load %arg2[%c2, %c0_18, %c0_19] : memref<9x4x4xbf16, #tpu.memory_space<vmem>>, vector<1x4x4xbf16>
    %16 = vector.shape_cast %15 : vector<1x4x4xbf16> to vector<4x4xbf16>
    %cst_20 = arith.constant dense<0.000000e+00> : vector<19x4xf32>
    %17 = tpu.matmul %14, %16, %cst_20 {dimension_numbers = #tpu.dot_dimension_numbers<[1], [0], [0], [1], [0, 0, 1, 1], [], []>} : vector<19x4xbf16>, vector<4x4xbf16>, vector<19x4xf32> -> vector<19x4xf32>
    %18 = arith.addf %12, %17 : vector<19x4xf32>
    %c0_21 = arith.constant 0 : index
    %c2_22 = arith.constant 2 : index
    %c0_23 = arith.constant 0 : index
    %c0_24 = arith.constant 0 : index
    %19 = vector.load %arg1[%c0_21, %c2_22, %c0_23, %c0_24] : memref<1x4x25x4xbf16, #tpu.memory_space<vmem>>, vector<1x1x19x4xbf16>
    %20 = vector.shape_cast %19 : vector<1x1x19x4xbf16> to vector<19x4xbf16>
    %c3 = arith.constant 3 : index
    %c0_25 = arith.constant 0 : index
    %c0_26 = arith.constant 0 : index
    %21 = vector.load %arg2[%c3, %c0_25, %c0_26] : memref<9x4x4xbf16, #tpu.memory_space<vmem>>, vector<1x4x4xbf16>
    %22 = vector.shape_cast %21 : vector<1x4x4xbf16> to vector<4x4xbf16>
    %cst_27 = arith.constant dense<0.000000e+00> : vector<19x4xf32>
    %23 = tpu.matmul %20, %22, %cst_27 {dimension_numbers = #tpu.dot_dimension_numbers<[1], [0], [0], [1], [0, 0, 1, 1], [], []>} : vector<19x4xbf16>, vector<4x4xbf16>, vector<19x4xf32> -> vector<19x4xf32>
    %24 = arith.addf %18, %23 : vector<19x4xf32>
    %c0_28 = arith.constant 0 : index
    %c3_29 = arith.constant 3 : index
    %c0_30 = arith.constant 0 : index
    %c0_31 = arith.constant 0 : index
    %25 = vector.load %arg1[%c0_28, %c3_29, %c0_30, %c0_31] : memref<1x4x25x4xbf16, #tpu.memory_space<vmem>>, vector<1x1x19x4xbf16>
    %26 = vector.shape_cast %25 : vector<1x1x19x4xbf16> to vector<19x4xbf16>
    %c4 = arith.constant 4 : index
    %c0_32 = arith.constant 0 : index
    %c0_33 = arith.constant 0 : index
    %27 = vector.load %arg2[%c4, %c0_32, %c0_33] : memref<9x4x4xbf16, #tpu.memory_space<vmem>>, vector<1x4x4xbf16>
    %28 = vector.shape_cast %27 : vector<1x4x4xbf16> to vector<4x4xbf16>
    %cst_34 = arith.constant dense<0.000000e+00> : vector<19x4xf32>
    %29 = tpu.matmul %26, %28, %cst_34 {dimension_numbers = #tpu.dot_dimension_numbers<[1], [0], [0], [1], [0, 0, 1, 1], [], []>} : vector<19x4xbf16>, vector<4x4xbf16>, vector<19x4xf32> -> vector<19x4xf32>
    %30 = arith.addf %24, %29 : vector<19x4xf32>
    %c0_35 = arith.constant 0 : index
    %c2_36 = arith.constant 2 : index
    %c1_37 = arith.constant 1 : index
    %c0_38 = arith.constant 0 : index
    %31 = vector.load %arg1[%c0_35, %c2_36, %c1_37, %c0_38] : memref<1x4x25x4xbf16, #tpu.memory_space<vmem>>, vector<1x1x19x4xbf16>
    %32 = vector.shape_cast %31 : vector<1x1x19x4xbf16> to vector<19x4xbf16>
    %c5 = arith.constant 5 : index
    %c0_39 = arith.constant 0 : index
    %c0_40 = arith.constant 0 : index
    %33 = vector.load %arg2[%c5, %c0_39, %c0_40] : memref<9x4x4xbf16, #tpu.memory_space<vmem>>, vector<1x4x4xbf16>
    %34 = vector.shape_cast %33 : vector<1x4x4xbf16> to vector<4x4xbf16>
    %cst_41 = arith.constant dense<0.000000e+00> : vector<19x4xf32>
    %35 = tpu.matmul %32, %34, %cst_41 {dimension_numbers = #tpu.dot_dimension_numbers<[1], [0], [0], [1], [0, 0, 1, 1], [], []>} : vector<19x4xbf16>, vector<4x4xbf16>, vector<19x4xf32> -> vector<19x4xf32>
    %36 = arith.addf %30, %35 : vector<19x4xf32>
    %c0_42 = arith.constant 0 : index
    %c0_43 = arith.constant 0 : index
    %c5_44 = arith.constant 5 : index
    %c0_45 = arith.constant 0 : index
    %37 = vector.load %arg1[%c0_42, %c0_43, %c5_44, %c0_45] : memref<1x4x25x4xbf16, #tpu.memory_space<vmem>>, vector<1x1x19x4xbf16>
    %38 = vector.shape_cast %37 : vector<1x1x19x4xbf16> to vector<19x4xbf16>
    %c6 = arith.constant 6 : index
    %c0_46 = arith.constant 0 : index
    %c0_47 = arith.constant 0 : index
    %39 = vector.load %arg2[%c6, %c0_46, %c0_47] : memref<9x4x4xbf16, #tpu.memory_space<vmem>>, vector<1x4x4xbf16>
    %40 = vector.shape_cast %39 : vector<1x4x4xbf16> to vector<4x4xbf16>
    %cst_48 = arith.constant dense<0.000000e+00> : vector<19x4xf32>
    %41 = tpu.matmul %38, %40, %cst_48 {dimension_numbers = #tpu.dot_dimension_numbers<[1], [0], [0], [1], [0, 0, 1, 1], [], []>} : vector<19x4xbf16>, vector<4x4xbf16>, vector<19x4xf32> -> vector<19x4xf32>
    %42 = arith.addf %36, %41 : vector<19x4xf32>
    %c0_49 = arith.constant 0 : index
    %c1_50 = arith.constant 1 : index
    %c5_51 = arith.constant 5 : index
    %c0_52 = arith.constant 0 : index
    %43 = vector.load %arg1[%c0_49, %c1_50, %c5_51, %c0_52] : memref<1x4x25x4xbf16, #tpu.memory_space<vmem>>, vector<1x1x19x4xbf16>
    %44 = vector.shape_cast %43 : vector<1x1x19x4xbf16> to vector<19x4xbf16>
    %c7 = arith.constant 7 : index
    %c0_53 = arith.constant 0 : index
    %c0_54 = arith.constant 0 : index
    %45 = vector.load %arg2[%c7, %c0_53, %c0_54] : memref<9x4x4xbf16, #tpu.memory_space<vmem>>, vector<1x4x4xbf16>
    %46 = vector.shape_cast %45 : vector<1x4x4xbf16> to vector<4x4xbf16>
    %cst_55 = arith.constant dense<0.000000e+00> : vector<19x4xf32>
    %47 = tpu.matmul %44, %46, %cst_55 {dimension_numbers = #tpu.dot_dimension_numbers<[1], [0], [0], [1], [0, 0, 1, 1], [], []>} : vector<19x4xbf16>, vector<4x4xbf16>, vector<19x4xf32> -> vector<19x4xf32>
    %48 = arith.addf %42, %47 : vector<19x4xf32>
    %c0_56 = arith.constant 0 : index
    %c0_57 = arith.constant 0 : index
    %c6_58 = arith.constant 6 : index
    %c0_59 = arith.constant 0 : index
    %49 = vector.load %arg1[%c0_56, %c0_57, %c6_58, %c0_59] : memref<1x4x25x4xbf16, #tpu.memory_space<vmem>>, vector<1x1x19x4xbf16>
    %50 = vector.shape_cast %49 : vector<1x1x19x4xbf16> to vector<19x4xbf16>
    %c8 = arith.constant 8 : index
    %c0_60 = arith.constant 0 : index
    %c0_61 = arith.constant 0 : index
    %51 = vector.load %arg2[%c8, %c0_60, %c0_61] : memref<9x4x4xbf16, #tpu.memory_space<vmem>>, vector<1x4x4xbf16>
    %52 = vector.shape_cast %51 : vector<1x4x4xbf16> to vector<4x4xbf16>
    %cst_62 = arith.constant dense<0.000000e+00> : vector<19x4xf32>
    %53 = tpu.matmul %50, %52, %cst_62 {dimension_numbers = #tpu.dot_dimension_numbers<[1], [0], [0], [1], [0, 0, 1, 1], [], []>} : vector<19x4xbf16>, vector<4x4xbf16>, vector<19x4xf32> -> vector<19x4xf32>
    %54 = arith.addf %48, %53 : vector<19x4xf32>
    %cst_63 = arith.constant 0.000000e+00 : f32
    %55 = vector.broadcast %cst_63 : f32 to vector<19x4xf32>
    %56 = arith.cmpf oge, %54, %55 : vector<19x4xf32>
    %cst_64 = arith.constant 1.000000e-01 : f32
    %57 = vector.broadcast %cst_64 : f32 to vector<19x4xf32>
    %58 = arith.mulf %57, %54 : vector<19x4xf32>
    %59 = arith.select %56, %54, %58 : vector<19x4xi1>, vector<19x4xf32>
    %60 = arith.truncf %59 : vector<19x4xf32> to vector<19x4xbf16>
    %cst_65 = arith.constant 0.000000e+00 : bf16
    %61 = vector.broadcast %cst_65 : bf16 to vector<36x4xbf16>
    %c0_66 = arith.constant 0 : index
    %c0_67 = arith.constant 0 : index
    %62 = vector.load %arg5[%c0_66, %c0_67] : memref<36x4xbf16, #tpu.memory_space<vmem>>, vector<36x4xbf16>
    tpu.vector_store %arg5[%c0_66, %c0_67], %61 {strides = array<i32>} : memref<36x4xbf16, #tpu.memory_space<vmem>>, vector<36x4xbf16>,
    %63 = vector.extract_strided_slice %60 {offsets = [0, 0], sizes = [4, 4], strides = [1, 1]} : vector<19x4xbf16> to vector<4x4xbf16>
    %c7_68 = arith.constant 7 : index
    %c0_69 = arith.constant 0 : index
    %64 = vector.load %arg5[%c7_68, %c0_69] : memref<36x4xbf16, #tpu.memory_space<vmem>>, vector<4x4xbf16>
    tpu.vector_store %arg5[%c7_68, %c0_69], %63 {strides = array<i32>} : memref<36x4xbf16, #tpu.memory_space<vmem>>, vector<4x4xbf16>,
    %65 = vector.extract_strided_slice %60 {offsets = [5, 0], sizes = [4, 4], strides = [1, 1]} : vector<19x4xbf16> to vector<4x4xbf16>
    %c13 = arith.constant 13 : index
    %c0_70 = arith.constant 0 : index
    %66 = vector.load %arg5[%c13, %c0_70] : memref<36x4xbf16, #tpu.memory_space<vmem>>, vector<4x4xbf16>
    tpu.vector_store %arg5[%c13, %c0_70], %65 {strides = array<i32>} : memref<36x4xbf16, #tpu.memory_space<vmem>>, vector<4x4xbf16>,
    %67 = vector.extract_strided_slice %60 {offsets = [10, 0], sizes = [4, 4], strides = [1, 1]} : vector<19x4xbf16> to vector<4x4xbf16>
    %c19 = arith.constant 19 : index
    %c0_71 = arith.constant 0 : index
    %68 = vector.load %arg5[%c19, %c0_71] : memref<36x4xbf16, #tpu.memory_space<vmem>>, vector<4x4xbf16>
    tpu.vector_store %arg5[%c19, %c0_71], %67 {strides = array<i32>} : memref<36x4xbf16, #tpu.memory_space<vmem>>, vector<4x4xbf16>,
    %69 = vector.extract_strided_slice %60 {offsets = [15, 0], sizes = [4, 4], strides = [1, 1]} : vector<19x4xbf16> to vector<4x4xbf16>
    %c25 = arith.constant 25 : index
    %c0_72 = arith.constant 0 : index
    %70 = vector.load %arg5[%c25, %c0_72] : memref<36x4xbf16, #tpu.memory_space<vmem>>, vector<4x4xbf16>
    tpu.vector_store %arg5[%c25, %c0_72], %69 {strides = array<i32>} : memref<36x4xbf16, #tpu.memory_space<vmem>>, vector<4x4xbf16>,
    %cst_73 = arith.constant 0.000000e+00 : f32
    %71 = vector.broadcast %cst_73 : f32 to vector<22x4xf32>
    %c0_74 = arith.constant 0 : index
    %c0_75 = arith.constant 0 : index
    %72 = vector.load %arg5[%c0_74, %c0_75] : memref<36x4xbf16, #tpu.memory_space<vmem>>, vector<22x4xbf16>
    %c0_76 = arith.constant 0 : index
    %c0_77 = arith.constant 0 : index
    %c0_78 = arith.constant 0 : index
    %73 = vector.load %arg3[%c0_76, %c0_77, %c0_78] : memref<9x4x4xbf16, #tpu.memory_space<vmem>>, vector<1x4x4xbf16>
    %74 = vector.shape_cast %73 : vector<1x4x4xbf16> to vector<4x4xbf16>
    %cst_79 = arith.constant dense<0.000000e+00> : vector<22x4xf32>
    %75 = tpu.matmul %72, %74, %cst_79 {dimension_numbers = #tpu.dot_dimension_numbers<[1], [0], [0], [1], [0, 0, 1, 1], [], []>} : vector<22x4xbf16>, vector<4x4xbf16>, vector<22x4xf32> -> vector<22x4xf32>
    %76 = arith.addf %71, %75 : vector<22x4xf32>
    %c1_80 = arith.constant 1 : index
    %c0_81 = arith.constant 0 : index
    %77 = vector.load %arg5[%c1_80, %c0_81] : memref<36x4xbf16, #tpu.memory_space<vmem>>, vector<22x4xbf16>
    %c1_82 = arith.constant 1 : index
    %c0_83 = arith.constant 0 : index
    %c0_84 = arith.constant 0 : index
    %78 = vector.load %arg3[%c1_82, %c0_83, %c0_84] : memref<9x4x4xbf16, #tpu.memory_space<vmem>>, vector<1x4x4xbf16>
    %79 = vector.shape_cast %78 : vector<1x4x4xbf16> to vector<4x4xbf16>
    %cst_85 = arith.constant dense<0.000000e+00> : vector<22x4xf32>
    %80 = tpu.matmul %77, %79, %cst_85 {dimension_numbers = #tpu.dot_dimension_numbers<[1], [0], [0], [1], [0, 0, 1, 1], [], []>} : vector<22x4xbf16>, vector<4x4xbf16>, vector<22x4xf32> -> vector<22x4xf32>
    %81 = arith.addf %76, %80 : vector<22x4xf32>
    %c2_86 = arith.constant 2 : index
    %c0_87 = arith.constant 0 : index
    %82 = vector.load %arg5[%c2_86, %c0_87] : memref<36x4xbf16, #tpu.memory_space<vmem>>, vector<22x4xbf16>
    %c2_88 = arith.constant 2 : index
    %c0_89 = arith.constant 0 : index
    %c0_90 = arith.constant 0 : index
    %83 = vector.load %arg3[%c2_88, %c0_89, %c0_90] : memref<9x4x4xbf16, #tpu.memory_space<vmem>>, vector<1x4x4xbf16>
    %84 = vector.shape_cast %83 : vector<1x4x4xbf16> to vector<4x4xbf16>
    %cst_91 = arith.constant dense<0.000000e+00> : vector<22x4xf32>
    %85 = tpu.matmul %82, %84, %cst_91 {dimension_numbers = #tpu.dot_dimension_numbers<[1], [0], [0], [1], [0, 0, 1, 1], [], []>} : vector<22x4xbf16>, vector<4x4xbf16>, vector<22x4xf32> -> vector<22x4xf32>
    %86 = arith.addf %81, %85 : vector<22x4xf32>
    %c6_92 = arith.constant 6 : index
    %c0_93 = arith.constant 0 : index
    %87 = vector.load %arg5[%c6_92, %c0_93] : memref<36x4xbf16, #tpu.memory_space<vmem>>, vector<22x4xbf16>
    %c3_94 = arith.constant 3 : index
    %c0_95 = arith.constant 0 : index
    %c0_96 = arith.constant 0 : index
    %88 = vector.load %arg3[%c3_94, %c0_95, %c0_96] : memref<9x4x4xbf16, #tpu.memory_space<vmem>>, vector<1x4x4xbf16>
    %89 = vector.shape_cast %88 : vector<1x4x4xbf16> to vector<4x4xbf16>
    %cst_97 = arith.constant dense<0.000000e+00> : vector<22x4xf32>
    %90 = tpu.matmul %87, %89, %cst_97 {dimension_numbers = #tpu.dot_dimension_numbers<[1], [0], [0], [1], [0, 0, 1, 1], [], []>} : vector<22x4xbf16>, vector<4x4xbf16>, vector<22x4xf32> -> vector<22x4xf32>
    %91 = arith.addf %86, %90 : vector<22x4xf32>
    %c7_98 = arith.constant 7 : index
    %c0_99 = arith.constant 0 : index
    %92 = vector.load %arg5[%c7_98, %c0_99] : memref<36x4xbf16, #tpu.memory_space<vmem>>, vector<22x4xbf16>
    %c4_100 = arith.constant 4 : index
    %c0_101 = arith.constant 0 : index
    %c0_102 = arith.constant 0 : index
    %93 = vector.load %arg3[%c4_100, %c0_101, %c0_102] : memref<9x4x4xbf16, #tpu.memory_space<vmem>>, vector<1x4x4xbf16>
    %94 = vector.shape_cast %93 : vector<1x4x4xbf16> to vector<4x4xbf16>
    %cst_103 = arith.constant dense<0.000000e+00> : vector<22x4xf32>
    %95 = tpu.matmul %92, %94, %cst_103 {dimension_numbers = #tpu.dot_dimension_numbers<[1], [0], [0], [1], [0, 0, 1, 1], [], []>} : vector<22x4xbf16>, vector<4x4xbf16>, vector<22x4xf32> -> vector<22x4xf32>
    %96 = arith.addf %91, %95 : vector<22x4xf32>
    %c8_104 = arith.constant 8 : index
    %c0_105 = arith.constant 0 : index
    %97 = vector.load %arg5[%c8_104, %c0_105] : memref<36x4xbf16, #tpu.memory_space<vmem>>, vector<22x4xbf16>
    %c5_106 = arith.constant 5 : index
    %c0_107 = arith.constant 0 : index
    %c0_108 = arith.constant 0 : index
    %98 = vector.load %arg3[%c5_106, %c0_107, %c0_108] : memref<9x4x4xbf16, #tpu.memory_space<vmem>>, vector<1x4x4xbf16>
    %99 = vector.shape_cast %98 : vector<1x4x4xbf16> to vector<4x4xbf16>
    %cst_109 = arith.constant dense<0.000000e+00> : vector<22x4xf32>
    %100 = tpu.matmul %97, %99, %cst_109 {dimension_numbers = #tpu.dot_dimension_numbers<[1], [0], [0], [1], [0, 0, 1, 1], [], []>} : vector<22x4xbf16>, vector<4x4xbf16>, vector<22x4xf32> -> vector<22x4xf32>
    %101 = arith.addf %96, %100 : vector<22x4xf32>
    %c12 = arith.constant 12 : index
    %c0_110 = arith.constant 0 : index
    %102 = vector.load %arg5[%c12, %c0_110] : memref<36x4xbf16, #tpu.memory_space<vmem>>, vector<22x4xbf16>
    %c6_111 = arith.constant 6 : index
    %c0_112 = arith.constant 0 : index
    %c0_113 = arith.constant 0 : index
    %103 = vector.load %arg3[%c6_111, %c0_112, %c0_113] : memref<9x4x4xbf16, #tpu.memory_space<vmem>>, vector<1x4x4xbf16>
    %104 = vector.shape_cast %103 : vector<1x4x4xbf16> to vector<4x4xbf16>
    %cst_114 = arith.constant dense<0.000000e+00> : vector<22x4xf32>
    %105 = tpu.matmul %102, %104, %cst_114 {dimension_numbers = #tpu.dot_dimension_numbers<[1], [0], [0], [1], [0, 0, 1, 1], [], []>} : vector<22x4xbf16>, vector<4x4xbf16>, vector<22x4xf32> -> vector<22x4xf32>
    %106 = arith.addf %101, %105 : vector<22x4xf32>
    %c13_115 = arith.constant 13 : index
    %c0_116 = arith.constant 0 : index
    %107 = vector.load %arg5[%c13_115, %c0_116] : memref<36x4xbf16, #tpu.memory_space<vmem>>, vector<22x4xbf16>
    %c7_117 = arith.constant 7 : index
    %c0_118 = arith.constant 0 : index
    %c0_119 = arith.constant 0 : index
    %108 = vector.load %arg3[%c7_117, %c0_118, %c0_119] : memref<9x4x4xbf16, #tpu.memory_space<vmem>>, vector<1x4x4xbf16>
    %109 = vector.shape_cast %108 : vector<1x4x4xbf16> to vector<4x4xbf16>
    %cst_120 = arith.constant dense<0.000000e+00> : vector<22x4xf32>
    %110 = tpu.matmul %107, %109, %cst_120 {dimension_numbers = #tpu.dot_dimension_numbers<[1], [0], [0], [1], [0, 0, 1, 1], [], []>} : vector<22x4xbf16>, vector<4x4xbf16>, vector<22x4xf32> -> vector<22x4xf32>
    %111 = arith.addf %106, %110 : vector<22x4xf32>
    %c14 = arith.constant 14 : index
    %c0_121 = arith.constant 0 : index
    %112 = vector.load %arg5[%c14, %c0_121] : memref<36x4xbf16, #tpu.memory_space<vmem>>, vector<22x4xbf16>
    %c8_122 = arith.constant 8 : index
    %c0_123 = arith.constant 0 : index
    %c0_124 = arith.constant 0 : index
    %113 = vector.load %arg3[%c8_122, %c0_123, %c0_124] : memref<9x4x4xbf16, #tpu.memory_space<vmem>>, vector<1x4x4xbf16>
    %114 = vector.shape_cast %113 : vector<1x4x4xbf16> to vector<4x4xbf16>
    %cst_125 = arith.constant dense<0.000000e+00> : vector<22x4xf32>
    %115 = tpu.matmul %112, %114, %cst_125 {dimension_numbers = #tpu.dot_dimension_numbers<[1], [0], [0], [1], [0, 0, 1, 1], [], []>} : vector<22x4xbf16>, vector<4x4xbf16>, vector<22x4xf32> -> vector<22x4xf32>
    %116 = arith.addf %111, %115 : vector<22x4xf32>
    %cst_126 = arith.constant 0.000000e+00 : f32
    %117 = vector.broadcast %cst_126 : f32 to vector<22x4xf32>
    %118 = arith.cmpf oge, %116, %117 : vector<22x4xf32>
    %cst_127 = arith.constant 1.000000e-01 : f32
    %119 = vector.broadcast %cst_127 : f32 to vector<22x4xf32>
    %120 = arith.mulf %119, %116 : vector<22x4xf32>
    %121 = arith.select %118, %116, %120 : vector<22x4xi1>, vector<22x4xf32>
    %122 = arith.truncf %121 : vector<22x4xf32> to vector<22x4xbf16>
    %c0_128 = arith.constant 0 : index
    %c0_129 = arith.constant 0 : index
    %c0_130 = arith.constant 0 : index
    %123 = vector.load %arg4[%c0_128, %c0_129, %c0_130] : memref<1x22x4xbf16, #tpu.memory_space<vmem>>, vector<1x22x4xbf16>
    %124 = vector.shape_cast %123 : vector<1x22x4xbf16> to vector<22x4xbf16>
    %125 = vector.shape_cast %122 : vector<22x4xbf16> to vector<1x22x4xbf16>
    tpu.vector_store %arg4[%c0_128, %c0_129, %c0_130], %125 {strides = array<i32>} : memref<1x22x4xbf16, #tpu.memory_space<vmem>>, vector<1x22x4xbf16>,
    return
  }
  func.func @transform_0(%arg0: i32) -> (i32, i32, i32, i32) {
    %c0_i32 = arith.constant 0 : i32
    %c0_i32_0 = arith.constant 0 : i32
    %c0_i32_1 = arith.constant 0 : i32
    %c0_i32_2 = arith.constant 0 : i32
    return %arg0, %c0_i32, %c0_i32_0, %c0_i32_1 : i32, i32, i32, i32
  }
  func.func @transform_1(%arg0: i32) -> (i32, i32, i32) {
    %c0_i32 = arith.constant 0 : i32
    %c0_i32_0 = arith.constant 0 : i32
    %c0_i32_1 = arith.constant 0 : i32
    %c0_i32_2 = arith.constant 0 : i32
    return %c0_i32, %c0_i32_0, %c0_i32_1 : i32, i32, i32
  }
  func.func @transform_2(%arg0: i32) -> (i32, i32, i32) {
    %c0_i32 = arith.constant 0 : i32
    %c0_i32_0 = arith.constant 0 : i32
    %c0_i32_1 = arith.constant 0 : i32
    %c0_i32_2 = arith.constant 0 : i32
    return %c0_i32, %c0_i32_0, %c0_i32_1 : i32, i32, i32
  }
  func.func @transform_3(%arg0: i32) -> (i32, i32, i32) {
    %c0_i32 = arith.constant 0 : i32
    %c0_i32_0 = arith.constant 0 : i32
    %c0_i32_1 = arith.constant 0 : i32
    return %arg0, %c0_i32, %c0_i32_0 : i32, i32, i32
  }
}

module attributes {stable_mosaic.version = 11 : i64} {
  func.func @_up_kernel(%arg0: i32, %arg1: memref<1x1x16x4xbf16, #tpu.memory_space<vmem>>, %arg2: memref<16x4x4xbf16, #tpu.memory_space<vmem>>, %arg3: memref<1x4xf32, #tpu.memory_space<vmem>>, %arg4: memref<1x4x6x4xbf16, #tpu.memory_space<vmem>>) attributes {dimension_semantics = [#tpu.dimension_semantics<parallel>], iteration_bounds = array<i64: 2>, scalar_prefetch = 0 : i64, scratch_operands = 0 : i64, tpu.core_type = #tpu.core_type<tc>, window_params = [{transform_indices = @transform_0, window_bounds = array<i64: 1, 1, 16, 4>}, {pipeline_mode = #tpu.pipeline_mode<synchronous>, transform_indices = @transform_1, window_bounds = array<i64: 16, 4, 4>}, {pipeline_mode = #tpu.pipeline_mode<synchronous>, transform_indices = @transform_2, window_bounds = array<i64: 1, 4>}, {transform_indices = @transform_3, window_bounds = array<i64: 1, 4, 6, 4>}]} {
    %c0 = arith.constant 0 : index
    %c0_0 = arith.constant 0 : index
    %0 = vector.load %arg3[%c0, %c0_0] : memref<1x4xf32, #tpu.memory_space<vmem>>, vector<1x4xf32>
    %cst = arith.constant 0.000000e+00 : f32
    %1 = vector.broadcast %cst : f32 to vector<6x4xf32>
    %c0_1 = arith.constant 0 : index
    %c0_2 = arith.constant 0 : index
    %c0_3 = arith.constant 0 : index
    %c0_4 = arith.constant 0 : index
    %2 = vector.load %arg1[%c0_1, %c0_2, %c0_3, %c0_4] : memref<1x1x16x4xbf16, #tpu.memory_space<vmem>>, vector<1x1x6x4xbf16>
    %3 = vector.shape_cast %2 : vector<1x1x6x4xbf16> to vector<6x4xbf16>
    %c0_5 = arith.constant 0 : index
    %c0_6 = arith.constant 0 : index
    %c0_7 = arith.constant 0 : index
    %4 = vector.load %arg2[%c0_5, %c0_6, %c0_7] : memref<16x4x4xbf16, #tpu.memory_space<vmem>>, vector<1x4x4xbf16>
    %5 = vector.shape_cast %4 : vector<1x4x4xbf16> to vector<4x4xbf16>
    %cst_8 = arith.constant dense<0.000000e+00> : vector<6x4xf32>
    %6 = tpu.matmul %3, %5, %cst_8 {dimension_numbers = #tpu.dot_dimension_numbers<[1], [0], [0], [1], [0, 0, 1, 1], [], []>} : vector<6x4xbf16>, vector<4x4xbf16>, vector<6x4xf32> -> vector<6x4xf32>
    %7 = arith.addf %1, %6 : vector<6x4xf32>
    %c0_9 = arith.constant 0 : index
    %c0_10 = arith.constant 0 : index
    %c1 = arith.constant 1 : index
    %c0_11 = arith.constant 0 : index
    %8 = vector.load %arg1[%c0_9, %c0_10, %c1, %c0_11] : memref<1x1x16x4xbf16, #tpu.memory_space<vmem>>, vector<1x1x6x4xbf16>
    %9 = vector.shape_cast %8 : vector<1x1x6x4xbf16> to vector<6x4xbf16>
    %c1_12 = arith.constant 1 : index
    %c0_13 = arith.constant 0 : index
    %c0_14 = arith.constant 0 : index
    %10 = vector.load %arg2[%c1_12, %c0_13, %c0_14] : memref<16x4x4xbf16, #tpu.memory_space<vmem>>, vector<1x4x4xbf16>
    %11 = vector.shape_cast %10 : vector<1x4x4xbf16> to vector<4x4xbf16>
    %cst_15 = arith.constant dense<0.000000e+00> : vector<6x4xf32>
    %12 = tpu.matmul %9, %11, %cst_15 {dimension_numbers = #tpu.dot_dimension_numbers<[1], [0], [0], [1], [0, 0, 1, 1], [], []>} : vector<6x4xbf16>, vector<4x4xbf16>, vector<6x4xf32> -> vector<6x4xf32>
    %13 = arith.addf %7, %12 : vector<6x4xf32>
    %c0_16 = arith.constant 0 : index
    %c0_17 = arith.constant 0 : index
    %c4 = arith.constant 4 : index
    %c0_18 = arith.constant 0 : index
    %14 = vector.load %arg1[%c0_16, %c0_17, %c4, %c0_18] : memref<1x1x16x4xbf16, #tpu.memory_space<vmem>>, vector<1x1x6x4xbf16>
    %15 = vector.shape_cast %14 : vector<1x1x6x4xbf16> to vector<6x4xbf16>
    %c2 = arith.constant 2 : index
    %c0_19 = arith.constant 0 : index
    %c0_20 = arith.constant 0 : index
    %16 = vector.load %arg2[%c2, %c0_19, %c0_20] : memref<16x4x4xbf16, #tpu.memory_space<vmem>>, vector<1x4x4xbf16>
    %17 = vector.shape_cast %16 : vector<1x4x4xbf16> to vector<4x4xbf16>
    %cst_21 = arith.constant dense<0.000000e+00> : vector<6x4xf32>
    %18 = tpu.matmul %15, %17, %cst_21 {dimension_numbers = #tpu.dot_dimension_numbers<[1], [0], [0], [1], [0, 0, 1, 1], [], []>} : vector<6x4xbf16>, vector<4x4xbf16>, vector<6x4xf32> -> vector<6x4xf32>
    %19 = arith.addf %13, %18 : vector<6x4xf32>
    %c0_22 = arith.constant 0 : index
    %c0_23 = arith.constant 0 : index
    %c5 = arith.constant 5 : index
    %c0_24 = arith.constant 0 : index
    %20 = vector.load %arg1[%c0_22, %c0_23, %c5, %c0_24] : memref<1x1x16x4xbf16, #tpu.memory_space<vmem>>, vector<1x1x6x4xbf16>
    %21 = vector.shape_cast %20 : vector<1x1x6x4xbf16> to vector<6x4xbf16>
    %c3 = arith.constant 3 : index
    %c0_25 = arith.constant 0 : index
    %c0_26 = arith.constant 0 : index
    %22 = vector.load %arg2[%c3, %c0_25, %c0_26] : memref<16x4x4xbf16, #tpu.memory_space<vmem>>, vector<1x4x4xbf16>
    %23 = vector.shape_cast %22 : vector<1x4x4xbf16> to vector<4x4xbf16>
    %cst_27 = arith.constant dense<0.000000e+00> : vector<6x4xf32>
    %24 = tpu.matmul %21, %23, %cst_27 {dimension_numbers = #tpu.dot_dimension_numbers<[1], [0], [0], [1], [0, 0, 1, 1], [], []>} : vector<6x4xbf16>, vector<4x4xbf16>, vector<6x4xf32> -> vector<6x4xf32>
    %25 = arith.addf %19, %24 : vector<6x4xf32>
    %26 = vector.broadcast %0 : vector<1x4xf32> to vector<6x4xf32>
    %27 = arith.addf %25, %26 : vector<6x4xf32>
    %cst_28 = arith.constant 0.000000e+00 : f32
    %28 = vector.broadcast %cst_28 : f32 to vector<6x4xf32>
    %29 = arith.cmpf oge, %27, %28 : vector<6x4xf32>
    %cst_29 = arith.constant 1.000000e-01 : f32
    %30 = vector.broadcast %cst_29 : f32 to vector<6x4xf32>
    %31 = arith.mulf %30, %27 : vector<6x4xf32>
    %32 = arith.select %29, %27, %31 : vector<6x4xi1>, vector<6x4xf32>
    %33 = arith.truncf %32 : vector<6x4xf32> to vector<6x4xbf16>
    %c0_30 = arith.constant 0 : index
    %c0_31 = arith.constant 0 : index
    %c0_32 = arith.constant 0 : index
    %c0_33 = arith.constant 0 : index
    %34 = vector.load %arg4[%c0_30, %c0_31, %c0_32, %c0_33] : memref<1x4x6x4xbf16, #tpu.memory_space<vmem>>, vector<1x1x6x4xbf16>
    %35 = vector.shape_cast %34 : vector<1x1x6x4xbf16> to vector<6x4xbf16>
    %36 = vector.shape_cast %33 : vector<6x4xbf16> to vector<1x1x6x4xbf16>
    tpu.vector_store %arg4[%c0_30, %c0_31, %c0_32, %c0_33], %36 {strides = array<i32>} : memref<1x4x6x4xbf16, #tpu.memory_space<vmem>>, vector<1x1x6x4xbf16>,
    %cst_34 = arith.constant 0.000000e+00 : f32
    %37 = vector.broadcast %cst_34 : f32 to vector<6x4xf32>
    %c0_35 = arith.constant 0 : index
    %c0_36 = arith.constant 0 : index
    %c1_37 = arith.constant 1 : index
    %c0_38 = arith.constant 0 : index
    %38 = vector.load %arg1[%c0_35, %c0_36, %c1_37, %c0_38] : memref<1x1x16x4xbf16, #tpu.memory_space<vmem>>, vector<1x1x6x4xbf16>
    %39 = vector.shape_cast %38 : vector<1x1x6x4xbf16> to vector<6x4xbf16>
    %c4_39 = arith.constant 4 : index
    %c0_40 = arith.constant 0 : index
    %c0_41 = arith.constant 0 : index
    %40 = vector.load %arg2[%c4_39, %c0_40, %c0_41] : memref<16x4x4xbf16, #tpu.memory_space<vmem>>, vector<1x4x4xbf16>
    %41 = vector.shape_cast %40 : vector<1x4x4xbf16> to vector<4x4xbf16>
    %cst_42 = arith.constant dense<0.000000e+00> : vector<6x4xf32>
    %42 = tpu.matmul %39, %41, %cst_42 {dimension_numbers = #tpu.dot_dimension_numbers<[1], [0], [0], [1], [0, 0, 1, 1], [], []>} : vector<6x4xbf16>, vector<4x4xbf16>, vector<6x4xf32> -> vector<6x4xf32>
    %43 = arith.addf %37, %42 : vector<6x4xf32>
    %c0_43 = arith.constant 0 : index
    %c0_44 = arith.constant 0 : index
    %c2_45 = arith.constant 2 : index
    %c0_46 = arith.constant 0 : index
    %44 = vector.load %arg1[%c0_43, %c0_44, %c2_45, %c0_46] : memref<1x1x16x4xbf16, #tpu.memory_space<vmem>>, vector<1x1x6x4xbf16>
    %45 = vector.shape_cast %44 : vector<1x1x6x4xbf16> to vector<6x4xbf16>
    %c5_47 = arith.constant 5 : index
    %c0_48 = arith.constant 0 : index
    %c0_49 = arith.constant 0 : index
    %46 = vector.load %arg2[%c5_47, %c0_48, %c0_49] : memref<16x4x4xbf16, #tpu.memory_space<vmem>>, vector<1x4x4xbf16>
    %47 = vector.shape_cast %46 : vector<1x4x4xbf16> to vector<4x4xbf16>
    %cst_50 = arith.constant dense<0.000000e+00> : vector<6x4xf32>
    %48 = tpu.matmul %45, %47, %cst_50 {dimension_numbers = #tpu.dot_dimension_numbers<[1], [0], [0], [1], [0, 0, 1, 1], [], []>} : vector<6x4xbf16>, vector<4x4xbf16>, vector<6x4xf32> -> vector<6x4xf32>
    %49 = arith.addf %43, %48 : vector<6x4xf32>
    %c0_51 = arith.constant 0 : index
    %c0_52 = arith.constant 0 : index
    %c5_53 = arith.constant 5 : index
    %c0_54 = arith.constant 0 : index
    %50 = vector.load %arg1[%c0_51, %c0_52, %c5_53, %c0_54] : memref<1x1x16x4xbf16, #tpu.memory_space<vmem>>, vector<1x1x6x4xbf16>
    %51 = vector.shape_cast %50 : vector<1x1x6x4xbf16> to vector<6x4xbf16>
    %c6 = arith.constant 6 : index
    %c0_55 = arith.constant 0 : index
    %c0_56 = arith.constant 0 : index
    %52 = vector.load %arg2[%c6, %c0_55, %c0_56] : memref<16x4x4xbf16, #tpu.memory_space<vmem>>, vector<1x4x4xbf16>
    %53 = vector.shape_cast %52 : vector<1x4x4xbf16> to vector<4x4xbf16>
    %cst_57 = arith.constant dense<0.000000e+00> : vector<6x4xf32>
    %54 = tpu.matmul %51, %53, %cst_57 {dimension_numbers = #tpu.dot_dimension_numbers<[1], [0], [0], [1], [0, 0, 1, 1], [], []>} : vector<6x4xbf16>, vector<4x4xbf16>, vector<6x4xf32> -> vector<6x4xf32>
    %55 = arith.addf %49, %54 : vector<6x4xf32>
    %c0_58 = arith.constant 0 : index
    %c0_59 = arith.constant 0 : index
    %c6_60 = arith.constant 6 : index
    %c0_61 = arith.constant 0 : index
    %56 = vector.load %arg1[%c0_58, %c0_59, %c6_60, %c0_61] : memref<1x1x16x4xbf16, #tpu.memory_space<vmem>>, vector<1x1x6x4xbf16>
    %57 = vector.shape_cast %56 : vector<1x1x6x4xbf16> to vector<6x4xbf16>
    %c7 = arith.constant 7 : index
    %c0_62 = arith.constant 0 : index
    %c0_63 = arith.constant 0 : index
    %58 = vector.load %arg2[%c7, %c0_62, %c0_63] : memref<16x4x4xbf16, #tpu.memory_space<vmem>>, vector<1x4x4xbf16>
    %59 = vector.shape_cast %58 : vector<1x4x4xbf16> to vector<4x4xbf16>
    %cst_64 = arith.constant dense<0.000000e+00> : vector<6x4xf32>
    %60 = tpu.matmul %57, %59, %cst_64 {dimension_numbers = #tpu.dot_dimension_numbers<[1], [0], [0], [1], [0, 0, 1, 1], [], []>} : vector<6x4xbf16>, vector<4x4xbf16>, vector<6x4xf32> -> vector<6x4xf32>
    %61 = arith.addf %55, %60 : vector<6x4xf32>
    %62 = vector.broadcast %0 : vector<1x4xf32> to vector<6x4xf32>
    %63 = arith.addf %61, %62 : vector<6x4xf32>
    %cst_65 = arith.constant 0.000000e+00 : f32
    %64 = vector.broadcast %cst_65 : f32 to vector<6x4xf32>
    %65 = arith.cmpf oge, %63, %64 : vector<6x4xf32>
    %cst_66 = arith.constant 1.000000e-01 : f32
    %66 = vector.broadcast %cst_66 : f32 to vector<6x4xf32>
    %67 = arith.mulf %66, %63 : vector<6x4xf32>
    %68 = arith.select %65, %63, %67 : vector<6x4xi1>, vector<6x4xf32>
    %69 = arith.truncf %68 : vector<6x4xf32> to vector<6x4xbf16>
    %c0_67 = arith.constant 0 : index
    %c1_68 = arith.constant 1 : index
    %c0_69 = arith.constant 0 : index
    %c0_70 = arith.constant 0 : index
    %70 = vector.load %arg4[%c0_67, %c1_68, %c0_69, %c0_70] : memref<1x4x6x4xbf16, #tpu.memory_space<vmem>>, vector<1x1x6x4xbf16>
    %71 = vector.shape_cast %70 : vector<1x1x6x4xbf16> to vector<6x4xbf16>
    %72 = vector.shape_cast %69 : vector<6x4xbf16> to vector<1x1x6x4xbf16>
    tpu.vector_store %arg4[%c0_67, %c1_68, %c0_69, %c0_70], %72 {strides = array<i32>} : memref<1x4x6x4xbf16, #tpu.memory_space<vmem>>, vector<1x1x6x4xbf16>,
    %cst_71 = arith.constant 0.000000e+00 : f32
    %73 = vector.broadcast %cst_71 : f32 to vector<6x4xf32>
    %c0_72 = arith.constant 0 : index
    %c0_73 = arith.constant 0 : index
    %c4_74 = arith.constant 4 : index
    %c0_75 = arith.constant 0 : index
    %74 = vector.load %arg1[%c0_72, %c0_73, %c4_74, %c0_75] : memref<1x1x16x4xbf16, #tpu.memory_space<vmem>>, vector<1x1x6x4xbf16>
    %75 = vector.shape_cast %74 : vector<1x1x6x4xbf16> to vector<6x4xbf16>
    %c8 = arith.constant 8 : index
    %c0_76 = arith.constant 0 : index
    %c0_77 = arith.constant 0 : index
    %76 = vector.load %arg2[%c8, %c0_76, %c0_77] : memref<16x4x4xbf16, #tpu.memory_space<vmem>>, vector<1x4x4xbf16>
    %77 = vector.shape_cast %76 : vector<1x4x4xbf16> to vector<4x4xbf16>
    %cst_78 = arith.constant dense<0.000000e+00> : vector<6x4xf32>
    %78 = tpu.matmul %75, %77, %cst_78 {dimension_numbers = #tpu.dot_dimension_numbers<[1], [0], [0], [1], [0, 0, 1, 1], [], []>} : vector<6x4xbf16>, vector<4x4xbf16>, vector<6x4xf32> -> vector<6x4xf32>
    %79 = arith.addf %73, %78 : vector<6x4xf32>
    %c0_79 = arith.constant 0 : index
    %c0_80 = arith.constant 0 : index
    %c5_81 = arith.constant 5 : index
    %c0_82 = arith.constant 0 : index
    %80 = vector.load %arg1[%c0_79, %c0_80, %c5_81, %c0_82] : memref<1x1x16x4xbf16, #tpu.memory_space<vmem>>, vector<1x1x6x4xbf16>
    %81 = vector.shape_cast %80 : vector<1x1x6x4xbf16> to vector<6x4xbf16>
    %c9 = arith.constant 9 : index
    %c0_83 = arith.constant 0 : index
    %c0_84 = arith.constant 0 : index
    %82 = vector.load %arg2[%c9, %c0_83, %c0_84] : memref<16x4x4xbf16, #tpu.memory_space<vmem>>, vector<1x4x4xbf16>
    %83 = vector.shape_cast %82 : vector<1x4x4xbf16> to vector<4x4xbf16>
    %cst_85 = arith.constant dense<0.000000e+00> : vector<6x4xf32>
    %84 = tpu.matmul %81, %83, %cst_85 {dimension_numbers = #tpu.dot_dimension_numbers<[1], [0], [0], [1], [0, 0, 1, 1], [], []>} : vector<6x4xbf16>, vector<4x4xbf16>, vector<6x4xf32> -> vector<6x4xf32>
    %85 = arith.addf %79, %84 : vector<6x4xf32>
    %c0_86 = arith.constant 0 : index
    %c0_87 = arith.constant 0 : index
    %c8_88 = arith.constant 8 : index
    %c0_89 = arith.constant 0 : index
    %86 = vector.load %arg1[%c0_86, %c0_87, %c8_88, %c0_89] : memref<1x1x16x4xbf16, #tpu.memory_space<vmem>>, vector<1x1x6x4xbf16>
    %87 = vector.shape_cast %86 : vector<1x1x6x4xbf16> to vector<6x4xbf16>
    %c10 = arith.constant 10 : index
    %c0_90 = arith.constant 0 : index
    %c0_91 = arith.constant 0 : index
    %88 = vector.load %arg2[%c10, %c0_90, %c0_91] : memref<16x4x4xbf16, #tpu.memory_space<vmem>>, vector<1x4x4xbf16>
    %89 = vector.shape_cast %88 : vector<1x4x4xbf16> to vector<4x4xbf16>
    %cst_92 = arith.constant dense<0.000000e+00> : vector<6x4xf32>
    %90 = tpu.matmul %87, %89, %cst_92 {dimension_numbers = #tpu.dot_dimension_numbers<[1], [0], [0], [1], [0, 0, 1, 1], [], []>} : vector<6x4xbf16>, vector<4x4xbf16>, vector<6x4xf32> -> vector<6x4xf32>
    %91 = arith.addf %85, %90 : vector<6x4xf32>
    %c0_93 = arith.constant 0 : index
    %c0_94 = arith.constant 0 : index
    %c9_95 = arith.constant 9 : index
    %c0_96 = arith.constant 0 : index
    %92 = vector.load %arg1[%c0_93, %c0_94, %c9_95, %c0_96] : memref<1x1x16x4xbf16, #tpu.memory_space<vmem>>, vector<1x1x6x4xbf16>
    %93 = vector.shape_cast %92 : vector<1x1x6x4xbf16> to vector<6x4xbf16>
    %c11 = arith.constant 11 : index
    %c0_97 = arith.constant 0 : index
    %c0_98 = arith.constant 0 : index
    %94 = vector.load %arg2[%c11, %c0_97, %c0_98] : memref<16x4x4xbf16, #tpu.memory_space<vmem>>, vector<1x4x4xbf16>
    %95 = vector.shape_cast %94 : vector<1x4x4xbf16> to vector<4x4xbf16>
    %cst_99 = arith.constant dense<0.000000e+00> : vector<6x4xf32>
    %96 = tpu.matmul %93, %95, %cst_99 {dimension_numbers = #tpu.dot_dimension_numbers<[1], [0], [0], [1], [0, 0, 1, 1], [], []>} : vector<6x4xbf16>, vector<4x4xbf16>, vector<6x4xf32> -> vector<6x4xf32>
    %97 = arith.addf %91, %96 : vector<6x4xf32>
    %98 = vector.broadcast %0 : vector<1x4xf32> to vector<6x4xf32>
    %99 = arith.addf %97, %98 : vector<6x4xf32>
    %cst_100 = arith.constant 0.000000e+00 : f32
    %100 = vector.broadcast %cst_100 : f32 to vector<6x4xf32>
    %101 = arith.cmpf oge, %99, %100 : vector<6x4xf32>
    %cst_101 = arith.constant 1.000000e-01 : f32
    %102 = vector.broadcast %cst_101 : f32 to vector<6x4xf32>
    %103 = arith.mulf %102, %99 : vector<6x4xf32>
    %104 = arith.select %101, %99, %103 : vector<6x4xi1>, vector<6x4xf32>
    %105 = arith.truncf %104 : vector<6x4xf32> to vector<6x4xbf16>
    %c0_102 = arith.constant 0 : index
    %c2_103 = arith.constant 2 : index
    %c0_104 = arith.constant 0 : index
    %c0_105 = arith.constant 0 : index
    %106 = vector.load %arg4[%c0_102, %c2_103, %c0_104, %c0_105] : memref<1x4x6x4xbf16, #tpu.memory_space<vmem>>, vector<1x1x6x4xbf16>
    %107 = vector.shape_cast %106 : vector<1x1x6x4xbf16> to vector<6x4xbf16>
    %108 = vector.shape_cast %105 : vector<6x4xbf16> to vector<1x1x6x4xbf16>
    tpu.vector_store %arg4[%c0_102, %c2_103, %c0_104, %c0_105], %108 {strides = array<i32>} : memref<1x4x6x4xbf16, #tpu.memory_space<vmem>>, vector<1x1x6x4xbf16>,
    %cst_106 = arith.constant 0.000000e+00 : f32
    %109 = vector.broadcast %cst_106 : f32 to vector<6x4xf32>
    %c0_107 = arith.constant 0 : index
    %c0_108 = arith.constant 0 : index
    %c5_109 = arith.constant 5 : index
    %c0_110 = arith.constant 0 : index
    %110 = vector.load %arg1[%c0_107, %c0_108, %c5_109, %c0_110] : memref<1x1x16x4xbf16, #tpu.memory_space<vmem>>, vector<1x1x6x4xbf16>
    %111 = vector.shape_cast %110 : vector<1x1x6x4xbf16> to vector<6x4xbf16>
    %c12 = arith.constant 12 : index
    %c0_111 = arith.constant 0 : index
    %c0_112 = arith.constant 0 : index
    %112 = vector.load %arg2[%c12, %c0_111, %c0_112] : memref<16x4x4xbf16, #tpu.memory_space<vmem>>, vector<1x4x4xbf16>
    %113 = vector.shape_cast %112 : vector<1x4x4xbf16> to vector<4x4xbf16>
    %cst_113 = arith.constant dense<0.000000e+00> : vector<6x4xf32>
    %114 = tpu.matmul %111, %113, %cst_113 {dimension_numbers = #tpu.dot_dimension_numbers<[1], [0], [0], [1], [0, 0, 1, 1], [], []>} : vector<6x4xbf16>, vector<4x4xbf16>, vector<6x4xf32> -> vector<6x4xf32>
    %115 = arith.addf %109, %114 : vector<6x4xf32>
    %c0_114 = arith.constant 0 : index
    %c0_115 = arith.constant 0 : index
    %c6_116 = arith.constant 6 : index
    %c0_117 = arith.constant 0 : index
    %116 = vector.load %arg1[%c0_114, %c0_115, %c6_116, %c0_117] : memref<1x1x16x4xbf16, #tpu.memory_space<vmem>>, vector<1x1x6x4xbf16>
    %117 = vector.shape_cast %116 : vector<1x1x6x4xbf16> to vector<6x4xbf16>
    %c13 = arith.constant 13 : index
    %c0_118 = arith.constant 0 : index
    %c0_119 = arith.constant 0 : index
    %118 = vector.load %arg2[%c13, %c0_118, %c0_119] : memref<16x4x4xbf16, #tpu.memory_space<vmem>>, vector<1x4x4xbf16>
    %119 = vector.shape_cast %118 : vector<1x4x4xbf16> to vector<4x4xbf16>
    %cst_120 = arith.constant dense<0.000000e+00> : vector<6x4xf32>
    %120 = tpu.matmul %117, %119, %cst_120 {dimension_numbers = #tpu.dot_dimension_numbers<[1], [0], [0], [1], [0, 0, 1, 1], [], []>} : vector<6x4xbf16>, vector<4x4xbf16>, vector<6x4xf32> -> vector<6x4xf32>
    %121 = arith.addf %115, %120 : vector<6x4xf32>
    %c0_121 = arith.constant 0 : index
    %c0_122 = arith.constant 0 : index
    %c9_123 = arith.constant 9 : index
    %c0_124 = arith.constant 0 : index
    %122 = vector.load %arg1[%c0_121, %c0_122, %c9_123, %c0_124] : memref<1x1x16x4xbf16, #tpu.memory_space<vmem>>, vector<1x1x6x4xbf16>
    %123 = vector.shape_cast %122 : vector<1x1x6x4xbf16> to vector<6x4xbf16>
    %c14 = arith.constant 14 : index
    %c0_125 = arith.constant 0 : index
    %c0_126 = arith.constant 0 : index
    %124 = vector.load %arg2[%c14, %c0_125, %c0_126] : memref<16x4x4xbf16, #tpu.memory_space<vmem>>, vector<1x4x4xbf16>
    %125 = vector.shape_cast %124 : vector<1x4x4xbf16> to vector<4x4xbf16>
    %cst_127 = arith.constant dense<0.000000e+00> : vector<6x4xf32>
    %126 = tpu.matmul %123, %125, %cst_127 {dimension_numbers = #tpu.dot_dimension_numbers<[1], [0], [0], [1], [0, 0, 1, 1], [], []>} : vector<6x4xbf16>, vector<4x4xbf16>, vector<6x4xf32> -> vector<6x4xf32>
    %127 = arith.addf %121, %126 : vector<6x4xf32>
    %c0_128 = arith.constant 0 : index
    %c0_129 = arith.constant 0 : index
    %c10_130 = arith.constant 10 : index
    %c0_131 = arith.constant 0 : index
    %128 = vector.load %arg1[%c0_128, %c0_129, %c10_130, %c0_131] : memref<1x1x16x4xbf16, #tpu.memory_space<vmem>>, vector<1x1x6x4xbf16>
    %129 = vector.shape_cast %128 : vector<1x1x6x4xbf16> to vector<6x4xbf16>
    %c15 = arith.constant 15 : index
    %c0_132 = arith.constant 0 : index
    %c0_133 = arith.constant 0 : index
    %130 = vector.load %arg2[%c15, %c0_132, %c0_133] : memref<16x4x4xbf16, #tpu.memory_space<vmem>>, vector<1x4x4xbf16>
    %131 = vector.shape_cast %130 : vector<1x4x4xbf16> to vector<4x4xbf16>
    %cst_134 = arith.constant dense<0.000000e+00> : vector<6x4xf32>
    %132 = tpu.matmul %129, %131, %cst_134 {dimension_numbers = #tpu.dot_dimension_numbers<[1], [0], [0], [1], [0, 0, 1, 1], [], []>} : vector<6x4xbf16>, vector<4x4xbf16>, vector<6x4xf32> -> vector<6x4xf32>
    %133 = arith.addf %127, %132 : vector<6x4xf32>
    %134 = vector.broadcast %0 : vector<1x4xf32> to vector<6x4xf32>
    %135 = arith.addf %133, %134 : vector<6x4xf32>
    %cst_135 = arith.constant 0.000000e+00 : f32
    %136 = vector.broadcast %cst_135 : f32 to vector<6x4xf32>
    %137 = arith.cmpf oge, %135, %136 : vector<6x4xf32>
    %cst_136 = arith.constant 1.000000e-01 : f32
    %138 = vector.broadcast %cst_136 : f32 to vector<6x4xf32>
    %139 = arith.mulf %138, %135 : vector<6x4xf32>
    %140 = arith.select %137, %135, %139 : vector<6x4xi1>, vector<6x4xf32>
    %141 = arith.truncf %140 : vector<6x4xf32> to vector<6x4xbf16>
    %c0_137 = arith.constant 0 : index
    %c3_138 = arith.constant 3 : index
    %c0_139 = arith.constant 0 : index
    %c0_140 = arith.constant 0 : index
    %142 = vector.load %arg4[%c0_137, %c3_138, %c0_139, %c0_140] : memref<1x4x6x4xbf16, #tpu.memory_space<vmem>>, vector<1x1x6x4xbf16>
    %143 = vector.shape_cast %142 : vector<1x1x6x4xbf16> to vector<6x4xbf16>
    %144 = vector.shape_cast %141 : vector<6x4xbf16> to vector<1x1x6x4xbf16>
    tpu.vector_store %arg4[%c0_137, %c3_138, %c0_139, %c0_140], %144 {strides = array<i32>} : memref<1x4x6x4xbf16, #tpu.memory_space<vmem>>, vector<1x1x6x4xbf16>,
    return
  }
  func.func @transform_0(%arg0: i32) -> (i32, i32, i32, i32) {
    %c0_i32 = arith.constant 0 : i32
    %c0_i32_0 = arith.constant 0 : i32
    %c0_i32_1 = arith.constant 0 : i32
    %c0_i32_2 = arith.constant 0 : i32
    return %arg0, %c0_i32, %c0_i32_0, %c0_i32_1 : i32, i32, i32, i32
  }
  func.func @transform_1(%arg0: i32) -> (i32, i32, i32) {
    %c0_i32 = arith.constant 0 : i32
    %c0_i32_0 = arith.constant 0 : i32
    %c0_i32_1 = arith.constant 0 : i32
    %c0_i32_2 = arith.constant 0 : i32
    return %c0_i32, %c0_i32_0, %c0_i32_1 : i32, i32, i32
  }
  func.func @transform_2(%arg0: i32) -> (i32, i32) {
    %c0_i32 = arith.constant 0 : i32
    %c0_i32_0 = arith.constant 0 : i32
    %c0_i32_1 = arith.constant 0 : i32
    return %c0_i32, %c0_i32_0 : i32, i32
  }
  func.func @transform_3(%arg0: i32) -> (i32, i32, i32, i32) {
    %c0_i32 = arith.constant 0 : i32
    %c0_i32_0 = arith.constant 0 : i32
    %c0_i32_1 = arith.constant 0 : i32
    %c0_i32_2 = arith.constant 0 : i32
    return %arg0, %c0_i32, %c0_i32_0, %c0_i32_1 : i32, i32, i32, i32
  }
}

module attributes {stable_mosaic.version = 11 : i64} {
  func.func @_down_block_kernel(%arg0: i32, %arg1: memref<1x4x9x4xbf16, #tpu.memory_space<vmem>>, %arg2: memref<9x4x4xbf16, #tpu.memory_space<vmem>>, %arg3: memref<9x4x4xbf16, #tpu.memory_space<vmem>>, %arg4: memref<1x6x4xbf16, #tpu.memory_space<vmem>>, %arg5: memref<16x4xbf16, #tpu.memory_space<vmem>>) attributes {dimension_semantics = [#tpu.dimension_semantics<parallel>], iteration_bounds = array<i64: 2>, scalar_prefetch = 0 : i64, scratch_operands = 1 : i64, tpu.core_type = #tpu.core_type<tc>, window_params = [{transform_indices = @transform_0, window_bounds = array<i64: 1, 4, 9, 4>}, {pipeline_mode = #tpu.pipeline_mode<synchronous>, transform_indices = @transform_1, window_bounds = array<i64: 9, 4, 4>}, {pipeline_mode = #tpu.pipeline_mode<synchronous>, transform_indices = @transform_2, window_bounds = array<i64: 9, 4, 4>}, {transform_indices = @transform_3, window_bounds = array<i64: 1, 6, 4>}]} {
    %cst = arith.constant 0.000000e+00 : f32
    %0 = vector.broadcast %cst : f32 to vector<5x4xf32>
    %c0 = arith.constant 0 : index
    %c0_0 = arith.constant 0 : index
    %c0_1 = arith.constant 0 : index
    %c0_2 = arith.constant 0 : index
    %1 = vector.load %arg1[%c0, %c0_0, %c0_1, %c0_2] : memref<1x4x9x4xbf16, #tpu.memory_space<vmem>>, vector<1x1x5x4xbf16>
    %2 = vector.shape_cast %1 : vector<1x1x5x4xbf16> to vector<5x4xbf16>
    %c0_3 = arith.constant 0 : index
    %c0_4 = arith.constant 0 : index
    %c0_5 = arith.constant 0 : index
    %3 = vector.load %arg2[%c0_3, %c0_4, %c0_5] : memref<9x4x4xbf16, #tpu.memory_space<vmem>>, vector<1x4x4xbf16>
    %4 = vector.shape_cast %3 : vector<1x4x4xbf16> to vector<4x4xbf16>
    %cst_6 = arith.constant dense<0.000000e+00> : vector<5x4xf32>
    %5 = tpu.matmul %2, %4, %cst_6 {dimension_numbers = #tpu.dot_dimension_numbers<[1], [0], [0], [1], [0, 0, 1, 1], [], []>} : vector<5x4xbf16>, vector<4x4xbf16>, vector<5x4xf32> -> vector<5x4xf32>
    %6 = arith.addf %0, %5 : vector<5x4xf32>
    %c0_7 = arith.constant 0 : index
    %c1 = arith.constant 1 : index
    %c0_8 = arith.constant 0 : index
    %c0_9 = arith.constant 0 : index
    %7 = vector.load %arg1[%c0_7, %c1, %c0_8, %c0_9] : memref<1x4x9x4xbf16, #tpu.memory_space<vmem>>, vector<1x1x5x4xbf16>
    %8 = vector.shape_cast %7 : vector<1x1x5x4xbf16> to vector<5x4xbf16>
    %c1_10 = arith.constant 1 : index
    %c0_11 = arith.constant 0 : index
    %c0_12 = arith.constant 0 : index
    %9 = vector.load %arg2[%c1_10, %c0_11, %c0_12] : memref<9x4x4xbf16, #tpu.memory_space<vmem>>, vector<1x4x4xbf16>
    %10 = vector.shape_cast %9 : vector<1x4x4xbf16> to vector<4x4xbf16>
    %cst_13 = arith.constant dense<0.000000e+00> : vector<5x4xf32>
    %11 = tpu.matmul %8, %10, %cst_13 {dimension_numbers = #tpu.dot_dimension_numbers<[1], [0], [0], [1], [0, 0, 1, 1], [], []>} : vector<5x4xbf16>, vector<4x4xbf16>, vector<5x4xf32> -> vector<5x4xf32>
    %12 = arith.addf %6, %11 : vector<5x4xf32>
    %c0_14 = arith.constant 0 : index
    %c0_15 = arith.constant 0 : index
    %c1_16 = arith.constant 1 : index
    %c0_17 = arith.constant 0 : index
    %13 = vector.load %arg1[%c0_14, %c0_15, %c1_16, %c0_17] : memref<1x4x9x4xbf16, #tpu.memory_space<vmem>>, vector<1x1x5x4xbf16>
    %14 = vector.shape_cast %13 : vector<1x1x5x4xbf16> to vector<5x4xbf16>
    %c2 = arith.constant 2 : index
    %c0_18 = arith.constant 0 : index
    %c0_19 = arith.constant 0 : index
    %15 = vector.load %arg2[%c2, %c0_18, %c0_19] : memref<9x4x4xbf16, #tpu.memory_space<vmem>>, vector<1x4x4xbf16>
    %16 = vector.shape_cast %15 : vector<1x4x4xbf16> to vector<4x4xbf16>
    %cst_20 = arith.constant dense<0.000000e+00> : vector<5x4xf32>
    %17 = tpu.matmul %14, %16, %cst_20 {dimension_numbers = #tpu.dot_dimension_numbers<[1], [0], [0], [1], [0, 0, 1, 1], [], []>} : vector<5x4xbf16>, vector<4x4xbf16>, vector<5x4xf32> -> vector<5x4xf32>
    %18 = arith.addf %12, %17 : vector<5x4xf32>
    %c0_21 = arith.constant 0 : index
    %c2_22 = arith.constant 2 : index
    %c0_23 = arith.constant 0 : index
    %c0_24 = arith.constant 0 : index
    %19 = vector.load %arg1[%c0_21, %c2_22, %c0_23, %c0_24] : memref<1x4x9x4xbf16, #tpu.memory_space<vmem>>, vector<1x1x5x4xbf16>
    %20 = vector.shape_cast %19 : vector<1x1x5x4xbf16> to vector<5x4xbf16>
    %c3 = arith.constant 3 : index
    %c0_25 = arith.constant 0 : index
    %c0_26 = arith.constant 0 : index
    %21 = vector.load %arg2[%c3, %c0_25, %c0_26] : memref<9x4x4xbf16, #tpu.memory_space<vmem>>, vector<1x4x4xbf16>
    %22 = vector.shape_cast %21 : vector<1x4x4xbf16> to vector<4x4xbf16>
    %cst_27 = arith.constant dense<0.000000e+00> : vector<5x4xf32>
    %23 = tpu.matmul %20, %22, %cst_27 {dimension_numbers = #tpu.dot_dimension_numbers<[1], [0], [0], [1], [0, 0, 1, 1], [], []>} : vector<5x4xbf16>, vector<4x4xbf16>, vector<5x4xf32> -> vector<5x4xf32>
    %24 = arith.addf %18, %23 : vector<5x4xf32>
    %c0_28 = arith.constant 0 : index
    %c3_29 = arith.constant 3 : index
    %c0_30 = arith.constant 0 : index
    %c0_31 = arith.constant 0 : index
    %25 = vector.load %arg1[%c0_28, %c3_29, %c0_30, %c0_31] : memref<1x4x9x4xbf16, #tpu.memory_space<vmem>>, vector<1x1x5x4xbf16>
    %26 = vector.shape_cast %25 : vector<1x1x5x4xbf16> to vector<5x4xbf16>
    %c4 = arith.constant 4 : index
    %c0_32 = arith.constant 0 : index
    %c0_33 = arith.constant 0 : index
    %27 = vector.load %arg2[%c4, %c0_32, %c0_33] : memref<9x4x4xbf16, #tpu.memory_space<vmem>>, vector<1x4x4xbf16>
    %28 = vector.shape_cast %27 : vector<1x4x4xbf16> to vector<4x4xbf16>
    %cst_34 = arith.constant dense<0.000000e+00> : vector<5x4xf32>
    %29 = tpu.matmul %26, %28, %cst_34 {dimension_numbers = #tpu.dot_dimension_numbers<[1], [0], [0], [1], [0, 0, 1, 1], [], []>} : vector<5x4xbf16>, vector<4x4xbf16>, vector<5x4xf32> -> vector<5x4xf32>
    %30 = arith.addf %24, %29 : vector<5x4xf32>
    %c0_35 = arith.constant 0 : index
    %c2_36 = arith.constant 2 : index
    %c1_37 = arith.constant 1 : index
    %c0_38 = arith.constant 0 : index
    %31 = vector.load %arg1[%c0_35, %c2_36, %c1_37, %c0_38] : memref<1x4x9x4xbf16, #tpu.memory_space<vmem>>, vector<1x1x5x4xbf16>
    %32 = vector.shape_cast %31 : vector<1x1x5x4xbf16> to vector<5x4xbf16>
    %c5 = arith.constant 5 : index
    %c0_39 = arith.constant 0 : index
    %c0_40 = arith.constant 0 : index
    %33 = vector.load %arg2[%c5, %c0_39, %c0_40] : memref<9x4x4xbf16, #tpu.memory_space<vmem>>, vector<1x4x4xbf16>
    %34 = vector.shape_cast %33 : vector<1x4x4xbf16> to vector<4x4xbf16>
    %cst_41 = arith.constant dense<0.000000e+00> : vector<5x4xf32>
    %35 = tpu.matmul %32, %34, %cst_41 {dimension_numbers = #tpu.dot_dimension_numbers<[1], [0], [0], [1], [0, 0, 1, 1], [], []>} : vector<5x4xbf16>, vector<4x4xbf16>, vector<5x4xf32> -> vector<5x4xf32>
    %36 = arith.addf %30, %35 : vector<5x4xf32>
    %c0_42 = arith.constant 0 : index
    %c0_43 = arith.constant 0 : index
    %c3_44 = arith.constant 3 : index
    %c0_45 = arith.constant 0 : index
    %37 = vector.load %arg1[%c0_42, %c0_43, %c3_44, %c0_45] : memref<1x4x9x4xbf16, #tpu.memory_space<vmem>>, vector<1x1x5x4xbf16>
    %38 = vector.shape_cast %37 : vector<1x1x5x4xbf16> to vector<5x4xbf16>
    %c6 = arith.constant 6 : index
    %c0_46 = arith.constant 0 : index
    %c0_47 = arith.constant 0 : index
    %39 = vector.load %arg2[%c6, %c0_46, %c0_47] : memref<9x4x4xbf16, #tpu.memory_space<vmem>>, vector<1x4x4xbf16>
    %40 = vector.shape_cast %39 : vector<1x4x4xbf16> to vector<4x4xbf16>
    %cst_48 = arith.constant dense<0.000000e+00> : vector<5x4xf32>
    %41 = tpu.matmul %38, %40, %cst_48 {dimension_numbers = #tpu.dot_dimension_numbers<[1], [0], [0], [1], [0, 0, 1, 1], [], []>} : vector<5x4xbf16>, vector<4x4xbf16>, vector<5x4xf32> -> vector<5x4xf32>
    %42 = arith.addf %36, %41 : vector<5x4xf32>
    %c0_49 = arith.constant 0 : index
    %c1_50 = arith.constant 1 : index
    %c3_51 = arith.constant 3 : index
    %c0_52 = arith.constant 0 : index
    %43 = vector.load %arg1[%c0_49, %c1_50, %c3_51, %c0_52] : memref<1x4x9x4xbf16, #tpu.memory_space<vmem>>, vector<1x1x5x4xbf16>
    %44 = vector.shape_cast %43 : vector<1x1x5x4xbf16> to vector<5x4xbf16>
    %c7 = arith.constant 7 : index
    %c0_53 = arith.constant 0 : index
    %c0_54 = arith.constant 0 : index
    %45 = vector.load %arg2[%c7, %c0_53, %c0_54] : memref<9x4x4xbf16, #tpu.memory_space<vmem>>, vector<1x4x4xbf16>
    %46 = vector.shape_cast %45 : vector<1x4x4xbf16> to vector<4x4xbf16>
    %cst_55 = arith.constant dense<0.000000e+00> : vector<5x4xf32>
    %47 = tpu.matmul %44, %46, %cst_55 {dimension_numbers = #tpu.dot_dimension_numbers<[1], [0], [0], [1], [0, 0, 1, 1], [], []>} : vector<5x4xbf16>, vector<4x4xbf16>, vector<5x4xf32> -> vector<5x4xf32>
    %48 = arith.addf %42, %47 : vector<5x4xf32>
    %c0_56 = arith.constant 0 : index
    %c0_57 = arith.constant 0 : index
    %c4_58 = arith.constant 4 : index
    %c0_59 = arith.constant 0 : index
    %49 = vector.load %arg1[%c0_56, %c0_57, %c4_58, %c0_59] : memref<1x4x9x4xbf16, #tpu.memory_space<vmem>>, vector<1x1x5x4xbf16>
    %50 = vector.shape_cast %49 : vector<1x1x5x4xbf16> to vector<5x4xbf16>
    %c8 = arith.constant 8 : index
    %c0_60 = arith.constant 0 : index
    %c0_61 = arith.constant 0 : index
    %51 = vector.load %arg2[%c8, %c0_60, %c0_61] : memref<9x4x4xbf16, #tpu.memory_space<vmem>>, vector<1x4x4xbf16>
    %52 = vector.shape_cast %51 : vector<1x4x4xbf16> to vector<4x4xbf16>
    %cst_62 = arith.constant dense<0.000000e+00> : vector<5x4xf32>
    %53 = tpu.matmul %50, %52, %cst_62 {dimension_numbers = #tpu.dot_dimension_numbers<[1], [0], [0], [1], [0, 0, 1, 1], [], []>} : vector<5x4xbf16>, vector<4x4xbf16>, vector<5x4xf32> -> vector<5x4xf32>
    %54 = arith.addf %48, %53 : vector<5x4xf32>
    %cst_63 = arith.constant 0.000000e+00 : f32
    %55 = vector.broadcast %cst_63 : f32 to vector<5x4xf32>
    %56 = arith.cmpf oge, %54, %55 : vector<5x4xf32>
    %cst_64 = arith.constant 1.000000e-01 : f32
    %57 = vector.broadcast %cst_64 : f32 to vector<5x4xf32>
    %58 = arith.mulf %57, %54 : vector<5x4xf32>
    %59 = arith.select %56, %54, %58 : vector<5x4xi1>, vector<5x4xf32>
    %60 = arith.truncf %59 : vector<5x4xf32> to vector<5x4xbf16>
    %cst_65 = arith.constant 0.000000e+00 : bf16
    %61 = vector.broadcast %cst_65 : bf16 to vector<16x4xbf16>
    %c0_66 = arith.constant 0 : index
    %c0_67 = arith.constant 0 : index
    %62 = vector.load %arg5[%c0_66, %c0_67] : memref<16x4xbf16, #tpu.memory_space<vmem>>, vector<16x4xbf16>
    tpu.vector_store %arg5[%c0_66, %c0_67], %61 {strides = array<i32>} : memref<16x4xbf16, #tpu.memory_space<vmem>>, vector<16x4xbf16>,
    %63 = vector.extract_strided_slice %60 {offsets = [0, 0], sizes = [2, 4], strides = [1, 1]} : vector<5x4xbf16> to vector<2x4xbf16>
    %c5_68 = arith.constant 5 : index
    %c0_69 = arith.constant 0 : index
    %64 = vector.load %arg5[%c5_68, %c0_69] : memref<16x4xbf16, #tpu.memory_space<vmem>>, vector<2x4xbf16>
    tpu.vector_store %arg5[%c5_68, %c0_69], %63 {strides = array<i32>} : memref<16x4xbf16, #tpu.memory_space<vmem>>, vector<2x4xbf16>,
    %65 = vector.extract_strided_slice %60 {offsets = [3, 0], sizes = [2, 4], strides = [1, 1]} : vector<5x4xbf16> to vector<2x4xbf16>
    %c9 = arith.constant 9 : index
    %c0_70 = arith.constant 0 : index
    %66 = vector.load %arg5[%c9, %c0_70] : memref<16x4xbf16, #tpu.memory_space<vmem>>, vector<2x4xbf16>
    tpu.vector_store %arg5[%c9, %c0_70], %65 {strides = array<i32>} : memref<16x4xbf16, #tpu.memory_space<vmem>>, vector<2x4xbf16>,
    %cst_71 = arith.constant 0.000000e+00 : f32
    %67 = vector.broadcast %cst_71 : f32 to vector<6x4xf32>
    %c0_72 = arith.constant 0 : index
    %c0_73 = arith.constant 0 : index
    %68 = vector.load %arg5[%c0_72, %c0_73] : memref<16x4xbf16, #tpu.memory_space<vmem>>, vector<6x4xbf16>
    %c0_74 = arith.constant 0 : index
    %c0_75 = arith.constant 0 : index
    %c0_76 = arith.constant 0 : index
    %69 = vector.load %arg3[%c0_74, %c0_75, %c0_76] : memref<9x4x4xbf16, #tpu.memory_space<vmem>>, vector<1x4x4xbf16>
    %70 = vector.shape_cast %69 : vector<1x4x4xbf16> to vector<4x4xbf16>
    %cst_77 = arith.constant dense<0.000000e+00> : vector<6x4xf32>
    %71 = tpu.matmul %68, %70, %cst_77 {dimension_numbers = #tpu.dot_dimension_numbers<[1], [0], [0], [1], [0, 0, 1, 1], [], []>} : vector<6x4xbf16>, vector<4x4xbf16>, vector<6x4xf32> -> vector<6x4xf32>
    %72 = arith.addf %67, %71 : vector<6x4xf32>
    %c1_78 = arith.constant 1 : index
    %c0_79 = arith.constant 0 : index
    %73 = vector.load %arg5[%c1_78, %c0_79] : memref<16x4xbf16, #tpu.memory_space<vmem>>, vector<6x4xbf16>
    %c1_80 = arith.constant 1 : index
    %c0_81 = arith.constant 0 : index
    %c0_82 = arith.constant 0 : index
    %74 = vector.load %arg3[%c1_80, %c0_81, %c0_82] : memref<9x4x4xbf16, #tpu.memory_space<vmem>>, vector<1x4x4xbf16>
    %75 = vector.shape_cast %74 : vector<1x4x4xbf16> to vector<4x4xbf16>
    %cst_83 = arith.constant dense<0.000000e+00> : vector<6x4xf32>
    %76 = tpu.matmul %73, %75, %cst_83 {dimension_numbers = #tpu.dot_dimension_numbers<[1], [0], [0], [1], [0, 0, 1, 1], [], []>} : vector<6x4xbf16>, vector<4x4xbf16>, vector<6x4xf32> -> vector<6x4xf32>
    %77 = arith.addf %72, %76 : vector<6x4xf32>
    %c2_84 = arith.constant 2 : index
    %c0_85 = arith.constant 0 : index
    %78 = vector.load %arg5[%c2_84, %c0_85] : memref<16x4xbf16, #tpu.memory_space<vmem>>, vector<6x4xbf16>
    %c2_86 = arith.constant 2 : index
    %c0_87 = arith.constant 0 : index
    %c0_88 = arith.constant 0 : index
    %79 = vector.load %arg3[%c2_86, %c0_87, %c0_88] : memref<9x4x4xbf16, #tpu.memory_space<vmem>>, vector<1x4x4xbf16>
    %80 = vector.shape_cast %79 : vector<1x4x4xbf16> to vector<4x4xbf16>
    %cst_89 = arith.constant dense<0.000000e+00> : vector<6x4xf32>
    %81 = tpu.matmul %78, %80, %cst_89 {dimension_numbers = #tpu.dot_dimension_numbers<[1], [0], [0], [1], [0, 0, 1, 1], [], []>} : vector<6x4xbf16>, vector<4x4xbf16>, vector<6x4xf32> -> vector<6x4xf32>
    %82 = arith.addf %77, %81 : vector<6x4xf32>
    %c4_90 = arith.constant 4 : index
    %c0_91 = arith.constant 0 : index
    %83 = vector.load %arg5[%c4_90, %c0_91] : memref<16x4xbf16, #tpu.memory_space<vmem>>, vector<6x4xbf16>
    %c3_92 = arith.constant 3 : index
    %c0_93 = arith.constant 0 : index
    %c0_94 = arith.constant 0 : index
    %84 = vector.load %arg3[%c3_92, %c0_93, %c0_94] : memref<9x4x4xbf16, #tpu.memory_space<vmem>>, vector<1x4x4xbf16>
    %85 = vector.shape_cast %84 : vector<1x4x4xbf16> to vector<4x4xbf16>
    %cst_95 = arith.constant dense<0.000000e+00> : vector<6x4xf32>
    %86 = tpu.matmul %83, %85, %cst_95 {dimension_numbers = #tpu.dot_dimension_numbers<[1], [0], [0], [1], [0, 0, 1, 1], [], []>} : vector<6x4xbf16>, vector<4x4xbf16>, vector<6x4xf32> -> vector<6x4xf32>
    %87 = arith.addf %82, %86 : vector<6x4xf32>
    %c5_96 = arith.constant 5 : index
    %c0_97 = arith.constant 0 : index
    %88 = vector.load %arg5[%c5_96, %c0_97] : memref<16x4xbf16, #tpu.memory_space<vmem>>, vector<6x4xbf16>
    %c4_98 = arith.constant 4 : index
    %c0_99 = arith.constant 0 : index
    %c0_100 = arith.constant 0 : index
    %89 = vector.load %arg3[%c4_98, %c0_99, %c0_100] : memref<9x4x4xbf16, #tpu.memory_space<vmem>>, vector<1x4x4xbf16>
    %90 = vector.shape_cast %89 : vector<1x4x4xbf16> to vector<4x4xbf16>
    %cst_101 = arith.constant dense<0.000000e+00> : vector<6x4xf32>
    %91 = tpu.matmul %88, %90, %cst_101 {dimension_numbers = #tpu.dot_dimension_numbers<[1], [0], [0], [1], [0, 0, 1, 1], [], []>} : vector<6x4xbf16>, vector<4x4xbf16>, vector<6x4xf32> -> vector<6x4xf32>
    %92 = arith.addf %87, %91 : vector<6x4xf32>
    %c6_102 = arith.constant 6 : index
    %c0_103 = arith.constant 0 : index
    %93 = vector.load %arg5[%c6_102, %c0_103] : memref<16x4xbf16, #tpu.memory_space<vmem>>, vector<6x4xbf16>
    %c5_104 = arith.constant 5 : index
    %c0_105 = arith.constant 0 : index
    %c0_106 = arith.constant 0 : index
    %94 = vector.load %arg3[%c5_104, %c0_105, %c0_106] : memref<9x4x4xbf16, #tpu.memory_space<vmem>>, vector<1x4x4xbf16>
    %95 = vector.shape_cast %94 : vector<1x4x4xbf16> to vector<4x4xbf16>
    %cst_107 = arith.constant dense<0.000000e+00> : vector<6x4xf32>
    %96 = tpu.matmul %93, %95, %cst_107 {dimension_numbers = #tpu.dot_dimension_numbers<[1], [0], [0], [1], [0, 0, 1, 1], [], []>} : vector<6x4xbf16>, vector<4x4xbf16>, vector<6x4xf32> -> vector<6x4xf32>
    %97 = arith.addf %92, %96 : vector<6x4xf32>
    %c8_108 = arith.constant 8 : index
    %c0_109 = arith.constant 0 : index
    %98 = vector.load %arg5[%c8_108, %c0_109] : memref<16x4xbf16, #tpu.memory_space<vmem>>, vector<6x4xbf16>
    %c6_110 = arith.constant 6 : index
    %c0_111 = arith.constant 0 : index
    %c0_112 = arith.constant 0 : index
    %99 = vector.load %arg3[%c6_110, %c0_111, %c0_112] : memref<9x4x4xbf16, #tpu.memory_space<vmem>>, vector<1x4x4xbf16>
    %100 = vector.shape_cast %99 : vector<1x4x4xbf16> to vector<4x4xbf16>
    %cst_113 = arith.constant dense<0.000000e+00> : vector<6x4xf32>
    %101 = tpu.matmul %98, %100, %cst_113 {dimension_numbers = #tpu.dot_dimension_numbers<[1], [0], [0], [1], [0, 0, 1, 1], [], []>} : vector<6x4xbf16>, vector<4x4xbf16>, vector<6x4xf32> -> vector<6x4xf32>
    %102 = arith.addf %97, %101 : vector<6x4xf32>
    %c9_114 = arith.constant 9 : index
    %c0_115 = arith.constant 0 : index
    %103 = vector.load %arg5[%c9_114, %c0_115] : memref<16x4xbf16, #tpu.memory_space<vmem>>, vector<6x4xbf16>
    %c7_116 = arith.constant 7 : index
    %c0_117 = arith.constant 0 : index
    %c0_118 = arith.constant 0 : index
    %104 = vector.load %arg3[%c7_116, %c0_117, %c0_118] : memref<9x4x4xbf16, #tpu.memory_space<vmem>>, vector<1x4x4xbf16>
    %105 = vector.shape_cast %104 : vector<1x4x4xbf16> to vector<4x4xbf16>
    %cst_119 = arith.constant dense<0.000000e+00> : vector<6x4xf32>
    %106 = tpu.matmul %103, %105, %cst_119 {dimension_numbers = #tpu.dot_dimension_numbers<[1], [0], [0], [1], [0, 0, 1, 1], [], []>} : vector<6x4xbf16>, vector<4x4xbf16>, vector<6x4xf32> -> vector<6x4xf32>
    %107 = arith.addf %102, %106 : vector<6x4xf32>
    %c10 = arith.constant 10 : index
    %c0_120 = arith.constant 0 : index
    %108 = vector.load %arg5[%c10, %c0_120] : memref<16x4xbf16, #tpu.memory_space<vmem>>, vector<6x4xbf16>
    %c8_121 = arith.constant 8 : index
    %c0_122 = arith.constant 0 : index
    %c0_123 = arith.constant 0 : index
    %109 = vector.load %arg3[%c8_121, %c0_122, %c0_123] : memref<9x4x4xbf16, #tpu.memory_space<vmem>>, vector<1x4x4xbf16>
    %110 = vector.shape_cast %109 : vector<1x4x4xbf16> to vector<4x4xbf16>
    %cst_124 = arith.constant dense<0.000000e+00> : vector<6x4xf32>
    %111 = tpu.matmul %108, %110, %cst_124 {dimension_numbers = #tpu.dot_dimension_numbers<[1], [0], [0], [1], [0, 0, 1, 1], [], []>} : vector<6x4xbf16>, vector<4x4xbf16>, vector<6x4xf32> -> vector<6x4xf32>
    %112 = arith.addf %107, %111 : vector<6x4xf32>
    %cst_125 = arith.constant 0.000000e+00 : f32
    %113 = vector.broadcast %cst_125 : f32 to vector<6x4xf32>
    %114 = arith.cmpf oge, %112, %113 : vector<6x4xf32>
    %cst_126 = arith.constant 1.000000e-01 : f32
    %115 = vector.broadcast %cst_126 : f32 to vector<6x4xf32>
    %116 = arith.mulf %115, %112 : vector<6x4xf32>
    %117 = arith.select %114, %112, %116 : vector<6x4xi1>, vector<6x4xf32>
    %118 = arith.truncf %117 : vector<6x4xf32> to vector<6x4xbf16>
    %c0_127 = arith.constant 0 : index
    %c0_128 = arith.constant 0 : index
    %c0_129 = arith.constant 0 : index
    %119 = vector.load %arg4[%c0_127, %c0_128, %c0_129] : memref<1x6x4xbf16, #tpu.memory_space<vmem>>, vector<1x6x4xbf16>
    %120 = vector.shape_cast %119 : vector<1x6x4xbf16> to vector<6x4xbf16>
    %121 = vector.shape_cast %118 : vector<6x4xbf16> to vector<1x6x4xbf16>
    tpu.vector_store %arg4[%c0_127, %c0_128, %c0_129], %121 {strides = array<i32>} : memref<1x6x4xbf16, #tpu.memory_space<vmem>>, vector<1x6x4xbf16>,
    return
  }
  func.func @transform_0(%arg0: i32) -> (i32, i32, i32, i32) {
    %c0_i32 = arith.constant 0 : i32
    %c0_i32_0 = arith.constant 0 : i32
    %c0_i32_1 = arith.constant 0 : i32
    %c0_i32_2 = arith.constant 0 : i32
    return %arg0, %c0_i32, %c0_i32_0, %c0_i32_1 : i32, i32, i32, i32
  }
  func.func @transform_1(%arg0: i32) -> (i32, i32, i32) {
    %c0_i32 = arith.constant 0 : i32
    %c0_i32_0 = arith.constant 0 : i32
    %c0_i32_1 = arith.constant 0 : i32
    %c0_i32_2 = arith.constant 0 : i32
    return %c0_i32, %c0_i32_0, %c0_i32_1 : i32, i32, i32
  }
  func.func @transform_2(%arg0: i32) -> (i32, i32, i32) {
    %c0_i32 = arith.constant 0 : i32
    %c0_i32_0 = arith.constant 0 : i32
    %c0_i32_1 = arith.constant 0 : i32
    %c0_i32_2 = arith.constant 0 : i32
    return %c0_i32, %c0_i32_0, %c0_i32_1 : i32, i32, i32
  }
  func.func @transform_3(%arg0: i32) -> (i32, i32, i32) {
    %c0_i32 = arith.constant 0 : i32
    %c0_i32_0 = arith.constant 0 : i32
    %c0_i32_1 = arith.constant 0 : i32
    return %arg0, %c0_i32, %c0_i32_0 : i32, i32, i32
  }
}

module attributes {stable_mosaic.version = 11 : i64} {
  func.func @_up_kernel(%arg0: i32, %arg1: memref<1x1x36x8xbf16, #tpu.memory_space<vmem>>, %arg2: memref<16x8x4xbf16, #tpu.memory_space<vmem>>, %arg3: memref<1x4xf32, #tpu.memory_space<vmem>>, %arg4: memref<1x4x22x4xbf16, #tpu.memory_space<vmem>>) attributes {dimension_semantics = [#tpu.dimension_semantics<parallel>], iteration_bounds = array<i64: 2>, scalar_prefetch = 0 : i64, scratch_operands = 0 : i64, tpu.core_type = #tpu.core_type<tc>, window_params = [{transform_indices = @transform_0, window_bounds = array<i64: 1, 1, 36, 8>}, {pipeline_mode = #tpu.pipeline_mode<synchronous>, transform_indices = @transform_1, window_bounds = array<i64: 16, 8, 4>}, {pipeline_mode = #tpu.pipeline_mode<synchronous>, transform_indices = @transform_2, window_bounds = array<i64: 1, 4>}, {transform_indices = @transform_3, window_bounds = array<i64: 1, 4, 22, 4>}]} {
    %c0 = arith.constant 0 : index
    %c0_0 = arith.constant 0 : index
    %0 = vector.load %arg3[%c0, %c0_0] : memref<1x4xf32, #tpu.memory_space<vmem>>, vector<1x4xf32>
    %cst = arith.constant 0.000000e+00 : f32
    %1 = vector.broadcast %cst : f32 to vector<22x4xf32>
    %c0_1 = arith.constant 0 : index
    %c0_2 = arith.constant 0 : index
    %c0_3 = arith.constant 0 : index
    %c0_4 = arith.constant 0 : index
    %2 = vector.load %arg1[%c0_1, %c0_2, %c0_3, %c0_4] : memref<1x1x36x8xbf16, #tpu.memory_space<vmem>>, vector<1x1x22x8xbf16>
    %3 = vector.shape_cast %2 : vector<1x1x22x8xbf16> to vector<22x8xbf16>
    %c0_5 = arith.constant 0 : index
    %c0_6 = arith.constant 0 : index
    %c0_7 = arith.constant 0 : index
    %4 = vector.load %arg2[%c0_5, %c0_6, %c0_7] : memref<16x8x4xbf16, #tpu.memory_space<vmem>>, vector<1x8x4xbf16>
    %5 = vector.shape_cast %4 : vector<1x8x4xbf16> to vector<8x4xbf16>
    %cst_8 = arith.constant dense<0.000000e+00> : vector<22x4xf32>
    %6 = tpu.matmul %3, %5, %cst_8 {dimension_numbers = #tpu.dot_dimension_numbers<[1], [0], [0], [1], [0, 0, 1, 1], [], []>} : vector<22x8xbf16>, vector<8x4xbf16>, vector<22x4xf32> -> vector<22x4xf32>
    %7 = arith.addf %1, %6 : vector<22x4xf32>
    %c0_9 = arith.constant 0 : index
    %c0_10 = arith.constant 0 : index
    %c1 = arith.constant 1 : index
    %c0_11 = arith.constant 0 : index
    %8 = vector.load %arg1[%c0_9, %c0_10, %c1, %c0_11] : memref<1x1x36x8xbf16, #tpu.memory_space<vmem>>, vector<1x1x22x8xbf16>
    %9 = vector.shape_cast %8 : vector<1x1x22x8xbf16> to vector<22x8xbf16>
    %c1_12 = arith.constant 1 : index
    %c0_13 = arith.constant 0 : index
    %c0_14 = arith.constant 0 : index
    %10 = vector.load %arg2[%c1_12, %c0_13, %c0_14] : memref<16x8x4xbf16, #tpu.memory_space<vmem>>, vector<1x8x4xbf16>
    %11 = vector.shape_cast %10 : vector<1x8x4xbf16> to vector<8x4xbf16>
    %cst_15 = arith.constant dense<0.000000e+00> : vector<22x4xf32>
    %12 = tpu.matmul %9, %11, %cst_15 {dimension_numbers = #tpu.dot_dimension_numbers<[1], [0], [0], [1], [0, 0, 1, 1], [], []>} : vector<22x8xbf16>, vector<8x4xbf16>, vector<22x4xf32> -> vector<22x4xf32>
    %13 = arith.addf %7, %12 : vector<22x4xf32>
    %c0_16 = arith.constant 0 : index
    %c0_17 = arith.constant 0 : index
    %c6 = arith.constant 6 : index
    %c0_18 = arith.constant 0 : index
    %14 = vector.load %arg1[%c0_16, %c0_17, %c6, %c0_18] : memref<1x1x36x8xbf16, #tpu.memory_space<vmem>>, vector<1x1x22x8xbf16>
    %15 = vector.shape_cast %14 : vector<1x1x22x8xbf16> to vector<22x8xbf16>
    %c2 = arith.constant 2 : index
    %c0_19 = arith.constant 0 : index
    %c0_20 = arith.constant 0 : index
    %16 = vector.load %arg2[%c2, %c0_19, %c0_20] : memref<16x8x4xbf16, #tpu.memory_space<vmem>>, vector<1x8x4xbf16>
    %17 = vector.shape_cast %16 : vector<1x8x4xbf16> to vector<8x4xbf16>
    %cst_21 = arith.constant dense<0.000000e+00> : vector<22x4xf32>
    %18 = tpu.matmul %15, %17, %cst_21 {dimension_numbers = #tpu.dot_dimension_numbers<[1], [0], [0], [1], [0, 0, 1, 1], [], []>} : vector<22x8xbf16>, vector<8x4xbf16>, vector<22x4xf32> -> vector<22x4xf32>
    %19 = arith.addf %13, %18 : vector<22x4xf32>
    %c0_22 = arith.constant 0 : index
    %c0_23 = arith.constant 0 : index
    %c7 = arith.constant 7 : index
    %c0_24 = arith.constant 0 : index
    %20 = vector.load %arg1[%c0_22, %c0_23, %c7, %c0_24] : memref<1x1x36x8xbf16, #tpu.memory_space<vmem>>, vector<1x1x22x8xbf16>
    %21 = vector.shape_cast %20 : vector<1x1x22x8xbf16> to vector<22x8xbf16>
    %c3 = arith.constant 3 : index
    %c0_25 = arith.constant 0 : index
    %c0_26 = arith.constant 0 : index
    %22 = vector.load %arg2[%c3, %c0_25, %c0_26] : memref<16x8x4xbf16, #tpu.memory_space<vmem>>, vector<1x8x4xbf16>
    %23 = vector.shape_cast %22 : vector<1x8x4xbf16> to vector<8x4xbf16>
    %cst_27 = arith.constant dense<0.000000e+00> : vector<22x4xf32>
    %24 = tpu.matmul %21, %23, %cst_27 {dimension_numbers = #tpu.dot_dimension_numbers<[1], [0], [0], [1], [0, 0, 1, 1], [], []>} : vector<22x8xbf16>, vector<8x4xbf16>, vector<22x4xf32> -> vector<22x4xf32>
    %25 = arith.addf %19, %24 : vector<22x4xf32>
    %26 = vector.broadcast %0 : vector<1x4xf32> to vector<22x4xf32>
    %27 = arith.addf %25, %26 : vector<22x4xf32>
    %cst_28 = arith.constant 0.000000e+00 : f32
    %28 = vector.broadcast %cst_28 : f32 to vector<22x4xf32>
    %29 = arith.cmpf oge, %27, %28 : vector<22x4xf32>
    %cst_29 = arith.constant 1.000000e-01 : f32
    %30 = vector.broadcast %cst_29 : f32 to vector<22x4xf32>
    %31 = arith.mulf %30, %27 : vector<22x4xf32>
    %32 = arith.select %29, %27, %31 : vector<22x4xi1>, vector<22x4xf32>
    %33 = arith.truncf %32 : vector<22x4xf32> to vector<22x4xbf16>
    %c0_30 = arith.constant 0 : index
    %c0_31 = arith.constant 0 : index
    %c0_32 = arith.constant 0 : index
    %c0_33 = arith.constant 0 : index
    %34 = vector.load %arg4[%c0_30, %c0_31, %c0_32, %c0_33] : memref<1x4x22x4xbf16, #tpu.memory_space<vmem>>, vector<1x1x22x4xbf16>
    %35 = vector.shape_cast %34 : vector<1x1x22x4xbf16> to vector<22x4xbf16>
    %36 = vector.shape_cast %33 : vector<22x4xbf16> to vector<1x1x22x4xbf16>
    tpu.vector_store %arg4[%c0_30, %c0_31, %c0_32, %c0_33], %36 {strides = array<i32>} : memref<1x4x22x4xbf16, #tpu.memory_space<vmem>>, vector<1x1x22x4xbf16>,
    %cst_34 = arith.constant 0.000000e+00 : f32
    %37 = vector.broadcast %cst_34 : f32 to vector<22x4xf32>
    %c0_35 = arith.constant 0 : index
    %c0_36 = arith.constant 0 : index
    %c1_37 = arith.constant 1 : index
    %c0_38 = arith.constant 0 : index
    %38 = vector.load %arg1[%c0_35, %c0_36, %c1_37, %c0_38] : memref<1x1x36x8xbf16, #tpu.memory_space<vmem>>, vector<1x1x22x8xbf16>
    %39 = vector.shape_cast %38 : vector<1x1x22x8xbf16> to vector<22x8xbf16>
    %c4 = arith.constant 4 : index
    %c0_39 = arith.constant 0 : index
    %c0_40 = arith.constant 0 : index
    %40 = vector.load %arg2[%c4, %c0_39, %c0_40] : memref<16x8x4xbf16, #tpu.memory_space<vmem>>, vector<1x8x4xbf16>
    %41 = vector.shape_cast %40 : vector<1x8x4xbf16> to vector<8x4xbf16>
    %cst_41 = arith.constant dense<0.000000e+00> : vector<22x4xf32>
    %42 = tpu.matmul %39, %41, %cst_41 {dimension_numbers = #tpu.dot_dimension_numbers<[1], [0], [0], [1], [0, 0, 1, 1], [], []>} : vector<22x8xbf16>, vector<8x4xbf16>, vector<22x4xf32> -> vector<22x4xf32>
    %43 = arith.addf %37, %42 : vector<22x4xf32>
    %c0_42 = arith.constant 0 : index
    %c0_43 = arith.constant 0 : index
    %c2_44 = arith.constant 2 : index
    %c0_45 = arith.constant 0 : index
    %44 = vector.load %arg1[%c0_42, %c0_43, %c2_44, %c0_45] : memref<1x1x36x8xbf16, #tpu.memory_space<vmem>>, vector<1x1x22x8xbf16>
    %45 = vector.shape_cast %44 : vector<1x1x22x8xbf16> to vector<22x8xbf16>
    %c5 = arith.constant 5 : index
    %c0_46 = arith.constant 0 : index
    %c0_47 = arith.constant 0 : index
    %46 = vector.load %arg2[%c5, %c0_46, %c0_47] : memref<16x8x4xbf16, #tpu.memory_space<vmem>>, vector<1x8x4xbf16>
    %47 = vector.shape_cast %46 : vector<1x8x4xbf16> to vector<8x4xbf16>
    %cst_48 = arith.constant dense<0.000000e+00> : vector<22x4xf32>
    %48 = tpu.matmul %45, %47, %cst_48 {dimension_numbers = #tpu.dot_dimension_numbers<[1], [0], [0], [1], [0, 0, 1, 1], [], []>} : vector<22x8xbf16>, vector<8x4xbf16>, vector<22x4xf32> -> vector<22x4xf32>
    %49 = arith.addf %43, %48 : vector<22x4xf32>
    %c0_49 = arith.constant 0 : index
    %c0_50 = arith.constant 0 : index
    %c7_51 = arith.constant 7 : index
    %c0_52 = arith.constant 0 : index
    %50 = vector.load %arg1[%c0_49, %c0_50, %c7_51, %c0_52] : memref<1x1x36x8xbf16, #tpu.memory_space<vmem>>, vector<1x1x22x8xbf16>
    %51 = vector.shape_cast %50 : vector<1x1x22x8xbf16> to vector<22x8xbf16>
    %c6_53 = arith.constant 6 : index
    %c0_54 = arith.constant 0 : index
    %c0_55 = arith.constant 0 : index
    %52 = vector.load %arg2[%c6_53, %c0_54, %c0_55] : memref<16x8x4xbf16, #tpu.memory_space<vmem>>, vector<1x8x4xbf16>
    %53 = vector.shape_cast %52 : vector<1x8x4xbf16> to vector<8x4xbf16>
    %cst_56 = arith.constant dense<0.000000e+00> : vector<22x4xf32>
    %54 = tpu.matmul %51, %53, %cst_56 {dimension_numbers = #tpu.dot_dimension_numbers<[1], [0], [0], [1], [0, 0, 1, 1], [], []>} : vector<22x8xbf16>, vector<8x4xbf16>, vector<22x4xf32> -> vector<22x4xf32>
    %55 = arith.addf %49, %54 : vector<22x4xf32>
    %c0_57 = arith.constant 0 : index
    %c0_58 = arith.constant 0 : index
    %c8 = arith.constant 8 : index
    %c0_59 = arith.constant 0 : index
    %56 = vector.load %arg1[%c0_57, %c0_58, %c8, %c0_59] : memref<1x1x36x8xbf16, #tpu.memory_space<vmem>>, vector<1x1x22x8xbf16>
    %57 = vector.shape_cast %56 : vector<1x1x22x8xbf16> to vector<22x8xbf16>
    %c7_60 = arith.constant 7 : index
    %c0_61 = arith.constant 0 : index
    %c0_62 = arith.constant 0 : index
    %58 = vector.load %arg2[%c7_60, %c0_61, %c0_62] : memref<16x8x4xbf16, #tpu.memory_space<vmem>>, vector<1x8x4xbf16>
    %59 = vector.shape_cast %58 : vector<1x8x4xbf16> to vector<8x4xbf16>
    %cst_63 = arith.constant dense<0.000000e+00> : vector<22x4xf32>
    %60 = tpu.matmul %57, %59, %cst_63 {dimension_numbers = #tpu.dot_dimension_numbers<[1], [0], [0], [1], [0, 0, 1, 1], [], []>} : vector<22x8xbf16>, vector<8x4xbf16>, vector<22x4xf32> -> vector<22x4xf32>
    %61 = arith.addf %55, %60 : vector<22x4xf32>
    %62 = vector.broadcast %0 : vector<1x4xf32> to vector<22x4xf32>
    %63 = arith.addf %61, %62 : vector<22x4xf32>
    %cst_64 = arith.constant 0.000000e+00 : f32
    %64 = vector.broadcast %cst_64 : f32 to vector<22x4xf32>
    %65 = arith.cmpf oge, %63, %64 : vector<22x4xf32>
    %cst_65 = arith.constant 1.000000e-01 : f32
    %66 = vector.broadcast %cst_65 : f32 to vector<22x4xf32>
    %67 = arith.mulf %66, %63 : vector<22x4xf32>
    %68 = arith.select %65, %63, %67 : vector<22x4xi1>, vector<22x4xf32>
    %69 = arith.truncf %68 : vector<22x4xf32> to vector<22x4xbf16>
    %c0_66 = arith.constant 0 : index
    %c1_67 = arith.constant 1 : index
    %c0_68 = arith.constant 0 : index
    %c0_69 = arith.constant 0 : index
    %70 = vector.load %arg4[%c0_66, %c1_67, %c0_68, %c0_69] : memref<1x4x22x4xbf16, #tpu.memory_space<vmem>>, vector<1x1x22x4xbf16>
    %71 = vector.shape_cast %70 : vector<1x1x22x4xbf16> to vector<22x4xbf16>
    %72 = vector.shape_cast %69 : vector<22x4xbf16> to vector<1x1x22x4xbf16>
    tpu.vector_store %arg4[%c0_66, %c1_67, %c0_68, %c0_69], %72 {strides = array<i32>} : memref<1x4x22x4xbf16, #tpu.memory_space<vmem>>, vector<1x1x22x4xbf16>,
    %cst_70 = arith.constant 0.000000e+00 : f32
    %73 = vector.broadcast %cst_70 : f32 to vector<22x4xf32>
    %c0_71 = arith.constant 0 : index
    %c0_72 = arith.constant 0 : index
    %c6_73 = arith.constant 6 : index
    %c0_74 = arith.constant 0 : index
    %74 = vector.load %arg1[%c0_71, %c0_72, %c6_73, %c0_74] : memref<1x1x36x8xbf16, #tpu.memory_space<vmem>>, vector<1x1x22x8xbf16>
    %75 = vector.shape_cast %74 : vector<1x1x22x8xbf16> to vector<22x8xbf16>
    %c8_75 = arith.constant 8 : index
    %c0_76 = arith.constant 0 : index
    %c0_77 = arith.constant 0 : index
    %76 = vector.load %arg2[%c8_75, %c0_76, %c0_77] : memref<16x8x4xbf16, #tpu.memory_space<vmem>>, vector<1x8x4xbf16>
    %77 = vector.shape_cast %76 : vector<1x8x4xbf16> to vector<8x4xbf16>
    %cst_78 = arith.constant dense<0.000000e+00> : vector<22x4xf32>
    %78 = tpu.matmul %75, %77, %cst_78 {dimension_numbers = #tpu.dot_dimension_numbers<[1], [0], [0], [1], [0, 0, 1, 1], [], []>} : vector<22x8xbf16>, vector<8x4xbf16>, vector<22x4xf32> -> vector<22x4xf32>
    %79 = arith.addf %73, %78 : vector<22x4xf32>
    %c0_79 = arith.constant 0 : index
    %c0_80 = arith.constant 0 : index
    %c7_81 = arith.constant 7 : index
    %c0_82 = arith.constant 0 : index
    %80 = vector.load %arg1[%c0_79, %c0_80, %c7_81, %c0_82] : memref<1x1x36x8xbf16, #tpu.memory_space<vmem>>, vector<1x1x22x8xbf16>
    %81 = vector.shape_cast %80 : vector<1x1x22x8xbf16> to vector<22x8xbf16>
    %c9 = arith.constant 9 : index
    %c0_83 = arith.constant 0 : index
    %c0_84 = arith.constant 0 : index
    %82 = vector.load %arg2[%c9, %c0_83, %c0_84] : memref<16x8x4xbf16, #tpu.memory_space<vmem>>, vector<1x8x4xbf16>
    %83 = vector.shape_cast %82 : vector<1x8x4xbf16> to vector<8x4xbf16>
    %cst_85 = arith.constant dense<0.000000e+00> : vector<22x4xf32>
    %84 = tpu.matmul %81, %83, %cst_85 {dimension_numbers = #tpu.dot_dimension_numbers<[1], [0], [0], [1], [0, 0, 1, 1], [], []>} : vector<22x8xbf16>, vector<8x4xbf16>, vector<22x4xf32> -> vector<22x4xf32>
    %85 = arith.addf %79, %84 : vector<22x4xf32>
    %c0_86 = arith.constant 0 : index
    %c0_87 = arith.constant 0 : index
    %c12 = arith.constant 12 : index
    %c0_88 = arith.constant 0 : index
    %86 = vector.load %arg1[%c0_86, %c0_87, %c12, %c0_88] : memref<1x1x36x8xbf16, #tpu.memory_space<vmem>>, vector<1x1x22x8xbf16>
    %87 = vector.shape_cast %86 : vector<1x1x22x8xbf16> to vector<22x8xbf16>
    %c10 = arith.constant 10 : index
    %c0_89 = arith.constant 0 : index
    %c0_90 = arith.constant 0 : index
    %88 = vector.load %arg2[%c10, %c0_89, %c0_90] : memref<16x8x4xbf16, #tpu.memory_space<vmem>>, vector<1x8x4xbf16>
    %89 = vector.shape_cast %88 : vector<1x8x4xbf16> to vector<8x4xbf16>
    %cst_91 = arith.constant dense<0.000000e+00> : vector<22x4xf32>
    %90 = tpu.matmul %87, %89, %cst_91 {dimension_numbers = #tpu.dot_dimension_numbers<[1], [0], [0], [1], [0, 0, 1, 1], [], []>} : vector<22x8xbf16>, vector<8x4xbf16>, vector<22x4xf32> -> vector<22x4xf32>
    %91 = arith.addf %85, %90 : vector<22x4xf32>
    %c0_92 = arith.constant 0 : index
    %c0_93 = arith.constant 0 : index
    %c13 = arith.constant 13 : index
    %c0_94 = arith.constant 0 : index
    %92 = vector.load %arg1[%c0_92, %c0_93, %c13, %c0_94] : memref<1x1x36x8xbf16, #tpu.memory_space<vmem>>, vector<1x1x22x8xbf16>
    %93 = vector.shape_cast %92 : vector<1x1x22x8xbf16> to vector<22x8xbf16>
    %c11 = arith.constant 11 : index
    %c0_95 = arith.constant 0 : index
    %c0_96 = arith.constant 0 : index
    %94 = vector.load %arg2[%c11, %c0_95, %c0_96] : memref<16x8x4xbf16, #tpu.memory_space<vmem>>, vector<1x8x4xbf16>
    %95 = vector.shape_cast %94 : vector<1x8x4xbf16> to vector<8x4xbf16>
    %cst_97 = arith.constant dense<0.000000e+00> : vector<22x4xf32>
    %96 = tpu.matmul %93, %95, %cst_97 {dimension_numbers = #tpu.dot_dimension_numbers<[1], [0], [0], [1], [0, 0, 1, 1], [], []>} : vector<22x8xbf16>, vector<8x4xbf16>, vector<22x4xf32> -> vector<22x4xf32>
    %97 = arith.addf %91, %96 : vector<22x4xf32>
    %98 = vector.broadcast %0 : vector<1x4xf32> to vector<22x4xf32>
    %99 = arith.addf %97, %98 : vector<22x4xf32>
    %cst_98 = arith.constant 0.000000e+00 : f32
    %100 = vector.broadcast %cst_98 : f32 to vector<22x4xf32>
    %101 = arith.cmpf oge, %99, %100 : vector<22x4xf32>
    %cst_99 = arith.constant 1.000000e-01 : f32
    %102 = vector.broadcast %cst_99 : f32 to vector<22x4xf32>
    %103 = arith.mulf %102, %99 : vector<22x4xf32>
    %104 = arith.select %101, %99, %103 : vector<22x4xi1>, vector<22x4xf32>
    %105 = arith.truncf %104 : vector<22x4xf32> to vector<22x4xbf16>
    %c0_100 = arith.constant 0 : index
    %c2_101 = arith.constant 2 : index
    %c0_102 = arith.constant 0 : index
    %c0_103 = arith.constant 0 : index
    %106 = vector.load %arg4[%c0_100, %c2_101, %c0_102, %c0_103] : memref<1x4x22x4xbf16, #tpu.memory_space<vmem>>, vector<1x1x22x4xbf16>
    %107 = vector.shape_cast %106 : vector<1x1x22x4xbf16> to vector<22x4xbf16>
    %108 = vector.shape_cast %105 : vector<22x4xbf16> to vector<1x1x22x4xbf16>
    tpu.vector_store %arg4[%c0_100, %c2_101, %c0_102, %c0_103], %108 {strides = array<i32>} : memref<1x4x22x4xbf16, #tpu.memory_space<vmem>>, vector<1x1x22x4xbf16>,
    %cst_104 = arith.constant 0.000000e+00 : f32
    %109 = vector.broadcast %cst_104 : f32 to vector<22x4xf32>
    %c0_105 = arith.constant 0 : index
    %c0_106 = arith.constant 0 : index
    %c7_107 = arith.constant 7 : index
    %c0_108 = arith.constant 0 : index
    %110 = vector.load %arg1[%c0_105, %c0_106, %c7_107, %c0_108] : memref<1x1x36x8xbf16, #tpu.memory_space<vmem>>, vector<1x1x22x8xbf16>
    %111 = vector.shape_cast %110 : vector<1x1x22x8xbf16> to vector<22x8xbf16>
    %c12_109 = arith.constant 12 : index
    %c0_110 = arith.constant 0 : index
    %c0_111 = arith.constant 0 : index
    %112 = vector.load %arg2[%c12_109, %c0_110, %c0_111] : memref<16x8x4xbf16, #tpu.memory_space<vmem>>, vector<1x8x4xbf16>
    %113 = vector.shape_cast %112 : vector<1x8x4xbf16> to vector<8x4xbf16>
    %cst_112 = arith.constant dense<0.000000e+00> : vector<22x4xf32>
    %114 = tpu.matmul %111, %113, %cst_112 {dimension_numbers = #tpu.dot_dimension_numbers<[1], [0], [0], [1], [0, 0, 1, 1], [], []>} : vector<22x8xbf16>, vector<8x4xbf16>, vector<22x4xf32> -> vector<22x4xf32>
    %115 = arith.addf %109, %114 : vector<22x4xf32>
    %c0_113 = arith.constant 0 : index
    %c0_114 = arith.constant 0 : index
    %c8_115 = arith.constant 8 : index
    %c0_116 = arith.constant 0 : index
    %116 = vector.load %arg1[%c0_113, %c0_114, %c8_115, %c0_116] : memref<1x1x36x8xbf16, #tpu.memory_space<vmem>>, vector<1x1x22x8xbf16>
    %117 = vector.shape_cast %116 : vector<1x1x22x8xbf16> to vector<22x8xbf16>
    %c13_117 = arith.constant 13 : index
    %c0_118 = arith.constant 0 : index
    %c0_119 = arith.constant 0 : index
    %118 = vector.load %arg2[%c13_117, %c0_118, %c0_119] : memref<16x8x4xbf16, #tpu.memory_space<vmem>>, vector<1x8x4xbf16>
    %119 = vector.shape_cast %118 : vector<1x8x4xbf16> to vector<8x4xbf16>
    %cst_120 = arith.constant dense<0.000000e+00> : vector<22x4xf32>
    %120 = tpu.matmul %117, %119, %cst_120 {dimension_numbers = #tpu.dot_dimension_numbers<[1], [0], [0], [1], [0, 0, 1, 1], [], []>} : vector<22x8xbf16>, vector<8x4xbf16>, vector<22x4xf32> -> vector<22x4xf32>
    %121 = arith.addf %115, %120 : vector<22x4xf32>
    %c0_121 = arith.constant 0 : index
    %c0_122 = arith.constant 0 : index
    %c13_123 = arith.constant 13 : index
    %c0_124 = arith.constant 0 : index
    %122 = vector.load %arg1[%c0_121, %c0_122, %c13_123, %c0_124] : memref<1x1x36x8xbf16, #tpu.memory_space<vmem>>, vector<1x1x22x8xbf16>
    %123 = vector.shape_cast %122 : vector<1x1x22x8xbf16> to vector<22x8xbf16>
    %c14 = arith.constant 14 : index
    %c0_125 = arith.constant 0 : index
    %c0_126 = arith.constant 0 : index
    %124 = vector.load %arg2[%c14, %c0_125, %c0_126] : memref<16x8x4xbf16, #tpu.memory_space<vmem>>, vector<1x8x4xbf16>
    %125 = vector.shape_cast %124 : vector<1x8x4xbf16> to vector<8x4xbf16>
    %cst_127 = arith.constant dense<0.000000e+00> : vector<22x4xf32>
    %126 = tpu.matmul %123, %125, %cst_127 {dimension_numbers = #tpu.dot_dimension_numbers<[1], [0], [0], [1], [0, 0, 1, 1], [], []>} : vector<22x8xbf16>, vector<8x4xbf16>, vector<22x4xf32> -> vector<22x4xf32>
    %127 = arith.addf %121, %126 : vector<22x4xf32>
    %c0_128 = arith.constant 0 : index
    %c0_129 = arith.constant 0 : index
    %c14_130 = arith.constant 14 : index
    %c0_131 = arith.constant 0 : index
    %128 = vector.load %arg1[%c0_128, %c0_129, %c14_130, %c0_131] : memref<1x1x36x8xbf16, #tpu.memory_space<vmem>>, vector<1x1x22x8xbf16>
    %129 = vector.shape_cast %128 : vector<1x1x22x8xbf16> to vector<22x8xbf16>
    %c15 = arith.constant 15 : index
    %c0_132 = arith.constant 0 : index
    %c0_133 = arith.constant 0 : index
    %130 = vector.load %arg2[%c15, %c0_132, %c0_133] : memref<16x8x4xbf16, #tpu.memory_space<vmem>>, vector<1x8x4xbf16>
    %131 = vector.shape_cast %130 : vector<1x8x4xbf16> to vector<8x4xbf16>
    %cst_134 = arith.constant dense<0.000000e+00> : vector<22x4xf32>
    %132 = tpu.matmul %129, %131, %cst_134 {dimension_numbers = #tpu.dot_dimension_numbers<[1], [0], [0], [1], [0, 0, 1, 1], [], []>} : vector<22x8xbf16>, vector<8x4xbf16>, vector<22x4xf32> -> vector<22x4xf32>
    %133 = arith.addf %127, %132 : vector<22x4xf32>
    %134 = vector.broadcast %0 : vector<1x4xf32> to vector<22x4xf32>
    %135 = arith.addf %133, %134 : vector<22x4xf32>
    %cst_135 = arith.constant 0.000000e+00 : f32
    %136 = vector.broadcast %cst_135 : f32 to vector<22x4xf32>
    %137 = arith.cmpf oge, %135, %136 : vector<22x4xf32>
    %cst_136 = arith.constant 1.000000e-01 : f32
    %138 = vector.broadcast %cst_136 : f32 to vector<22x4xf32>
    %139 = arith.mulf %138, %135 : vector<22x4xf32>
    %140 = arith.select %137, %135, %139 : vector<22x4xi1>, vector<22x4xf32>
    %141 = arith.truncf %140 : vector<22x4xf32> to vector<22x4xbf16>
    %c0_137 = arith.constant 0 : index
    %c3_138 = arith.constant 3 : index
    %c0_139 = arith.constant 0 : index
    %c0_140 = arith.constant 0 : index
    %142 = vector.load %arg4[%c0_137, %c3_138, %c0_139, %c0_140] : memref<1x4x22x4xbf16, #tpu.memory_space<vmem>>, vector<1x1x22x4xbf16>
    %143 = vector.shape_cast %142 : vector<1x1x22x4xbf16> to vector<22x4xbf16>
    %144 = vector.shape_cast %141 : vector<22x4xbf16> to vector<1x1x22x4xbf16>
    tpu.vector_store %arg4[%c0_137, %c3_138, %c0_139, %c0_140], %144 {strides = array<i32>} : memref<1x4x22x4xbf16, #tpu.memory_space<vmem>>, vector<1x1x22x4xbf16>,
    return
  }
  func.func @transform_0(%arg0: i32) -> (i32, i32, i32, i32) {
    %c0_i32 = arith.constant 0 : i32
    %c0_i32_0 = arith.constant 0 : i32
    %c0_i32_1 = arith.constant 0 : i32
    %c0_i32_2 = arith.constant 0 : i32
    return %arg0, %c0_i32, %c0_i32_0, %c0_i32_1 : i32, i32, i32, i32
  }
  func.func @transform_1(%arg0: i32) -> (i32, i32, i32) {
    %c0_i32 = arith.constant 0 : i32
    %c0_i32_0 = arith.constant 0 : i32
    %c0_i32_1 = arith.constant 0 : i32
    %c0_i32_2 = arith.constant 0 : i32
    return %c0_i32, %c0_i32_0, %c0_i32_1 : i32, i32, i32
  }
  func.func @transform_2(%arg0: i32) -> (i32, i32) {
    %c0_i32 = arith.constant 0 : i32
    %c0_i32_0 = arith.constant 0 : i32
    %c0_i32_1 = arith.constant 0 : i32
    return %c0_i32, %c0_i32_0 : i32, i32
  }
  func.func @transform_3(%arg0: i32) -> (i32, i32, i32, i32) {
    %c0_i32 = arith.constant 0 : i32
    %c0_i32_0 = arith.constant 0 : i32
    %c0_i32_1 = arith.constant 0 : i32
    %c0_i32_2 = arith.constant 0 : i32
    return %arg0, %c0_i32, %c0_i32_0, %c0_i32_1 : i32, i32, i32, i32
  }
}

module attributes {stable_mosaic.version = 11 : i64} {
  func.func @_up_kernel(%arg0: i32, %arg1: memref<1x1x100x8xbf16, #tpu.memory_space<vmem>>, %arg2: memref<16x8x4xbf16, #tpu.memory_space<vmem>>, %arg3: memref<1x4xf32, #tpu.memory_space<vmem>>, %arg4: memref<1x4x78x4xbf16, #tpu.memory_space<vmem>>) attributes {dimension_semantics = [#tpu.dimension_semantics<parallel>], iteration_bounds = array<i64: 2>, scalar_prefetch = 0 : i64, scratch_operands = 0 : i64, tpu.core_type = #tpu.core_type<tc>, window_params = [{transform_indices = @transform_0, window_bounds = array<i64: 1, 1, 100, 8>}, {pipeline_mode = #tpu.pipeline_mode<synchronous>, transform_indices = @transform_1, window_bounds = array<i64: 16, 8, 4>}, {pipeline_mode = #tpu.pipeline_mode<synchronous>, transform_indices = @transform_2, window_bounds = array<i64: 1, 4>}, {transform_indices = @transform_3, window_bounds = array<i64: 1, 4, 78, 4>}]} {
    %c0 = arith.constant 0 : index
    %c0_0 = arith.constant 0 : index
    %0 = vector.load %arg3[%c0, %c0_0] : memref<1x4xf32, #tpu.memory_space<vmem>>, vector<1x4xf32>
    %cst = arith.constant 0.000000e+00 : f32
    %1 = vector.broadcast %cst : f32 to vector<78x4xf32>
    %c0_1 = arith.constant 0 : index
    %c0_2 = arith.constant 0 : index
    %c0_3 = arith.constant 0 : index
    %c0_4 = arith.constant 0 : index
    %2 = vector.load %arg1[%c0_1, %c0_2, %c0_3, %c0_4] : memref<1x1x100x8xbf16, #tpu.memory_space<vmem>>, vector<1x1x78x8xbf16>
    %3 = vector.shape_cast %2 : vector<1x1x78x8xbf16> to vector<78x8xbf16>
    %c0_5 = arith.constant 0 : index
    %c0_6 = arith.constant 0 : index
    %c0_7 = arith.constant 0 : index
    %4 = vector.load %arg2[%c0_5, %c0_6, %c0_7] : memref<16x8x4xbf16, #tpu.memory_space<vmem>>, vector<1x8x4xbf16>
    %5 = vector.shape_cast %4 : vector<1x8x4xbf16> to vector<8x4xbf16>
    %cst_8 = arith.constant dense<0.000000e+00> : vector<78x4xf32>
    %6 = tpu.matmul %3, %5, %cst_8 {dimension_numbers = #tpu.dot_dimension_numbers<[1], [0], [0], [1], [0, 0, 1, 1], [], []>} : vector<78x8xbf16>, vector<8x4xbf16>, vector<78x4xf32> -> vector<78x4xf32>
    %7 = arith.addf %1, %6 : vector<78x4xf32>
    %c0_9 = arith.constant 0 : index
    %c0_10 = arith.constant 0 : index
    %c1 = arith.constant 1 : index
    %c0_11 = arith.constant 0 : index
    %8 = vector.load %arg1[%c0_9, %c0_10, %c1, %c0_11] : memref<1x1x100x8xbf16, #tpu.memory_space<vmem>>, vector<1x1x78x8xbf16>
    %9 = vector.shape_cast %8 : vector<1x1x78x8xbf16> to vector<78x8xbf16>
    %c1_12 = arith.constant 1 : index
    %c0_13 = arith.constant 0 : index
    %c0_14 = arith.constant 0 : index
    %10 = vector.load %arg2[%c1_12, %c0_13, %c0_14] : memref<16x8x4xbf16, #tpu.memory_space<vmem>>, vector<1x8x4xbf16>
    %11 = vector.shape_cast %10 : vector<1x8x4xbf16> to vector<8x4xbf16>
    %cst_15 = arith.constant dense<0.000000e+00> : vector<78x4xf32>
    %12 = tpu.matmul %9, %11, %cst_15 {dimension_numbers = #tpu.dot_dimension_numbers<[1], [0], [0], [1], [0, 0, 1, 1], [], []>} : vector<78x8xbf16>, vector<8x4xbf16>, vector<78x4xf32> -> vector<78x4xf32>
    %13 = arith.addf %7, %12 : vector<78x4xf32>
    %c0_16 = arith.constant 0 : index
    %c0_17 = arith.constant 0 : index
    %c10 = arith.constant 10 : index
    %c0_18 = arith.constant 0 : index
    %14 = vector.load %arg1[%c0_16, %c0_17, %c10, %c0_18] : memref<1x1x100x8xbf16, #tpu.memory_space<vmem>>, vector<1x1x78x8xbf16>
    %15 = vector.shape_cast %14 : vector<1x1x78x8xbf16> to vector<78x8xbf16>
    %c2 = arith.constant 2 : index
    %c0_19 = arith.constant 0 : index
    %c0_20 = arith.constant 0 : index
    %16 = vector.load %arg2[%c2, %c0_19, %c0_20] : memref<16x8x4xbf16, #tpu.memory_space<vmem>>, vector<1x8x4xbf16>
    %17 = vector.shape_cast %16 : vector<1x8x4xbf16> to vector<8x4xbf16>
    %cst_21 = arith.constant dense<0.000000e+00> : vector<78x4xf32>
    %18 = tpu.matmul %15, %17, %cst_21 {dimension_numbers = #tpu.dot_dimension_numbers<[1], [0], [0], [1], [0, 0, 1, 1], [], []>} : vector<78x8xbf16>, vector<8x4xbf16>, vector<78x4xf32> -> vector<78x4xf32>
    %19 = arith.addf %13, %18 : vector<78x4xf32>
    %c0_22 = arith.constant 0 : index
    %c0_23 = arith.constant 0 : index
    %c11 = arith.constant 11 : index
    %c0_24 = arith.constant 0 : index
    %20 = vector.load %arg1[%c0_22, %c0_23, %c11, %c0_24] : memref<1x1x100x8xbf16, #tpu.memory_space<vmem>>, vector<1x1x78x8xbf16>
    %21 = vector.shape_cast %20 : vector<1x1x78x8xbf16> to vector<78x8xbf16>
    %c3 = arith.constant 3 : index
    %c0_25 = arith.constant 0 : index
    %c0_26 = arith.constant 0 : index
    %22 = vector.load %arg2[%c3, %c0_25, %c0_26] : memref<16x8x4xbf16, #tpu.memory_space<vmem>>, vector<1x8x4xbf16>
    %23 = vector.shape_cast %22 : vector<1x8x4xbf16> to vector<8x4xbf16>
    %cst_27 = arith.constant dense<0.000000e+00> : vector<78x4xf32>
    %24 = tpu.matmul %21, %23, %cst_27 {dimension_numbers = #tpu.dot_dimension_numbers<[1], [0], [0], [1], [0, 0, 1, 1], [], []>} : vector<78x8xbf16>, vector<8x4xbf16>, vector<78x4xf32> -> vector<78x4xf32>
    %25 = arith.addf %19, %24 : vector<78x4xf32>
    %26 = vector.broadcast %0 : vector<1x4xf32> to vector<78x4xf32>
    %27 = arith.addf %25, %26 : vector<78x4xf32>
    %cst_28 = arith.constant 0.000000e+00 : f32
    %28 = vector.broadcast %cst_28 : f32 to vector<78x4xf32>
    %29 = arith.cmpf oge, %27, %28 : vector<78x4xf32>
    %cst_29 = arith.constant 1.000000e-01 : f32
    %30 = vector.broadcast %cst_29 : f32 to vector<78x4xf32>
    %31 = arith.mulf %30, %27 : vector<78x4xf32>
    %32 = arith.select %29, %27, %31 : vector<78x4xi1>, vector<78x4xf32>
    %33 = arith.truncf %32 : vector<78x4xf32> to vector<78x4xbf16>
    %c0_30 = arith.constant 0 : index
    %c0_31 = arith.constant 0 : index
    %c0_32 = arith.constant 0 : index
    %c0_33 = arith.constant 0 : index
    %34 = vector.load %arg4[%c0_30, %c0_31, %c0_32, %c0_33] : memref<1x4x78x4xbf16, #tpu.memory_space<vmem>>, vector<1x1x78x4xbf16>
    %35 = vector.shape_cast %34 : vector<1x1x78x4xbf16> to vector<78x4xbf16>
    %36 = vector.shape_cast %33 : vector<78x4xbf16> to vector<1x1x78x4xbf16>
    tpu.vector_store %arg4[%c0_30, %c0_31, %c0_32, %c0_33], %36 {strides = array<i32>} : memref<1x4x78x4xbf16, #tpu.memory_space<vmem>>, vector<1x1x78x4xbf16>,
    %cst_34 = arith.constant 0.000000e+00 : f32
    %37 = vector.broadcast %cst_34 : f32 to vector<78x4xf32>
    %c0_35 = arith.constant 0 : index
    %c0_36 = arith.constant 0 : index
    %c1_37 = arith.constant 1 : index
    %c0_38 = arith.constant 0 : index
    %38 = vector.load %arg1[%c0_35, %c0_36, %c1_37, %c0_38] : memref<1x1x100x8xbf16, #tpu.memory_space<vmem>>, vector<1x1x78x8xbf16>
    %39 = vector.shape_cast %38 : vector<1x1x78x8xbf16> to vector<78x8xbf16>
    %c4 = arith.constant 4 : index
    %c0_39 = arith.constant 0 : index
    %c0_40 = arith.constant 0 : index
    %40 = vector.load %arg2[%c4, %c0_39, %c0_40] : memref<16x8x4xbf16, #tpu.memory_space<vmem>>, vector<1x8x4xbf16>
    %41 = vector.shape_cast %40 : vector<1x8x4xbf16> to vector<8x4xbf16>
    %cst_41 = arith.constant dense<0.000000e+00> : vector<78x4xf32>
    %42 = tpu.matmul %39, %41, %cst_41 {dimension_numbers = #tpu.dot_dimension_numbers<[1], [0], [0], [1], [0, 0, 1, 1], [], []>} : vector<78x8xbf16>, vector<8x4xbf16>, vector<78x4xf32> -> vector<78x4xf32>
    %43 = arith.addf %37, %42 : vector<78x4xf32>
    %c0_42 = arith.constant 0 : index
    %c0_43 = arith.constant 0 : index
    %c2_44 = arith.constant 2 : index
    %c0_45 = arith.constant 0 : index
    %44 = vector.load %arg1[%c0_42, %c0_43, %c2_44, %c0_45] : memref<1x1x100x8xbf16, #tpu.memory_space<vmem>>, vector<1x1x78x8xbf16>
    %45 = vector.shape_cast %44 : vector<1x1x78x8xbf16> to vector<78x8xbf16>
    %c5 = arith.constant 5 : index
    %c0_46 = arith.constant 0 : index
    %c0_47 = arith.constant 0 : index
    %46 = vector.load %arg2[%c5, %c0_46, %c0_47] : memref<16x8x4xbf16, #tpu.memory_space<vmem>>, vector<1x8x4xbf16>
    %47 = vector.shape_cast %46 : vector<1x8x4xbf16> to vector<8x4xbf16>
    %cst_48 = arith.constant dense<0.000000e+00> : vector<78x4xf32>
    %48 = tpu.matmul %45, %47, %cst_48 {dimension_numbers = #tpu.dot_dimension_numbers<[1], [0], [0], [1], [0, 0, 1, 1], [], []>} : vector<78x8xbf16>, vector<8x4xbf16>, vector<78x4xf32> -> vector<78x4xf32>
    %49 = arith.addf %43, %48 : vector<78x4xf32>
    %c0_49 = arith.constant 0 : index
    %c0_50 = arith.constant 0 : index
    %c11_51 = arith.constant 11 : index
    %c0_52 = arith.constant 0 : index
    %50 = vector.load %arg1[%c0_49, %c0_50, %c11_51, %c0_52] : memref<1x1x100x8xbf16, #tpu.memory_space<vmem>>, vector<1x1x78x8xbf16>
    %51 = vector.shape_cast %50 : vector<1x1x78x8xbf16> to vector<78x8xbf16>
    %c6 = arith.constant 6 : index
    %c0_53 = arith.constant 0 : index
    %c0_54 = arith.constant 0 : index
    %52 = vector.load %arg2[%c6, %c0_53, %c0_54] : memref<16x8x4xbf16, #tpu.memory_space<vmem>>, vector<1x8x4xbf16>
    %53 = vector.shape_cast %52 : vector<1x8x4xbf16> to vector<8x4xbf16>
    %cst_55 = arith.constant dense<0.000000e+00> : vector<78x4xf32>
    %54 = tpu.matmul %51, %53, %cst_55 {dimension_numbers = #tpu.dot_dimension_numbers<[1], [0], [0], [1], [0, 0, 1, 1], [], []>} : vector<78x8xbf16>, vector<8x4xbf16>, vector<78x4xf32> -> vector<78x4xf32>
    %55 = arith.addf %49, %54 : vector<78x4xf32>
    %c0_56 = arith.constant 0 : index
    %c0_57 = arith.constant 0 : index
    %c12 = arith.constant 12 : index
    %c0_58 = arith.constant 0 : index
    %56 = vector.load %arg1[%c0_56, %c0_57, %c12, %c0_58] : memref<1x1x100x8xbf16, #tpu.memory_space<vmem>>, vector<1x1x78x8xbf16>
    %57 = vector.shape_cast %56 : vector<1x1x78x8xbf16> to vector<78x8xbf16>
    %c7 = arith.constant 7 : index
    %c0_59 = arith.constant 0 : index
    %c0_60 = arith.constant 0 : index
    %58 = vector.load %arg2[%c7, %c0_59, %c0_60] : memref<16x8x4xbf16, #tpu.memory_space<vmem>>, vector<1x8x4xbf16>
    %59 = vector.shape_cast %58 : vector<1x8x4xbf16> to vector<8x4xbf16>
    %cst_61 = arith.constant dense<0.000000e+00> : vector<78x4xf32>
    %60 = tpu.matmul %57, %59, %cst_61 {dimension_numbers = #tpu.dot_dimension_numbers<[1], [0], [0], [1], [0, 0, 1, 1], [], []>} : vector<78x8xbf16>, vector<8x4xbf16>, vector<78x4xf32> -> vector<78x4xf32>
    %61 = arith.addf %55, %60 : vector<78x4xf32>
    %62 = vector.broadcast %0 : vector<1x4xf32> to vector<78x4xf32>
    %63 = arith.addf %61, %62 : vector<78x4xf32>
    %cst_62 = arith.constant 0.000000e+00 : f32
    %64 = vector.broadcast %cst_62 : f32 to vector<78x4xf32>
    %65 = arith.cmpf oge, %63, %64 : vector<78x4xf32>
    %cst_63 = arith.constant 1.000000e-01 : f32
    %66 = vector.broadcast %cst_63 : f32 to vector<78x4xf32>
    %67 = arith.mulf %66, %63 : vector<78x4xf32>
    %68 = arith.select %65, %63, %67 : vector<78x4xi1>, vector<78x4xf32>
    %69 = arith.truncf %68 : vector<78x4xf32> to vector<78x4xbf16>
    %c0_64 = arith.constant 0 : index
    %c1_65 = arith.constant 1 : index
    %c0_66 = arith.constant 0 : index
    %c0_67 = arith.constant 0 : index
    %70 = vector.load %arg4[%c0_64, %c1_65, %c0_66, %c0_67] : memref<1x4x78x4xbf16, #tpu.memory_space<vmem>>, vector<1x1x78x4xbf16>
    %71 = vector.shape_cast %70 : vector<1x1x78x4xbf16> to vector<78x4xbf16>
    %72 = vector.shape_cast %69 : vector<78x4xbf16> to vector<1x1x78x4xbf16>
    tpu.vector_store %arg4[%c0_64, %c1_65, %c0_66, %c0_67], %72 {strides = array<i32>} : memref<1x4x78x4xbf16, #tpu.memory_space<vmem>>, vector<1x1x78x4xbf16>,
    %cst_68 = arith.constant 0.000000e+00 : f32
    %73 = vector.broadcast %cst_68 : f32 to vector<78x4xf32>
    %c0_69 = arith.constant 0 : index
    %c0_70 = arith.constant 0 : index
    %c10_71 = arith.constant 10 : index
    %c0_72 = arith.constant 0 : index
    %74 = vector.load %arg1[%c0_69, %c0_70, %c10_71, %c0_72] : memref<1x1x100x8xbf16, #tpu.memory_space<vmem>>, vector<1x1x78x8xbf16>
    %75 = vector.shape_cast %74 : vector<1x1x78x8xbf16> to vector<78x8xbf16>
    %c8 = arith.constant 8 : index
    %c0_73 = arith.constant 0 : index
    %c0_74 = arith.constant 0 : index
    %76 = vector.load %arg2[%c8, %c0_73, %c0_74] : memref<16x8x4xbf16, #tpu.memory_space<vmem>>, vector<1x8x4xbf16>
    %77 = vector.shape_cast %76 : vector<1x8x4xbf16> to vector<8x4xbf16>
    %cst_75 = arith.constant dense<0.000000e+00> : vector<78x4xf32>
    %78 = tpu.matmul %75, %77, %cst_75 {dimension_numbers = #tpu.dot_dimension_numbers<[1], [0], [0], [1], [0, 0, 1, 1], [], []>} : vector<78x8xbf16>, vector<8x4xbf16>, vector<78x4xf32> -> vector<78x4xf32>
    %79 = arith.addf %73, %78 : vector<78x4xf32>
    %c0_76 = arith.constant 0 : index
    %c0_77 = arith.constant 0 : index
    %c11_78 = arith.constant 11 : index
    %c0_79 = arith.constant 0 : index
    %80 = vector.load %arg1[%c0_76, %c0_77, %c11_78, %c0_79] : memref<1x1x100x8xbf16, #tpu.memory_space<vmem>>, vector<1x1x78x8xbf16>
    %81 = vector.shape_cast %80 : vector<1x1x78x8xbf16> to vector<78x8xbf16>
    %c9 = arith.constant 9 : index
    %c0_80 = arith.constant 0 : index
    %c0_81 = arith.constant 0 : index
    %82 = vector.load %arg2[%c9, %c0_80, %c0_81] : memref<16x8x4xbf16, #tpu.memory_space<vmem>>, vector<1x8x4xbf16>
    %83 = vector.shape_cast %82 : vector<1x8x4xbf16> to vector<8x4xbf16>
    %cst_82 = arith.constant dense<0.000000e+00> : vector<78x4xf32>
    %84 = tpu.matmul %81, %83, %cst_82 {dimension_numbers = #tpu.dot_dimension_numbers<[1], [0], [0], [1], [0, 0, 1, 1], [], []>} : vector<78x8xbf16>, vector<8x4xbf16>, vector<78x4xf32> -> vector<78x4xf32>
    %85 = arith.addf %79, %84 : vector<78x4xf32>
    %c0_83 = arith.constant 0 : index
    %c0_84 = arith.constant 0 : index
    %c20 = arith.constant 20 : index
    %c0_85 = arith.constant 0 : index
    %86 = vector.load %arg1[%c0_83, %c0_84, %c20, %c0_85] : memref<1x1x100x8xbf16, #tpu.memory_space<vmem>>, vector<1x1x78x8xbf16>
    %87 = vector.shape_cast %86 : vector<1x1x78x8xbf16> to vector<78x8xbf16>
    %c10_86 = arith.constant 10 : index
    %c0_87 = arith.constant 0 : index
    %c0_88 = arith.constant 0 : index
    %88 = vector.load %arg2[%c10_86, %c0_87, %c0_88] : memref<16x8x4xbf16, #tpu.memory_space<vmem>>, vector<1x8x4xbf16>
    %89 = vector.shape_cast %88 : vector<1x8x4xbf16> to vector<8x4xbf16>
    %cst_89 = arith.constant dense<0.000000e+00> : vector<78x4xf32>
    %90 = tpu.matmul %87, %89, %cst_89 {dimension_numbers = #tpu.dot_dimension_numbers<[1], [0], [0], [1], [0, 0, 1, 1], [], []>} : vector<78x8xbf16>, vector<8x4xbf16>, vector<78x4xf32> -> vector<78x4xf32>
    %91 = arith.addf %85, %90 : vector<78x4xf32>
    %c0_90 = arith.constant 0 : index
    %c0_91 = arith.constant 0 : index
    %c21 = arith.constant 21 : index
    %c0_92 = arith.constant 0 : index
    %92 = vector.load %arg1[%c0_90, %c0_91, %c21, %c0_92] : memref<1x1x100x8xbf16, #tpu.memory_space<vmem>>, vector<1x1x78x8xbf16>
    %93 = vector.shape_cast %92 : vector<1x1x78x8xbf16> to vector<78x8xbf16>
    %c11_93 = arith.constant 11 : index
    %c0_94 = arith.constant 0 : index
    %c0_95 = arith.constant 0 : index
    %94 = vector.load %arg2[%c11_93, %c0_94, %c0_95] : memref<16x8x4xbf16, #tpu.memory_space<vmem>>, vector<1x8x4xbf16>
    %95 = vector.shape_cast %94 : vector<1x8x4xbf16> to vector<8x4xbf16>
    %cst_96 = arith.constant dense<0.000000e+00> : vector<78x4xf32>
    %96 = tpu.matmul %93, %95, %cst_96 {dimension_numbers = #tpu.dot_dimension_numbers<[1], [0], [0], [1], [0, 0, 1, 1], [], []>} : vector<78x8xbf16>, vector<8x4xbf16>, vector<78x4xf32> -> vector<78x4xf32>
    %97 = arith.addf %91, %96 : vector<78x4xf32>
    %98 = vector.broadcast %0 : vector<1x4xf32> to vector<78x4xf32>
    %99 = arith.addf %97, %98 : vector<78x4xf32>
    %cst_97 = arith.constant 0.000000e+00 : f32
    %100 = vector.broadcast %cst_97 : f32 to vector<78x4xf32>
    %101 = arith.cmpf oge, %99, %100 : vector<78x4xf32>
    %cst_98 = arith.constant 1.000000e-01 : f32
    %102 = vector.broadcast %cst_98 : f32 to vector<78x4xf32>
    %103 = arith.mulf %102, %99 : vector<78x4xf32>
    %104 = arith.select %101, %99, %103 : vector<78x4xi1>, vector<78x4xf32>
    %105 = arith.truncf %104 : vector<78x4xf32> to vector<78x4xbf16>
    %c0_99 = arith.constant 0 : index
    %c2_100 = arith.constant 2 : index
    %c0_101 = arith.constant 0 : index
    %c0_102 = arith.constant 0 : index
    %106 = vector.load %arg4[%c0_99, %c2_100, %c0_101, %c0_102] : memref<1x4x78x4xbf16, #tpu.memory_space<vmem>>, vector<1x1x78x4xbf16>
    %107 = vector.shape_cast %106 : vector<1x1x78x4xbf16> to vector<78x4xbf16>
    %108 = vector.shape_cast %105 : vector<78x4xbf16> to vector<1x1x78x4xbf16>
    tpu.vector_store %arg4[%c0_99, %c2_100, %c0_101, %c0_102], %108 {strides = array<i32>} : memref<1x4x78x4xbf16, #tpu.memory_space<vmem>>, vector<1x1x78x4xbf16>,
    %cst_103 = arith.constant 0.000000e+00 : f32
    %109 = vector.broadcast %cst_103 : f32 to vector<78x4xf32>
    %c0_104 = arith.constant 0 : index
    %c0_105 = arith.constant 0 : index
    %c11_106 = arith.constant 11 : index
    %c0_107 = arith.constant 0 : index
    %110 = vector.load %arg1[%c0_104, %c0_105, %c11_106, %c0_107] : memref<1x1x100x8xbf16, #tpu.memory_space<vmem>>, vector<1x1x78x8xbf16>
    %111 = vector.shape_cast %110 : vector<1x1x78x8xbf16> to vector<78x8xbf16>
    %c12_108 = arith.constant 12 : index
    %c0_109 = arith.constant 0 : index
    %c0_110 = arith.constant 0 : index
    %112 = vector.load %arg2[%c12_108, %c0_109, %c0_110] : memref<16x8x4xbf16, #tpu.memory_space<vmem>>, vector<1x8x4xbf16>
    %113 = vector.shape_cast %112 : vector<1x8x4xbf16> to vector<8x4xbf16>
    %cst_111 = arith.constant dense<0.000000e+00> : vector<78x4xf32>
    %114 = tpu.matmul %111, %113, %cst_111 {dimension_numbers = #tpu.dot_dimension_numbers<[1], [0], [0], [1], [0, 0, 1, 1], [], []>} : vector<78x8xbf16>, vector<8x4xbf16>, vector<78x4xf32> -> vector<78x4xf32>
    %115 = arith.addf %109, %114 : vector<78x4xf32>
    %c0_112 = arith.constant 0 : index
    %c0_113 = arith.constant 0 : index
    %c12_114 = arith.constant 12 : index
    %c0_115 = arith.constant 0 : index
    %116 = vector.load %arg1[%c0_112, %c0_113, %c12_114, %c0_115] : memref<1x1x100x8xbf16, #tpu.memory_space<vmem>>, vector<1x1x78x8xbf16>
    %117 = vector.shape_cast %116 : vector<1x1x78x8xbf16> to vector<78x8xbf16>
    %c13 = arith.constant 13 : index
    %c0_116 = arith.constant 0 : index
    %c0_117 = arith.constant 0 : index
    %118 = vector.load %arg2[%c13, %c0_116, %c0_117] : memref<16x8x4xbf16, #tpu.memory_space<vmem>>, vector<1x8x4xbf16>
    %119 = vector.shape_cast %118 : vector<1x8x4xbf16> to vector<8x4xbf16>
    %cst_118 = arith.constant dense<0.000000e+00> : vector<78x4xf32>
    %120 = tpu.matmul %117, %119, %cst_118 {dimension_numbers = #tpu.dot_dimension_numbers<[1], [0], [0], [1], [0, 0, 1, 1], [], []>} : vector<78x8xbf16>, vector<8x4xbf16>, vector<78x4xf32> -> vector<78x4xf32>
    %121 = arith.addf %115, %120 : vector<78x4xf32>
    %c0_119 = arith.constant 0 : index
    %c0_120 = arith.constant 0 : index
    %c21_121 = arith.constant 21 : index
    %c0_122 = arith.constant 0 : index
    %122 = vector.load %arg1[%c0_119, %c0_120, %c21_121, %c0_122] : memref<1x1x100x8xbf16, #tpu.memory_space<vmem>>, vector<1x1x78x8xbf16>
    %123 = vector.shape_cast %122 : vector<1x1x78x8xbf16> to vector<78x8xbf16>
    %c14 = arith.constant 14 : index
    %c0_123 = arith.constant 0 : index
    %c0_124 = arith.constant 0 : index
    %124 = vector.load %arg2[%c14, %c0_123, %c0_124] : memref<16x8x4xbf16, #tpu.memory_space<vmem>>, vector<1x8x4xbf16>
    %125 = vector.shape_cast %124 : vector<1x8x4xbf16> to vector<8x4xbf16>
    %cst_125 = arith.constant dense<0.000000e+00> : vector<78x4xf32>
    %126 = tpu.matmul %123, %125, %cst_125 {dimension_numbers = #tpu.dot_dimension_numbers<[1], [0], [0], [1], [0, 0, 1, 1], [], []>} : vector<78x8xbf16>, vector<8x4xbf16>, vector<78x4xf32> -> vector<78x4xf32>
    %127 = arith.addf %121, %126 : vector<78x4xf32>
    %c0_126 = arith.constant 0 : index
    %c0_127 = arith.constant 0 : index
    %c22 = arith.constant 22 : index
    %c0_128 = arith.constant 0 : index
    %128 = vector.load %arg1[%c0_126, %c0_127, %c22, %c0_128] : memref<1x1x100x8xbf16, #tpu.memory_space<vmem>>, vector<1x1x78x8xbf16>
    %129 = vector.shape_cast %128 : vector<1x1x78x8xbf16> to vector<78x8xbf16>
    %c15 = arith.constant 15 : index
    %c0_129 = arith.constant 0 : index
    %c0_130 = arith.constant 0 : index
    %130 = vector.load %arg2[%c15, %c0_129, %c0_130] : memref<16x8x4xbf16, #tpu.memory_space<vmem>>, vector<1x8x4xbf16>
    %131 = vector.shape_cast %130 : vector<1x8x4xbf16> to vector<8x4xbf16>
    %cst_131 = arith.constant dense<0.000000e+00> : vector<78x4xf32>
    %132 = tpu.matmul %129, %131, %cst_131 {dimension_numbers = #tpu.dot_dimension_numbers<[1], [0], [0], [1], [0, 0, 1, 1], [], []>} : vector<78x8xbf16>, vector<8x4xbf16>, vector<78x4xf32> -> vector<78x4xf32>
    %133 = arith.addf %127, %132 : vector<78x4xf32>
    %134 = vector.broadcast %0 : vector<1x4xf32> to vector<78x4xf32>
    %135 = arith.addf %133, %134 : vector<78x4xf32>
    %cst_132 = arith.constant 0.000000e+00 : f32
    %136 = vector.broadcast %cst_132 : f32 to vector<78x4xf32>
    %137 = arith.cmpf oge, %135, %136 : vector<78x4xf32>
    %cst_133 = arith.constant 1.000000e-01 : f32
    %138 = vector.broadcast %cst_133 : f32 to vector<78x4xf32>
    %139 = arith.mulf %138, %135 : vector<78x4xf32>
    %140 = arith.select %137, %135, %139 : vector<78x4xi1>, vector<78x4xf32>
    %141 = arith.truncf %140 : vector<78x4xf32> to vector<78x4xbf16>
    %c0_134 = arith.constant 0 : index
    %c3_135 = arith.constant 3 : index
    %c0_136 = arith.constant 0 : index
    %c0_137 = arith.constant 0 : index
    %142 = vector.load %arg4[%c0_134, %c3_135, %c0_136, %c0_137] : memref<1x4x78x4xbf16, #tpu.memory_space<vmem>>, vector<1x1x78x4xbf16>
    %143 = vector.shape_cast %142 : vector<1x1x78x4xbf16> to vector<78x4xbf16>
    %144 = vector.shape_cast %141 : vector<78x4xbf16> to vector<1x1x78x4xbf16>
    tpu.vector_store %arg4[%c0_134, %c3_135, %c0_136, %c0_137], %144 {strides = array<i32>} : memref<1x4x78x4xbf16, #tpu.memory_space<vmem>>, vector<1x1x78x4xbf16>,
    return
  }
  func.func @transform_0(%arg0: i32) -> (i32, i32, i32, i32) {
    %c0_i32 = arith.constant 0 : i32
    %c0_i32_0 = arith.constant 0 : i32
    %c0_i32_1 = arith.constant 0 : i32
    %c0_i32_2 = arith.constant 0 : i32
    return %arg0, %c0_i32, %c0_i32_0, %c0_i32_1 : i32, i32, i32, i32
  }
  func.func @transform_1(%arg0: i32) -> (i32, i32, i32) {
    %c0_i32 = arith.constant 0 : i32
    %c0_i32_0 = arith.constant 0 : i32
    %c0_i32_1 = arith.constant 0 : i32
    %c0_i32_2 = arith.constant 0 : i32
    return %c0_i32, %c0_i32_0, %c0_i32_1 : i32, i32, i32
  }
  func.func @transform_2(%arg0: i32) -> (i32, i32) {
    %c0_i32 = arith.constant 0 : i32
    %c0_i32_0 = arith.constant 0 : i32
    %c0_i32_1 = arith.constant 0 : i32
    return %c0_i32, %c0_i32_0 : i32, i32
  }
  func.func @transform_3(%arg0: i32) -> (i32, i32, i32, i32) {
    %c0_i32 = arith.constant 0 : i32
    %c0_i32_0 = arith.constant 0 : i32
    %c0_i32_1 = arith.constant 0 : i32
    %c0_i32_2 = arith.constant 0 : i32
    return %arg0, %c0_i32, %c0_i32_0, %c0_i32_1 : i32, i32, i32, i32
  }
}

module attributes {stable_mosaic.version = 11 : i64} {
  func.func @_conv_flat_kernel(%arg0: i32, %arg1: memref<1x1x324x8xbf16, #tpu.memory_space<vmem>>, %arg2: memref<9x8x4xbf16, #tpu.memory_space<vmem>>, %arg3: memref<1x4xf32, #tpu.memory_space<vmem>>, %arg4: memref<1x286x4xf32, #tpu.memory_space<vmem>>) attributes {dimension_semantics = [#tpu.dimension_semantics<parallel>], iteration_bounds = array<i64: 2>, scalar_prefetch = 0 : i64, scratch_operands = 0 : i64, tpu.core_type = #tpu.core_type<tc>, window_params = [{transform_indices = @transform_0, window_bounds = array<i64: 1, 1, 324, 8>}, {pipeline_mode = #tpu.pipeline_mode<synchronous>, transform_indices = @transform_1, window_bounds = array<i64: 9, 8, 4>}, {pipeline_mode = #tpu.pipeline_mode<synchronous>, transform_indices = @transform_2, window_bounds = array<i64: 1, 4>}, {transform_indices = @transform_3, window_bounds = array<i64: 1, 286, 4>}]} {
    %cst = arith.constant 0.000000e+00 : f32
    %0 = vector.broadcast %cst : f32 to vector<286x4xf32>
    %c0 = arith.constant 0 : index
    %c0_0 = arith.constant 0 : index
    %c0_1 = arith.constant 0 : index
    %c0_2 = arith.constant 0 : index
    %1 = vector.load %arg1[%c0, %c0_0, %c0_1, %c0_2] : memref<1x1x324x8xbf16, #tpu.memory_space<vmem>>, vector<1x1x286x8xbf16>
    %2 = vector.shape_cast %1 : vector<1x1x286x8xbf16> to vector<286x8xbf16>
    %c0_3 = arith.constant 0 : index
    %c0_4 = arith.constant 0 : index
    %c0_5 = arith.constant 0 : index
    %3 = vector.load %arg2[%c0_3, %c0_4, %c0_5] : memref<9x8x4xbf16, #tpu.memory_space<vmem>>, vector<1x8x4xbf16>
    %4 = vector.shape_cast %3 : vector<1x8x4xbf16> to vector<8x4xbf16>
    %cst_6 = arith.constant dense<0.000000e+00> : vector<286x4xf32>
    %5 = tpu.matmul %2, %4, %cst_6 {dimension_numbers = #tpu.dot_dimension_numbers<[1], [0], [0], [1], [0, 0, 1, 1], [], []>} : vector<286x8xbf16>, vector<8x4xbf16>, vector<286x4xf32> -> vector<286x4xf32>
    %6 = arith.addf %0, %5 : vector<286x4xf32>
    %c0_7 = arith.constant 0 : index
    %c0_8 = arith.constant 0 : index
    %c1 = arith.constant 1 : index
    %c0_9 = arith.constant 0 : index
    %7 = vector.load %arg1[%c0_7, %c0_8, %c1, %c0_9] : memref<1x1x324x8xbf16, #tpu.memory_space<vmem>>, vector<1x1x286x8xbf16>
    %8 = vector.shape_cast %7 : vector<1x1x286x8xbf16> to vector<286x8xbf16>
    %c1_10 = arith.constant 1 : index
    %c0_11 = arith.constant 0 : index
    %c0_12 = arith.constant 0 : index
    %9 = vector.load %arg2[%c1_10, %c0_11, %c0_12] : memref<9x8x4xbf16, #tpu.memory_space<vmem>>, vector<1x8x4xbf16>
    %10 = vector.shape_cast %9 : vector<1x8x4xbf16> to vector<8x4xbf16>
    %cst_13 = arith.constant dense<0.000000e+00> : vector<286x4xf32>
    %11 = tpu.matmul %8, %10, %cst_13 {dimension_numbers = #tpu.dot_dimension_numbers<[1], [0], [0], [1], [0, 0, 1, 1], [], []>} : vector<286x8xbf16>, vector<8x4xbf16>, vector<286x4xf32> -> vector<286x4xf32>
    %12 = arith.addf %6, %11 : vector<286x4xf32>
    %c0_14 = arith.constant 0 : index
    %c0_15 = arith.constant 0 : index
    %c2 = arith.constant 2 : index
    %c0_16 = arith.constant 0 : index
    %13 = vector.load %arg1[%c0_14, %c0_15, %c2, %c0_16] : memref<1x1x324x8xbf16, #tpu.memory_space<vmem>>, vector<1x1x286x8xbf16>
    %14 = vector.shape_cast %13 : vector<1x1x286x8xbf16> to vector<286x8xbf16>
    %c2_17 = arith.constant 2 : index
    %c0_18 = arith.constant 0 : index
    %c0_19 = arith.constant 0 : index
    %15 = vector.load %arg2[%c2_17, %c0_18, %c0_19] : memref<9x8x4xbf16, #tpu.memory_space<vmem>>, vector<1x8x4xbf16>
    %16 = vector.shape_cast %15 : vector<1x8x4xbf16> to vector<8x4xbf16>
    %cst_20 = arith.constant dense<0.000000e+00> : vector<286x4xf32>
    %17 = tpu.matmul %14, %16, %cst_20 {dimension_numbers = #tpu.dot_dimension_numbers<[1], [0], [0], [1], [0, 0, 1, 1], [], []>} : vector<286x8xbf16>, vector<8x4xbf16>, vector<286x4xf32> -> vector<286x4xf32>
    %18 = arith.addf %12, %17 : vector<286x4xf32>
    %c0_21 = arith.constant 0 : index
    %c0_22 = arith.constant 0 : index
    %c18 = arith.constant 18 : index
    %c0_23 = arith.constant 0 : index
    %19 = vector.load %arg1[%c0_21, %c0_22, %c18, %c0_23] : memref<1x1x324x8xbf16, #tpu.memory_space<vmem>>, vector<1x1x286x8xbf16>
    %20 = vector.shape_cast %19 : vector<1x1x286x8xbf16> to vector<286x8xbf16>
    %c3 = arith.constant 3 : index
    %c0_24 = arith.constant 0 : index
    %c0_25 = arith.constant 0 : index
    %21 = vector.load %arg2[%c3, %c0_24, %c0_25] : memref<9x8x4xbf16, #tpu.memory_space<vmem>>, vector<1x8x4xbf16>
    %22 = vector.shape_cast %21 : vector<1x8x4xbf16> to vector<8x4xbf16>
    %cst_26 = arith.constant dense<0.000000e+00> : vector<286x4xf32>
    %23 = tpu.matmul %20, %22, %cst_26 {dimension_numbers = #tpu.dot_dimension_numbers<[1], [0], [0], [1], [0, 0, 1, 1], [], []>} : vector<286x8xbf16>, vector<8x4xbf16>, vector<286x4xf32> -> vector<286x4xf32>
    %24 = arith.addf %18, %23 : vector<286x4xf32>
    %c0_27 = arith.constant 0 : index
    %c0_28 = arith.constant 0 : index
    %c19 = arith.constant 19 : index
    %c0_29 = arith.constant 0 : index
    %25 = vector.load %arg1[%c0_27, %c0_28, %c19, %c0_29] : memref<1x1x324x8xbf16, #tpu.memory_space<vmem>>, vector<1x1x286x8xbf16>
    %26 = vector.shape_cast %25 : vector<1x1x286x8xbf16> to vector<286x8xbf16>
    %c4 = arith.constant 4 : index
    %c0_30 = arith.constant 0 : index
    %c0_31 = arith.constant 0 : index
    %27 = vector.load %arg2[%c4, %c0_30, %c0_31] : memref<9x8x4xbf16, #tpu.memory_space<vmem>>, vector<1x8x4xbf16>
    %28 = vector.shape_cast %27 : vector<1x8x4xbf16> to vector<8x4xbf16>
    %cst_32 = arith.constant dense<0.000000e+00> : vector<286x4xf32>
    %29 = tpu.matmul %26, %28, %cst_32 {dimension_numbers = #tpu.dot_dimension_numbers<[1], [0], [0], [1], [0, 0, 1, 1], [], []>} : vector<286x8xbf16>, vector<8x4xbf16>, vector<286x4xf32> -> vector<286x4xf32>
    %30 = arith.addf %24, %29 : vector<286x4xf32>
    %c0_33 = arith.constant 0 : index
    %c0_34 = arith.constant 0 : index
    %c20 = arith.constant 20 : index
    %c0_35 = arith.constant 0 : index
    %31 = vector.load %arg1[%c0_33, %c0_34, %c20, %c0_35] : memref<1x1x324x8xbf16, #tpu.memory_space<vmem>>, vector<1x1x286x8xbf16>
    %32 = vector.shape_cast %31 : vector<1x1x286x8xbf16> to vector<286x8xbf16>
    %c5 = arith.constant 5 : index
    %c0_36 = arith.constant 0 : index
    %c0_37 = arith.constant 0 : index
    %33 = vector.load %arg2[%c5, %c0_36, %c0_37] : memref<9x8x4xbf16, #tpu.memory_space<vmem>>, vector<1x8x4xbf16>
    %34 = vector.shape_cast %33 : vector<1x8x4xbf16> to vector<8x4xbf16>
    %cst_38 = arith.constant dense<0.000000e+00> : vector<286x4xf32>
    %35 = tpu.matmul %32, %34, %cst_38 {dimension_numbers = #tpu.dot_dimension_numbers<[1], [0], [0], [1], [0, 0, 1, 1], [], []>} : vector<286x8xbf16>, vector<8x4xbf16>, vector<286x4xf32> -> vector<286x4xf32>
    %36 = arith.addf %30, %35 : vector<286x4xf32>
    %c0_39 = arith.constant 0 : index
    %c0_40 = arith.constant 0 : index
    %c36 = arith.constant 36 : index
    %c0_41 = arith.constant 0 : index
    %37 = vector.load %arg1[%c0_39, %c0_40, %c36, %c0_41] : memref<1x1x324x8xbf16, #tpu.memory_space<vmem>>, vector<1x1x286x8xbf16>
    %38 = vector.shape_cast %37 : vector<1x1x286x8xbf16> to vector<286x8xbf16>
    %c6 = arith.constant 6 : index
    %c0_42 = arith.constant 0 : index
    %c0_43 = arith.constant 0 : index
    %39 = vector.load %arg2[%c6, %c0_42, %c0_43] : memref<9x8x4xbf16, #tpu.memory_space<vmem>>, vector<1x8x4xbf16>
    %40 = vector.shape_cast %39 : vector<1x8x4xbf16> to vector<8x4xbf16>
    %cst_44 = arith.constant dense<0.000000e+00> : vector<286x4xf32>
    %41 = tpu.matmul %38, %40, %cst_44 {dimension_numbers = #tpu.dot_dimension_numbers<[1], [0], [0], [1], [0, 0, 1, 1], [], []>} : vector<286x8xbf16>, vector<8x4xbf16>, vector<286x4xf32> -> vector<286x4xf32>
    %42 = arith.addf %36, %41 : vector<286x4xf32>
    %c0_45 = arith.constant 0 : index
    %c0_46 = arith.constant 0 : index
    %c37 = arith.constant 37 : index
    %c0_47 = arith.constant 0 : index
    %43 = vector.load %arg1[%c0_45, %c0_46, %c37, %c0_47] : memref<1x1x324x8xbf16, #tpu.memory_space<vmem>>, vector<1x1x286x8xbf16>
    %44 = vector.shape_cast %43 : vector<1x1x286x8xbf16> to vector<286x8xbf16>
    %c7 = arith.constant 7 : index
    %c0_48 = arith.constant 0 : index
    %c0_49 = arith.constant 0 : index
    %45 = vector.load %arg2[%c7, %c0_48, %c0_49] : memref<9x8x4xbf16, #tpu.memory_space<vmem>>, vector<1x8x4xbf16>
    %46 = vector.shape_cast %45 : vector<1x8x4xbf16> to vector<8x4xbf16>
    %cst_50 = arith.constant dense<0.000000e+00> : vector<286x4xf32>
    %47 = tpu.matmul %44, %46, %cst_50 {dimension_numbers = #tpu.dot_dimension_numbers<[1], [0], [0], [1], [0, 0, 1, 1], [], []>} : vector<286x8xbf16>, vector<8x4xbf16>, vector<286x4xf32> -> vector<286x4xf32>
    %48 = arith.addf %42, %47 : vector<286x4xf32>
    %c0_51 = arith.constant 0 : index
    %c0_52 = arith.constant 0 : index
    %c38 = arith.constant 38 : index
    %c0_53 = arith.constant 0 : index
    %49 = vector.load %arg1[%c0_51, %c0_52, %c38, %c0_53] : memref<1x1x324x8xbf16, #tpu.memory_space<vmem>>, vector<1x1x286x8xbf16>
    %50 = vector.shape_cast %49 : vector<1x1x286x8xbf16> to vector<286x8xbf16>
    %c8 = arith.constant 8 : index
    %c0_54 = arith.constant 0 : index
    %c0_55 = arith.constant 0 : index
    %51 = vector.load %arg2[%c8, %c0_54, %c0_55] : memref<9x8x4xbf16, #tpu.memory_space<vmem>>, vector<1x8x4xbf16>
    %52 = vector.shape_cast %51 : vector<1x8x4xbf16> to vector<8x4xbf16>
    %cst_56 = arith.constant dense<0.000000e+00> : vector<286x4xf32>
    %53 = tpu.matmul %50, %52, %cst_56 {dimension_numbers = #tpu.dot_dimension_numbers<[1], [0], [0], [1], [0, 0, 1, 1], [], []>} : vector<286x8xbf16>, vector<8x4xbf16>, vector<286x4xf32> -> vector<286x4xf32>
    %54 = arith.addf %48, %53 : vector<286x4xf32>
    %c0_57 = arith.constant 0 : index
    %c0_58 = arith.constant 0 : index
    %55 = vector.load %arg3[%c0_57, %c0_58] : memref<1x4xf32, #tpu.memory_space<vmem>>, vector<1x4xf32>
    %56 = vector.broadcast %55 : vector<1x4xf32> to vector<286x4xf32>
    %57 = arith.addf %54, %56 : vector<286x4xf32>
    %c0_59 = arith.constant 0 : index
    %c0_60 = arith.constant 0 : index
    %c0_61 = arith.constant 0 : index
    %58 = vector.load %arg4[%c0_59, %c0_60, %c0_61] : memref<1x286x4xf32, #tpu.memory_space<vmem>>, vector<1x286x4xf32>
    %59 = vector.shape_cast %58 : vector<1x286x4xf32> to vector<286x4xf32>
    %60 = vector.shape_cast %57 : vector<286x4xf32> to vector<1x286x4xf32>
    tpu.vector_store %arg4[%c0_59, %c0_60, %c0_61], %60 {strides = array<i32>} : memref<1x286x4xf32, #tpu.memory_space<vmem>>, vector<1x286x4xf32>,
    return
  }
  func.func @transform_0(%arg0: i32) -> (i32, i32, i32, i32) {
    %c0_i32 = arith.constant 0 : i32
    %c0_i32_0 = arith.constant 0 : i32
    %c0_i32_1 = arith.constant 0 : i32
    %c0_i32_2 = arith.constant 0 : i32
    return %arg0, %c0_i32, %c0_i32_0, %c0_i32_1 : i32, i32, i32, i32
  }
  func.func @transform_1(%arg0: i32) -> (i32, i32, i32) {
    %c0_i32 = arith.constant 0 : i32
    %c0_i32_0 = arith.constant 0 : i32
    %c0_i32_1 = arith.constant 0 : i32
    %c0_i32_2 = arith.constant 0 : i32
    return %c0_i32, %c0_i32_0, %c0_i32_1 : i32, i32, i32
  }
  func.func @transform_2(%arg0: i32) -> (i32, i32) {
    %c0_i32 = arith.constant 0 : i32
    %c0_i32_0 = arith.constant 0 : i32
    %c0_i32_1 = arith.constant 0 : i32
    return %c0_i32, %c0_i32_0 : i32, i32
  }
  func.func @transform_3(%arg0: i32) -> (i32, i32, i32) {
    %c0_i32 = arith.constant 0 : i32
    %c0_i32_0 = arith.constant 0 : i32
    %c0_i32_1 = arith.constant 0 : i32
    return %arg0, %c0_i32, %c0_i32_0 : i32, i32, i32
  }
}

</mosaic_0001>

<bundles_post_ra>
// kernel: unet2d_forward.7
= control target key start
LH: loop header
LB: loop body
LE: loop exit
PB: predicated region body
PF: predicated region fallthrough
CT: control target
= control target key end

     0   :  { %s2035_s9 = smov 0   ;;  %s2474_s0 = inlined_call_operand.vmem [shape: bf16[2,4,81,4], index: 0, kind: input, shape index: {}]   ;;  %s2475_s1 = inlined_call_operand.vmem [shape: bf16[9,4,4], index: 1, kind: input, shape index: {}]   ;;  %s2476_s2 = inlined_call_operand.vmem [shape: bf16[2,71,4], index: 2, kind: output, shape index: {}]  }
   0x1 LB: > { %s1558_s10 = sadd.s32 4294967295, %s2016_s9   ;;  %p1562_p0 = scmp.ge.s32.totalorder %s2016_s9, 1  ;;  %s2016_s9 = sphi %s2035_s9, %s12_s9  }
   0x2   : > { %p112_p1 = scmp.lt.s32.totalorder %s2016_s9, 3 }
   0x4   : > { %p113_p2 = pnand %p1562_p0, %p112_p1 }
   0x5   : > { %p134_p3 = scmp.lt.s32.totalorder (!%p113_p2), %s1558_s10, 1 }
   0x6   : > { %116 = sbr.rel (%p113_p2) target bundleno = 394 (0x18a), region = 28 }
   0xb   : > { %v1574_v0 = vld [vmem:[%s2475_s1 + $0x2] sm:$0x3]  ;;  %vm206_vm0 = vcmask 1041408   ;;  %v2018_v1 = vmov 0.0   ;;  %s2478_s10 = smov (!%p134_p3, %s1558_s10), 1  ;;  %vm2019_vm1 = vmmov 0  }
   0xc   : > { %1763 = vmatprep.subr.bf16.mxu0 %v2018_v1  ;;  %1961 = vmatprep.subr.bf16.mxu1 %v2018_v1  ;;  %v208_v2 = vsel %vm206_vm0, %v1574_v0, 0  ;;  %s1963_s13 = smul.u32 176, %s2478_s10  ;;  %v1595_v3 = vld [vmem:[%s2475_s1 + $0x4] sm:$0x3]  ;;  %v154_v4 = vld [vmem:[%s2475_s1] sm:$0x3] }
   0xd   : > { %1764 = vmatpush3.bf16.msra.mxu0 %v208_v2  ;;  %1962 = vmatpush3.bf16.msra.mxu1 %v208_v2  ;;  %vm190_vm2 = vcmask 31744   ;;  %v448_v6 = vsel %vm206_vm0, %v1595_v3, 0  ;;  %v321_v8 = vsel %vm206_vm0, %v154_v4, 0  ;;  %v1610_v11 = vld [vmem:[%s2475_s1 + $0x6] sm:$0x3]  ;;  %vm1315_vm4 = vcmask 1046528  }
   0xe   : > { %1765 = vmatprep.mubr.msk.bf16.mxu0 %vm2019_vm1, %v2018_v1  ;;  %1777 = vmatprep.mubr.msk.bf16.mxu1 %vm2019_vm1, %v2018_v1  ;;  %s2067_s20 = scalar_lea.vmem %s2474_s0, %s1963_s13  ;;  %v1630_v12 = vld [vmem:[%s2475_s1 + $0x8] sm:$0x3]  ;;  %v582_v17 = vsel %vm206_vm0, %v1610_v11, 0  ;;  %vm397_vm3 = vsmask.f32 7424  ;;  %s1964_s5 = smul.u32 36, %s2478_s10 }
   0xf   : > { %1807 = vmatprep.subr.bf16.mxu0 %v2018_v1  ;;  %1785 = vmatprep.subr.bf16.mxu1 %v2018_v1  ;;  %v1975_v5 = vld [vmem:[%s2067_s20 + $0x2c] sm:$0xff]   ;;  %v1976_v7 = vld [vmem:[%s2067_s20 + $0x44] sm:$0xff]   ;;  %v1977_v9 = vld [vmem:[%s2067_s20 + $0x34] sm:$0xff]   ;;  %v716_v19 = vsel %vm206_vm0, %v1630_v12, 0  ;;  %vm1488_vm6 = vcmask 27648  }
  0x10   : > { %1766 = vmatmul.mubr.msk.bf16.vlgmr.msra.gmra.mxu0 %vm190_vm2, %v1975_v5  ;;  %1778 = vmatmul.mubr.msk.bf16.vlgmr.msra.gmra.mxu1 %vm190_vm2, %v1976_v7  ;;  %v1980_v10 = vld [vmem:[%s2067_s20] sm:$0xff]   ;;  %v1978_v13 = vld [vmem:[%s2067_s20 + $0x4c] ss:$0 sps:$4 sm:$0xff]   ;;  %v2094_v15 = vld [vmem:[%s2067_s20 + $0x10] sm:$0xff]   ;;  %s2434_s8 = scalar_lea.vmem %s2476_s2, %s1964_s5  ;;  %vm1498_vm14 = vsmask.f32 3328 }
  0x11   : > { %1808 = vmatpush3.bf16.msra.mxu0 %v448_v6  ;;  %1786 = vmatpush3.bf16.msra.mxu1 %v321_v8  ;;  %v2091_v14 = vld [vmem:[%s2067_s20 + $0x8] sm:$0xff]   ;;  %v400_v16 = vshll.u32 %v1980_v10, 16  ;;  %v1979_v20 = vld [vmem:[%s2067_s20 + $0x3c] sm:$0xff]   ;;  %v411_v21 = vshll.u32 %v2094_v15, 16  ;;  %v398_v23 = vshrl.u32 %v1980_v10, 16  ;;  %v415_v27 = vshrl.u32 %v2094_v15, 16 }
  0x12   : > { %1769 = vmatprep.mubr.msk.bf16.mxu0 %vm2019_vm1, %v2018_v1  ;;  %1781 = vmatprep.mubr.msk.bf16.mxu1 %vm2019_vm1, %v2018_v1  ;;  %v404_v18 = vshll.u32 %v2091_v14, 16  ;;  %v2108_v22 = vld [vmem:[%s2067_s20 + $0x60] sm:$0xff]   ;;  %v408_v24 = vshrl.u32 %v2091_v14, 16  ;;  %v2114_v28 = vld [vmem:[%s2067_s20 + $0x58] sm:$0xff]   ;;  %v2122_v34 = vld [vmem:[%s2067_s20 + $0x68] sm:$0xff]  }
  0x13   : > { %1829 = vmatprep.subr.bf16.mxu1 %v2018_v1  ;;  %1851 = vmatprep.subr.bf16.mxu0 %v2018_v1  ;;  %v402_v25 = vrot.slane %v400_v16, 1  ;;  %v807_v26 = vshll.u32 %v2108_v22, 16  ;;  %v2116_v30 = vrot.slane %v411_v21, 1  ;;  %v801_v31 = vshrl.u32 %v2114_v28, 16  ;;  %v2128_v36 = vld [vmem:[%s2067_s20 + $0x70] sm:$0xff]   ;;  %v1995_v45 = vld [vmem:[%s2067_s20 + $0x4] sm:$0xff]  }
  0x14   : > { %v406_v29 = vrot.slane %v404_v18, 1  ;;  %v803_v32 = vshll.u32 %v2114_v28, 16  ;;  %v2133_v38 = vld [vmem:[%s2067_s20 + $0x78] ss:$0 sps:$4 sm:$0xff]   ;;  %v811_v39 = vshrl.u32 %v2108_v22, 16  ;;  %v814_v40 = vshll.u32 %v2122_v34, 16 }
  0x15   : > { %v809_v33 = vrot.slane %v807_v26, 1  ;;  %v403_v35 = vor.u32 %v402_v25, %v398_v23  ;;  %v1996_v46 = vld [vmem:[%s2067_s20 + $0xc] sm:$0xff]   ;;  %v818_v47 = vshrl.u32 %v2122_v34, 16  ;;  %v821_v48 = vshll.u32 %v2128_v36, 16  ;;  %v1997_v49 = vld [vmem:[%s2067_s20 + $0x14] sm:$0xff]   ;;  %v1998_v58 = vld [vmem:[%s2067_s20 + $0x1c] sm:$0xff]  }
  0x16   : > { %v805_v37 = vrot.slane %v803_v32, 1  ;;  %v410_v41 = vor.u32 %v408_v24, %v406_v29  ;;  %v816_v44 = vrot.slane %v814_v40, 1  ;;  %v825_v52 = vshrl.u32 %v2128_v36, 16  ;;  %v2154_v59 = vld [vmem:[%s2067_s20 + $0x18] sm:$0xff]   ;;  %v1984_v40 = vld [vmem:[%s2067_s20 + $0x20] ss:$0 sps:$4 sm:$0xff]  }
  0x17   : > { %v813_v43 = vor.u32 %v811_v39, %v809_v33  ;;  %v407_v50 = vsel %vm397_vm3, %v403_v35, %v406_v29  ;;  %v828_v53 = vshll.u32 %v2133_v38, 16  ;;  %v969_v55 = vshrl.u32 %v1995_v45, 16 }
  0x18   : > { %1770 = vmatmul.mubr.msk.bf16.gmra.mxu0 %vm190_vm2, %v1977_v9  ;;  %1782 = vmatmul.mubr.msk.bf16.gmra.mxu1 %vm190_vm2, %v1978_v13  ;;  %v806_v42 = vor.u32 %v805_v37, %v801_v31  ;;  %v971_v56 = vshll.u32 %v1995_v45, 16  ;;  %v976_v57 = vshll.u32 %v1996_v46, 16  ;;  %v820_v60 = vor.u32 %v818_v47, %v816_v44  ;;  %v2165_v9 = vld [vmem:[%s2067_s20 + $0x24] ss:$0 sps:$4 sm:$0xff]   ;;  %v2000_v13 = vld [vmem:[%s2067_s20 + $0x30] sm:$0xff]   ;;  %v2005_v45 = vld [vmem:[%s2067_s20 + $0x48] sm:$0xff]  }
  0x19   : > { %1773 = vmatprep.mubr.msk.bf16.mxu0 %vm2019_vm1, %v2018_v1  ;;  %1787 = vmatprep.mubr.msk.bf16.mxu1 %vm2019_vm1, %v2018_v1  ;;  %v2150_v54 = vsel %vm397_vm3, %v813_v43, %v816_v44  ;;  %v823_v61 = vrot.slane %v821_v48, 1  ;;  %v980_v62 = vshrl.u32 %v1996_v46, 16  ;;  %v984_v63 = vshll.u32 %v1997_v49, 16 }
  0x1a   : > { %v2145_v51 = vsel %vm397_vm3, %v806_v42, %v809_v33  ;;  %v973_v0 = vrot.slane %v971_v56, 1  ;;  %v978_v2 = vrot.slane %v976_v57, 1  ;;  %v2157_v3 = vrot.slane %v828_v53, 1 }
  0x1b   : > { %v988_v4 = vshrl.u32 %v1997_v49, 16  ;;  %v2162_v5 = vsel %vm397_vm3, %v820_v60, %v823_v61  ;;  %v986_v6 = vrot.slane %v984_v63, 1  ;;  %v827_v7 = vor.u32 %v825_v52, %v823_v61 }
  0x1c   : > { %v992_v8 = vshll.u32 %v1998_v58, 16  ;;  %v982_v11 = vor.u32 %v980_v62, %v978_v2  ;;  %v996_v12 = vshrl.u32 %v1998_v58, 16  ;;  %v1000_v18 = vshll.u32 %v2165_v9, 16 }
  0x1d   : > { %v990_v16 = vor.u32 %v988_v4, %v986_v6  ;;  %v414_v21 = vsel %vm397_vm3, %v410_v41, %v2116_v30  ;;  %v418_v23 = vshll.u32 %v2154_v59, 16  ;;  %v1141_v32 = vshrl.u32 %v2000_v13, 16 }
  0x1e   : > { %v2187_v25 = vsel %vm397_vm3, %v982_v11, %v986_v6  ;;  %v2192_v31 = vrot.slane %v1000_v18, 1  ;;  %v1143_v33 = vshll.u32 %v2000_v13, 16  ;;  %v417_v46 = vor.u32 %v415_v27, %v2116_v30  ;;  %v1987_v13 = vld [vmem:[%s2067_s20 + $0x84] sm:$0xff]  }
  0x1f   : > { %v420_v47 = vrot.slane %v418_v23, 1  ;;  %v1164_v52 = vshll.u32 %v2005_v45, 16  ;;  %v1168_v56 = vshrl.u32 %v2005_v45, 16  ;;  %v422_v30 = vshrl.u32 %v2154_v59, 16 }
  0x20   : > { %1774 = vmatmul.mubr.msk.bf16.gmra.mxu0 %vm190_vm2, %v1979_v20  ;;  %1788 = vmatmul.mubr.msk.bf16.vlgmr.msra.gmra.mxu1 %vm190_vm2, %v1980_v10  ;;  %v974_v10 = vor.u32 %v973_v0, %v969_v55  ;;  %v2002_v20 = vld [vmem:[%s2067_s20 + $0x40] sm:$0xff]   ;;  %v1145_v42 = vrot.slane %v1143_v33, 1  ;;  %v2211_v55 = vld [vmem:[%s2067_s20 + $0x50] ss:$0 sps:$4 sm:$0xff]   ;;  %v425_v60 = vshll.u32 %v1984_v40, 16 }
  0x21   : > { %1809 = vmatprep.mubr.msk.bf16.mxu0 %vm2019_vm1, %v2018_v1  ;;  %1830 = vmatpush3.bf16.msra.mxu1 %v582_v17  ;;  %v994_v17 = vrot.slane %v992_v8, 1  ;;  %v1156_v39 = vshll.u32 %v2002_v20, 16  ;;  %v1160_v48 = vshrl.u32 %v2002_v20, 16  ;;  %v421_v27 = vsel %vm397_vm3, %v417_v46, %v420_v47  ;;  %v2009_v33 = vld [vmem:[%s2067_s20 + $0x24] sm:$0x1f]  }
  0x22   : > { %1791 = vmatprep.mubr.msk.bf16.mxu1 %vm2019_vm1, %v2018_v1  ;;  %1873 = vmatprep.subr.bf16.mxu1 %v2018_v1  ;;  %v2184_v24 = vsel %vm397_vm3, %v974_v10, %v978_v2  ;;  %v1146_v49 = vor.u32 %v1145_v42, %v1141_v32  ;;  %v1172_v61 = vshll.u32 %v2211_v55, 16  ;;  %v424_v2 = vor.u32 %v422_v30, %v420_v47  ;;  %v1641_v10 = vld [vmem:[%s2475_s1 + $0xa] sm:$0x3] }
  0x23   : > { %v2190_v26 = vsel %vm397_vm3, %v990_v16, %v994_v17  ;;  %v998_v29 = vor.u32 %v996_v12, %v994_v17  ;;  %v1158_v44 = vrot.slane %v1156_v39, 1  ;;  %v427_v4 = vrot.slane %v425_v60, 1  ;;  %v1647_v12 = vld [vmem:[%s2475_s1 + $0xc] sm:$0x3]  ;;  %v1993_v17 = vld [vmem:[%s2067_s20 + $0x9c] sm:$0xff]  }
  0x24   : > { %v2225_v0 = vrot.slane %v1172_v61, 1  ;;  %v429_v8 = vshrl.u32 %v1984_v40, 16  ;;  %v851_v11 = vsel %vm206_vm0, %v1641_v10, 0  ;;  %v1023_v16 = vsel %vm206_vm0, %v1647_v12, 0 }
  0x25   : > { %v2197_v41 = vsel %vm397_vm3, %v998_v29, %v2192_v31  ;;  %v1162_v53 = vor.u32 %v1160_v48, %v1158_v44  ;;  %v2008_v29 = vld [vmem:[%s2067_s20 + $0x1c] sm:$0xff]  }
  0x28   : > { %1810 = vmatmul.mubr.msk.bf16.vlgmr.msra.gmra.mxu0 %vm190_vm2, %v407_v50  ;;  %1792 = vmatmul.mubr.msk.bf16.gmra.mxu1 %vm190_vm2, %v2091_v14  ;;  %v2175_v14 = vsel %vm397_vm3, %v827_v7, %v2157_v3  ;;  %v428_v7 = vsel %vm397_vm3, %v424_v2, %v427_v4 }
  0x29   : > { %1852 = vmatpush3.bf16.msra.mxu0 %v716_v19  ;;  %1795 = vmatprep.mubr.msk.bf16.mxu1 %vm2019_vm1, %v2018_v1  ;;  %v2001_v19 = vld [vmem:[%s2067_s20 + $0x38] sm:$0xff]  }
  0x2a   : > { %1813 = vmatprep.mubr.msk.bf16.mxu0 %vm2019_vm1, %v2018_v1  ;;  %1895 = vmatprep.subr.bf16.mxu0 %v2018_v1  ;;  %v1148_v35 = vshll.u32 %v2001_v19, 16  ;;  %v1152_v37 = vshrl.u32 %v2001_v19, 16  ;;  %v1678_v19 = vld [vmem:[%s2475_s1 + $0x10] sm:$0x3] }
  0x2b   : > { %v1341_v20 = vsel %vm206_vm0, %v1678_v19, 0 }
  0x2c   : > { %v1150_v43 = vrot.slane %v1148_v35, 1  ;;  %v1176_v35 = vshrl.u32 %v2211_v55, 16 }
  0x2e   : > { %v1154_v50 = vor.u32 %v1152_v37, %v1150_v43  ;;  %v2214_v57 = vsel %vm397_vm3, %v1146_v49, %v1150_v43  ;;  %v1323_v37 = vrot.slane %v2009_v33, 1  ;;  %v1178_v39 = vor.u32 %v1176_v35, %v2225_v0 }
  0x30   : > { %1814 = vmatmul.mubr.msk.bf16.gmra.mxu0 %vm190_vm2, %v414_v21  ;;  %1796 = vmatmul.mubr.msk.bf16.gmra.mxu1 %vm190_vm2, %v2094_v15  ;;  %v2217_v58 = vsel %vm397_vm3, %v1154_v50, %v1158_v44  ;;  %v1166_v15 = vrot.slane %v1164_v52, 1  ;;  %v2004_v21 = vld [vmem:[%s2067_s20 + $0xc] sm:$0xff]  }
  0x31   : > { %1817 = vmatprep.mubr.msk.bf16.mxu0 %vm2019_vm1, %v2018_v1  ;;  %1799 = vmatprep.mubr.msk.bf16.mxu1 %vm2019_vm1, %v2018_v1 }
  0x32   : > { %v2223_v62 = vsel %vm397_vm3, %v1162_v53, %v1166_v15  ;;  %v1170_v63 = vor.u32 %v1168_v56, %v1166_v15 }
  0x34   : > { %v2234_v6 = vsel %vm397_vm3, %v1170_v63, %v2225_v0 }
  0x38   : > { %1818 = vmatmul.mubr.msk.bf16.gmra.mxu0 %vm190_vm2, %v421_v27  ;;  %1800 = vmatmul.mubr.msk.bf16.gmra.mxu1 %vm190_vm2, %v2154_v59  ;;  %v431_v59 = vor.u32 %v429_v8, %v427_v4 }
  0x39   : > { %1821 = vmatprep.mubr.msk.bf16.mxu0 %vm2019_vm1, %v2018_v1  ;;  %1803 = vmatprep.mubr.msk.bf16.mxu1 %vm2019_vm1, %v2018_v1 }
  0x40   : > { %1822 = vmatmul.mubr.msk.bf16.gmra.mxu0 %vm190_vm2, %v428_v7  ;;  %1804 = vmatmul.mubr.msk.bf16.gmra.mxu1 %vm190_vm2, %v1984_v40 }
  0x41   : > { %1825 = vmatprep.mubr.msk.bf16.mxu0 %vm2019_vm1, %v2018_v1  ;;  %1831 = vmatprep.mubr.msk.bf16.mxu1 %vm2019_vm1, %v2018_v1 }
  0x48   : > { %1826 = vmatmul.mubr.msk.bf16.gmra.mxu0 %vm190_vm2, %v431_v59  ;;  %1832 = vmatmul.mubr.msk.bf16.vlgmr.msra.gmra.mxu1 %vm190_vm2, %v2114_v28  ;;  %v1989_v28 = vld [vmem:[%s2067_s20 + $0x8c] sm:$0xff]  }
  0x49   : > { %1853 = vmatprep.mubr.msk.bf16.mxu0 %vm2019_vm1, %v2018_v1  ;;  %1874 = vmatpush3.bf16.msra.mxu1 %v851_v11 }
  0x4a   : > { %1835 = vmatprep.mubr.msk.bf16.mxu1 %vm2019_vm1, %v2018_v1  ;;  %1917 = vmatprep.subr.bf16.mxu1 %v2018_v1 }
  0x50   : > { %1854 = vmatmul.mubr.msk.bf16.vlgmr.msra.gmra.mxu0 %vm190_vm2, %v1987_v13  ;;  %1836 = vmatmul.mubr.msk.bf16.gmra.mxu1 %vm190_vm2, %v2108_v22  ;;  %v1991_v22 = vld [vmem:[%s2067_s20 + $0x94] sm:$0xff]  }
  0x51   : > { %1896 = vmatpush3.bf16.msra.mxu0 %v1023_v16  ;;  %1839 = vmatprep.mubr.msk.bf16.mxu1 %vm2019_vm1, %v2018_v1 }
  0x52   : > { %1857 = vmatprep.mubr.msk.bf16.mxu0 %vm2019_vm1, %v2018_v1  ;;  %1939 = vmatprep.subr.bf16.mxu0 %v2018_v1 }
  0x58   : > { %1858 = vmatmul.mubr.msk.bf16.gmra.mxu0 %vm190_vm2, %v1989_v28  ;;  %1840 = vmatmul.mubr.msk.bf16.gmra.mxu1 %vm190_vm2, %v2122_v34  ;;  %v1994_v34 = vld [vmem:[%s2067_s20 + $0xa4] ss:$0 sps:$4 sm:$0xff]  }
  0x59   : > { %1861 = vmatprep.mubr.msk.bf16.mxu0 %vm2019_vm1, %v2018_v1  ;;  %1843 = vmatprep.mubr.msk.bf16.mxu1 %vm2019_vm1, %v2018_v1 }
  0x60   : > { %1862 = vmatmul.mubr.msk.bf16.gmra.mxu0 %vm190_vm2, %v1991_v22  ;;  %1844 = vmatmul.mubr.msk.bf16.gmra.mxu1 %vm190_vm2, %v2128_v36  ;;  %v1667_v36 = vld [vmem:[%s2475_s1 + $0xe] sm:$0x3] }
  0x61   : > { %1865 = vmatprep.mubr.msk.bf16.mxu0 %vm2019_vm1, %v2018_v1  ;;  %1847 = vmatprep.mubr.msk.bf16.mxu1 %vm2019_vm1, %v2018_v1  ;;  %v1195_v18 = vsel %vm206_vm0, %v1667_v36, 0  ;;  %vm1499_vm0 = vmand %vm1488_vm6, %vm1498_vm14 }
  0x68   : > { %1866 = vmatmul.mubr.msk.bf16.gmra.mxu0 %vm190_vm2, %v1993_v17  ;;  %1848 = vmatmul.mubr.msk.bf16.gmra.mxu1 %vm190_vm2, %v2133_v38 }
  0x69   : > { %1869 = vmatprep.mubr.msk.bf16.mxu0 %vm2019_vm1, %v2018_v1  ;;  %1875 = vmatprep.mubr.msk.bf16.mxu1 %vm2019_vm1, %v2018_v1 }
  0x70   : > { %1870 = vmatmul.mubr.msk.bf16.gmra.mxu0 %vm190_vm2, %v1994_v34  ;;  %1876 = vmatmul.mubr.msk.bf16.vlgmr.msra.gmra.mxu1 %vm190_vm2, %v2145_v51  ;;  %v832_v51 = vshrl.u32 %v2133_v38, 16 }
  0x71   : > { %1897 = vmatprep.mubr.msk.bf16.mxu0 %vm2019_vm1, %v2018_v1  ;;  %1918 = vmatpush3.bf16.msra.mxu1 %v1195_v18 }
  0x72   : > { %1879 = vmatprep.mubr.msk.bf16.mxu1 %vm2019_vm1, %v2018_v1 }
  0x78   : > { %1898 = vmatmul.mubr.msk.bf16.vlgmr.msra.gmra.mxu0 %vm190_vm2, %v2184_v24  ;;  %1880 = vmatmul.mubr.msk.bf16.gmra.mxu1 %vm190_vm2, %v2150_v54  ;;  %v834_v54 = vor.u32 %v832_v51, %v2157_v3  ;;  %v2006_v24 = vld [vmem:[%s2067_s20 + $0x14] sm:$0xff]  }
  0x79   : > { %1940 = vmatpush3.bf16.msra.mxu0 %v1341_v20  ;;  %1883 = vmatprep.mubr.msk.bf16.mxu1 %vm2019_vm1, %v2018_v1 }
  0x7a   : > { %1901 = vmatprep.mubr.msk.bf16.mxu0 %vm2019_vm1, %v2018_v1 }
  0x80   : > { %1902 = vmatmul.mubr.msk.bf16.gmra.mxu0 %vm190_vm2, %v2187_v25  ;;  %1884 = vmatmul.mubr.msk.bf16.gmra.mxu1 %vm190_vm2, %v2162_v5  ;;  %v1004_v5 = vshrl.u32 %v2165_v9, 16  ;;  %v1317_v9 = vrot.slane %v2004_v21, 1  ;;  %v1319_v25 = vrot.slane %v2006_v24, 1 }
  0x81   : > { %1905 = vmatprep.mubr.msk.bf16.mxu0 %vm2019_vm1, %v2018_v1  ;;  %1887 = vmatprep.mubr.msk.bf16.mxu1 %vm2019_vm1, %v2018_v1 }
  0x82   : > { %v1006_v38 = vor.u32 %v1004_v5, %v2192_v31  ;;  %v1321_v31 = vrot.slane %v2008_v29, 1 }
  0x84   : > { %v1322_v32 = vsel %vm1315_vm4, %v1319_v25, %v1321_v31  ;;  %v1324_v40 = vsel %vm1315_vm4, %v1321_v31, %v1323_v37 }
  0x88   : > { %1906 = vmatmul.mubr.msk.bf16.gmra.mxu0 %vm190_vm2, %v2190_v26  ;;  %1888 = vmatmul.mubr.msk.bf16.gmra.mxu1 %vm190_vm2, %v2175_v14  ;;  %v2003_v14 = vld [vmem:[%s2067_s20 + $0x4] sm:$0xfe]   ;;  %v1320_v26 = vsel %vm1315_vm4, %v1317_v9, %v1319_v25 }
  0x89   : > { %1909 = vmatprep.mubr.msk.bf16.mxu0 %vm2019_vm1, %v2018_v1  ;;  %1891 = vmatprep.mubr.msk.bf16.mxu1 %vm2019_vm1, %v2018_v1  ;;  %v1316_v3 = vrot.slane %v2003_v14, 1 }
  0x8b   : > { %v1318_v23 = vsel %vm1315_vm4, %v1316_v3, %v1317_v9 }
  0x90   : > { %1910 = vmatmul.mubr.msk.bf16.gmra.mxu0 %vm190_vm2, %v2197_v41  ;;  %1892 = vmatmul.mubr.msk.bf16.gmra.mxu1 %vm190_vm2, %v834_v54 }
  0x91   : > { %1913 = vmatprep.mubr.msk.bf16.mxu0 %vm2019_vm1, %v2018_v1  ;;  %1919 = vmatprep.mubr.msk.bf16.mxu1 %vm2019_vm1, %v2018_v1 }
  0x98   : > { %1914 = vmatmul.mubr.msk.bf16.gmra.mxu0 %vm190_vm2, %v1006_v38  ;;  %1920 = vmatmul.mubr.msk.bf16.vlgmr.msra.gmra.mxu1 %vm190_vm2, %v2214_v57 }
  0x99   : > { %1941 = vmatprep.mubr.msk.bf16.mxu0 %vm2019_vm1, %v2018_v1  ;;  %1923 = vmatprep.mubr.msk.bf16.mxu1 %vm2019_vm1, %v2018_v1 }
  0xa0   : > { %1942 = vmatmul.mubr.msk.bf16.vlgmr.msra.gmra.mxu0 %vm190_vm2, %v1318_v23  ;;  %1924 = vmatmul.mubr.msk.bf16.gmra.mxu1 %vm190_vm2, %v2217_v58 }
  0xa1   : > { %1945 = vmatprep.mubr.msk.bf16.mxu0 %vm2019_vm1, %v2018_v1  ;;  %1927 = vmatprep.mubr.msk.bf16.mxu1 %vm2019_vm1, %v2018_v1 }
  0xa8   : > { %1946 = vmatmul.mubr.msk.bf16.gmra.mxu0 %vm190_vm2, %v1320_v26  ;;  %1928 = vmatmul.mubr.msk.bf16.gmra.mxu1 %vm190_vm2, %v2223_v62 }
  0xa9   : > { %1949 = vmatprep.mubr.msk.bf16.mxu0 %vm2019_vm1, %v2018_v1  ;;  %1931 = vmatprep.mubr.msk.bf16.mxu1 %vm2019_vm1, %v2018_v1 }
  0xb0   : > { %1950 = vmatmul.mubr.msk.bf16.gmra.mxu0 %vm190_vm2, %v1322_v32  ;;  %1932 = vmatmul.mubr.msk.bf16.gmra.mxu1 %vm190_vm2, %v2234_v6 }
  0xb1   : > { %1953 = vmatprep.mubr.msk.bf16.mxu0 %vm2019_vm1, %v2018_v1  ;;  %1935 = vmatprep.mubr.msk.bf16.mxu1 %vm2019_vm1, %v2018_v1 }
  0xb8   : > { %1954 = vmatmul.mubr.msk.bf16.gmra.mxu0 %vm190_vm2, %v1324_v40  ;;  %1936 = vmatmul.mubr.msk.bf16.gmra.mxu1 %vm190_vm2, %v1178_v39 }
  0xb9   : > { %1957 = vmatprep.mubr.msk.bf16.mxu0 %vm2019_vm1, %v2018_v1 }
  0xc0   : > { %1958 = vmatmul.mubr.msk.bf16.gmra.mxu0 %vm190_vm2, %v1323_v37 }
  0xd0   : > { %v244_v41 = vpop.f32.mrf.mxu0  ;;  %v268_v42 = vpop.f32.mrf.mxu1 }
  0xd2   : > { %v1767_v43 = vpop.f32.mrf.mxu0  ;;  %v1779_v44 = vpop.f32.mrf.mxu1 }
  0xd4   : > { %v247_v45 = vpop.f32.mrf.mxu0  ;;  %v271_v46 = vpop.f32.mrf.mxu1 }
  0xd6   : > { %v1768_v47 = vpop.f32.mrf.mxu0  ;;  %v1780_v48 = vpop.f32.mrf.mxu1 }
  0xd8   : > { %v252_v49 = vpop.f32.mrf.mxu0  ;;  %v276_v50 = vpop.f32.mrf.mxu1 }
  0xda   : > { %v1771_v52 = vpop.f32.mrf.mxu0  ;;  %v1783_v53 = vpop.f32.mrf.mxu1 }
  0xdc   : > { %v255_v55 = vpop.f32.mrf.mxu0  ;;  %v279_v56 = vpop.f32.mrf.mxu1 }
  0xde   : > { %v1772_v57 = vpop.f32.mrf.mxu0  ;;  %v1784_v58 = vpop.f32.mrf.mxu1 }
  0xe0   : > { %v260_v15 = vpop.f32.mrf.mxu0  ;;  %v357_v1 = vpop.f32.mrf.mxu1 }
  0xe1   : > { %v358_v27 = vadd.f32 %v357_v1, %v244_v41 }
  0xe2   : > { %v1775_v30 = vpop.f32.mrf.mxu0  ;;  %v1789_v60 = vpop.f32.mrf.mxu1 }
  0xe4   : > { %v263_v61 = vpop.f32.mrf.mxu0  ;;  %v360_v62 = vpop.f32.mrf.mxu1 }
  0xe5   : > { %v361_v63 = vadd.f32 %v360_v62, %v247_v45 }
  0xe6   : > { %v1776_v0 = vpop.f32.mrf.mxu0  ;;  %v1790_v2 = vpop.f32.mrf.mxu1 }
  0xe8   : > { %v484_v4 = vpop.f32.mrf.mxu0  ;;  %v365_v6 = vpop.f32.mrf.mxu1 }
  0xe9   : > { %v522_v7 = vadd.f32 %v484_v4, %v358_v27  ;;  %v366_v8 = vadd.f32 %v365_v6, %v252_v49 }
  0xea   : > { %v1811_v59 = vpop.f32.mrf.mxu0  ;;  %v1793_v10 = vpop.f32.mrf.mxu1 }
  0xec   : > { %v487_v11 = vpop.f32.mrf.mxu0  ;;  %v368_v12 = vpop.f32.mrf.mxu1 }
  0xed   : > { %v523_v13 = vadd.f32 %v487_v11, %v361_v63  ;;  %v369_v16 = vadd.f32 %v368_v12, %v255_v55 }
  0xee   : > { %v1812_v28 = vpop.f32.mrf.mxu0  ;;  %v1794_v22 = vpop.f32.mrf.mxu1 }
  0xf0   : > { %v492_v17 = vpop.f32.mrf.mxu0  ;;  %v373_v34 = vpop.f32.mrf.mxu1 }
  0xf1   : > { %v524_v36 = vadd.f32 %v492_v17, %v366_v8  ;;  %v374_v18 = vadd.f32 %v373_v34, %v260_v15 }
  0xf2   : > { %v1815_v19 = vpop.f32.mrf.mxu0  ;;  %v1797_v20 = vpop.f32.mrf.mxu1 }
  0xf4   : > { %v495_v51 = vpop.f32.mrf.mxu0  ;;  %v376_v54 = vpop.f32.mrf.mxu1 }
  0xf5   : > { %v525_v5 = vadd.f32 %v495_v51, %v369_v16  ;;  %v377_v38 = vadd.f32 %v376_v54, %v263_v61 }
  0xf6   : > { %v1816_v14 = vpop.f32.mrf.mxu0  ;;  %v1798_v21 = vpop.f32.mrf.mxu1 }
  0xf8   : > { %v500_v3 = vpop.f32.mrf.mxu0  ;;  %v381_v9 = vpop.f32.mrf.mxu1 }
  0xf9   : > { %v526_v23 = vadd.f32 %v500_v3, %v374_v18  ;;  %v382_v24 = vadd.f32 %v381_v9, %v268_v42 }
  0xfa   : > { %v1819_v25 = vpop.f32.mrf.mxu0  ;;  %v1801_v26 = vpop.f32.mrf.mxu1 }
  0xfc   : > { %v503_v29 = vpop.f32.mrf.mxu0  ;;  %v384_v31 = vpop.f32.mrf.mxu1 }
  0xfd   : > { %v527_v32 = vadd.f32 %v503_v29, %v377_v38  ;;  %v385_v33 = vadd.f32 %v384_v31, %v271_v46 }
  0xfe   : > { %v1820_v35 = vpop.f32.mrf.mxu0  ;;  %v1802_v37 = vpop.f32.mrf.mxu1 }
 0x100   : > { %v508_v39 = vpop.f32.mrf.mxu0  ;;  %v389_v40 = vpop.f32.mrf.mxu1 }
 0x101   : > { %v528_v41 = vadd.f32 %v508_v39, %v382_v24  ;;  %v390_v43 = vadd.f32 %v389_v40, %v276_v50 }
 0x102   : > { %v1823_v44 = vpop.f32.mrf.mxu0  ;;  %v1805_v45 = vpop.f32.mrf.mxu1 }
 0x104   : > { %v511_v47 = vpop.f32.mrf.mxu0  ;;  %v392_v48 = vpop.f32.mrf.mxu1 }
 0x105   : > { %v529_v49 = vadd.f32 %v511_v47, %v385_v33 }
 0x106   : > { %v1824_v52 = vpop.f32.mrf.mxu0  ;;  %v1806_v53 = vpop.f32.mrf.mxu1 }
 0x108   : > { %v516_v42 = vpop.f32.mrf.mxu0  ;;  %v618_v56 = vpop.f32.mrf.mxu1 }
 0x109   : > { %v530_v55 = vadd.f32 %v516_v42, %v390_v43  ;;  %v656_v57 = vadd.f32 %v618_v56, %v522_v7 }
 0x10a   : > { %v1827_v58 = vpop.f32.mrf.mxu0  ;;  %v1833_v15 = vpop.f32.mrf.mxu1 }
 0x10c   : > { %v519_v46 = vpop.f32.mrf.mxu0  ;;  %v621_v1 = vpop.f32.mrf.mxu1 }
 0x10d   : > { %v657_v27 = vadd.f32 %v621_v1, %v523_v13 }
 0x10e   : > { %v1828_v30 = vpop.f32.mrf.mxu0  ;;  %v1834_v60 = vpop.f32.mrf.mxu1 }
 0x110   : > { %v752_v61 = vpop.f32.mrf.mxu0  ;;  %v626_v50 = vpop.f32.mrf.mxu1 }
 0x111   : > { %v2389_v62 = vadd.f32 %v752_v61, %v656_v57  ;;  %v658_v63 = vadd.f32 %v626_v50, %v524_v36 }
 0x112   : > { %v1855_v0 = vpop.f32.mrf.mxu0  ;;  %v1837_v2 = vpop.f32.mrf.mxu1 }
 0x114   : > { %v755_v4 = vpop.f32.mrf.mxu0  ;;  %v629_v6 = vpop.f32.mrf.mxu1 }
 0x115   : > { %v2391_v8 = vadd.f32 %v755_v4, %v657_v27  ;;  %v659_v59 = vadd.f32 %v629_v6, %v525_v5 }
 0x116   : > { %v1856_v7 = vpop.f32.mrf.mxu0  ;;  %v1838_v10 = vpop.f32.mrf.mxu1 }
 0x118   : > { %v760_v11 = vpop.f32.mrf.mxu0  ;;  %v634_v12 = vpop.f32.mrf.mxu1 }
 0x119   : > { %v2393_v16 = vadd.f32 %v760_v11, %v658_v63  ;;  %v660_v13 = vadd.f32 %v634_v12, %v526_v23 }
 0x11a   : > { %v1859_v28 = vpop.f32.mrf.mxu0  ;;  %v1841_v22 = vpop.f32.mrf.mxu1 }
 0x11c   : > { %v763_v17 = vpop.f32.mrf.mxu0  ;;  %v637_v34 = vpop.f32.mrf.mxu1 }
 0x11d   : > { %v2395_v18 = vadd.f32 %v763_v17, %v659_v59  ;;  %v661_v36 = vadd.f32 %v637_v34, %v527_v32 }
 0x11e   : > { %v1860_v19 = vpop.f32.mrf.mxu0  ;;  %v1842_v20 = vpop.f32.mrf.mxu1 }
 0x120   : > { %v768_v51 = vpop.f32.mrf.mxu0  ;;  %v642_v54 = vpop.f32.mrf.mxu1 }
 0x121   : > { %v2397_v38 = vadd.f32 %v768_v51, %v660_v13  ;;  %v662_v5 = vadd.f32 %v642_v54, %v528_v41 }
 0x122   : > { %v1863_v14 = vpop.f32.mrf.mxu0  ;;  %v1845_v21 = vpop.f32.mrf.mxu1 }
 0x124   : > { %v771_v3 = vpop.f32.mrf.mxu0  ;;  %v645_v9 = vpop.f32.mrf.mxu1 }
 0x125   : > { %v2399_v24 = vadd.f32 %v771_v3, %v661_v36  ;;  %v663_v23 = vadd.f32 %v645_v9, %v529_v49 }
 0x126   : > { %v1864_v25 = vpop.f32.mrf.mxu0  ;;  %v1846_v26 = vpop.f32.mrf.mxu1 }
 0x128   : > { %v776_v29 = vpop.f32.mrf.mxu0  ;;  %v650_v31 = vpop.f32.mrf.mxu1 }
 0x129   : > { %v2401_v33 = vadd.f32 %v776_v29, %v662_v5  ;;  %v664_v32 = vadd.f32 %v650_v31, %v530_v55 }
 0x12a   : > { %v1867_v35 = vpop.f32.mrf.mxu0  ;;  %v1849_v37 = vpop.f32.mrf.mxu1 }
 0x12c   : > { %v779_v39 = vpop.f32.mrf.mxu0  ;;  %v653_v40 = vpop.f32.mrf.mxu1 }
 0x12d   : > { %v2403_v43 = vadd.f32 %v779_v39, %v663_v23 }
 0x12e   : > { %v1868_v41 = vpop.f32.mrf.mxu0  ;;  %v1850_v44 = vpop.f32.mrf.mxu1 }
 0x130   : > { %v784_v45 = vpop.f32.mrf.mxu0  ;;  %v887_v48 = vpop.f32.mrf.mxu1 }
 0x131   : > { %v2405_v47 = vadd.f32 %v784_v45, %v664_v32  ;;  %v925_v23 = vadd.f32 %v887_v48, %v2389_v62 }
 0x132   : > { %v1871_v49 = vpop.f32.mrf.mxu0  ;;  %v1877_v52 = vpop.f32.mrf.mxu1 }
 0x134   : > { %v787_v53 = vpop.f32.mrf.mxu0  ;;  %v890_v42 = vpop.f32.mrf.mxu1 }
 0x135   : > { %v926_v35 = vadd.f32 %v890_v42, %v2391_v8 }
 0x136   : > { %v1872_v56 = vpop.f32.mrf.mxu0  ;;  %v1878_v57 = vpop.f32.mrf.mxu1 }
 0x138   : > { %v1059_v58 = vpop.f32.mrf.mxu0  ;;  %v895_v55 = vpop.f32.mrf.mxu1 }
 0x139   : > { %v1097_v29 = vadd.f32 %v1059_v58, %v925_v23  ;;  %v927_v52 = vadd.f32 %v895_v55, %v2393_v16 }
 0x13a   : > { %v1899_v15 = vpop.f32.mrf.mxu0  ;;  %v1881_v46 = vpop.f32.mrf.mxu1 }
 0x13c   : > { %v1062_v1 = vpop.f32.mrf.mxu0  ;;  %v898_v27 = vpop.f32.mrf.mxu1 }
 0x13d   : > { %v1098_v41 = vadd.f32 %v1062_v1, %v926_v35  ;;  %v928_v16 = vadd.f32 %v898_v27, %v2395_v18 }
 0x13e   : > { %v1900_v30 = vpop.f32.mrf.mxu0  ;;  %v1882_v60 = vpop.f32.mrf.mxu1 }
 0x140   : > { %v1067_v61 = vpop.f32.mrf.mxu0  ;;  %v2407_v50 = vpop.f32.mrf.mxu1 }
 0x141   : > { %v1099_v57 = vadd.f32 %v1067_v61, %v927_v52 }
 0x142   : > { %v1903_v63 = vpop.f32.mrf.mxu0  ;;  %v1885_v0 = vpop.f32.mrf.mxu1 }
 0x144   : > { %v1070_v2 = vpop.f32.mrf.mxu0  ;;  %v2409_v4 = vpop.f32.mrf.mxu1 }
 0x145   : > { %v1100_v61 = vadd.f32 %v1070_v2, %v928_v16 }
 0x146   : > { %v1904_v6 = vpop.f32.mrf.mxu0  ;;  %v1886_v59 = vpop.f32.mrf.mxu1 }
 0x148   : > { %v2411_v7 = vpop.f32.mrf.mxu0  ;;  %v2413_v10 = vpop.f32.mrf.mxu1 }
 0x149   : > { %v931_v35 = vadd.f32 %v2413_v10, %v2401_v33 }
 0x14a   : > { %v1907_v11 = vpop.f32.mrf.mxu0  ;;  %v1889_v12 = vpop.f32.mrf.mxu1 }
 0x14b   : > { %v929_v12 = vadd.f32 %v2407_v50, %v2397_v38 }
 0x14c   : > { %v2415_v13 = vpop.f32.mrf.mxu0  ;;  %v2417_v28 = vpop.f32.mrf.mxu1 }
 0x14d   : > { %v932_v52 = vadd.f32 %v2417_v28, %v2403_v43 }
 0x14e   : > { %v1908_v22 = vpop.f32.mrf.mxu0  ;;  %v1890_v17 = vpop.f32.mrf.mxu1 }
 0x150   : > { %v2419_v34 = vpop.f32.mrf.mxu0  ;;  %v2421_v36 = vpop.f32.mrf.mxu1 }
 0x152   : > { %v1911_v19 = vpop.f32.mrf.mxu0  ;;  %v1893_v20 = vpop.f32.mrf.mxu1 }
 0x153   : > { %v1101_v19 = vadd.f32 %v2411_v7, %v929_v12 }
 0x154   : > { %v2423_v51 = vpop.f32.mrf.mxu0  ;;  %v922_v54 = vpop.f32.mrf.mxu1 }
 0x156   : > { %v1912_v5 = vpop.f32.mrf.mxu0  ;;  %v1894_v14 = vpop.f32.mrf.mxu1 }
 0x158   : > { %v2425_v21 = vpop.f32.mrf.mxu0  ;;  %v1231_v3 = vpop.f32.mrf.mxu1 }
 0x159   : > { %v1269_v37 = vadd.f32 %v1231_v3, %v1097_v29  ;;  %v930_v3 = vadd.f32 %v2409_v4, %v2399_v24 }
 0x15a   : > { %v1915_v9 = vpop.f32.mrf.mxu0  ;;  %v1921_v25 = vpop.f32.mrf.mxu1 }
 0x15b   : > { %v1102_v25 = vadd.f32 %v2415_v13, %v930_v3 }
 0x15c   : > { %v1094_v26 = vpop.f32.mrf.mxu0  ;;  %v1234_v31 = vpop.f32.mrf.mxu1 }
 0x15d   : > { %v1270_v53 = vadd.f32 %v1234_v31, %v1098_v41 }
 0x15e   : > { %v1916_v32 = vpop.f32.mrf.mxu0  ;;  %v1922_v39 = vpop.f32.mrf.mxu1 }
 0x160   : > { %v1377_v40 = vpop.f32.mrf.mxu0  ;;  %v1239_v44 = vpop.f32.mrf.mxu1 }
 0x161   : > { %v1415_v45 = vadd.f32 %v1377_v40, %v1269_v37  ;;  %v1271_v55 = vadd.f32 %v1239_v44, %v1099_v57  ;;  %v1103_v40 = vadd.f32 %v2419_v34, %v931_v35 }
 0x162   : > { %v1943_v49 = vpop.f32.mrf.mxu0  ;;  %v1925_v48 = vpop.f32.mrf.mxu1 }
 0x163   : > { %vm1424_vm5 = vcmp.ge.f32.partialorder %v1415_v45, 0.0  ;;  %v1433_v62 = vmul.f32 0.1, %v1415_v45  ;;  %v1104_v48 = vadd.f32 %v2423_v51, %v932_v52 }
 0x164   : > { %v1380_v56 = vpop.f32.mrf.mxu0  ;;  %v1242_v42 = vpop.f32.mrf.mxu1 }
 0x165   : > { %v1442_v8 = vsel %vm1424_vm5, %v1415_v45, %v1433_v62  ;;  %v1416_v58 = vadd.f32 %v1380_v56, %v1270_v53  ;;  %v1272_v22 = vadd.f32 %v1242_v42, %v1100_v61 }
 0x166   : > { %v1700_v15 = vpack.c.bf16 %v1442_v8, %v1442_v8  ;;  %v1944_v46 = vpop.f32.mrf.mxu0  ;;  %v1926_v30 = vpop.f32.mrf.mxu1 }
 0x167   : > { %vm1425_vm7 = vcmp.ge.f32.partialorder %v1416_v58, 0.0  ;;  %v1434_v1 = vmul.f32 0.1, %v1416_v58 }
 0x168   : > { %1489 = vst.msk [vmem:[%s2434_s8] sm:$0xf] %vm1488_vm6, %v1700_v15  ;;  %v1385_v60 = vpop.f32.mrf.mxu0  ;;  %v1247_v0 = vpop.f32.mrf.mxu1 }
 0x169   : > { %v1443_v63 = vsel %vm1425_vm7, %v1416_v58, %v1434_v1  ;;  %v1417_v6 = vadd.f32 %v1385_v60, %v1271_v55  ;;  %v1273_v9 = vadd.f32 %v1247_v0, %v1101_v19  ;;  %v933_v58 = vadd.f32 %v2421_v36, %v2405_v47 }
 0x16a   : > { %v1701_v59 = vpack.c.bf16 %v1443_v63, %v1443_v63  ;;  %v1947_v11 = vpop.f32.mrf.mxu0  ;;  %v1929_v27 = vpop.f32.mrf.mxu1 }
 0x16b   : > { %vm1426_vm8 = vcmp.ge.f32.partialorder %v1417_v6, 0.0  ;;  %v1435_v18 = vmul.f32 0.1, %v1417_v6  ;;  %v1105_v16 = vadd.f32 %v2425_v21, %v933_v58 }
 0x16c   : > { %1490 = vst.msk [vmem:[%s2434_s8 + $0x4] sm:$0xf] %vm1488_vm6, %v1701_v59  ;;  %v1388_v17 = vpop.f32.mrf.mxu0  ;;  %v1250_v2 = vpop.f32.mrf.mxu1 }
 0x16d   : > { %v1444_v20 = vsel %vm1426_vm8, %v1417_v6, %v1435_v18  ;;  %v1418_v54 = vadd.f32 %v1388_v17, %v1272_v22  ;;  %v1274_v37 = vadd.f32 %v1250_v2, %v1102_v25  ;;  %v1500_v18 = vld [vmem:[%s2434_s8 + $0x20] sm:$0xf] }
 0x16e   : > { %v1702_v5 = vpack.c.bf16 %v1444_v20, %v1444_v20  ;;  %v1948_v14 = vpop.f32.mrf.mxu0  ;;  %v1930_v50 = vpop.f32.mrf.mxu1 }
 0x16f   : > { %vm1427_vm9 = vcmp.ge.f32.partialorder %v1418_v54, 0.0  ;;  %v1436_v38 = vmul.f32 0.1, %v1418_v54 }
 0x170   : > { %1491 = vst.msk [vmem:[%s2434_s8 + $0x8] sm:$0xf] %vm1488_vm6, %v1702_v5  ;;  %v1393_v23 = vpop.f32.mrf.mxu0  ;;  %v1255_v7 = vpop.f32.mrf.mxu1 }
 0x171   : > { %v1445_v26 = vsel %vm1427_vm9, %v1418_v54, %v1436_v38  ;;  %v1419_v29 = vadd.f32 %v1393_v23, %v1273_v9  ;;  %v1275_v53 = vadd.f32 %v1255_v7, %v1103_v40 }
 0x172   : > { %v1703_v31 = vpack.c.bf16 %v1445_v26, %v1445_v26  ;;  %v1951_v32 = vpop.f32.mrf.mxu0  ;;  %v1933_v4 = vpop.f32.mrf.mxu1 }
 0x173   : > { %vm1428_vm10 = vcmp.ge.f32.partialorder %v1419_v29, 0.0  ;;  %v1437_v24 = vmul.f32 0.1, %v1419_v29 }
 0x174   : > { %1492 = vst.msk [vmem:[%s2434_s8 + $0xc] sm:$0xf] %vm1488_vm6, %v1703_v31  ;;  %v1396_v39 = vpop.f32.mrf.mxu0  ;;  %v1258_v13 = vpop.f32.mrf.mxu1 }
 0x175   : > { %v1446_v41 = vsel %vm1428_vm10, %v1419_v29, %v1437_v24  ;;  %v1420_v44 = vadd.f32 %v1396_v39, %v1274_v37  ;;  %v1276_v15 = vadd.f32 %v1258_v13, %v1104_v48 }
 0x176   : > { %v1704_v45 = vpack.c.bf16 %v1446_v41, %v1446_v41  ;;  %v1952_v49 = vpop.f32.mrf.mxu0  ;;  %v1934_v10 = vpop.f32.mrf.mxu1 }
 0x177   : > { %vm1429_vm11 = vcmp.ge.f32.partialorder %v1420_v44, 0.0  ;;  %v1438_v33 = vmul.f32 0.1, %v1420_v44 }
 0x178   : > { %1493 = vst.msk [vmem:[%s2434_s8 + $0x10] sm:$0xf] %vm1488_vm6, %v1704_v45  ;;  %v1401_v62 = vpop.f32.mrf.mxu0  ;;  %v1263_v34 = vpop.f32.mrf.mxu1 }
 0x179   : > { %v1447_v56 = vsel %vm1429_vm11, %v1420_v44, %v1438_v33  ;;  %v1421_v57 = vadd.f32 %v1401_v62, %v1275_v53  ;;  %v1277_v61 = vadd.f32 %v1263_v34, %v1105_v16 }
 0x17a   : > { %v1705_v8 = vpack.c.bf16 %v1447_v56, %v1447_v56  ;;  %v1955_v42 = vpop.f32.mrf.mxu0  ;;  %v1937_v28 = vpop.f32.mrf.mxu1 }
 0x17b   : > { %vm1430_vm12 = vcmp.ge.f32.partialorder %v1421_v57, 0.0  ;;  %v1439_v43 = vmul.f32 0.1, %v1421_v57 }
 0x17c   : > { %1494 = vst.msk [vmem:[%s2434_s8 + $0x14] sm:$0xf] %vm1488_vm6, %v1705_v8  ;;  %v1404_v46 = vpop.f32.mrf.mxu0  ;;  %v1266_v51 = vpop.f32.mrf.mxu1 }
 0x17d   : > { %v1448_v55 = vsel %vm1430_vm12, %v1421_v57, %v1439_v43  ;;  %v1422_v1 = vadd.f32 %v1404_v46, %v1276_v15 }
 0x17e   : > { %v1706_v30 = vpack.c.bf16 %v1448_v55, %v1448_v55  ;;  %v1956_v60 = vpop.f32.mrf.mxu0  ;;  %v1938_v36 = vpop.f32.mrf.mxu1 }
 0x17f   : > { %vm1431_vm13 = vcmp.ge.f32.partialorder %v1422_v1, 0.0  ;;  %v1440_v47 = vmul.f32 0.1, %v1422_v1 }
 0x180   : > { %1495 = vst.msk [vmem:[%s2434_s8 + $0x18] sm:$0xf] %vm1488_vm6, %v1706_v30  ;;  %v1409_v63 = vpop.f32.mrf.mxu0 }
 0x181   : > { %v1449_v0 = vsel %vm1431_vm13, %v1422_v1, %v1440_v47  ;;  %v1423_v6 = vadd.f32 %v1409_v63, %v1277_v61 }
 0x182   : > { %v1707_v59 = vpack.c.bf16 %v1449_v0, %v1449_v0  ;;  %v1959_v21 = vpop.f32.mrf.mxu0 }
 0x183   : > { %vm1432_vm15 = vcmp.ge.f32.partialorder %v1423_v6, 0.0  ;;  %v1441_v11 = vmul.f32 0.1, %v1423_v6 }
 0x184   : > { %1496 = vst.msk [vmem:[%s2434_s8 + $0x1c] sm:$0xf] %vm1488_vm6, %v1707_v59  ;;  %v1412_v12 = vpop.f32.mrf.mxu0 }
 0x185   : > { %v1450_v22 = vsel %vm1432_vm15, %v1423_v6, %v1441_v11 }
 0x186   : > { %v1708_v27 = vpack.c.bf16 %v1450_v22, %v1450_v22  ;;  %v1960_v17 = vpop.f32.mrf.mxu0 }
 0x188   : > { %v1501_v19 = vsel %vm1499_vm0, %v1708_v27, %v1500_v18 }
 0x189   : > { %1502 = vst [vmem:[%s2434_s8 + $0x20] sm:$0xf] %v1501_v19 }
 0x18a PF: > { %s12_s9 = sadd.s32 1, %s2016_s9  }
 0x18b   : > { %p9_p4 = scmp.ge.s32.totalorder %s12_s9, 4  }
 0x18d   :  { %11 = sbr.rel (!%p9_p4) target bundleno = 1 (0x1), region = 69 }

// kernel: unet2d_forward.8
= control target key start
LH: loop header
LB: loop body
LE: loop exit
PB: predicated region body
PF: predicated region fallthrough
CT: control target
= control target key end

     0   :  { %s2075_s12 = smov 0   ;;  %s2327_s0 = inlined_call_operand.vmem [shape: bf16[2,4,25,4], index: 0, kind: input, shape index: {}]   ;;  %s2328_s1 = inlined_call_operand.vmem [shape: bf16[9,4,4], index: 1, kind: input, shape index: {}]   ;;  %s2329_s2 = inlined_call_operand.vmem [shape: bf16[9,4,4], index: 2, kind: input, shape index: {}]   ;;  %s2330_s3 = inlined_call_operand.vmem [shape: bf16[2,22,4], index: 3, kind: output, shape index: {}]  }
   0x1 LB: > { %s1715_s13 = sadd.s32 4294967295, %s2052_s12   ;;  %p1719_p0 = scmp.ge.s32.totalorder %s2052_s12, 1  ;;  %s2052_s12 = sphi %s2075_s12, %s13_s12  }
   0x2   : > { %p137_p1 = scmp.lt.s32.totalorder %s2052_s12, 3 }
   0x4   : > { %p138_p2 = pnand %p1719_p0, %p137_p1 }
   0x5   : > { %p161_p3 = scmp.lt.s32.totalorder (!%p138_p2), %s1715_s13, 1 }
   0x6   : > { %141 = sbr.rel (%p138_p2) target bundleno = 519 (0x207), region = 32 }
   0xb   : > { %v1726_v0 = vld [vmem:[%s2328_s1 + $0x2] sm:$0x3]  ;;  %vm197_vm0 = vcmask 1041408   ;;  %v175_v1 = vld [vmem:[%s2328_s1] sm:$0x3]  ;;  %s2350_s13 = smov (!%p161_p3, %s1715_s13), 1 }
   0xc   : > { %1991 = vmatprep.subr.msk.bf16.mxu0 %vm197_vm0, %v1726_v0  ;;  %v199_v2 = vsel %vm197_vm0, %v1726_v0, 0  ;;  %1992 = vmatprep.subr.msk.bf16.mxu1 %vm197_vm0, %v175_v1  ;;  %v264_v3 = vsel %vm197_vm0, %v175_v1, 0  ;;  %v1735_v4 = vld [vmem:[%s2328_s1 + $0x4] sm:$0x3]  ;;  %v1741_v5 = vld [vmem:[%s2328_s1 + $0x6] sm:$0x3] }
   0xd   : > { %1884 = vmatpush3.bf16.msra.mxu0 %v199_v2  ;;  %1890 = vmatpush3.bf16.msra.mxu1 %v264_v3  ;;  %s1822_s22 = sshll.u32 %s2350_s13, 6  ;;  %vm190_vm1 = vcmask 31744   ;;  %vm2333_vm2 = vsmask.f32 7424  ;;  %v1749_v14 = vld [vmem:[%s2328_s1 + $0x8] sm:$0x3] }
   0xe   : > { %1993 = vmatprep.subr.msk.bf16.mxu0 %vm197_vm0, %v1735_v4  ;;  %1994 = vmatprep.subr.msk.bf16.mxu1 %vm197_vm0, %v1741_v5  ;;  %s2107_s25 = scalar_lea.vmem %s2327_s0, %s1822_s22  ;;  %v337_v18 = vsel %vm197_vm0, %v1735_v4, 0  ;;  %v1754_v22 = vld [vmem:[%s2328_s1 + $0xa] sm:$0x3]  ;;  %v411_v26 = vsel %vm197_vm0, %v1741_v5, 0  ;;  %v485_v37 = vsel %vm197_vm0, %v1749_v14, 0  ;;  %vm2334_vm4 = vcmask 1044480  }
   0xf   : > { %v1723_v6 = vld [vmem:[%s2107_s25 + $0x10] sm:$0xf]  ;;  %v1724_v7 = vld [vmem:[%s2107_s25 + $0x14] sm:$0xf]  ;;  %v172_v11 = vld [vmem:[%s2107_s25] sm:$0xf] }
  0x10   : > { %v1762_v8 = vld [vmem:[%s2107_s25 + $0x10] sm:$0xc]  ;;  %v1727_v9 = vcombine.low %v1723_v6, %v1724_v7  ;;  %v173_v12 = vld [vmem:[%s2107_s25 + $0x4] sm:$0xf]  ;;  %v613_v13 = vld [vmem:[%s2107_s25] sm:$0xc] }
  0x11   : > { %v1765_v10 = vcombine.low %v1762_v8, %v1724_v7  ;;  %v1731_v15 = vcombine.low %v172_v11, %v173_v12  ;;  %v1758_v16 = vcombine.low %v613_v13, %v173_v12  ;;  %v2023_v17 = vld [vmem:[%s2107_s25 + $0x18] ss:$0 sps:$4 sm:$0x33]   ;;  %v2025_v19 = vld [vmem:[%s2107_s25 + $0x20] sm:$0xff]   ;;  %v560_v42 = vsel %vm197_vm0, %v1754_v22, 0  ;;  %v2027_v43 = vld [vmem:[%s2107_s25 + $0x30] sm:$0xff]  }
  0x12   : > { %1885 = vmatprep.mubr.msk.bf16.mxu0 %vm190_vm1, %v1727_v9  ;;  %v2024_v25 = vld [vmem:[%s2107_s25 + $0x8] ss:$0 sps:$4 sm:$0x33]   ;;  %v540_v30 = vshrl.u32 %v2025_v19, 16  ;;  %v542_v34 = vshll.u32 %v2025_v19, 16  ;;  %vm2331_vm5 = vcmask 27648  }
  0x13   : > { %1891 = vmatprep.mubr.msk.bf16.mxu1 %vm190_vm1, %v1731_v15  ;;  %v317_v20 = vshrl.u32 %v1731_v15, 16  ;;  %v319_v21 = vshll.u32 %v1731_v15, 16  ;;  %1886 = vmatmul.mubr.msk.bf16.vlgmr.msra.gmra.mxu0 %vm190_vm1, %v2023_v17  ;;  %v712_v23 = vshrl.u32 %v1765_v10, 16  ;;  %v715_v24 = vshll.u32 %v1765_v10, 16  ;;  %v1757_v44 = vld [vmem:[%s2328_s1 + $0xc] sm:$0x3] }
  0x14   : > { %1896 = vmatpush3.bf16.msra.mxu0 %v337_v18  ;;  %v625_v28 = vshrl.u32 %v1758_v16, 16  ;;  %v628_v29 = vshll.u32 %v1758_v16, 16  ;;  %1892 = vmatmul.mubr.msk.bf16.vlgmr.msra.gmra.mxu1 %vm190_vm1, %v2024_v25  ;;  %v323_v31 = vshll.u32 %v2024_v25, 16  ;;  %v327_v32 = vshrl.u32 %v2024_v25, 16  ;;  %v2029_v45 = vld [vmem:[%s2107_s25 + $0x8] ss:$0 sps:$4 sm:$0xff]  }
  0x15   : > { %v321_v27 = vrot.slane %v319_v21, 1  ;;  %1995 = vmatprep.subr.msk.bf16.mxu0 %vm197_vm0, %v1749_v14  ;;  %v2026_v33 = vld [vmem:[%s2107_s25 + $0x28] ss:$0 sps:$4 sm:$0x33]   ;;  %1902 = vmatpush3.bf16.msra.mxu1 %v411_v26  ;;  %v544_v38 = vrot.slane %v542_v34, 1  ;;  %v714_v51 = vrot.slane %v712_v23, 2 }
  0x16   : > { %1903 = vmatprep.mubr.msk.bf16.mxu1 %vm190_vm1, %v2025_v19  ;;  %v325_v36 = vrot.slane %v323_v31, 1  ;;  %1996 = vmatprep.subr.msk.bf16.mxu1 %vm197_vm0, %v1754_v22  ;;  %v546_v39 = vshll.u32 %v2026_v33, 16  ;;  %v627_v40 = vrot.slane %v625_v28, 2  ;;  %v630_v41 = vrot.slane %v628_v29, 3  ;;  %v2030_v50 = vld [vmem:[%s2107_s25 + $0x18] ss:$0 sps:$4 sm:$0xff]  }
  0x17   : > { %v322_v35 = vor.u32 %v321_v27, %v317_v20  ;;  %v545_v48 = vor.u32 %v544_v38, %v540_v30  ;;  %v717_v52 = vrot.slane %v715_v24, 3  ;;  %v633_v53 = vshrl.u32 %v2029_v45, 16  ;;  %v1764_v58 = vld [vmem:[%s2328_s1 + $0xe] sm:$0x3]  ;;  %v2031_v8 = vld [vmem:[%s2107_s25] sm:$0xf8]  }
  0x18   : > { %v329_v47 = vor.u32 %v327_v32, %v325_v36  ;;  %v548_v49 = vrot.slane %v546_v39, 1  ;;  %v636_v54 = vshll.u32 %v2029_v45, 16  ;;  %v720_v56 = vshrl.u32 %v2030_v50, 16  ;;  %v2028_v2 = vld [vmem:[%s2107_s25 + $0x38] ss:$0 sps:$4 sm:$0x33]  }
  0x19   : > { %v326_v46 = vsel %vm2333_vm2, %v322_v35, %v325_v36  ;;  %v723_v57 = vshll.u32 %v2030_v50, 16  ;;  %v635_v59 = vrot.slane %v633_v53, 2  ;;  %v550_v61 = vshrl.u32 %v2026_v33, 16  ;;  %v2032_v9 = vld [vmem:[%s2107_s25 + $0x8] sm:$0x1f]   ;;  %s2009_s29 = smul.u32 12, %s2350_s13 }
  0x1a   : > { %1897 = vmatprep.mubr.msk.bf16.mxu0 %vm190_vm1, %v326_v46  ;;  %v549_v55 = vsel %vm2333_vm2, %v545_v48, %v548_v49  ;;  %v638_v60 = vrot.slane %v636_v54, 3  ;;  %v631_v62 = vor.u32 %v630_v41, %v627_v40  ;;  %v722_v63 = vrot.slane %v720_v56, 2  ;;  %v1769_v10 = vld [vmem:[%s2328_s1 + $0x10] sm:$0x3]  ;;  %v962_v18 = vld [vmem:[%s2329_s2] sm:$0x3] }
  0x1b   : > { %1898 = vmatmul.mubr.msk.bf16.vlgmr.msra.gmra.mxu0 %vm190_vm1, %v329_v47  ;;  %v725_v0 = vrot.slane %v723_v57, 3  ;;  %vm2332_vm3 = vsmask.f32 5376  ;;  %v718_v3 = vor.u32 %v717_v52, %v714_v51  ;;  %v552_v5 = vor.u32 %v550_v61, %v548_v49  ;;  %v1778_v19 = vld [vmem:[%s2329_s2 + $0x2] sm:$0x3]  ;;  %s170_s5 = scalar_lea.vmem %s2330_s3, %s2009_s29 }
  0x1c   : > { %1908 = vmatpush3.bf16.msra.mxu0 %v485_v37  ;;  %1909 = vmatprep.mubr.msk.bf16.mxu0 %vm190_vm1, %v2027_v43  ;;  %v639_v1 = vor.u32 %v638_v60, %v635_v59  ;;  %v648_v6 = vsel %vm197_vm0, %v1757_v44, 0  ;;  %v735_v11 = vsel %vm197_vm0, %v1764_v58, 0  ;;  %v805_v13 = vrot.slane %v2031_v8, 3  ;;  %v2193_v22 = vld [vmem:[%s2329_s2 + $0x6] sm:$0x3] }
  0x1d   : > { %1904 = vmatmul.mubr.msk.bf16.vlgmr.msra.gmra.mxu1 %vm190_vm1, %v2026_v33  ;;  %1997 = vmatprep.subr.msk.bf16.mxu0 %vm197_vm0, %v1757_v44  ;;  %v726_v4 = vor.u32 %v725_v0, %v722_v63  ;;  %v806_v14 = vrot.slane %v2032_v9, 3  ;;  %v815_v15 = vsel %vm197_vm0, %v1769_v10, 0  ;;  %v2054_v17 = vmov 0   ;;  %v2200_v23 = vld [vmem:[%s2329_s2 + $0x4] sm:$0x3] }
  0x1e   : > { %1914 = vmatpush3.bf16.msra.mxu1 %v560_v42  ;;  %1915 = vmatprep.mubr.msk.bf16.mxu1 %vm190_vm1, %v549_v55  ;;  %v640_v7 = vsel %vm2332_vm3, %v631_v62, %v639_v1  ;;  %880 = vst.msk [vmem:[#allocation2] sm:$0xf] %vm2331_vm5, %v2054_v17  ;;  %881 = vst.msk [vmem:[#allocation2 + $0x4] sm:$0xf] %vm2331_vm5, %v2054_v17  ;;  %vm884_vm6 = vcmask 25600   ;;  %v1055_v20 = vsel %vm197_vm0, %v962_v18, 0 }
  0x1f   : > { %1998 = vmatprep.subr.msk.bf16.mxu1 %vm197_vm0, %v1764_v58  ;;  %v727_v12 = vsel %vm2332_vm3, %v718_v3, %v726_v4  ;;  %v807_v16 = vsel %vm2334_vm4, %v805_v13, %v806_v14  ;;  %882 = vst.msk [vmem:[#allocation2 + $0x8] sm:$0xf] %vm2331_vm5, %v2054_v17  ;;  %883 = vst.msk [vmem:[#allocation2 + $0xc] sm:$0xf] %vm2331_vm5, %v2054_v17  ;;  %v996_v21 = vsel %vm197_vm0, %v1778_v19, 0  ;;  %vm916_vm7 = vcmask 27650  }
  0x20   : > { %885 = vst.msk [vmem:[#allocation2 + $0x10] sm:$0x3] %vm884_vm6, %v2054_v17  ;;  %vm917_vm8 = vsmask.f32 7946  ;;  %vm900_vm11 = vcmask 27651   ;;  %vm922_vm14 = vcmask 24576  }
  0x21   : > { %vm901_vm12 = vsmask.f32 7950  ;;  %vm2204_vm13 = vmand %vm916_vm7, %vm917_vm8  ;;  %vm923_vm15 = vsmask.f32 256  ;;  %vm907_vm5 = vsmask.f32 1280 }
  0x22   : > { %vm2208_vm2 = vmand %vm900_vm11, %vm901_vm12  ;;  %vm945_vm7 = vcmask 1040384   ;;  %vm954_vm11 = vsmask.f32 2306  ;;  %vm937_vm4 = vsmask.f32 3334 }
  0x23   : > { %1910 = vmatmul.mubr.msk.bf16.vlgmr.msra.gmra.mxu0 %vm190_vm1, %v2028_v2  ;;  %vm2214_vm8 = vmand %vm922_vm14, %vm923_vm15  ;;  %vm2344_vm14 = vsmask.f32 7424  ;;  %vm1260_vm15 = vsmask.f32 4352 }
  0x24   : > { %1920 = vmatpush3.bf16.msra.mxu0 %v648_v6  ;;  %1921 = vmatprep.mubr.msk.bf16.mxu0 %vm190_vm1, %v640_v7  ;;  %vm2220_vm12 = vmand %vm884_vm6, %vm907_vm5  ;;  %vm1111_vm6 = vcmask 1046528  }
  0x25   : > { %1916 = vmatmul.mubr.msk.bf16.vlgmr.msra.gmra.mxu1 %vm190_vm1, %v552_v5  ;;  %1999 = vmatprep.subr.msk.bf16.mxu0 %vm197_vm0, %v1769_v10 }
  0x26   : > { %1926 = vmatpush3.bf16.msra.mxu1 %v735_v11  ;;  %1927 = vmatprep.mubr.msk.bf16.mxu1 %vm190_vm1, %v727_v12 }
  0x27   : > { %2000 = vmatprep.subr.msk.bf16.mxu1 %vm197_vm0, %v1778_v19 }
  0x2b   : > { %1922 = vmatmul.mubr.msk.bf16.vlgmr.msra.gmra.mxu0 %vm190_vm1, %v639_v1 }
  0x2c   : > { %1932 = vmatpush3.bf16.msra.mxu0 %v815_v15  ;;  %1933 = vmatprep.mubr.msk.bf16.mxu0 %vm190_vm1, %v807_v16 }
  0x2d   : > { %1928 = vmatmul.mubr.msk.bf16.vlgmr.msra.gmra.mxu1 %vm190_vm1, %v726_v4  ;;  %2001 = vmatprep.subr.msk.bf16.mxu0 %vm197_vm0, %v962_v18 }
  0x2e   : > { %1938 = vmatpush3.bf16.msra.mxu1 %v996_v21 }
  0x2f   : > { %2002 = vmatprep.subr.msk.bf16.mxu1 %vm197_vm0, %v2200_v23 }
  0x33   : > { %1934 = vmatmul.mubr.msk.bf16.vlgmr.msra.gmra.mxu0 %vm190_vm1, %v806_v14 }
  0x34   : > { %1944 = vmatpush3.bf16.msra.mxu0 %v1055_v20 }
  0x35   : > { %2003 = vmatprep.subr.msk.bf16.mxu0 %vm197_vm0, %v2193_v22 }
  0xd3   : > { %v1887_v24 = vpop.f32.mrf.mxu0 }
  0xd4   : > { %v1893_v26 = vpop.f32.mrf.mxu1 }
  0xd5   : > { %v235_v25 = vpop.f32.mrf.mxu0  ;;  %v309_v37 = vadd.f32 %v1893_v26, %v1887_v24 }
  0xd6   : > { %v300_v28 = vpop.f32.mrf.mxu1 }
  0xd7   : > { %v1888_v27 = vpop.f32.mrf.mxu0  ;;  %v301_v40 = vadd.f32 %v300_v28, %v235_v25  ;;  %v919_v25 = vld [vmem:[#allocation2 + $0x4] sm:$0xc] }
  0xd8   : > { %v1894_v30 = vpop.f32.mrf.mxu1 }
  0xd9   : > { %v238_v29 = vpop.f32.mrf.mxu0 }
  0xda   : > { %v303_v31 = vpop.f32.mrf.mxu1 }
  0xdb   : > { %v1899_v32 = vpop.f32.mrf.mxu0  ;;  %v304_v47 = vadd.f32 %v303_v31, %v238_v29 }
  0xdc   : > { %v389_v41 = vadd.f32 %v1899_v32, %v309_v37 }
  0xdd   : > { %v1905_v33 = vpop.f32.mrf.mxu1  ;;  %v373_v34 = vpop.f32.mrf.mxu0 }
  0xde   : > { %v387_v44 = vadd.f32 %v373_v34, %v301_v40  ;;  %v463_v48 = vadd.f32 %v1905_v33, %v389_v41 }
  0xdf   : > { %v447_v35 = vpop.f32.mrf.mxu1  ;;  %v1900_v36 = vpop.f32.mrf.mxu0 }
  0xe0   : > { %v461_v51 = vadd.f32 %v447_v35, %v387_v44  ;;  %v903_v35 = vld [vmem:[#allocation2] sm:$0x8] }
  0xe1   : > { %v1906_v38 = vpop.f32.mrf.mxu1  ;;  %v376_v39 = vpop.f32.mrf.mxu0 }
  0xe2   : > { %v388_v52 = vadd.f32 %v376_v39, %v304_v47  ;;  %v925_v38 = vld [vmem:[#allocation2 + $0x8] sm:$0x1] }
  0xe3   : > { %v450_v42 = vpop.f32.mrf.mxu1  ;;  %v1911_v43 = vpop.f32.mrf.mxu0 }
  0xe4   : > { %v537_v53 = vadd.f32 %v1911_v43, %v463_v48  ;;  %v462_v59 = vadd.f32 %v450_v42, %v388_v52  ;;  %v909_v48 = vld [vmem:[#allocation2 + $0x4] sm:$0x3] }
  0xe5   : > { %v1917_v45 = vpop.f32.mrf.mxu1  ;;  %v521_v46 = vpop.f32.mrf.mxu0 }
  0xe6   : > { %v535_v56 = vadd.f32 %v521_v46, %v461_v51  ;;  %v612_v60 = vadd.f32 %v1917_v45, %v537_v53 }
  0xe7   : > { %v596_v49 = vpop.f32.mrf.mxu1  ;;  %v1912_v50 = vpop.f32.mrf.mxu0 }
  0xe8   : > { %v610_v63 = vadd.f32 %v596_v49, %v535_v56  ;;  %v956_v50 = vld [vmem:[#allocation2 + $0xc] sm:$0x7] }
  0xe9   : > { %v1918_v54 = vpop.f32.mrf.mxu1  ;;  %v524_v55 = vpop.f32.mrf.mxu0 }
  0xea   : > { %v536_v0 = vadd.f32 %v524_v55, %v462_v59  ;;  %v939_v54 = vld [vmem:[#allocation2 + $0x8] sm:$0xe] }
  0xeb   : > { %v599_v57 = vpop.f32.mrf.mxu1  ;;  %v1923_v58 = vpop.f32.mrf.mxu0 }
  0xec   : > { %v700_v1 = vadd.f32 %v1923_v58, %v612_v60  ;;  %v611_v7 = vadd.f32 %v599_v57, %v536_v0  ;;  %v1482_v0 = vld [vmem:[#allocation2 + $0x10] sm:$0x3] }
  0xed   : > { %v1929_v61 = vpop.f32.mrf.mxu1  ;;  %v684_v62 = vpop.f32.mrf.mxu0 }
  0xee   : > { %v698_v4 = vadd.f32 %v684_v62, %v610_v63  ;;  %v787_v8 = vadd.f32 %v1929_v61, %v700_v1 }
  0xef   : > { %v771_v2 = vpop.f32.mrf.mxu1  ;;  %v1924_v3 = vpop.f32.mrf.mxu0 }
  0xf0   : > { %v785_v10 = vadd.f32 %v771_v2, %v698_v4 }
  0xf1   : > { %v1930_v5 = vpop.f32.mrf.mxu1  ;;  %v687_v6 = vpop.f32.mrf.mxu0 }
  0xf2   : > { %v699_v11 = vadd.f32 %v687_v6, %v611_v7  ;;  %v1799_v5 = vld [vmem:[%s2329_s2 + $0xa] sm:$0x3] }
  0xf3   : > { %v1935_v9 = vpop.f32.mrf.mxu0  ;;  %v774_v15 = vpop.f32.mrf.mxu1  ;;  %v1349_v42 = vsel %vm197_vm0, %v1799_v5, 0 }
  0xf4   : > { %v867_v12 = vadd.f32 %v1935_v9, %v787_v8  ;;  %v786_v18 = vadd.f32 %v774_v15, %v699_v11  ;;  %v1201_v8 = vsel %vm197_vm0, %v2193_v22, 0 }
  0xf5   : > { %v851_v13 = vpop.f32.mrf.mxu0 }
  0xf6   : > { %v865_v14 = vadd.f32 %v851_v13, %v785_v10  ;;  %v873_v16 = vmul.f32 0.1, %v867_v12  ;;  %vm870_vm9 = vcmp.ge.f32.partialorder %v867_v12, 0.0 }
  0xf7   : > { %v1936_v17 = vpop.f32.mrf.mxu0 }
  0xf8   : > { %vm868_vm10 = vcmp.ge.f32.partialorder %v865_v14, 0.0  ;;  %v871_v19 = vmul.f32 0.1, %v865_v14  ;;  %v876_v27 = vsel %vm870_vm9, %v867_v12, %v873_v16  ;;  %vm946_vm9 = vcmask 1044484  }
  0xf9   : > { %v854_v20 = vpop.f32.mrf.mxu0  ;;  %v1825_v34 = vpack.c.bf16 %v876_v27, %v876_v27 }
  0xfa   : > { %v874_v21 = vsel %vm868_vm10, %v865_v14, %v871_v19  ;;  %v866_v26 = vadd.f32 %v854_v20, %v786_v18  ;;  %vm953_vm10 = vcmask 26624  }
  0xfb   : > { %v1823_v28 = vpack.c.bf16 %v874_v21, %v874_v21  ;;  %v950_v47 = vrot.slane %v1825_v34, 7  ;;  %vm955_vm5 = vmand %vm953_vm10, %vm954_vm11  ;;  %v1122_v34 = vsel %vm197_vm0, %v2200_v23, 0 }
  0xfc   : > { %vm869_vm3 = vcmp.ge.f32.partialorder %v866_v26, 0.0  ;;  %v872_v29 = vmul.f32 0.1, %v866_v26 }
  0xfd   : > { %v890_v30 = vshll.u32 %v1823_v28, 16  ;;  %v893_v31 = vshrl.u32 %v1823_v28, 16  ;;  %v920_v33 = vsel %vm2204_vm13, %v1823_v28, %v919_v25  ;;  %vm936_vm13 = vcmask 27649  }
  0xfe   : > { %921 = vst [vmem:[#allocation2 + $0x4] sm:$0xc] %v920_v33  ;;  %v875_v36 = vsel %vm869_vm3, %v866_v26, %v872_v29  ;;  %vm947_vm3 = vmor %vm945_vm7, %vm946_vm9  ;;  %vm2345_vm7 = vsmask.f32 5376 }
  0xff   : > { %v892_v39 = vrot.slane %v890_v30, 5  ;;  %v895_v40 = vrot.slane %v893_v31, 4  ;;  %v1824_v41 = vpack.c.bf16 %v875_v36, %v875_v36 }
 0x101   : > { %v896_v43 = vor.u32 %v895_v40, %v892_v39  ;;  %v904_v44 = vsel %vm2208_vm2, %v892_v39, %v903_v35  ;;  %v926_v45 = vsel %vm2214_vm8, %v1824_v41, %v925_v38  ;;  %v929_v46 = vshrl.u32 %v1824_v41, 16  ;;  %vm938_vm2 = vmand %vm936_vm13, %vm937_vm4 }
 0x102   : > { %905 = vst [vmem:[#allocation2] sm:$0x8] %v904_v44  ;;  %927 = vst [vmem:[#allocation2 + $0x8] sm:$0x1] %v926_v45  ;;  %v1777_v49 = vrot.slane %v1824_v41, 11  ;;  %v932_v53 = vshll.u32 %v1824_v41, 16 }
 0x103   : > { %v897_v51 = vrot.slane %v896_v43, 4  ;;  %v931_v52 = vrot.slane %v929_v46, 7  ;;  %vm2343_vm4 = vcmask 1044480   ;;  %v1795_v41 = vld [vmem:[%s2329_s2 + $0x8] sm:$0x3]  ;;  %vm1418_vm8 = vcmask 1045504  }
 0x104   : > { %v951_v55 = vsel %vm947_vm3, %v1777_v49, %v950_v47  ;;  %vm2346_vm9 = vmmov %vm2343_vm4 }
 0x105   : > { %v910_v56 = vsel %vm2220_vm12, %v897_v51, %v909_v48  ;;  %v934_v57 = vor.u32 %v932_v53, %v931_v52  ;;  %v957_v58 = vsel %vm955_vm5, %v951_v55, %v956_v50  ;;  %v1402_v9 = vld [vmem:[#allocation2 + $0x4] sm:$0xc]  ;;  %v1809_v50 = vld [vmem:[%s2329_s2 + $0xe] sm:$0x3]  ;;  %vm2347_vm12 = vcmask 27648  }
 0x106   : > { %911 = vst [vmem:[#allocation2 + $0x4] sm:$0x3] %v910_v56  ;;  %958 = vst [vmem:[#allocation2 + $0xc] sm:$0x7] %v957_v58 }
 0x107   : > { %v940_v59 = vsel %vm938_vm2, %v934_v57, %v939_v54  ;;  %v1285_v57 = vsel %vm197_vm0, %v1795_v41, 0  ;;  %vm2348_vm13 = vmmov %vm2347_vm12 }
 0x108   : > { %941 = vst [vmem:[#allocation2 + $0x8] sm:$0xe] %v940_v59 }
 0x109   : > { %v959_v60 = vld [vmem:[#allocation2] sm:$0xf]  ;;  %v2034_v7 = vld [vmem:[#allocation2 + $0x8] ss:$0 sps:$4 sm:$0x77]  }
 0x10a   : > { %v1175_v62 = vld [vmem:[#allocation2] sm:$0x8]  ;;  %v2248_v14 = vld [vmem:[#allocation2 + $0x8] ss:$0 sps:$4 sm:$0xff]  }
 0x10b   : > { %v1105_v4 = vld [vmem:[#allocation2] sm:$0xe]  ;;  %v982_v25 = vshll.u32 %v2248_v14, 16  ;;  %v986_v26 = vshrl.u32 %v2248_v14, 16  ;;  %v1113_v28 = vrot.slane %v2248_v14, 1 }
 0x10d   : > { %v960_v61 = vld [vmem:[#allocation2 + $0x4] sm:$0xf]  ;;  %v1178_v2 = vld [vmem:[#allocation2 + $0xc] sm:$0x3]  ;;  %v984_v32 = vrot.slane %v982_v25, 1 }
 0x10e   : > { %v2234_v63 = vld [vmem:[#allocation2 + $0x4] sm:$0xf]  ;;  %v1779_v1 = vcombine.low %v959_v60, %v960_v61  ;;  %v2240_v6 = vld [vmem:[#allocation2 + $0xc] sm:$0xf]  ;;  %v1787_v11 = vcombine.low %v1105_v4, %v960_v61 }
 0x10f   : > { %v1791_v3 = vcombine.low %v1175_v62, %v2234_v63  ;;  %v1177_v10 = vld [vmem:[#allocation2 + $0x8] sm:$0xf]  ;;  %v2245_v12 = vld [vmem:[#allocation2 + $0xc] sm:$0x7]  ;;  %v2257_v19 = vcombine.low %v2240_v6, %v1482_v0  ;;  %v988_v38 = vor.u32 %v986_v26, %v984_v32  ;;  %v1405_v62 = vld [vmem:[#allocation2 + $0x10] sm:$0x1] }
 0x110   : > { %1945 = vmatprep.mubr.msk.bf16.mxu0 %vm190_vm1, %v1779_v1  ;;  %v1792_v13 = vcombine.low %v1177_v10, %v1178_v2  ;;  %v977_v15 = vshll.u32 %v1779_v1, 16  ;;  %v2250_v16 = vld [vmem:[#allocation2 + $0x8] sm:$0xf]  ;;  %v1796_v18 = vcombine.low %v1177_v10, %v2245_v12  ;;  %v975_v21 = vshrl.u32 %v1779_v1, 16  ;;  %v1804_v61 = vld [vmem:[%s2329_s2 + $0xc] sm:$0x3] }
 0x111   : > { %1946 = vmatmul.mubr.msk.bf16.vlgmr.msra.gmra.mxu0 %vm190_vm1, %v2034_v7  ;;  %v1191_v17 = vrot.slane %v1791_v3, 3  ;;  %v2254_v22 = vcombine.low %v1402_v9, %v2250_v16  ;;  %v1112_v27 = vrot.slane %v1787_v11, 1  ;;  %v1262_v35 = vshrl.u32 %v1791_v3, 16  ;;  %v1813_v7 = vld [vmem:[%s2329_s2 + $0x10] sm:$0x3] }
 0x112   : > { %1956 = vmatpush3.bf16.msra.mxu0 %v1201_v8  ;;  %v1192_v20 = vrot.slane %v1792_v13, 3  ;;  %v979_v24 = vrot.slane %v977_v15, 1  ;;  %v1270_v29 = vshrl.u32 %v1796_v18, 16  ;;  %v1273_v33 = vshll.u32 %v1796_v18, 16  ;;  %v1565_v8 = vld [vmem:[#allocation2 + $0x4] sm:$0x8] }
 0x113   : > { %2005 = vmatprep.subr.msk.bf16.mxu0 %vm197_vm0, %v1799_v5  ;;  %v1489_v36 = vshrl.u32 %v2254_v22, 16  ;;  %v1265_v39 = vshll.u32 %v1791_v3, 16  ;;  %v1492_v40 = vshll.u32 %v2254_v22, 16  ;;  %v1497_v23 = vshrl.u32 %v2257_v19, 16 }
 0x114   : > { %v1193_v30 = vsel %vm2343_vm4, %v1191_v17, %v1192_v20  ;;  %v980_v31 = vor.u32 %v979_v24, %v975_v21  ;;  %v1500_v43 = vshll.u32 %v2257_v19, 16  ;;  %v1114_v44 = vsel %vm1111_vm6, %v1112_v27, %v1113_v28 }
 0x115   : > { %1957 = vmatprep.mubr.msk.bf16.mxu0 %vm190_vm1, %v1193_v30  ;;  %v1800_v45 = vcombine.low %v2234_v63, %v1177_v10  ;;  %v1272_v46 = vrot.slane %v1270_v29, 3  ;;  %v1275_v47 = vrot.slane %v1273_v33, 4  ;;  %v1491_v48 = vrot.slane %v1489_v36, 2 }
 0x116   : > { %v985_v37 = vsel %vm2344_vm14, %v980_v31, %v984_v32  ;;  %v1494_v49 = vrot.slane %v1492_v40, 3  ;;  %v1264_v51 = vrot.slane %v1262_v35, 3  ;;  %v1267_v52 = vrot.slane %v1265_v39, 4 }
 0x117   : > { %1939 = vmatprep.mubr.msk.bf16.mxu1 %vm190_vm1, %v985_v37  ;;  %v1499_v53 = vrot.slane %v1497_v23, 2  ;;  %v1502_v54 = vrot.slane %v1500_v43, 3  ;;  %v1276_v55 = vor.u32 %v1275_v47, %v1272_v46  ;;  %v1801_v59 = vcombine.low %v2245_v12, %v2245_v12 }
 0x118   : > { %1940 = vmatmul.mubr.msk.bf16.vlgmr.msra.gmra.mxu1 %vm190_vm1, %v988_v38  ;;  %v1495_v56 = vor.u32 %v1494_v49, %v1491_v48  ;;  %v1268_v58 = vor.u32 %v1267_v52, %v1264_v51  ;;  %v1512_v0 = vsel %vm197_vm0, %v1809_v50, 0  ;;  %v1806_v2 = vcombine.low %v2240_v6, %v1405_v62 }
 0x119   : > { %1958 = vmatmul.mubr.msk.bf16.vlgmr.msra.gmra.mxu0 %vm190_vm1, %v1192_v20  ;;  %1950 = vmatpush3.bf16.msra.mxu1 %v1122_v34  ;;  %v1503_v60 = vor.u32 %v1502_v54, %v1499_v53  ;;  %v1419_v3 = vrot.slane %v2254_v22, 2  ;;  %v1429_v4 = vsel %vm197_vm0, %v1804_v61, 0  ;;  %v1814_v10 = vcombine.low %v1565_v8, %v2250_v16 }
 0x11a   : > { %1951 = vmatprep.mubr.msk.bf16.mxu1 %vm190_vm1, %v1114_v44  ;;  %1969 = vmatprep.mubr.msk.bf16.mxu0 %vm190_vm1, %v1800_v45  ;;  %v1277_v63 = vsel %vm1260_vm15, %v1268_v58, %v1276_v55  ;;  %v1420_v5 = vrot.slane %v1806_v2, 2  ;;  %v1581_v11 = vsel %vm197_vm0, %v1813_v7, 0  ;;  %v1572_v12 = vrot.slane %v2257_v19, 3 }
 0x11b   : > { %2004 = vmatprep.subr.msk.bf16.mxu1 %vm197_vm0, %v1795_v41  ;;  %1968 = vmatpush3.bf16.msra.mxu0 %v1349_v42  ;;  %v1504_v1 = vsel %vm2345_vm7, %v1495_v56, %v1503_v60  ;;  %v1571_v6 = vrot.slane %v1814_v10, 3 }
 0x11c   : > { %2007 = vmatprep.subr.msk.bf16.mxu0 %vm197_vm0, %v1809_v50  ;;  %v1421_v9 = vsel %vm1418_vm8, %v1419_v3, %v1420_v5 }
 0x11d   : > { %v1573_v13 = vsel %vm2346_vm9, %v1571_v6, %v1572_v12 }
 0x120   : > { %1952 = vmatmul.mubr.msk.bf16.vlgmr.msra.gmra.mxu1 %vm190_vm1, %v1113_v28 }
 0x121   : > { %1970 = vmatmul.mubr.msk.bf16.vlgmr.msra.gmra.mxu0 %vm190_vm1, %v1801_v59  ;;  %1962 = vmatpush3.bf16.msra.mxu1 %v1285_v57 }
 0x122   : > { %1963 = vmatprep.mubr.msk.bf16.mxu1 %vm190_vm1, %v1277_v63  ;;  %1981 = vmatprep.mubr.msk.bf16.mxu0 %vm190_vm1, %v1504_v1 }
 0x123   : > { %2006 = vmatprep.subr.msk.bf16.mxu1 %vm197_vm0, %v1804_v61  ;;  %1980 = vmatpush3.bf16.msra.mxu0 %v1512_v0 }
 0x128   : > { %1964 = vmatmul.mubr.msk.bf16.vlgmr.msra.gmra.mxu1 %vm190_vm1, %v1276_v55 }
 0x129   : > { %1982 = vmatmul.mubr.msk.bf16.vlgmr.msra.gmra.mxu0 %vm190_vm1, %v1503_v60  ;;  %1974 = vmatpush3.bf16.msra.mxu1 %v1429_v4 }
 0x12a   : > { %1975 = vmatprep.mubr.msk.bf16.mxu1 %vm190_vm1, %v1421_v9  ;;  %2008 = vmatprep.subr.msk.bf16.mxu1 %vm197_vm0, %v1813_v7 }
 0x130   : > { %1976 = vmatmul.mubr.msk.bf16.vlgmr.msra.gmra.mxu1 %vm190_vm1, %v1420_v5 }
 0x131   : > { %1986 = vmatpush3.bf16.msra.mxu1 %v1581_v11  ;;  %1987 = vmatprep.mubr.msk.bf16.mxu1 %vm190_vm1, %v1573_v13 }
 0x138   : > { %1988 = vmatmul.mubr.msk.bf16.vlgmr.msra.gmra.mxu1 %vm190_vm1, %v1572_v12 }
 0x1d1   : > { %v1947_v14 = vpop.f32.mrf.mxu0 }
 0x1d3   : > { %v1091_v15 = vpop.f32.mrf.mxu0 }
 0x1d5   : > { %v1948_v16 = vpop.f32.mrf.mxu0 }
 0x1d7   : > { %v1094_v17 = vpop.f32.mrf.mxu0 }
 0x1d8   : > { %v1941_v18 = vpop.f32.mrf.mxu1 }
 0x1d9   : > { %v1959_v22 = vpop.f32.mrf.mxu0  ;;  %v1100_v33 = vadd.f32 %v1947_v14, %v1941_v18 }
 0x1da   : > { %v1032_v20 = vpop.f32.mrf.mxu1 }
 0x1db   : > { %v1237_v21 = vpop.f32.mrf.mxu0  ;;  %v1092_v36 = vadd.f32 %v1091_v15, %v1032_v20 }
 0x1dc   : > { %v1942_v24 = vpop.f32.mrf.mxu1 }
 0x1dd   : > { %v1960_v25 = vpop.f32.mrf.mxu0 }
 0x1de   : > { %v1035_v19 = vpop.f32.mrf.mxu1 }
 0x1df   : > { %v1240_v26 = vpop.f32.mrf.mxu0  ;;  %v1095_v23 = vadd.f32 %v1094_v17, %v1035_v19 }
 0x1e0   : > { %v1953_v27 = vpop.f32.mrf.mxu1 }
 0x1e1   : > { %v1971_v28 = vpop.f32.mrf.mxu0  ;;  %v1174_v37 = vadd.f32 %v1953_v27, %v1100_v33 }
 0x1e2   : > { %v1158_v29 = vpop.f32.mrf.mxu1 }
 0x1e3   : > { %v1385_v30 = vpop.f32.mrf.mxu0  ;;  %v1172_v40 = vadd.f32 %v1158_v29, %v1092_v36  ;;  %v1253_v43 = vadd.f32 %v1959_v22, %v1174_v37 }
 0x1e4   : > { %v1954_v31 = vpop.f32.mrf.mxu1 }
 0x1e5   : > { %v1972_v32 = vpop.f32.mrf.mxu0  ;;  %v1251_v48 = vadd.f32 %v1237_v21, %v1172_v40 }
 0x1e6   : > { %v1161_v34 = vpop.f32.mrf.mxu1 }
 0x1e7   : > { %v1388_v35 = vpop.f32.mrf.mxu0  ;;  %v1173_v46 = vadd.f32 %v1161_v34, %v1095_v23 }
 0x1e8   : > { %v1965_v38 = vpop.f32.mrf.mxu1 }
 0x1e9   : > { %v1983_v39 = vpop.f32.mrf.mxu0  ;;  %v1337_v47 = vadd.f32 %v1965_v38, %v1253_v43  ;;  %v1252_v52 = vadd.f32 %v1240_v26, %v1173_v46 }
 0x1ea   : > { %v1321_v41 = vpop.f32.mrf.mxu1 }
 0x1eb   : > { %v1548_v42 = vpop.f32.mrf.mxu0  ;;  %v1335_v50 = vadd.f32 %v1321_v41, %v1251_v48  ;;  %v1401_v53 = vadd.f32 %v1971_v28, %v1337_v47 }
 0x1ec   : > { %v1966_v44 = vpop.f32.mrf.mxu1 }
 0x1ed   : > { %v1984_v45 = vpop.f32.mrf.mxu0  ;;  %v1399_v57 = vadd.f32 %v1385_v30, %v1335_v50 }
 0x1ee   : > { %v1324_v49 = vpop.f32.mrf.mxu1 }
 0x1ef   : > { %v1336_v55 = vadd.f32 %v1324_v49, %v1252_v52  ;;  %v1551_v7 = vpop.f32.mrf.mxu0 }
 0x1f0   : > { %v1977_v51 = vpop.f32.mrf.mxu1 }
 0x1f1   : > { %v1481_v56 = vadd.f32 %v1977_v51, %v1401_v53  ;;  %v1400_v61 = vadd.f32 %v1388_v35, %v1336_v55 }
 0x1f2   : > { %v1465_v54 = vpop.f32.mrf.mxu1 }
 0x1f3   : > { %v1479_v59 = vadd.f32 %v1465_v54, %v1399_v57  ;;  %v1564_v62 = vadd.f32 %v1983_v39, %v1481_v56 }
 0x1f4   : > { %v1978_v58 = vpop.f32.mrf.mxu1 }
 0x1f5   : > { %v1562_v2 = vadd.f32 %v1548_v42, %v1479_v59 }
 0x1f6   : > { %v1468_v60 = vpop.f32.mrf.mxu1 }
 0x1f7   : > { %v1480_v0 = vadd.f32 %v1468_v60, %v1400_v61 }
 0x1f8   : > { %v1989_v63 = vpop.f32.mrf.mxu1 }
 0x1f9   : > { %v1633_v1 = vadd.f32 %v1989_v63, %v1564_v62  ;;  %v1563_v6 = vadd.f32 %v1551_v7, %v1480_v0 }
 0x1fa   : > { %v1617_v3 = vpop.f32.mrf.mxu1 }
 0x1fb   : > { %vm1636_vm0 = vcmp.ge.f32.partialorder %v1633_v1, 0.0  ;;  %v1639_v4 = vmul.f32 0.1, %v1633_v1  ;;  %v1631_v5 = vadd.f32 %v1617_v3, %v1562_v2 }
 0x1fc   : > { %v1990_v8 = vpop.f32.mrf.mxu1 }
 0x1fd   : > { %v1642_v9 = vsel %vm1636_vm0, %v1633_v1, %v1639_v4  ;;  %vm1634_vm1 = vcmp.ge.f32.partialorder %v1631_v5, 0.0  ;;  %v1637_v10 = vmul.f32 0.1, %v1631_v5 }
 0x1fe   : > { %v1828_v11 = vpack.c.bf16 %v1642_v9, %v1642_v9  ;;  %v1620_v12 = vpop.f32.mrf.mxu1 }
 0x1ff   : > { %v1640_v13 = vsel %vm1634_vm1, %v1631_v5, %v1637_v10  ;;  %v1632_v14 = vadd.f32 %v1620_v12, %v1563_v6 }
 0x200   : > { %1659 = vst.msk [vmem:[%s170_s5 + $0x8] sm:$0x7] %vm953_vm10, %v1828_v11  ;;  %v1826_v15 = vpack.c.bf16 %v1640_v13, %v1640_v13 }
 0x201   : > { %vm1635_vm11 = vcmp.ge.f32.partialorder %v1632_v14, 0.0  ;;  %v1638_v16 = vmul.f32 0.1, %v1632_v14 }
 0x202   : > { %1656 = vst.msk [vmem:[%s170_s5] sm:$0xf] %vm2347_vm12, %v1826_v15 }
 0x203   : > { %v1641_v17 = vsel %vm1635_vm11, %v1632_v14, %v1638_v16 }
 0x204   : > { %v1827_v18 = vpack.c.bf16 %v1641_v17, %v1641_v17 }
 0x206   : > { %1657 = vst.msk [vmem:[%s170_s5 + $0x4] sm:$0xf] %vm2348_vm13, %v1827_v18 }
 0x207 PF: > { %s13_s12 = sadd.s32 1, %s2052_s12  }
 0x208   : > { %p10_p4 = scmp.ge.s32.totalorder %s13_s12, 4  }
 0x20a   :  { %12 = sbr.rel (!%p10_p4) target bundleno = 1 (0x1), region = 81 }

// kernel: unet2d_forward.9
= control target key start
LH: loop header
LB: loop body
LE: loop exit
PB: predicated region body
PF: predicated region fallthrough
CT: control target
= control target key end

     0   :  { %s1521_s12 = smov 0   ;;  %s1695_s0 = inlined_call_operand.vmem [shape: bf16[2,4,9,4], index: 0, kind: input, shape index: {}]   ;;  %s1696_s1 = inlined_call_operand.vmem [shape: bf16[9,4,4], index: 1, kind: input, shape index: {}]   ;;  %s1697_s2 = inlined_call_operand.vmem [shape: bf16[9,4,4], index: 2, kind: input, shape index: {}]   ;;  %s1698_s3 = inlined_call_operand.vmem [shape: bf16[2,6,4], index: 3, kind: output, shape index: {}]  }
   0x1 LB: > { %s1259_s13 = sadd.s32 4294967295, %s1496_s12   ;;  %p1263_p0 = scmp.ge.s32.totalorder %s1496_s12, 1  ;;  %s1496_s12 = sphi %s1521_s12, %s13_s12  }
   0x2   : > { %p137_p1 = scmp.lt.s32.totalorder %s1496_s12, 3 }
   0x4   : > { %p138_p2 = pnand %p1263_p0, %p137_p1 }
   0x5   : > { %p160_p3 = scmp.lt.s32.totalorder (!%p138_p2), %s1259_s13, 1 }
   0x6   : > { %141 = sbr.rel (%p138_p2) target bundleno = 490 (0x1ea), region = 32 }
   0xb   : > { %v1268_v0 = vld [vmem:[%s1696_s1 + $0x2] sm:$0x3]  ;;  %vm180_vm0 = vcmask 1041408   ;;  %v171_v1 = vld [vmem:[%s1696_s1] sm:$0x3]  ;;  %v1498_v2 = vmov 0.0  }
   0xc   : > { %1359 = vmatprep.subr.bf16.mxu0 %v1498_v2  ;;  %v182_v3 = vsel %vm180_vm0, %v1268_v0, 0  ;;  %1365 = vmatprep.subr.bf16.mxu1 %v1498_v2  ;;  %v228_v4 = vsel %vm180_vm0, %v171_v1, 0  ;;  %vm1499_vm1 = vmmov 0   ;;  %s1700_s13 = smov (!%p160_p3, %s1259_s13), 1  ;;  %v1271_v5 = vld [vmem:[%s1696_s1 + $0x4] sm:$0x3] }
   0xd   : > { %1360 = vmatpush3.bf16.msra.mxu0 %v182_v3  ;;  %1366 = vmatpush3.bf16.msra.mxu1 %v228_v4  ;;  %v1275_v6 = vld [vmem:[%s1696_s1 + $0x6] sm:$0x3]  ;;  %s1321_s22 = sshll.u32 %s1700_s13, 5  ;;  %vm176_vm2 = vcmask 31744   ;;  %v286_v7 = vsel %vm180_vm0, %v1271_v5, 0  ;;  %vm673_vm3 = vcmask 27648  }
   0xe   : > { %1361 = vmatprep.mubr.msk.bf16.mxu0 %vm1499_vm1, %v1498_v2  ;;  %1367 = vmatprep.mubr.msk.bf16.mxu1 %vm1499_vm1, %v1498_v2  ;;  %s1557_s25 = scalar_lea.vmem %s1695_s0, %s1321_s22  ;;  %v337_v8 = vsel %vm180_vm0, %v1275_v6, 0  ;;  %v1278_v16 = vld [vmem:[%s1696_s1 + $0x8] sm:$0x3]  ;;  %v1280_v17 = vld [vmem:[%s1696_s1 + $0xa] sm:$0x3]  ;;  %v1500_v47 = vmov 0  }
   0xf   : > { %1371 = vmatprep.subr.bf16.mxu0 %v1498_v2  ;;  %1377 = vmatprep.subr.bf16.mxu1 %v1498_v2  ;;  %v1267_v9 = vld [vmem:[%s1557_s25 + $0x8] sm:$0x7]  ;;  %v170_v10 = vld [vmem:[%s1557_s25] sm:$0x7]  ;;  %v1274_v11 = vld [vmem:[%s1557_s25 + $0x10] sm:$0x7] }
  0x10   : > { %1362 = vmatmul.mubr.msk.bf16.vlgmr.msra.gmra.mxu0 %vm176_vm2, %v1267_v9  ;;  %1368 = vmatmul.mubr.msk.bf16.vlgmr.msra.gmra.mxu1 %vm176_vm2, %v170_v10  ;;  %v1272_v12 = vcombine.low %v170_v10, %v170_v10  ;;  %v1281_v13 = vcombine.low %v1274_v11, %v1274_v11  ;;  %v388_v21 = vsel %vm180_vm0, %v1278_v16, 0  ;;  %v447_v22 = vsel %vm180_vm0, %v1280_v17, 0  ;;  %v1480_v23 = vld [vmem:[%s1557_s25] ss:$0 sps:$4 sm:$0xee]   ;;  %s1266_s29 = sshll.u32 %s1700_s13, 2 }
  0x11   : > { %1372 = vmatpush3.bf16.msra.mxu0 %v286_v7  ;;  %1378 = vmatpush3.bf16.msra.mxu1 %v337_v8  ;;  %v1481_v26 = vld [vmem:[%s1557_s25 + $0x8] ss:$0 sps:$4 sm:$0xee]   ;;  %v1283_v27 = vld [vmem:[%s1696_s1 + $0xc] sm:$0x3]  ;;  %v497_v29 = vshrl.u32 %v1480_v23, 16  ;;  %s168_s5 = scalar_lea.vmem %s1698_s3, %s1266_s29 }
  0x12   : > { %v276_v14 = vshrl.u32 %v1272_v12, 16  ;;  %v278_v15 = vshll.u32 %v1272_v12, 16  ;;  %1373 = vmatprep.mubr.msk.bf16.mxu0 %vm1499_vm1, %v1498_v2  ;;  %1379 = vmatprep.mubr.msk.bf16.mxu1 %vm1499_vm1, %v1498_v2  ;;  %v439_v19 = vshll.u32 %v1281_v13, 16  ;;  %v437_v24 = vshrl.u32 %v1281_v13, 16  ;;  %v1287_v28 = vld [vmem:[%s1696_s1 + $0xe] sm:$0x3] }
  0x13   : > { %1383 = vmatprep.subr.bf16.mxu0 %v1498_v2  ;;  %1389 = vmatprep.subr.bf16.mxu1 %v1498_v2  ;;  %v500_v31 = vshll.u32 %v1480_v23, 16  ;;  %v558_v32 = vshrl.u32 %v1481_v26, 16  ;;  %v561_v33 = vshll.u32 %v1481_v26, 16  ;;  %v1277_v34 = vld [vmem:[%s1557_s25 + $0x18] sm:$0x7]  ;;  %v508_v35 = vsel %vm180_vm0, %v1283_v27, 0 }
  0x14   : > { %v280_v18 = vrot.slane %v278_v15, 1  ;;  %v441_v25 = vrot.slane %v439_v19, 1  ;;  %v569_v36 = vsel %vm180_vm0, %v1287_v28, 0  ;;  %v499_v37 = vrot.slane %v497_v29, 1  ;;  %v1290_v41 = vld [vmem:[%s1696_s1 + $0x10] sm:$0x3] }
  0x15   : > { %v502_v38 = vrot.slane %v500_v31, 2  ;;  %v560_v39 = vrot.slane %v558_v32, 1  ;;  %v563_v40 = vrot.slane %v561_v33, 2  ;;  %v626_v44 = vsel %vm180_vm0, %v1290_v41, 0  ;;  %v1482_v45 = vld [vmem:[%s1557_s25] sm:$0x1c]  }
  0x16   : > { %v281_v20 = vor.u32 %v280_v18, %v276_v14  ;;  %v442_v30 = vor.u32 %v441_v25, %v437_v24  ;;  %v621_v46 = vrot.slane %v1482_v45, 2  ;;  %674 = vst.msk [vmem:[#allocation2] sm:$0xf] %vm673_vm3, %v1500_v47  ;;  %675 = vst.msk [vmem:[#allocation2 + $0x4] sm:$0xf] %vm673_vm3, %v1500_v47  ;;  %vm697_vm5 = vcmask 25600  }
  0x17   : > { %v503_v42 = vor.u32 %v502_v38, %v499_v37  ;;  %v564_v43 = vor.u32 %v563_v40, %v560_v39  ;;  %v704_v48 = vld [vmem:[%s1697_s2] sm:$0x3]  ;;  %v1295_v49 = vld [vmem:[%s1697_s2 + $0x2] sm:$0x3]  ;;  %vm698_vm6 = vsmask.f32 1282 }
  0x18   : > { %1374 = vmatmul.mubr.msk.bf16.vlgmr.msra.gmra.mxu0 %vm176_vm2, %v281_v20  ;;  %1380 = vmatmul.mubr.msk.bf16.vlgmr.msra.gmra.mxu1 %vm176_vm2, %v1274_v11  ;;  %v768_v50 = vsel %vm180_vm0, %v704_v48, 0  ;;  %v722_v51 = vsel %vm180_vm0, %v1295_v49, 0  ;;  %vm688_vm7 = vcmask 27650   ;;  %vm699_vm8 = vmand %vm697_vm5, %vm698_vm6  ;;  %vm689_vm9 = vsmask.f32 3338 }
  0x19   : > { %1384 = vmatpush3.bf16.msra.mxu0 %v388_v21  ;;  %1390 = vmatpush3.bf16.msra.mxu1 %v447_v22  ;;  %vm690_vm10 = vmand %vm688_vm7, %vm689_vm9  ;;  %vm1204_vm12 = vcmask 26624  }
  0x1a   : > { %1385 = vmatprep.mubr.msk.bf16.mxu0 %vm1499_vm1, %v1498_v2  ;;  %1391 = vmatprep.mubr.msk.bf16.mxu1 %vm1499_vm1, %v1498_v2 }
  0x1b   : > { %1395 = vmatprep.subr.bf16.mxu0 %v1498_v2  ;;  %1401 = vmatprep.subr.bf16.mxu1 %v1498_v2 }
  0x1d   : > { %v1483_v49 = vld [vmem:[#allocation2] ss:$0 sps:$4 sm:$0xff]  }
  0x20   : > { %1386 = vmatmul.mubr.msk.bf16.vlgmr.msra.gmra.mxu0 %vm176_vm2, %v1277_v34  ;;  %1392 = vmatmul.mubr.msk.bf16.vlgmr.msra.gmra.mxu1 %vm176_vm2, %v442_v30 }
  0x21   : > { %1396 = vmatpush3.bf16.msra.mxu0 %v508_v35  ;;  %1402 = vmatpush3.bf16.msra.mxu1 %v569_v36  ;;  %v700_v36 = vld [vmem:[#allocation2 + $0x4] sm:$0x3] }
  0x22   : > { %1397 = vmatprep.mubr.msk.bf16.mxu0 %vm1499_vm1, %v1498_v2  ;;  %1403 = vmatprep.mubr.msk.bf16.mxu1 %vm1499_vm1, %v1498_v2 }
  0x23   : > { %1407 = vmatprep.subr.bf16.mxu0 %v1498_v2  ;;  %1413 = vmatprep.subr.bf16.mxu1 %v1498_v2 }
  0x28   : > { %1398 = vmatmul.mubr.msk.bf16.vlgmr.msra.gmra.mxu0 %vm176_vm2, %v503_v42  ;;  %1404 = vmatmul.mubr.msk.bf16.vlgmr.msra.gmra.mxu1 %vm176_vm2, %v564_v43  ;;  %v691_v43 = vld [vmem:[#allocation2] sm:$0xc] }
  0x29   : > { %1408 = vmatpush3.bf16.msra.mxu0 %v626_v44  ;;  %1409 = vmatprep.mubr.msk.bf16.mxu0 %vm1499_vm1, %v1498_v2 }
  0x2a   : > { %1419 = vmatprep.subr.bf16.mxu0 %v1498_v2  ;;  %1415 = vmatprep.mubr.msk.bf16.mxu1 %vm1499_vm1, %v1498_v2 }
  0x2b   : > { %1414 = vmatpush3.bf16.msra.mxu1 %v722_v51  ;;  %v714_v51 = vshll.u32 %v1483_v49, 16 }
  0x2c   : > { %1425 = vmatprep.subr.bf16.mxu1 %v1498_v2 }
  0x30   : > { %1410 = vmatmul.mubr.msk.bf16.vlgmr.msra.gmra.mxu0 %vm176_vm2, %v621_v46  ;;  %v1302_v46 = vld [vmem:[%s1697_s2 + $0x6] sm:$0x3] }
  0x31   : > { %1421 = vmatprep.mubr.msk.bf16.mxu0 %vm1499_vm1, %v1498_v2  ;;  %1420 = vmatpush3.bf16.msra.mxu0 %v768_v50  ;;  %v878_v47 = vsel %vm180_vm0, %v1302_v46, 0 }
  0x32   : > { %1431 = vmatprep.subr.bf16.mxu0 %v1498_v2 }
  0xd0   : > { %v218_v52 = vpop.f32.mrf.mxu0  ;;  %v264_v53 = vpop.f32.mrf.mxu1 }
  0xd1   : > { %v265_v3 = vadd.f32 %v264_v53, %v218_v52  ;;  %v1299_v53 = vld [vmem:[%s1697_s2 + $0x4] sm:$0x3] }
  0xd2   : > { %v1363_v54 = vpop.f32.mrf.mxu0  ;;  %v1369_v55 = vpop.f32.mrf.mxu1 }
  0xd3   : > { %v712_v55 = vshrl.u32 %v1483_v49, 16 }
  0xd4   : > { %v221_v56 = vpop.f32.mrf.mxu0  ;;  %v267_v57 = vpop.f32.mrf.mxu1 }
  0xd5   : > { %v716_v56 = vrot.slane %v714_v51, 1  ;;  %v1308_v57 = vld [vmem:[%s1697_s2 + $0xa] sm:$0x3] }
  0xd6   : > { %v1364_v58 = vpop.f32.mrf.mxu0  ;;  %v1370_v59 = vpop.f32.mrf.mxu1 }
  0xd7   : > { %v717_v58 = vor.u32 %v716_v56, %v712_v55  ;;  %v821_v59 = vsel %vm180_vm0, %v1299_v53, 0 }
  0xd8   : > { %v322_v60 = vpop.f32.mrf.mxu0  ;;  %v373_v61 = vpop.f32.mrf.mxu1 }
  0xd9   : > { %v328_v6 = vadd.f32 %v322_v60, %v265_v3  ;;  %1416 = vmatmul.mubr.msk.bf16.vlgmr.msra.gmra.mxu1 %vm176_vm2, %v717_v58  ;;  %v1305_v3 = vld [vmem:[%s1697_s2 + $0x8] sm:$0x3] }
  0xda   : > { %v1375_v62 = vpop.f32.mrf.mxu0  ;;  %v1381_v63 = vpop.f32.mrf.mxu1  ;;  %1426 = vmatpush3.bf16.msra.mxu1 %v821_v59  ;;  %1427 = vmatprep.mubr.msk.bf16.mxu1 %vm1499_vm1, %v1498_v2 }
  0xdb   : > { %v379_v11 = vadd.f32 %v373_v61, %v328_v6  ;;  %v993_v61 = vsel %vm180_vm0, %v1308_v57, 0  ;;  %1437 = vmatprep.subr.bf16.mxu1 %v1498_v2  ;;  %v1313_v6 = vld [vmem:[%s1697_s2 + $0xe] sm:$0x3] }
  0xdc   : > { %v325_v0 = vpop.f32.mrf.mxu0  ;;  %v376_v1 = vpop.f32.mrf.mxu1 }
  0xdd   : > { %v1485_v0 = vld [vmem:[#allocation2] ss:$0 sps:$4 sm:$0xee]  }
  0xde   : > { %v1376_v4 = vpop.f32.mrf.mxu0  ;;  %v1382_v5 = vpop.f32.mrf.mxu1 }
  0xe0   : > { %v424_v7 = vpop.f32.mrf.mxu0  ;;  %v483_v8 = vpop.f32.mrf.mxu1 }
  0xe1   : > { %v430_v14 = vadd.f32 %v424_v7, %v379_v11  ;;  %v816_v7 = vrot.slane %v1485_v0, 1 }
  0xe2   : > { %v1387_v9 = vpop.f32.mrf.mxu0  ;;  %v1393_v10 = vpop.f32.mrf.mxu1 }
  0xe3   : > { %v489_v19 = vadd.f32 %v483_v8, %v430_v14  ;;  %v939_v8 = vsel %vm180_vm0, %v1305_v3, 0  ;;  %1428 = vmatmul.mubr.msk.bf16.vlgmr.msra.gmra.mxu1 %vm176_vm2, %v816_v7 }
  0xe4   : > { %v427_v12 = vpop.f32.mrf.mxu0  ;;  %v486_v13 = vpop.f32.mrf.mxu1  ;;  %1438 = vmatpush3.bf16.msra.mxu1 %v939_v8  ;;  %1439 = vmatprep.mubr.msk.bf16.mxu1 %vm1499_vm1, %v1498_v2 }
  0xe5   : > { %v1103_v12 = vsel %vm180_vm0, %v1313_v6, 0  ;;  %1449 = vmatprep.subr.bf16.mxu1 %v1498_v2 }
  0xe6   : > { %v1388_v15 = vpop.f32.mrf.mxu0  ;;  %v1394_v16 = vpop.f32.mrf.mxu1 }
  0xe7   : > { %v1311_v16 = vld [vmem:[%s1697_s2 + $0xc] sm:$0x3] }
  0xe8   : > { %v544_v17 = vpop.f32.mrf.mxu0  ;;  %v605_v18 = vpop.f32.mrf.mxu1 }
  0xe9   : > { %v550_v22 = vadd.f32 %v544_v17, %v489_v19 }
  0xea   : > { %v1399_v20 = vpop.f32.mrf.mxu0  ;;  %v1405_v21 = vpop.f32.mrf.mxu1 }
  0xeb   : > { %v611_v27 = vadd.f32 %v605_v18, %v550_v22  ;;  %v1043_v20 = vsel %vm180_vm0, %v1311_v16, 0  ;;  %v1316_v22 = vld [vmem:[%s1697_s2 + $0x10] sm:$0x3] }
  0xec   : > { %v547_v23 = vpop.f32.mrf.mxu0  ;;  %v608_v24 = vpop.f32.mrf.mxu1 }
  0xed   : > { %v1157_v23 = vsel %vm180_vm0, %v1316_v22, 0 }
  0xee   : > { %v1400_v25 = vpop.f32.mrf.mxu0  ;;  %v1406_v26 = vpop.f32.mrf.mxu1 }
  0xf0   : > { %v662_v28 = vpop.f32.mrf.mxu0 }
  0xf1   : > { %v668_v29 = vadd.f32 %v662_v28, %v611_v27 }
  0xf2   : > { %v1411_v30 = vpop.f32.mrf.mxu0 }
  0xf3   : > { %vm669_vm4 = vcmp.ge.f32.partialorder %v668_v29, 0.0  ;;  %v670_v31 = vmul.f32 0.1, %v668_v29 }
  0xf4   : > { %v665_v32 = vpop.f32.mrf.mxu0 }
  0xf5   : > { %v671_v33 = vsel %vm669_vm4, %v668_v29, %v670_v31 }
  0xf6   : > { %v1322_v34 = vpack.c.bf16 %v671_v33, %v671_v33  ;;  %v1412_v35 = vpop.f32.mrf.mxu0 }
  0xf8   : > { %v680_v37 = vshrl.u32 %v1322_v34, 16  ;;  %v683_v38 = vshll.u32 %v1322_v34, 16  ;;  %v1294_v39 = vrot.slane %v1322_v34, 9 }
  0xfa   : > { %v682_v40 = vrot.slane %v680_v37, 5  ;;  %v685_v41 = vrot.slane %v683_v38, 6  ;;  %v701_v42 = vsel %vm699_vm8, %v1294_v39, %v700_v36 }
  0xfb   : > { %702 = vst [vmem:[#allocation2 + $0x4] sm:$0x3] %v701_v42 }
  0xfc   : > { %v686_v44 = vor.u32 %v685_v41, %v682_v40 }
  0xfe   : > { %v692_v45 = vsel %vm690_vm10, %v686_v44, %v691_v43 }
  0xff   : > { %693 = vst [vmem:[#allocation2] sm:$0xc] %v692_v45 }
 0x102   : > { %v865_v52 = vld [vmem:[#allocation2 + $0x4] sm:$0x1] }
 0x103   : > { %v921_v63 = vld [vmem:[#allocation2 + $0x4] sm:$0x3] }
 0x104   : > { %v1488_v5 = vld [vmem:[#allocation2 + $0x4] ss:$0 sps:$4 sm:$0xff]  }
 0x105   : > { %v1095_v13 = vshll.u32 %v1488_v5, 16  ;;  %v1093_v18 = vshrl.u32 %v1488_v5, 16  ;;  %v1036_v24 = vld [vmem:[#allocation2 + $0x4] sm:$0x7] }
 0x106   : > { %v703_v48 = vld [vmem:[#allocation2] sm:$0x7]  ;;  %v982_v62 = vld [vmem:[#allocation2] sm:$0x8] }
 0x107   : > { %1422 = vmatmul.mubr.msk.bf16.vlgmr.msra.gmra.mxu0 %vm176_vm2, %v703_v48  ;;  %v864_v50 = vld [vmem:[#allocation2] sm:$0xc]  ;;  %v1309_v4 = vcombine.low %v982_v62, %v921_v63  ;;  %v1097_v17 = vrot.slane %v1095_v13, 1  ;;  %v1489_v25 = vld [vmem:[#allocation2 + $0x4] ss:$0 sps:$4 sm:$0xee]  }
 0x108   : > { %1432 = vmatpush3.bf16.msra.mxu0 %v878_v47  ;;  %1433 = vmatprep.mubr.msk.bf16.mxu0 %vm1499_vm1, %v1498_v2  ;;  %v1303_v54 = vcombine.low %v864_v50, %v865_v52  ;;  %v1306_v1 = vcombine.low %v864_v50, %v921_v63  ;;  %v1152_v26 = vrot.slane %v1489_v25, 1 }
 0x109   : > { %1443 = vmatprep.subr.bf16.mxu0 %v1498_v2  ;;  %v988_v11 = vrot.slane %v1309_v4, 3  ;;  %v1098_v21 = vor.u32 %v1097_v17, %v1093_v18 }
 0x10a   : > { %v873_v60 = vrot.slane %v1303_v54, 2  ;;  %v928_v9 = vshrl.u32 %v1306_v1, 16  ;;  %v931_v10 = vshll.u32 %v1306_v1, 16 }
 0x10c   : > { %v930_v14 = vrot.slane %v928_v9, 2  ;;  %v933_v15 = vrot.slane %v931_v10, 3 }
 0x10e   : > { %v934_v19 = vor.u32 %v933_v15, %v930_v14 }
 0x10f   : > { %1434 = vmatmul.mubr.msk.bf16.vlgmr.msra.gmra.mxu0 %vm176_vm2, %v873_v60 }
 0x110   : > { %1444 = vmatpush3.bf16.msra.mxu0 %v993_v61  ;;  %1445 = vmatprep.mubr.msk.bf16.mxu0 %vm1499_vm1, %v1498_v2 }
 0x111   : > { %1455 = vmatprep.subr.bf16.mxu0 %v1498_v2  ;;  %1440 = vmatmul.mubr.msk.bf16.vlgmr.msra.gmra.mxu1 %vm176_vm2, %v934_v19 }
 0x112   : > { %1450 = vmatpush3.bf16.msra.mxu1 %v1043_v20  ;;  %1451 = vmatprep.mubr.msk.bf16.mxu1 %vm1499_vm1, %v1498_v2 }
 0x113   : > { %1461 = vmatprep.subr.bf16.mxu1 %v1498_v2 }
 0x117   : > { %1446 = vmatmul.mubr.msk.bf16.vlgmr.msra.gmra.mxu0 %vm176_vm2, %v988_v11 }
 0x118   : > { %1456 = vmatpush3.bf16.msra.mxu0 %v1103_v12  ;;  %1457 = vmatprep.mubr.msk.bf16.mxu0 %vm1499_vm1, %v1498_v2 }
 0x119   : > { %1452 = vmatmul.mubr.msk.bf16.vlgmr.msra.gmra.mxu1 %vm176_vm2, %v1036_v24 }
 0x11a   : > { %1462 = vmatpush3.bf16.msra.mxu1 %v1157_v23  ;;  %1463 = vmatprep.mubr.msk.bf16.mxu1 %vm1499_vm1, %v1498_v2 }
 0x11f   : > { %1458 = vmatmul.mubr.msk.bf16.vlgmr.msra.gmra.mxu0 %vm176_vm2, %v1098_v21 }
 0x121   : > { %1464 = vmatmul.mubr.msk.bf16.vlgmr.msra.gmra.mxu1 %vm176_vm2, %v1152_v26 }
 0x199   : > { %v758_v31 = vpop.f32.mrf.mxu1 }
 0x19b   : > { %v1417_v33 = vpop.f32.mrf.mxu1 }
 0x19d   : > { %v761_v35 = vpop.f32.mrf.mxu1 }
 0x19f   : > { %v1418_v37 = vpop.f32.mrf.mxu1 }
 0x1a3   : > { %v857_v39 = vpop.f32.mrf.mxu1 }
 0x1a5   : > { %v1429_v41 = vpop.f32.mrf.mxu1 }
 0x1a7   : > { %v860_v42 = vpop.f32.mrf.mxu1 }
 0x1a9   : > { %v1430_v45 = vpop.f32.mrf.mxu1 }
 0x1c7   : > { %v804_v27 = vpop.f32.mrf.mxu0 }
 0x1c8   : > { %v805_v43 = vadd.f32 %v804_v27, %v758_v31 }
 0x1c9   : > { %v1423_v28 = vpop.f32.mrf.mxu0 }
 0x1ca   : > { %v863_v46 = vadd.f32 %v857_v39, %v805_v43 }
 0x1cb   : > { %v807_v29 = vpop.f32.mrf.mxu0 }
 0x1cd   : > { %v1424_v30 = vpop.f32.mrf.mxu0 }
 0x1cf   : > { %v914_v32 = vpop.f32.mrf.mxu0 }
 0x1d0   : > { %v920_v51 = vadd.f32 %v914_v32, %v863_v46 }
 0x1d1   : > { %v1435_v34 = vpop.f32.mrf.mxu0  ;;  %v975_v48 = vpop.f32.mrf.mxu1 }
 0x1d2   : > { %v981_v54 = vadd.f32 %v975_v48, %v920_v51 }
 0x1d3   : > { %v917_v36 = vpop.f32.mrf.mxu0  ;;  %v1441_v50 = vpop.f32.mrf.mxu1 }
 0x1d5   : > { %v1436_v38 = vpop.f32.mrf.mxu0  ;;  %v978_v53 = vpop.f32.mrf.mxu1 }
 0x1d7   : > { %v1029_v40 = vpop.f32.mrf.mxu0  ;;  %v1442_v56 = vpop.f32.mrf.mxu1 }
 0x1d8   : > { %v1035_v59 = vadd.f32 %v1029_v40, %v981_v54 }
 0x1d9   : > { %v1447_v2 = vpop.f32.mrf.mxu0  ;;  %v1079_v58 = vpop.f32.mrf.mxu1 }
 0x1da   : > { %v1085_v61 = vadd.f32 %v1079_v58, %v1035_v59 }
 0x1db   : > { %v1032_v44 = vpop.f32.mrf.mxu0  ;;  %v1453_v60 = vpop.f32.mrf.mxu1 }
 0x1dd   : > { %v1448_v47 = vpop.f32.mrf.mxu0  ;;  %v1082_v62 = vpop.f32.mrf.mxu1 }
 0x1df   : > { %v1139_v49 = vpop.f32.mrf.mxu0  ;;  %v1454_v63 = vpop.f32.mrf.mxu1 }
 0x1e0   : > { %v1145_v0 = vadd.f32 %v1139_v49, %v1085_v61 }
 0x1e1   : > { %v1459_v52 = vpop.f32.mrf.mxu0  ;;  %v1193_v1 = vpop.f32.mrf.mxu1 }
 0x1e2   : > { %v1199_v3 = vadd.f32 %v1193_v1, %v1145_v0 }
 0x1e3   : > { %v1142_v55 = vpop.f32.mrf.mxu0  ;;  %v1465_v4 = vpop.f32.mrf.mxu1 }
 0x1e4   : > { %vm1200_vm11 = vcmp.ge.f32.partialorder %v1199_v3, 0.0  ;;  %v1201_v5 = vmul.f32 0.1, %v1199_v3 }
 0x1e5   : > { %v1460_v57 = vpop.f32.mrf.mxu0  ;;  %v1196_v6 = vpop.f32.mrf.mxu1 }
 0x1e6   : > { %v1202_v7 = vsel %vm1200_vm11, %v1199_v3, %v1201_v5 }
 0x1e7   : > { %v1203_v8 = vpack.c.bf16 %v1202_v7, %v1202_v7  ;;  %v1466_v9 = vpop.f32.mrf.mxu1 }
 0x1e9   : > { %1205 = vst.msk [vmem:[%s168_s5] sm:$0x7] %vm1204_vm12, %v1203_v8 }
 0x1ea PF: > { %s13_s12 = sadd.s32 1, %s1496_s12  }
 0x1eb   : > { %p10_p4 = scmp.ge.s32.totalorder %s13_s12, 4  }
 0x1ed   :  { %12 = sbr.rel (!%p10_p4) target bundleno = 1 (0x1), region = 81 }

// kernel: unet2d_forward.10
= control target key start
LH: loop header
LB: loop body
LE: loop exit
PB: predicated region body
PF: predicated region fallthrough
CT: control target
= control target key end

     0   :  { %s1419_s12 = smov 0   ;;  %s1609_s0 = inlined_call_operand.vmem [shape: bf16[2,1,16,4], index: 0, kind: input, shape index: {}]   ;;  %s1610_s1 = inlined_call_operand.vmem [shape: bf16[16,4,4], index: 1, kind: input, shape index: {}]   ;;  %s1611_s2 = inlined_call_operand.vmem [shape: f32[1,4], index: 2, kind: input, shape index: {}]   ;;  %s1612_s3 = inlined_call_operand.vmem [shape: bf16[2,4,6,4], index: 3, kind: output, shape index: {}]  }
   0x1 LB: > { %s1175_s13 = sadd.s32 4294967295, %s1395_s12   ;;  %p1179_p0 = scmp.ge.s32.totalorder %s1395_s12, 1  ;;  %s1395_s12 = sphi %s1419_s12, %s13_s12  }
   0x2   : > { %p137_p1 = scmp.lt.s32.totalorder %s1395_s12, 3 }
   0x4   : > { %p138_p2 = pnand %p1179_p0, %p137_p1 }
   0x5   : > { %p161_p3 = scmp.lt.s32.totalorder (!%p138_p2), %s1175_s13, 1 }
   0x6   : > { %141 = sbr.rel (%p138_p2) target bundleno = 284 (0x11c), region = 32 }
   0xb   : > { %v174_v0 = vld [vmem:[%s1610_s1] sm:$0x3]  ;;  %vm192_vm0 = vcmask 1041408   ;;  %v1397_v1 = vmov 0.0   ;;  %v1184_v3 = vld [vmem:[%s1610_s1 + $0x2] sm:$0x3] }
   0xc   : > { %1275 = vmatprep.subr.bf16.mxu1 %v1397_v1  ;;  %v240_v2 = vsel %vm192_vm0, %v174_v0, 0  ;;  %1269 = vmatprep.subr.bf16.mxu0 %v1397_v1  ;;  %vm1398_vm1 = vmmov 0   ;;  %v194_v4 = vsel %vm192_vm0, %v1184_v3, 0  ;;  %s1614_s13 = smov (!%p161_p3, %s1175_s13), 1  ;;  %v1191_v5 = vld [vmem:[%s1610_s1 + $0x6] sm:$0x3] }
   0xd   : > { %1276 = vmatpush3.bf16.msra.mxu1 %v240_v2  ;;  %1277 = vmatprep.mubr.msk.bf16.mxu1 %vm1398_vm1, %v1397_v1  ;;  %s1235_s20 = sshll.u32 %s1614_s13, 3  ;;  %vm188_vm2 = vcmask 31744   ;;  %v357_v6 = vsel %vm192_vm0, %v1191_v5, 0  ;;  %v1188_v9 = vld [vmem:[%s1610_s1 + $0x4] sm:$0x3]  ;;  %s1236_s27 = sshll.u32 %s1614_s13, 4 }
   0xe   : > { %1270 = vmatpush3.bf16.msra.mxu0 %v194_v4  ;;  %1271 = vmatprep.mubr.msk.bf16.mxu0 %vm1398_vm1, %v1397_v1  ;;  %s1452_s23 = scalar_lea.vmem %s1609_s0, %s1235_s20  ;;  %v296_v19 = vsel %vm192_vm0, %v1188_v9, 0  ;;  %v1195_v21 = vld [vmem:[%s1610_s1 + $0x8] sm:$0x3]  ;;  %v1196_v31 = vld [vmem:[%s1610_s1 + $0xa] sm:$0x3]  ;;  %s1593_s30 = scalar_lea.vmem %s1612_s3, %s1236_s27  ;;  %vm411_vm4 = vcmask 26624  }
   0xf   : > { %1281 = vmatprep.subr.bf16.mxu0 %v1397_v1  ;;  %1287 = vmatprep.subr.bf16.mxu1 %v1397_v1  ;;  %v173_v7 = vld [vmem:[%s1452_s23] sm:$0x7]  ;;  %v339_v11 = vld [vmem:[%s1452_s23 + $0x4] sm:$0x3]  ;;  %v483_v28 = vsel %vm192_vm0, %v1195_v21, 0  ;;  %v427_v36 = vsel %vm192_vm0, %v1196_v31, 0 }
  0x10   : > { %v1375_v8 = vld [vmem:[%s1452_s23] ss:$0 sps:$4 sm:$0xff]   ;;  %1278 = vmatmul.mubr.msk.bf16.vlgmr.msra.gmra.mxu1 %vm188_vm2, %v173_v7  ;;  %v282_v10 = vld [vmem:[%s1452_s23] sm:$0xc]  ;;  %v283_v20 = vld [vmem:[%s1452_s23 + $0x4] sm:$0x1] }
  0x11   : > { %v182_v12 = vshrl.u32 %v1375_v8, 16  ;;  %v184_v13 = vshll.u32 %v1375_v8, 16  ;;  %1288 = vmatpush3.bf16.msra.mxu1 %v357_v6  ;;  %1289 = vmatprep.mubr.msk.bf16.mxu1 %vm1398_vm1, %v1397_v1  ;;  %v1192_v14 = vcombine.low %v282_v10, %v339_v11  ;;  %v1378_v15 = vld [vmem:[%s1452_s23] ss:$0 sps:$4 sm:$0xff]   ;;  %v1189_v27 = vcombine.low %v282_v10, %v283_v20  ;;  %v1204_v33 = vld [vmem:[%s1610_s1 + $0xe] sm:$0x3] }
  0x12   : > { %1299 = vmatprep.subr.bf16.mxu1 %v1397_v1  ;;  %v475_v25 = vshll.u32 %v1378_v15, 16  ;;  %v473_v29 = vshrl.u32 %v1378_v15, 16  ;;  %v525_v34 = vld [vmem:[%s1452_s23] sm:$0xc]  ;;  %v526_v35 = vld [vmem:[%s1452_s23 + $0x4] sm:$0x3] }
  0x13   : > { %v186_v16 = vrot.slane %v184_v13, 1  ;;  %v346_v17 = vshrl.u32 %v1192_v14, 16  ;;  %v349_v18 = vshll.u32 %v1192_v14, 16  ;;  %v291_v32 = vrot.slane %v1189_v27, 2  ;;  %v589_v38 = vld [vmem:[%s1452_s23] sm:$0x8] }
  0x14   : > { %v477_v30 = vrot.slane %v475_v25, 1  ;;  %v1379_v39 = vld [vmem:[%s1452_s23] ss:$0 sps:$4 sm:$0xee]   ;;  %v600_v40 = vsel %vm192_vm0, %v1204_v33, 0  ;;  %v1202_v41 = vcombine.low %v525_v34, %v526_v35  ;;  %v1205_v42 = vcombine.low %v589_v38, %v526_v35 }
  0x15   : > { %v187_v22 = vor.u32 %v186_v16, %v182_v12  ;;  %v348_v23 = vrot.slane %v346_v17, 2  ;;  %v351_v24 = vrot.slane %v349_v18, 3  ;;  %v1201_v43 = vld [vmem:[%s1610_s1 + $0xc] sm:$0x3]  ;;  %v422_v44 = vrot.slane %v1379_v39, 1 }
  0x16   : > { %v478_v37 = vor.u32 %v477_v30, %v473_v29  ;;  %v535_v45 = vshrl.u32 %v1202_v41, 16  ;;  %v538_v46 = vshll.u32 %v1202_v41, 16  ;;  %v1208_v47 = vld [vmem:[%s1610_s1 + $0x10] sm:$0x3]  ;;  %v650_v48 = vld [vmem:[%s1452_s23] sm:$0xc] }
  0x17   : > { %1272 = vmatmul.mubr.msk.bf16.vlgmr.msra.gmra.mxu0 %vm188_vm2, %v187_v22  ;;  %v352_v26 = vor.u32 %v351_v24, %v348_v23  ;;  %v654_v49 = vld [vmem:[%s1452_s23 + $0x4] sm:$0x3]  ;;  %v546_v50 = vsel %vm192_vm0, %v1201_v43, 0  ;;  %v595_v51 = vrot.slane %v1205_v42, 3  ;;  %v724_v55 = vsel %vm192_vm0, %v1208_v47, 0 }
  0x18   : > { %1282 = vmatpush3.bf16.msra.mxu0 %v296_v19  ;;  %1283 = vmatprep.mubr.msk.bf16.mxu0 %vm1398_vm1, %v1397_v1  ;;  %v651_v52 = vld [vmem:[%s1452_s23 + $0x4] sm:$0x1]  ;;  %v537_v53 = vrot.slane %v535_v45, 2  ;;  %v540_v54 = vrot.slane %v538_v46, 3  ;;  %v1210_v56 = vcombine.low %v650_v48, %v654_v49  ;;  %v1209_v59 = vld [vmem:[%s1610_s1 + $0x12] sm:$0x3] }
  0x19   : > { %1290 = vmatmul.mubr.msk.bf16.vlgmr.msra.gmra.mxu1 %vm188_vm2, %v352_v26  ;;  %1293 = vmatprep.subr.bf16.mxu0 %v1397_v1  ;;  %v1212_v57 = vcombine.low %v650_v48, %v651_v52  ;;  %v1384_v58 = vld [vmem:[%s1452_s23 + $0x4] ss:$0 sps:$4 sm:$0xff]   ;;  %v1216_v63 = vld [vmem:[%s1610_s1 + $0x16] sm:$0x3]  ;;  %v674_v0 = vsel %vm192_vm0, %v1209_v59, 0 }
  0x1a   : > { %1300 = vmatpush3.bf16.msra.mxu1 %v483_v28  ;;  %1301 = vmatprep.mubr.msk.bf16.mxu1 %vm1398_vm1, %v1397_v1  ;;  %v541_v60 = vor.u32 %v540_v54, %v537_v53  ;;  %v663_v61 = vshrl.u32 %v1210_v56, 16  ;;  %v666_v62 = vshll.u32 %v1210_v56, 16  ;;  %v825_v3 = vshll.u32 %v1384_v58, 16  ;;  %v883_v4 = vld [vmem:[%s1452_s23] sm:$0xc] }
  0x1b   : > { %1311 = vmatprep.subr.bf16.mxu1 %v1397_v1  ;;  %v719_v2 = vrot.slane %v1212_v57, 2  ;;  %v884_v5 = vld [vmem:[%s1452_s23 + $0x4] sm:$0x3]  ;;  %v833_v8 = vsel %vm192_vm0, %v1216_v63, 0  ;;  %v823_v9 = vshrl.u32 %v1384_v58, 16 }
  0x1c   : > { %v665_v6 = vrot.slane %v663_v61, 2  ;;  %v668_v7 = vrot.slane %v666_v62, 3  ;;  %v827_v10 = vrot.slane %v825_v3, 1  ;;  %v1224_v11 = vcombine.low %v883_v4, %v884_v5  ;;  %v1214_v12 = vld [vmem:[%s1610_s1 + $0x14] sm:$0x3] }
  0x1d   : > { %v1220_v14 = vld [vmem:[%s1610_s1 + $0x18] sm:$0x3]  ;;  %v773_v15 = vsel %vm192_vm0, %v1214_v12, 0  ;;  %v1221_v22 = vld [vmem:[%s1610_s1 + $0x1a] sm:$0x3] }
  0x1e   : > { %v669_v13 = vor.u32 %v668_v7, %v665_v6  ;;  %v828_v16 = vor.u32 %v827_v10, %v823_v9  ;;  %v946_v17 = vshrl.u32 %v1224_v11, 16  ;;  %v949_v18 = vshll.u32 %v1224_v11, 16  ;;  %v766_v23 = vld [vmem:[%s1452_s23 + $0x4] sm:$0x7]  ;;  %v887_v24 = vld [vmem:[%s1452_s23] sm:$0x8] }
  0x1f   : > { %1284 = vmatmul.mubr.msk.bf16.vlgmr.msra.gmra.mxu0 %vm188_vm2, %v291_v32  ;;  %v957_v19 = vsel %vm192_vm0, %v1220_v14, 0  ;;  %v1229_v25 = vld [vmem:[%s1610_s1 + $0x1e] sm:$0x3]  ;;  %v900_v26 = vsel %vm192_vm0, %v1221_v22, 0  ;;  %v1222_v28 = vcombine.low %v887_v24, %v884_v5  ;;  %v1388_v30 = vld [vmem:[%s1452_s23 + $0x4] ss:$0 sps:$4 sm:$0xff]  }
  0x20   : > { %1294 = vmatpush3.bf16.msra.mxu0 %v427_v36  ;;  %1295 = vmatprep.mubr.msk.bf16.mxu0 %vm1398_vm1, %v1397_v1  ;;  %v948_v20 = vrot.slane %v946_v17, 2  ;;  %v951_v21 = vrot.slane %v949_v18, 3  ;;  %v1070_v29 = vsel %vm192_vm0, %v1229_v25, 0  ;;  %v1387_v31 = vld [vmem:[%s1452_s23 + $0x4] ss:$0 sps:$4 sm:$0xee]  }
  0x21   : > { %1302 = vmatmul.mubr.msk.bf16.vlgmr.msra.gmra.mxu1 %vm188_vm2, %v478_v37  ;;  %1305 = vmatprep.subr.bf16.mxu0 %v1397_v1  ;;  %v1226_v32 = vld [vmem:[%s1610_s1 + $0x1c] sm:$0x3]  ;;  %v895_v33 = vrot.slane %v1222_v28, 3  ;;  %v1008_v34 = vshll.u32 %v1388_v30, 16  ;;  %v1065_v36 = vrot.slane %v1387_v31, 1  ;;  %v1006_v37 = vshrl.u32 %v1388_v30, 16 }
  0x22   : > { %1312 = vmatpush3.bf16.msra.mxu1 %v600_v40  ;;  %1313 = vmatprep.mubr.msk.bf16.mxu1 %vm1398_vm1, %v1397_v1  ;;  %v952_v27 = vor.u32 %v951_v21, %v948_v20  ;;  %v1016_v35 = vsel %vm192_vm0, %v1226_v32, 0  ;;  %v1586_v54 = vld [vmem:[%s1611_s2] ss:$0 sm:$0xff] }
  0x23   : > { %1323 = vmatprep.subr.bf16.mxu1 %v1397_v1  ;;  %v1010_v38 = vrot.slane %v1008_v34, 1 }
  0x25   : > { %v1011_v39 = vor.u32 %v1010_v38, %v1006_v37 }
  0x27   : > { %1296 = vmatmul.mubr.msk.bf16.vlgmr.msra.gmra.mxu0 %vm188_vm2, %v422_v44 }
  0x28   : > { %1306 = vmatpush3.bf16.msra.mxu0 %v546_v50  ;;  %1307 = vmatprep.mubr.msk.bf16.mxu0 %vm1398_vm1, %v1397_v1 }
  0x29   : > { %1314 = vmatmul.mubr.msk.bf16.vlgmr.msra.gmra.mxu1 %vm188_vm2, %v595_v51  ;;  %1317 = vmatprep.subr.bf16.mxu0 %v1397_v1 }
  0x2a   : > { %1324 = vmatpush3.bf16.msra.mxu1 %v724_v55  ;;  %1325 = vmatprep.mubr.msk.bf16.mxu1 %vm1398_vm1, %v1397_v1 }
  0x2b   : > { %1335 = vmatprep.subr.bf16.mxu1 %v1397_v1 }
  0x2f   : > { %1308 = vmatmul.mubr.msk.bf16.vlgmr.msra.gmra.mxu0 %vm188_vm2, %v541_v60 }
  0x30   : > { %1318 = vmatpush3.bf16.msra.mxu0 %v674_v0  ;;  %1319 = vmatprep.mubr.msk.bf16.mxu0 %vm1398_vm1, %v1397_v1 }
  0x31   : > { %1326 = vmatmul.mubr.msk.bf16.vlgmr.msra.gmra.mxu1 %vm188_vm2, %v719_v2  ;;  %1329 = vmatprep.subr.bf16.mxu0 %v1397_v1 }
  0x32   : > { %1336 = vmatpush3.bf16.msra.mxu1 %v833_v8  ;;  %1337 = vmatprep.mubr.msk.bf16.mxu1 %vm1398_vm1, %v1397_v1 }
  0x33   : > { %1347 = vmatprep.subr.bf16.mxu1 %v1397_v1 }
  0x37   : > { %1320 = vmatmul.mubr.msk.bf16.vlgmr.msra.gmra.mxu0 %vm188_vm2, %v669_v13 }
  0x38   : > { %1330 = vmatpush3.bf16.msra.mxu0 %v773_v15  ;;  %1331 = vmatprep.mubr.msk.bf16.mxu0 %vm1398_vm1, %v1397_v1 }
  0x39   : > { %1338 = vmatmul.mubr.msk.bf16.vlgmr.msra.gmra.mxu1 %vm188_vm2, %v828_v16  ;;  %1341 = vmatprep.subr.bf16.mxu0 %v1397_v1 }
  0x3a   : > { %1348 = vmatpush3.bf16.msra.mxu1 %v957_v19  ;;  %1349 = vmatprep.mubr.msk.bf16.mxu1 %vm1398_vm1, %v1397_v1 }
  0x3b   : > { %1359 = vmatprep.subr.bf16.mxu1 %v1397_v1 }
  0x3f   : > { %1332 = vmatmul.mubr.msk.bf16.vlgmr.msra.gmra.mxu0 %vm188_vm2, %v766_v23 }
  0x40   : > { %1342 = vmatpush3.bf16.msra.mxu0 %v900_v26  ;;  %1343 = vmatprep.mubr.msk.bf16.mxu0 %vm1398_vm1, %v1397_v1 }
  0x41   : > { %1350 = vmatmul.mubr.msk.bf16.vlgmr.msra.gmra.mxu1 %vm188_vm2, %v952_v27  ;;  %1353 = vmatprep.subr.bf16.mxu0 %v1397_v1 }
  0x42   : > { %1360 = vmatpush3.bf16.msra.mxu1 %v1070_v29  ;;  %1361 = vmatprep.mubr.msk.bf16.mxu1 %vm1398_vm1, %v1397_v1 }
  0x47   : > { %1344 = vmatmul.mubr.msk.bf16.vlgmr.msra.gmra.mxu0 %vm188_vm2, %v895_v33 }
  0x48   : > { %1354 = vmatpush3.bf16.msra.mxu0 %v1016_v35  ;;  %1355 = vmatprep.mubr.msk.bf16.mxu0 %vm1398_vm1, %v1397_v1 }
  0x49   : > { %1362 = vmatmul.mubr.msk.bf16.vlgmr.msra.gmra.mxu1 %vm188_vm2, %v1065_v36 }
  0x4f   : > { %1356 = vmatmul.mubr.msk.bf16.vlgmr.msra.gmra.mxu0 %vm188_vm2, %v1011_v39 }
  0xd0   : > { %v276_v40 = vpop.f32.mrf.mxu1 }
  0xd2   : > { %v1279_v41 = vpop.f32.mrf.mxu1 }
  0xd4   : > { %v279_v42 = vpop.f32.mrf.mxu1 }
  0xd6   : > { %v1280_v43 = vpop.f32.mrf.mxu1 }
  0xd7   : > { %v230_v44 = vpop.f32.mrf.mxu0 }
  0xd8   : > { %v277_v51 = vadd.f32 %v276_v40, %v230_v44 }
  0xd9   : > { %v1273_v45 = vpop.f32.mrf.mxu0  ;;  %v393_v46 = vpop.f32.mrf.mxu1 }
  0xdb   : > { %v233_v47 = vpop.f32.mrf.mxu0  ;;  %v1291_v48 = vpop.f32.mrf.mxu1 }
  0xdd   : > { %v1274_v49 = vpop.f32.mrf.mxu0  ;;  %v396_v50 = vpop.f32.mrf.mxu1 }
  0xdf   : > { %v332_v52 = vpop.f32.mrf.mxu0  ;;  %v1292_v1 = vpop.f32.mrf.mxu1 }
  0xe0   : > { %v338_v53 = vadd.f32 %v332_v52, %v277_v51 }
  0xe1   : > { %v1285_v55 = vpop.f32.mrf.mxu0  ;;  %v519_v56 = vpop.f32.mrf.mxu1 }
  0xe2   : > { %v399_v57 = vadd.f32 %v393_v46, %v338_v53 }
  0xe3   : > { %v335_v58 = vpop.f32.mrf.mxu0  ;;  %v1303_v59 = vpop.f32.mrf.mxu1 }
  0xe4   : > { %v406_v60 = vadd.f32 %v1586_v54, %v399_v57 }
  0xe5   : > { %v1286_v61 = vpop.f32.mrf.mxu0  ;;  %v522_v62 = vpop.f32.mrf.mxu1 }
  0xe6   : > { %vm407_vm3 = vcmp.ge.f32.partialorder %v406_v60, 0.0  ;;  %v408_v63 = vmul.f32 0.1, %v406_v60 }
  0xe7   : > { %v463_v0 = vpop.f32.mrf.mxu0  ;;  %v1304_v2 = vpop.f32.mrf.mxu1 }
  0xe8   : > { %v409_v3 = vsel %vm407_vm3, %v406_v60, %v408_v63  ;;  %v520_v11 = vadd.f32 %v519_v56, %v463_v0 }
  0xe9   : > { %v410_v4 = vpack.c.bf16 %v409_v3, %v409_v3  ;;  %v1297_v5 = vpop.f32.mrf.mxu0  ;;  %v636_v6 = vpop.f32.mrf.mxu1 }
  0xeb   : > { %412 = vst.msk [vmem:[%s1593_s30] sm:$0x7] %vm411_vm4, %v410_v4  ;;  %v466_v7 = vpop.f32.mrf.mxu0  ;;  %v1315_v8 = vpop.f32.mrf.mxu1 }
  0xed   : > { %v1298_v9 = vpop.f32.mrf.mxu0  ;;  %v639_v10 = vpop.f32.mrf.mxu1 }
  0xef   : > { %v582_v12 = vpop.f32.mrf.mxu0  ;;  %v1316_v13 = vpop.f32.mrf.mxu1 }
  0xf0   : > { %v588_v14 = vadd.f32 %v582_v12, %v520_v11 }
  0xf1   : > { %v1309_v15 = vpop.f32.mrf.mxu0  ;;  %v760_v16 = vpop.f32.mrf.mxu1 }
  0xf2   : > { %v642_v17 = vadd.f32 %v636_v6, %v588_v14 }
  0xf3   : > { %v585_v18 = vpop.f32.mrf.mxu0  ;;  %v1327_v19 = vpop.f32.mrf.mxu1 }
  0xf4   : > { %v643_v20 = vadd.f32 %v1586_v54, %v642_v17 }
  0xf5   : > { %v1310_v21 = vpop.f32.mrf.mxu0  ;;  %v763_v22 = vpop.f32.mrf.mxu1 }
  0xf6   : > { %vm644_vm5 = vcmp.ge.f32.partialorder %v643_v20, 0.0  ;;  %v645_v23 = vmul.f32 0.1, %v643_v20 }
  0xf7   : > { %v710_v24 = vpop.f32.mrf.mxu0  ;;  %v1328_v25 = vpop.f32.mrf.mxu1 }
  0xf8   : > { %v646_v26 = vsel %vm644_vm5, %v643_v20, %v645_v23  ;;  %v761_v34 = vadd.f32 %v760_v16, %v710_v24 }
  0xf9   : > { %v647_v27 = vpack.c.bf16 %v646_v26, %v646_v26  ;;  %v1321_v28 = vpop.f32.mrf.mxu0  ;;  %v869_v29 = vpop.f32.mrf.mxu1 }
  0xfb   : > { %1207 = vst.msk [vmem:[%s1593_s30 + $0x4] sm:$0x7] %vm411_vm4, %v647_v27  ;;  %v713_v30 = vpop.f32.mrf.mxu0  ;;  %v1339_v31 = vpop.f32.mrf.mxu1 }
  0xfd   : > { %v1322_v32 = vpop.f32.mrf.mxu0  ;;  %v872_v33 = vpop.f32.mrf.mxu1 }
  0xff   : > { %v809_v35 = vpop.f32.mrf.mxu0  ;;  %v1340_v36 = vpop.f32.mrf.mxu1 }
 0x100   : > { %v815_v37 = vadd.f32 %v809_v35, %v761_v34 }
 0x101   : > { %v1333_v38 = vpop.f32.mrf.mxu0  ;;  %v993_v39 = vpop.f32.mrf.mxu1 }
 0x102   : > { %v875_v40 = vadd.f32 %v869_v29, %v815_v37 }
 0x103   : > { %v812_v41 = vpop.f32.mrf.mxu0  ;;  %v1351_v42 = vpop.f32.mrf.mxu1 }
 0x104   : > { %v876_v43 = vadd.f32 %v1586_v54, %v875_v40 }
 0x105   : > { %v1334_v44 = vpop.f32.mrf.mxu0  ;;  %v996_v45 = vpop.f32.mrf.mxu1 }
 0x106   : > { %vm877_vm6 = vcmp.ge.f32.partialorder %v876_v43, 0.0  ;;  %v878_v46 = vmul.f32 0.1, %v876_v43 }
 0x107   : > { %v936_v47 = vpop.f32.mrf.mxu0  ;;  %v1352_v48 = vpop.f32.mrf.mxu1 }
 0x108   : > { %v879_v49 = vsel %vm877_vm6, %v876_v43, %v878_v46  ;;  %v994_v57 = vadd.f32 %v993_v39, %v936_v47 }
 0x109   : > { %v880_v50 = vpack.c.bf16 %v879_v49, %v879_v49  ;;  %v1345_v51 = vpop.f32.mrf.mxu0  ;;  %v1106_v52 = vpop.f32.mrf.mxu1 }
 0x10b   : > { %1219 = vst.msk [vmem:[%s1593_s30 + $0x8] sm:$0x7] %vm411_vm4, %v880_v50  ;;  %v939_v1 = vpop.f32.mrf.mxu0  ;;  %v1363_v53 = vpop.f32.mrf.mxu1 }
 0x10d   : > { %v1346_v55 = vpop.f32.mrf.mxu0  ;;  %v1109_v56 = vpop.f32.mrf.mxu1 }
 0x10f   : > { %v1052_v58 = vpop.f32.mrf.mxu0  ;;  %v1364_v59 = vpop.f32.mrf.mxu1 }
 0x110   : > { %v1058_v60 = vadd.f32 %v1052_v58, %v994_v57 }
 0x111   : > { %v1357_v61 = vpop.f32.mrf.mxu0 }
 0x112   : > { %v1112_v62 = vadd.f32 %v1106_v52, %v1058_v60 }
 0x113   : > { %v1055_v63 = vpop.f32.mrf.mxu0 }
 0x114   : > { %v1113_v0 = vadd.f32 %v1586_v54, %v1112_v62 }
 0x115   : > { %v1358_v2 = vpop.f32.mrf.mxu0 }
 0x116   : > { %vm1114_vm7 = vcmp.ge.f32.partialorder %v1113_v0, 0.0  ;;  %v1115_v3 = vmul.f32 0.1, %v1113_v0 }
 0x118   : > { %v1116_v4 = vsel %vm1114_vm7, %v1113_v0, %v1115_v3 }
 0x119   : > { %v1117_v5 = vpack.c.bf16 %v1116_v4, %v1116_v4 }
 0x11b   : > { %1232 = vst.msk [vmem:[%s1593_s30 + $0xc] sm:$0x7] %vm411_vm4, %v1117_v5 }
 0x11c PF: > { %s13_s12 = sadd.s32 1, %s1395_s12  }
 0x11d   : > { %p10_p4 = scmp.ge.s32.totalorder %s13_s12, 4  }
 0x11f   :  { %12 = sbr.rel (!%p10_p4) target bundleno = 1 (0x1), region = 80 }

// kernel: unet2d_forward.11
= control target key start
LH: loop header
LB: loop body
LE: loop exit
PB: predicated region body
PF: predicated region fallthrough
CT: control target
= control target key end

     0   :  { %s1946_s12 = smov 0   ;;  %s2215_s0 = inlined_call_operand.vmem [shape: bf16[2,1,36,8], index: 0, kind: input, shape index: {}]   ;;  %s2216_s1 = inlined_call_operand.vmem [shape: bf16[16,8,4], index: 1, kind: input, shape index: {}]   ;;  %s2217_s2 = inlined_call_operand.vmem [shape: f32[1,4], index: 2, kind: input, shape index: {}]   ;;  %s2218_s3 = inlined_call_operand.vmem [shape: bf16[2,4,22,4], index: 3, kind: output, shape index: {}]  }
   0x1 LB: > { %s1606_s13 = sadd.s32 4294967295, %s1924_s12   ;;  %p1610_p0 = scmp.ge.s32.totalorder %s1924_s12, 1  ;;  %s1924_s12 = sphi %s1946_s12, %s13_s12  }
   0x2   : > { %p137_p1 = scmp.lt.s32.totalorder %s1924_s12, 3 }
   0x4   : > { %p138_p2 = pnand %p1610_p0, %p137_p1 }
   0x5   : > { %p161_p3 = scmp.lt.s32.totalorder (!%p138_p2), %s1606_s13, 1 }
   0x6   : > { %141 = sbr.rel (%p138_p2) target bundleno = 292 (0x124), region = 32 }
   0xb   : > { %v176_v0 = vld [vmem:[%s2216_s1] sm:$0xf]  ;;  %vm211_vm0 = vcmask 1043456   ;;  %v1613_v1 = vld [vmem:[%s2216_s1 + $0x4] sm:$0xf]  ;;  %s2220_s13 = smov (!%p161_p3, %s1606_s13), 1 }
   0xc   : > { %1867 = vmatprep.subr.msk.bf16.mxu1 %vm211_vm0, %v176_v0  ;;  %v272_v2 = vsel %vm211_vm0, %v176_v0, 0  ;;  %1866 = vmatprep.subr.msk.bf16.mxu0 %vm211_vm0, %v1613_v1  ;;  %v213_v3 = vsel %vm211_vm0, %v1613_v1, 0  ;;  %v1621_v4 = vld [vmem:[%s2216_s1 + $0x8] sm:$0xf]  ;;  %v1626_v5 = vld [vmem:[%s2216_s1 + $0xc] sm:$0xf] }
   0xd   : > { %1777 = vmatpush3.bf16.msra.mxu1 %v272_v2  ;;  %1771 = vmatpush3.bf16.msra.mxu0 %v213_v3  ;;  %s1882_s22 = smul.u32 20, %s2220_s13  ;;  %vm204_vm1 = vcmask 64512   ;;  %vm188_vm2 = vsmask.f32 7424  ;;  %vm338_vm3 = vcmask 1044480   ;;  %v433_v9 = vsel %vm211_vm0, %v1626_v5, 0 }
   0xe   : > { %1868 = vmatprep.subr.msk.bf16.mxu0 %vm211_vm0, %v1621_v4  ;;  %1869 = vmatprep.subr.msk.bf16.mxu1 %vm211_vm0, %v1626_v5  ;;  %v1984_v7 = vld [vmem:[%s2216_s1 + $0x10] sm:$0xf]  ;;  %v349_v17 = vsel %vm211_vm0, %v1621_v4, 0  ;;  %vm408_vm4 = vsmask.f32 4352  ;;  %vm538_vm5 = vcmask 1046528  }
   0xf   : > { %s1978_s25 = scalar_lea.vmem %s2215_s0, %s1882_s22  ;;  %v1635_v30 = vld [vmem:[%s2216_s1 + $0x14] sm:$0xf]  ;;  %v624_v2 = vsel %vm211_vm0, %v1984_v7, 0  ;;  %vm1102_vm6 = vsmask.f32 5376  ;;  %vm1032_vm7 = vcmask 1045504  }
  0x10   : > { %v1892_v6 = vld [vmem:[%s1978_s25] sm:$0xff]   ;;  %v1893_v8 = vld [vmem:[%s1978_s25 + $0x8] ss:$0 sps:$4 sm:$0x77]   ;;  %v402_v19 = vld [vmem:[%s1978_s25 + $0xc] sm:$0x7] }
  0x11   : > { %1778 = vmatprep.mubr.msk.bf16.mxu1 %vm204_vm1, %v1892_v6  ;;  %v1894_v10 = vld [vmem:[%s1978_s25 + $0x8] ss:$0 sps:$4 sm:$0xff]   ;;  %v190_v11 = vshrl.u32 %v1892_v6, 16  ;;  %v192_v12 = vshll.u32 %v1892_v6, 16  ;;  %v1895_v18 = vld [vmem:[%s1978_s25] sm:$0xf8]  }
  0x12   : > { %1779 = vmatmul.mubr.msk.bf16.vlgmr.msra.gmra.mxu1 %vm204_vm1, %v1893_v8  ;;  %v324_v13 = vld [vmem:[%s1978_s25 + $0x8] sm:$0xf]  ;;  %v197_v15 = vshll.u32 %v1894_v10, 16  ;;  %v201_v16 = vshrl.u32 %v1894_v10, 16  ;;  %v325_v20 = vld [vmem:[%s1978_s25 + $0xc] sm:$0x3] }
  0x13   : > { %v194_v14 = vrot.slane %v192_v12, 1  ;;  %1789 = vmatpush3.bf16.msra.mxu1 %v433_v9  ;;  %v522_v21 = vld [vmem:[%s1978_s25] sm:$0xf]  ;;  %v1627_v24 = vcombine.low %v324_v13, %v402_v19  ;;  %v410_v25 = vshrl.u32 %v1895_v18, 16  ;;  %v523_v26 = vld [vmem:[%s1978_s25 + $0x4] sm:$0xf]  ;;  %v1623_v28 = vcombine.low %v324_v13, %v325_v20 }
  0x14   : > { %1871 = vmatprep.subr.msk.bf16.mxu1 %vm211_vm0, %v1984_v7  ;;  %v199_v23 = vrot.slane %v197_v15, 1  ;;  %v413_v27 = vshll.u32 %v1895_v18, 16  ;;  %v339_v29 = vrot.slane %v1895_v18, 3  ;;  %v2004_v31 = vld [vmem:[%s1978_s25 + $0x8] ss:$0 sps:$4 sm:$0xff]   ;;  %v1640_v32 = vcombine.low %v522_v21, %v523_v26  ;;  %s1883_s27 = smul.u32 48, %s2220_s13 }
  0x15   : > { %v195_v22 = vor.u32 %v194_v14, %v190_v11  ;;  %v527_v33 = vld [vmem:[%s1978_s25] sm:$0xe]  ;;  %v412_v36 = vrot.slane %v410_v25, 3  ;;  %v418_v37 = vshrl.u32 %v1627_v24, 16  ;;  %v2010_v39 = vld [vmem:[%s1978_s25 + $0x4] sm:$0xf] }
  0x16   : > { %v203_v35 = vor.u32 %v201_v16, %v199_v23  ;;  %v674_v38 = vld [vmem:[%s1978_s25] sm:$0x8]  ;;  %v415_v40 = vrot.slane %v413_v27, 4  ;;  %v421_v41 = vshll.u32 %v1627_v24, 16  ;;  %v340_v42 = vrot.slane %v1623_v28, 3  ;;  %s2176_s30 = scalar_lea.vmem %s2218_s3, %s1883_s27 }
  0x17   : > { %v200_v34 = vsel %vm188_vm2, %v195_v22, %v199_v23  ;;  %v2014_v43 = vld [vmem:[%s1978_s25 + $0x8] sm:$0xf]  ;;  %v420_v44 = vrot.slane %v418_v37, 3  ;;  %v603_v45 = vshrl.u32 %v1640_v32, 16  ;;  %v605_v46 = vshll.u32 %v1640_v32, 16 }
  0x18   : > { %1772 = vmatprep.mubr.msk.bf16.mxu0 %vm204_vm1, %v200_v34  ;;  %v610_v47 = vshll.u32 %v2004_v31, 16  ;;  %v2019_v48 = vld [vmem:[%s1978_s25 + $0xc] sm:$0x7]  ;;  %v416_v49 = vor.u32 %v415_v40, %v412_v36  ;;  %v423_v50 = vrot.slane %v421_v41, 4  ;;  %v341_v51 = vsel %vm338_vm3, %v339_v29, %v340_v42  ;;  %v862_v63 = vld [vmem:[%s1978_s25 + $0x8] sm:$0xf] }
  0x19   : > { %1773 = vmatmul.mubr.msk.bf16.vlgmr.msra.gmra.mxu0 %vm204_vm1, %v203_v35  ;;  %v1636_v52 = vcombine.low %v527_v33, %v523_v26  ;;  %v607_v53 = vrot.slane %v605_v46, 1  ;;  %v540_v55 = vrot.slane %v2004_v31, 1  ;;  %v1644_v56 = vcombine.low %v674_v38, %v2010_v39  ;;  %v866_v0 = vld [vmem:[%s1978_s25 + $0xc] sm:$0x7]  ;;  %v2038_v10 = vld [vmem:[%s1978_s25] sm:$0xf8]  }
  0x1a   : > { %1783 = vmatpush3.bf16.msra.mxu0 %v349_v17  ;;  %1784 = vmatprep.mubr.msk.bf16.mxu0 %vm204_vm1, %v341_v51  ;;  %v612_v54 = vrot.slane %v610_v47, 1  ;;  %v424_v57 = vor.u32 %v423_v50, %v420_v44  ;;  %v1645_v59 = vcombine.low %v2014_v43, %v2019_v48  ;;  %v549_v60 = vsel %vm211_vm0, %v1635_v30, 0  ;;  %v1643_v11 = vld [vmem:[%s2216_s1 + $0x18] sm:$0xf]  ;;  %v1648_v15 = vld [vmem:[%s2216_s1 + $0x1c] sm:$0xf] }
  0x1b   : > { %1870 = vmatprep.subr.msk.bf16.mxu0 %vm211_vm0, %v1635_v30  ;;  %v539_v58 = vrot.slane %v1636_v52, 1  ;;  %v608_v61 = vor.u32 %v607_v53, %v603_v45  ;;  %v691_v62 = vshrl.u32 %v1644_v56, 16  ;;  %v694_v3 = vshll.u32 %v1644_v56, 16  ;;  %v2054_v20 = vld [vmem:[%s1978_s25 + $0xc] sm:$0xf] }
  0x1c   : > { %v425_v1 = vsel %vm408_vm4, %v416_v49, %v424_v57  ;;  %v699_v4 = vshrl.u32 %v1645_v59, 16  ;;  %v614_v6 = vshrl.u32 %v2004_v31, 16  ;;  %v702_v9 = vshll.u32 %v1645_v59, 16  ;;  %v1096_v21 = vld [vmem:[%s1978_s25 + $0x10] sm:$0x3] }
  0x1d   : > { %1790 = vmatprep.mubr.msk.bf16.mxu1 %vm204_vm1, %v425_v1  ;;  %v613_v5 = vsel %vm188_vm2, %v608_v61, %v612_v54  ;;  %v541_v8 = vsel %vm538_vm5, %v539_v58, %v540_v55  ;;  %v693_v7 = vrot.slane %v691_v62, 3  ;;  %v696_v12 = vrot.slane %v694_v3, 4  ;;  %v863_v24 = vld [vmem:[%s1978_s25 + $0xc] sm:$0x3]  ;;  %v2063_v29 = vld [vmem:[%s1978_s25 + $0x4] sm:$0xfc]  }
  0x1e   : > { %1791 = vmatmul.mubr.msk.bf16.vlgmr.msra.gmra.mxu1 %vm204_vm1, %v424_v57  ;;  %v701_v13 = vrot.slane %v699_v4, 3  ;;  %v1662_v14 = vcombine.low %v862_v63, %v866_v0  ;;  %v704_v16 = vrot.slane %v702_v9, 4  ;;  %v616_v17 = vor.u32 %v614_v6, %v612_v54  ;;  %v1660_v35 = vld [vmem:[%s2216_s1 + $0x24] sm:$0xf]  ;;  %v1209_v46 = vld [vmem:[%s1978_s25] sm:$0x8] }
  0x1f   : > { %1801 = vmatpush3.bf16.msra.mxu1 %v624_v2  ;;  %1802 = vmatprep.mubr.msk.bf16.mxu1 %vm204_vm1, %v613_v5  ;;  %v880_v18 = vshrl.u32 %v2038_v10, 16  ;;  %v883_v19 = vshll.u32 %v2038_v10, 16  ;;  %v697_v22 = vor.u32 %v696_v12, %v693_v7  ;;  %v778_v27 = vsel %vm211_vm0, %v1648_v15, 0  ;;  %v2087_v51 = vld [vmem:[%s1978_s25 + $0x4] sm:$0xf] }
  0x20   : > { %1873 = vmatprep.subr.msk.bf16.mxu1 %vm211_vm0, %v1648_v15  ;;  %v705_v23 = vor.u32 %v704_v16, %v701_v13  ;;  %v888_v25 = vshrl.u32 %v1662_v14, 16  ;;  %v891_v26 = vshll.u32 %v1662_v14, 16  ;;  %v1649_v28 = vcombine.low %v2010_v39, %v2014_v43  ;;  %v1659_v39 = vld [vmem:[%s2216_s1 + $0x20] sm:$0xf]  ;;  %v2090_v52 = vld [vmem:[%s1978_s25 + $0x8] sm:$0xf] }
  0x21   : > { %1785 = vmatmul.mubr.msk.bf16.vlgmr.msra.gmra.mxu0 %vm204_vm1, %v340_v42  ;;  %v1674_v30 = vcombine.low %v2054_v20, %v1096_v21  ;;  %v714_v31 = vsel %vm211_vm0, %v1643_v11, 0  ;;  %v1665_v32 = vcombine.low %v862_v63, %v863_v24  ;;  %v882_v33 = vrot.slane %v880_v18, 3  ;;  %v2093_v53 = vld [vmem:[%s1978_s25 + $0xc] sm:$0x7]  ;;  %v1668_v0 = vld [vmem:[%s2216_s1 + $0x28] sm:$0xf] }
  0x22   : > { %1795 = vmatpush3.bf16.msra.mxu0 %v549_v60  ;;  %1796 = vmatprep.mubr.msk.bf16.mxu0 %vm204_vm1, %v541_v8  ;;  %v706_v34 = vsel %vm408_vm4, %v697_v22, %v705_v23  ;;  %v885_v36 = vrot.slane %v883_v19, 4  ;;  %v890_v37 = vrot.slane %v888_v25, 3  ;;  %v893_v38 = vrot.slane %v891_v26, 4  ;;  %v1673_v2 = vld [vmem:[%s2216_s1 + $0x2c] sm:$0xf] }
  0x23   : > { %1872 = vmatprep.subr.msk.bf16.mxu0 %vm211_vm0, %v1643_v11  ;;  %v1104_v40 = vshrl.u32 %v2063_v29, 16  ;;  %v1107_v41 = vshll.u32 %v2063_v29, 16  ;;  %v1112_v42 = vshrl.u32 %v1674_v30, 16  ;;  %v1115_v43 = vshll.u32 %v1674_v30, 16  ;;  %v1360_v7 = vld [vmem:[%s1978_s25 + $0x4] sm:$0xc] }
  0x24   : > { %v956_v44 = vrot.slane %v2038_v10, 3  ;;  %v957_v45 = vrot.slane %v1665_v32, 3  ;;  %v1650_v47 = vcombine.low %v2019_v48, %v2019_v48  ;;  %v886_v49 = vor.u32 %v885_v36, %v882_v33  ;;  %v1361_v12 = vld [vmem:[%s1978_s25 + $0x8] sm:$0xf]  ;;  %v1684_v21 = vld [vmem:[%s2216_s1 + $0x34] sm:$0xf] }
  0x25   : > { %v894_v50 = vor.u32 %v893_v38, %v890_v37  ;;  %v966_v54 = vsel %vm211_vm0, %v1659_v39, 0  ;;  %v1106_v56 = vrot.slane %v1104_v40, 2  ;;  %v1109_v57 = vrot.slane %v1107_v41, 3  ;;  %v1683_v24 = vld [vmem:[%s2216_s1 + $0x30] sm:$0xf] }
  0x26   : > { %1803 = vmatmul.mubr.msk.bf16.vlgmr.msra.gmra.mxu1 %vm204_vm1, %v616_v17  ;;  %v1114_v58 = vrot.slane %v1112_v42, 2  ;;  %v1117_v59 = vrot.slane %v1115_v43, 3  ;;  %v903_v60 = vsel %vm211_vm0, %v1660_v35, 0  ;;  %v958_v48 = vsel %vm338_vm3, %v956_v44, %v957_v45  ;;  %v1693_v37 = vld [vmem:[%s2216_s1 + $0x38] sm:$0xf] }
  0x27   : > { %1813 = vmatpush3.bf16.msra.mxu1 %v778_v27  ;;  %1814 = vmatprep.mubr.msk.bf16.mxu1 %vm204_vm1, %v1649_v28  ;;  %v1689_v61 = vcombine.low %v1209_v46, %v2087_v51  ;;  %v1690_v62 = vcombine.low %v2090_v52, %v2093_v53  ;;  %v895_v63 = vsel %vm408_vm4, %v886_v49, %v894_v50  ;;  %v1033_v10 = vrot.slane %v2063_v29, 2  ;;  %v1453_v27 = vld [vmem:[%s1978_s25 + $0x4] sm:$0x8]  ;;  %v1698_v42 = vld [vmem:[%s2216_s1 + $0x3c] sm:$0xf] }
  0x28   : > { %1875 = vmatprep.subr.msk.bf16.mxu1 %vm211_vm0, %v1659_v39  ;;  %v1110_v3 = vor.u32 %v1109_v57, %v1106_v56  ;;  %v1118_v4 = vor.u32 %v1117_v59, %v1114_v58  ;;  %v1043_v13 = vsel %vm211_vm0, %v1668_v0, 0  ;;  %v1127_v14 = vsel %vm211_vm0, %v1673_v2, 0 }
  0x29   : > { %1797 = vmatmul.mubr.msk.bf16.vlgmr.msra.gmra.mxu0 %vm204_vm1, %v540_v55  ;;  %v1019_v55 = vld [vmem:[%s1978_s25 + $0x10] sm:$0x1]  ;;  %v1287_v5 = vshrl.u32 %v1689_v61, 16  ;;  %v1290_v6 = vshll.u32 %v1689_v61, 16  ;;  %v1295_v8 = vshrl.u32 %v1690_v62, 16  ;;  %v1298_v9 = vshll.u32 %v1690_v62, 16 }
  0x2a   : > { %1807 = vmatpush3.bf16.msra.mxu0 %v714_v31  ;;  %1808 = vmatprep.mubr.msk.bf16.mxu0 %vm204_vm1, %v706_v34  ;;  %v1670_v1 = vcombine.low %v2054_v20, %v1019_v55  ;;  %v1119_v15 = vsel %vm1102_vm6, %v1110_v3, %v1118_v4  ;;  %v1694_v22 = vcombine.low %v1360_v7, %v1361_v12  ;;  %v1310_v32 = vsel %vm211_vm0, %v1683_v24, 0 }
  0x2b   : > { %1874 = vmatprep.subr.msk.bf16.mxu0 %vm211_vm0, %v1660_v35  ;;  %v1289_v16 = vrot.slane %v1287_v5, 3  ;;  %v1292_v17 = vrot.slane %v1290_v6, 4  ;;  %v1297_v18 = vrot.slane %v1295_v8, 3  ;;  %v1300_v19 = vrot.slane %v1298_v9, 4 }
  0x2c   : > { %v1034_v11 = vrot.slane %v1670_v1, 2  ;;  %v1377_v28 = vshrl.u32 %v1694_v22, 16  ;;  %v1380_v29 = vshll.u32 %v1694_v22, 16  ;;  %v1232_v33 = vsel %vm211_vm0, %v1684_v21, 0 }
  0x2d   : > { %v1293_v25 = vor.u32 %v1292_v17, %v1289_v16  ;;  %v1301_v26 = vor.u32 %v1300_v19, %v1297_v18  ;;  %v1685_v35 = vcombine.low %v2087_v51, %v2090_v52  ;;  %v1699_v36 = vcombine.low %v1453_v27, %v1361_v12 }
  0x2e   : > { %1815 = vmatmul.mubr.msk.bf16.vlgmr.msra.gmra.mxu1 %vm204_vm1, %v1650_v47  ;;  %v1035_v20 = vsel %vm1032_vm7, %v1033_v10, %v1034_v11  ;;  %v1379_v38 = vrot.slane %v1377_v28, 2  ;;  %v1382_v39 = vrot.slane %v1380_v29, 3  ;;  %v1686_v47 = vcombine.low %v2093_v53, %v2093_v53 }
  0x2f   : > { %1825 = vmatpush3.bf16.msra.mxu1 %v966_v54  ;;  %1826 = vmatprep.mubr.msk.bf16.mxu1 %vm204_vm1, %v958_v48  ;;  %v1302_v34 = vsel %vm408_vm4, %v1293_v25, %v1301_v26  ;;  %v1459_v43 = vrot.slane %v1699_v36, 3  ;;  %v1469_v49 = vsel %vm211_vm0, %v1698_v42, 0  ;;  %vm520_vm9 = vcmask 26624  }
  0x30   : > { %1877 = vmatprep.subr.msk.bf16.mxu1 %vm211_vm0, %v1673_v2  ;;  %v2168_v2 = vld [vmem:[%s2217_s2] ss:$0 sm:$0xff]  ;;  %vm517_vm11 = vcmask 27648  }
  0x31   : > { %1809 = vmatmul.mubr.msk.bf16.vlgmr.msra.gmra.mxu0 %vm204_vm1, %v705_v23  ;;  %v1916_v23 = vld [vmem:[%s1978_s25 + $0xc] sm:$0x3f]  }
  0x32   : > { %1819 = vmatpush3.bf16.msra.mxu0 %v903_v60  ;;  %1820 = vmatprep.mubr.msk.bf16.mxu0 %vm204_vm1, %v895_v63  ;;  %v1385_v30 = vshrl.u32 %v1916_v23, 16  ;;  %v1388_v31 = vshll.u32 %v1916_v23, 16  ;;  %v1460_v44 = vrot.slane %v1916_v23, 3 }
  0x33   : > { %1876 = vmatprep.subr.msk.bf16.mxu0 %vm211_vm0, %v1668_v0 }
  0x34   : > { %v1387_v40 = vrot.slane %v1385_v30, 2  ;;  %v1390_v41 = vrot.slane %v1388_v31, 3  ;;  %v1461_v51 = vsel %vm338_vm3, %v1459_v43, %v1460_v44 }
  0x36   : > { %1827 = vmatmul.mubr.msk.bf16.vlgmr.msra.gmra.mxu1 %vm204_vm1, %v957_v45  ;;  %v1383_v45 = vor.u32 %v1382_v39, %v1379_v38  ;;  %v1391_v46 = vor.u32 %v1390_v41, %v1387_v40 }
  0x37   : > { %1837 = vmatpush3.bf16.msra.mxu1 %v1127_v14  ;;  %1838 = vmatprep.mubr.msk.bf16.mxu1 %vm204_vm1, %v1119_v15 }
  0x38   : > { %1879 = vmatprep.subr.msk.bf16.mxu1 %vm211_vm0, %v1683_v24  ;;  %v1392_v52 = vsel %vm1102_vm6, %v1383_v45, %v1391_v46 }
  0x39   : > { %1821 = vmatmul.mubr.msk.bf16.vlgmr.msra.gmra.mxu0 %vm204_vm1, %v894_v50  ;;  %v1400_v50 = vsel %vm211_vm0, %v1693_v37, 0 }
  0x3a   : > { %1831 = vmatpush3.bf16.msra.mxu0 %v1043_v13  ;;  %1832 = vmatprep.mubr.msk.bf16.mxu0 %vm204_vm1, %v1035_v20 }
  0x3b   : > { %1878 = vmatprep.subr.msk.bf16.mxu0 %vm211_vm0, %v1684_v21 }
  0x3e   : > { %1839 = vmatmul.mubr.msk.bf16.vlgmr.msra.gmra.mxu1 %vm204_vm1, %v1118_v4 }
  0x3f   : > { %1849 = vmatpush3.bf16.msra.mxu1 %v1310_v32  ;;  %1850 = vmatprep.mubr.msk.bf16.mxu1 %vm204_vm1, %v1302_v34 }
  0x40   : > { %1881 = vmatprep.subr.msk.bf16.mxu1 %vm211_vm0, %v1698_v42 }
  0x41   : > { %1833 = vmatmul.mubr.msk.bf16.vlgmr.msra.gmra.mxu0 %vm204_vm1, %v1034_v11 }
  0x42   : > { %1843 = vmatpush3.bf16.msra.mxu0 %v1232_v33  ;;  %1844 = vmatprep.mubr.msk.bf16.mxu0 %vm204_vm1, %v1685_v35 }
  0x43   : > { %1880 = vmatprep.subr.msk.bf16.mxu0 %vm211_vm0, %v1693_v37 }
  0x46   : > { %1851 = vmatmul.mubr.msk.bf16.vlgmr.msra.gmra.mxu1 %vm204_vm1, %v1301_v26 }
  0x47   : > { %1861 = vmatpush3.bf16.msra.mxu1 %v1469_v49  ;;  %1862 = vmatprep.mubr.msk.bf16.mxu1 %vm204_vm1, %v1461_v51 }
  0x49   : > { %1845 = vmatmul.mubr.msk.bf16.vlgmr.msra.gmra.mxu0 %vm204_vm1, %v1686_v47 }
  0x4a   : > { %1855 = vmatpush3.bf16.msra.mxu0 %v1400_v50  ;;  %1856 = vmatprep.mubr.msk.bf16.mxu0 %vm204_vm1, %v1392_v52 }
  0x4e   : > { %1863 = vmatmul.mubr.msk.bf16.vlgmr.msra.gmra.mxu1 %vm204_vm1, %v1460_v44 }
  0x51   : > { %1857 = vmatmul.mubr.msk.bf16.vlgmr.msra.gmra.mxu0 %vm204_vm1, %v1391_v46 }
  0xd2   : > { %v1780_v53 = vpop.f32.mrf.mxu1 }
  0xd4   : > { %v308_v54 = vpop.f32.mrf.mxu1 }
  0xd6   : > { %v1781_v55 = vpop.f32.mrf.mxu1 }
  0xd8   : > { %v311_v58 = vpop.f32.mrf.mxu1 }
  0xd9   : > { %v1774_v56 = vpop.f32.mrf.mxu0 }
  0xda   : > { %v317_v48 = vadd.f32 %v1780_v53, %v1774_v56 }
  0xdb   : > { %v249_v57 = vpop.f32.mrf.mxu0 }
  0xdc   : > { %v309_v63 = vadd.f32 %v308_v54, %v249_v57 }
  0xdd   : > { %v1775_v59 = vpop.f32.mrf.mxu0 }
  0xde   : > { %v1792_v61 = vpop.f32.mrf.mxu1 }
  0xdf   : > { %v252_v60 = vpop.f32.mrf.mxu0 }
  0xe0   : > { %v469_v0 = vpop.f32.mrf.mxu1  ;;  %v312_v9 = vadd.f32 %v311_v58, %v252_v60 }
  0xe1   : > { %v1786_v62 = vpop.f32.mrf.mxu0 }
  0xe2   : > { %v401_v1 = vadd.f32 %v1786_v62, %v317_v48  ;;  %v1793_v5 = vpop.f32.mrf.mxu1 }
  0xe3   : > { %v385_v3 = vpop.f32.mrf.mxu0 }
  0xe4   : > { %v485_v4 = vadd.f32 %v1792_v61, %v401_v1  ;;  %v399_v6 = vadd.f32 %v385_v3, %v309_v63  ;;  %v472_v7 = vpop.f32.mrf.mxu1 }
  0xe5   : > { %v1787_v8 = vpop.f32.mrf.mxu0 }
  0xe6   : > { %v494_v10 = vadd.f32 %v2168_v2, %v485_v4  ;;  %v483_v11 = vadd.f32 %v469_v0, %v399_v6  ;;  %v1804_v15 = vpop.f32.mrf.mxu1 }
  0xe7   : > { %v388_v12 = vpop.f32.mrf.mxu0 }
  0xe8   : > { %vm497_vm8 = vcmp.ge.f32.partialorder %v494_v10, 0.0  ;;  %v500_v13 = vmul.f32 0.1, %v494_v10  ;;  %v492_v14 = vadd.f32 %v2168_v2, %v483_v11  ;;  %v400_v16 = vadd.f32 %v388_v12, %v312_v9  ;;  %v660_v21 = vpop.f32.mrf.mxu1 }
  0xe9   : > { %v1798_v17 = vpop.f32.mrf.mxu0 }
  0xea   : > { %v503_v18 = vsel %vm497_vm8, %v494_v10, %v500_v13  ;;  %vm495_vm10 = vcmp.ge.f32.partialorder %v492_v14, 0.0  ;;  %v498_v19 = vmul.f32 0.1, %v492_v14  ;;  %v484_v20 = vadd.f32 %v472_v7, %v400_v16  ;;  %v1805_v26 = vpop.f32.mrf.mxu1 }
  0xeb   : > { %v1712_v22 = vpack.c.bf16 %v503_v18, %v503_v18  ;;  %v585_v23 = vpop.f32.mrf.mxu0  ;;  %v669_v33 = vadd.f32 %v1804_v15, %v1798_v17 }
  0xec   : > { %v501_v24 = vsel %vm495_vm10, %v492_v14, %v498_v19  ;;  %v493_v25 = vadd.f32 %v2168_v2, %v484_v20  ;;  %v663_v30 = vpop.f32.mrf.mxu1  ;;  %v661_v37 = vadd.f32 %v660_v21, %v585_v23 }
  0xed   : > { %521 = vst.msk [vmem:[%s2176_s30 + $0x8] sm:$0x7] %vm520_vm9, %v1712_v22  ;;  %v1710_v27 = vpack.c.bf16 %v501_v24, %v501_v24  ;;  %v1799_v28 = vpop.f32.mrf.mxu0 }
  0xee   : > { %vm496_vm12 = vcmp.ge.f32.partialorder %v493_v25, 0.0  ;;  %v499_v29 = vmul.f32 0.1, %v493_v25  ;;  %v1816_v34 = vpop.f32.mrf.mxu1 }
  0xef   : > { %518 = vst.msk [vmem:[%s2176_s30] sm:$0xf] %vm517_vm11, %v1710_v27  ;;  %v588_v31 = vpop.f32.mrf.mxu0 }
  0xf0   : > { %v502_v32 = vsel %vm496_vm12, %v493_v25, %v499_v29  ;;  %v814_v38 = vpop.f32.mrf.mxu1  ;;  %v664_v45 = vadd.f32 %v663_v30, %v588_v31 }
  0xf1   : > { %v1711_v35 = vpack.c.bf16 %v502_v32, %v502_v32  ;;  %v1810_v36 = vpop.f32.mrf.mxu0 }
  0xf2   : > { %v766_v39 = vadd.f32 %v1810_v36, %v669_v33  ;;  %v1817_v42 = vpop.f32.mrf.mxu1 }
  0xf3   : > { %519 = vst.msk [vmem:[%s2176_s30 + $0x4] sm:$0xf] %vm517_vm11, %v1711_v35  ;;  %v750_v40 = vpop.f32.mrf.mxu0 }
  0xf4   : > { %v830_v41 = vadd.f32 %v1816_v34, %v766_v39  ;;  %v764_v43 = vadd.f32 %v750_v40, %v661_v37  ;;  %v817_v49 = vpop.f32.mrf.mxu1 }
  0xf5   : > { %v1811_v44 = vpop.f32.mrf.mxu0 }
  0xf6   : > { %v833_v46 = vadd.f32 %v2168_v2, %v830_v41  ;;  %v828_v47 = vadd.f32 %v814_v38, %v764_v43  ;;  %v1828_v53 = vpop.f32.mrf.mxu1 }
  0xf7   : > { %v753_v50 = vpop.f32.mrf.mxu0 }
  0xf8   : > { %vm836_vm13 = vcmp.ge.f32.partialorder %v833_v46, 0.0  ;;  %v839_v51 = vmul.f32 0.1, %v833_v46  ;;  %v831_v52 = vadd.f32 %v2168_v2, %v828_v47  ;;  %v765_v54 = vadd.f32 %v753_v50, %v664_v45  ;;  %v1002_v59 = vpop.f32.mrf.mxu1 }
  0xf9   : > { %v1822_v55 = vpop.f32.mrf.mxu0 }
  0xfa   : > { %v842_v56 = vsel %vm836_vm13, %v833_v46, %v839_v51  ;;  %vm834_vm14 = vcmp.ge.f32.partialorder %v831_v52, 0.0  ;;  %v837_v57 = vmul.f32 0.1, %v831_v52  ;;  %v829_v58 = vadd.f32 %v817_v49, %v765_v54  ;;  %v1829_v63 = vpop.f32.mrf.mxu1 }
  0xfb   : > { %v1715_v60 = vpack.c.bf16 %v842_v56, %v842_v56  ;;  %v939_v48 = vpop.f32.mrf.mxu0  ;;  %v1011_v8 = vadd.f32 %v1828_v53, %v1822_v55 }
  0xfc   : > { %v840_v61 = vsel %vm834_vm14, %v831_v52, %v837_v57  ;;  %v832_v62 = vadd.f32 %v2168_v2, %v829_v58  ;;  %v1005_v4 = vpop.f32.mrf.mxu1  ;;  %v1003_v7 = vadd.f32 %v1002_v59, %v939_v48 }
  0xfd   : > { %1658 = vst.msk [vmem:[%s2176_s30 + $0x14] sm:$0x7] %vm520_vm9, %v1715_v60  ;;  %v1713_v0 = vpack.c.bf16 %v840_v61, %v840_v61  ;;  %v1823_v1 = vpop.f32.mrf.mxu0 }
  0xfe   : > { %vm835_vm15 = vcmp.ge.f32.partialorder %v832_v62, 0.0  ;;  %v838_v3 = vmul.f32 0.1, %v832_v62  ;;  %v1840_v9 = vpop.f32.mrf.mxu1 }
  0xff   : > { %1656 = vst.msk [vmem:[%s2176_s30 + $0xc] sm:$0xf] %vm517_vm11, %v1713_v0  ;;  %v942_v5 = vpop.f32.mrf.mxu0 }
 0x100   : > { %v841_v6 = vsel %vm835_vm15, %v832_v62, %v838_v3  ;;  %v1163_v12 = vpop.f32.mrf.mxu1  ;;  %v1006_v19 = vadd.f32 %v1005_v4, %v942_v5 }
 0x101   : > { %v1714_v10 = vpack.c.bf16 %v841_v6, %v841_v6  ;;  %v1834_v11 = vpop.f32.mrf.mxu0 }
 0x102   : > { %v1095_v13 = vadd.f32 %v1834_v11, %v1011_v8  ;;  %v1841_v16 = vpop.f32.mrf.mxu1 }
 0x103   : > { %1657 = vst.msk [vmem:[%s2176_s30 + $0x10] sm:$0xf] %vm517_vm11, %v1714_v10  ;;  %v1079_v14 = vpop.f32.mrf.mxu0 }
 0x104   : > { %v1179_v15 = vadd.f32 %v1840_v9, %v1095_v13  ;;  %v1093_v17 = vadd.f32 %v1079_v14, %v1003_v7  ;;  %v1166_v22 = vpop.f32.mrf.mxu1 }
 0x105   : > { %v1835_v18 = vpop.f32.mrf.mxu0 }
 0x106   : > { %v1182_v20 = vadd.f32 %v2168_v2, %v1179_v15  ;;  %v1177_v21 = vadd.f32 %v1163_v12, %v1093_v17  ;;  %v1852_v26 = vpop.f32.mrf.mxu1 }
 0x107   : > { %v1082_v23 = vpop.f32.mrf.mxu0 }
 0x108   : > { %vm1185_vm0 = vcmp.ge.f32.partialorder %v1182_v20, 0.0  ;;  %v1188_v24 = vmul.f32 0.1, %v1182_v20  ;;  %v1180_v25 = vadd.f32 %v2168_v2, %v1177_v21  ;;  %v1094_v27 = vadd.f32 %v1082_v23, %v1006_v19  ;;  %v1346_v32 = vpop.f32.mrf.mxu1 }
 0x109   : > { %v1846_v28 = vpop.f32.mrf.mxu0 }
 0x10a   : > { %v1191_v29 = vsel %vm1185_vm0, %v1182_v20, %v1188_v24  ;;  %vm1183_vm1 = vcmp.ge.f32.partialorder %v1180_v25, 0.0  ;;  %v1186_v30 = vmul.f32 0.1, %v1180_v25  ;;  %v1178_v31 = vadd.f32 %v1166_v22, %v1094_v27  ;;  %v1853_v37 = vpop.f32.mrf.mxu1 }
 0x10b   : > { %v1718_v33 = vpack.c.bf16 %v1191_v29, %v1191_v29  ;;  %v1268_v34 = vpop.f32.mrf.mxu0  ;;  %v1355_v44 = vadd.f32 %v1852_v26, %v1846_v28 }
 0x10c   : > { %v1189_v35 = vsel %vm1183_vm1, %v1180_v25, %v1186_v30  ;;  %v1181_v36 = vadd.f32 %v2168_v2, %v1178_v31  ;;  %v1349_v41 = vpop.f32.mrf.mxu1  ;;  %v1347_v49 = vadd.f32 %v1346_v32, %v1268_v34 }
 0x10d   : > { %1682 = vst.msk [vmem:[%s2176_s30 + $0x20] sm:$0x7] %vm520_vm9, %v1718_v33  ;;  %v1716_v38 = vpack.c.bf16 %v1189_v35, %v1189_v35  ;;  %v1847_v39 = vpop.f32.mrf.mxu0 }
 0x10e   : > { %vm1184_vm2 = vcmp.ge.f32.partialorder %v1181_v36, 0.0  ;;  %v1187_v40 = vmul.f32 0.1, %v1181_v36  ;;  %v1864_v45 = vpop.f32.mrf.mxu1 }
 0x10f   : > { %1680 = vst.msk [vmem:[%s2176_s30 + $0x18] sm:$0xf] %vm517_vm11, %v1716_v38  ;;  %v1271_v42 = vpop.f32.mrf.mxu0 }
 0x110   : > { %v1190_v43 = vsel %vm1184_vm2, %v1181_v36, %v1187_v40  ;;  %v1505_v50 = vpop.f32.mrf.mxu1  ;;  %v1350_v57 = vadd.f32 %v1349_v41, %v1271_v42 }
 0x111   : > { %v1717_v46 = vpack.c.bf16 %v1190_v43, %v1190_v43  ;;  %v1858_v47 = vpop.f32.mrf.mxu0 }
 0x112   : > { %v1452_v51 = vadd.f32 %v1858_v47, %v1355_v44  ;;  %v1865_v54 = vpop.f32.mrf.mxu1 }
 0x113   : > { %1681 = vst.msk [vmem:[%s2176_s30 + $0x1c] sm:$0xf] %vm517_vm11, %v1717_v46  ;;  %v1436_v52 = vpop.f32.mrf.mxu0 }
 0x114   : > { %v1521_v53 = vadd.f32 %v1864_v45, %v1452_v51  ;;  %v1450_v55 = vadd.f32 %v1436_v52, %v1347_v49  ;;  %v1508_v63 = vpop.f32.mrf.mxu1 }
 0x115   : > { %v1859_v56 = vpop.f32.mrf.mxu0 }
 0x116   : > { %v1524_v58 = vadd.f32 %v2168_v2, %v1521_v53  ;;  %v1519_v59 = vadd.f32 %v1505_v50, %v1450_v55 }
 0x117   : > { %v1439_v60 = vpop.f32.mrf.mxu0 }
 0x118   : > { %vm1527_vm3 = vcmp.ge.f32.partialorder %v1524_v58, 0.0  ;;  %v1530_v48 = vmul.f32 0.1, %v1524_v58  ;;  %v1522_v61 = vadd.f32 %v2168_v2, %v1519_v59  ;;  %v1451_v62 = vadd.f32 %v1439_v60, %v1350_v57 }
 0x11a   : > { %v1533_v0 = vsel %vm1527_vm3, %v1524_v58, %v1530_v48  ;;  %vm1525_vm4 = vcmp.ge.f32.partialorder %v1522_v61, 0.0  ;;  %v1528_v1 = vmul.f32 0.1, %v1522_v61  ;;  %v1520_v3 = vadd.f32 %v1508_v63, %v1451_v62 }
 0x11b   : > { %v1721_v4 = vpack.c.bf16 %v1533_v0, %v1533_v0 }
 0x11c   : > { %v1531_v5 = vsel %vm1525_vm4, %v1522_v61, %v1528_v1  ;;  %v1523_v6 = vadd.f32 %v2168_v2, %v1520_v3 }
 0x11d   : > { %1707 = vst.msk [vmem:[%s2176_s30 + $0x2c] sm:$0x7] %vm520_vm9, %v1721_v4  ;;  %v1719_v8 = vpack.c.bf16 %v1531_v5, %v1531_v5 }
 0x11e   : > { %vm1526_vm5 = vcmp.ge.f32.partialorder %v1523_v6, 0.0  ;;  %v1529_v9 = vmul.f32 0.1, %v1523_v6 }
 0x11f   : > { %1705 = vst.msk [vmem:[%s2176_s30 + $0x24] sm:$0xf] %vm517_vm11, %v1719_v8 }
 0x120   : > { %v1532_v10 = vsel %vm1526_vm5, %v1523_v6, %v1529_v9 }
 0x121   : > { %v1720_v11 = vpack.c.bf16 %v1532_v10, %v1532_v10 }
 0x123   : > { %1706 = vst.msk [vmem:[%s2176_s30 + $0x28] sm:$0xf] %vm517_vm11, %v1720_v11 }
 0x124 PF: > { %s13_s12 = sadd.s32 1, %s1924_s12  }
 0x125   : > { %p10_p4 = scmp.ge.s32.totalorder %s13_s12, 4  }
 0x127   :  { %12 = sbr.rel (!%p10_p4) target bundleno = 1 (0x1), region = 80 }

// kernel: unet2d_forward.12
= control target key start
LH: loop header
LB: loop body
LE: loop exit
PB: predicated region body
PF: predicated region fallthrough
CT: control target
= control target key end

     0   :  { %s3803_s12 = smov 0   ;;  %s4659_s0 = inlined_call_operand.vmem [shape: bf16[2,1,100,8], index: 0, kind: input, shape index: {}]   ;;  %s4660_s1 = inlined_call_operand.vmem [shape: bf16[16,8,4], index: 1, kind: input, shape index: {}]   ;;  %s4661_s2 = inlined_call_operand.vmem [shape: f32[1,4], index: 2, kind: input, shape index: {}]   ;;  %s4662_s3 = inlined_call_operand.vmem [shape: bf16[2,4,78,4], index: 3, kind: output, shape index: {}]  }
   0x1 LB: > { %s2984_s13 = sadd.s32 4294967295, %s3779_s12   ;;  %p2988_p0 = scmp.ge.s32.totalorder %s3779_s12, 1  ;;  %s3779_s12 = sphi %s3803_s12, %s13_s12  }
   0x2   : > { %p137_p1 = scmp.lt.s32.totalorder %s3779_s12, 3 }
   0x4   : > { %p138_p2 = pnand %p2988_p0, %p137_p1 }
   0x5   : > { %p161_p3 = scmp.lt.s32.totalorder (!%p138_p2), %s2984_s13, 1 }
   0x6   : > { %141 = sbr.rel (%p138_p2) target bundleno = 545 (0x221), region = 32 }
   0xb   : > { %v183_v0 = vld [vmem:[%s4660_s1] sm:$0xf]  ;;  %vm268_vm0 = vcmask 1043456   ;;  %v3781_v1 = vmov 0.0   ;;  %v2991_v3 = vld [vmem:[%s4660_s1 + $0x4] sm:$0xf] }
   0xc   : > { %3374 = vmatprep.subr.bf16.mxu1 %v3781_v1  ;;  %v360_v2 = vsel %vm268_vm0, %v183_v0, 0  ;;  %3352 = vmatprep.subr.bf16.mxu0 %v3781_v1  ;;  %vm3782_vm1 = vmmov 0   ;;  %v270_v4 = vsel %vm268_vm0, %v2991_v3, 0  ;;  %s4664_s13 = smov (!%p161_p3, %s2984_s13), 1  ;;  %v3019_v5 = vld [vmem:[%s4660_s1 + $0xc] sm:$0xf] }
   0xd   : > { %3375 = vmatpush3.bf16.msra.mxu1 %v360_v2  ;;  %3376 = vmatprep.mubr.msk.bf16.mxu1 %vm3782_vm1, %v3781_v1  ;;  %s3704_s18 = smul.u32 52, %s4664_s13  ;;  %vm252_vm2 = vcmask 64512   ;;  %v690_v7 = vsel %vm268_vm0, %v3019_v5, 0  ;;  %v3008_v14 = vld [vmem:[%s4660_s1 + $0x8] sm:$0xf]  ;;  %vm472_vm5 = vcmask 1046528  }
   0xe   : > { %3353 = vmatpush3.bf16.msra.mxu0 %v270_v4  ;;  %3354 = vmatprep.mubr.msk.bf16.mxu0 %vm3782_vm1, %v3781_v1  ;;  %vm212_vm3 = vsmask.f32 7424  ;;  %v498_v19 = vsel %vm268_vm0, %v3008_v14, 0  ;;  %vm624_vm4 = vsmask.f32 6400  ;;  %vm1343_vm6 = vcmask 1045504  }
   0xf   : > { %3396 = vmatprep.subr.bf16.mxu0 %v3781_v1  ;;  %3418 = vmatprep.subr.bf16.mxu1 %v3781_v1  ;;  %s3836_s23 = scalar_lea.vmem %s4659_s0, %s3704_s18  ;;  %v3042_v58 = vld [vmem:[%s4660_s1 + $0x10] sm:$0xf]  ;;  %v3043_v4 = vld [vmem:[%s4660_s1 + $0x14] sm:$0xf]  ;;  %vm1989_vm7 = vsmask.f32 5376 }
  0x10   : > { %v3716_v6 = vld [vmem:[%s3836_s23] sm:$0xff]   ;;  %v3717_v8 = vld [vmem:[%s3836_s23 + $0x8] sm:$0xff]   ;;  %v3718_v12 = vld [vmem:[%s3836_s23 + $0x10] sm:$0xff]   ;;  %v1071_v0 = vsel %vm268_vm0, %v3042_v58, 0  ;;  %s3705_s28 = smul.u32 160, %s4664_s13  ;;  %vm861_vm9 = vcmask 27648  }
  0x11   : > { %3377 = vmatmul.mubr.msk.bf16.vlgmr.msra.gmra.mxu1 %vm252_vm2, %v3716_v6  ;;  %v214_v9 = vshrl.u32 %v3716_v6, 16  ;;  %v216_v10 = vshll.u32 %v3716_v6, 16  ;;  %v221_v11 = vshll.u32 %v3717_v8, 16  ;;  %v225_v17 = vshrl.u32 %v3717_v8, 16  ;;  %v3719_v23 = vld [vmem:[%s3836_s23 + $0x18] sm:$0xff]   ;;  %v3723_v35 = vld [vmem:[%s3836_s23 + $0xc] sm:$0xff]  }
  0x12   : > { %3419 = vmatpush3.bf16.msra.mxu1 %v690_v7  ;;  %3380 = vmatprep.mubr.msk.bf16.mxu1 %vm3782_vm1, %v3781_v1  ;;  %v229_v18 = vshll.u32 %v3718_v12, 16  ;;  %v233_v25 = vshrl.u32 %v3718_v12, 16  ;;  %v237_v26 = vshll.u32 %v3719_v23, 16  ;;  %v181_v27 = vld [vmem:[%s3836_s23 + $0x20] sm:$0xf]  ;;  %v241_v33 = vshrl.u32 %v3719_v23, 16  ;;  %s4288_s30 = scalar_lea.vmem %s4662_s3, %s3705_s28 }
  0x13   : > { %v218_v13 = vrot.slane %v216_v10, 1  ;;  %3462 = vmatprep.subr.bf16.mxu1 %v3781_v1  ;;  %v223_v15 = vrot.slane %v221_v11, 1  ;;  %v184_v28 = vld [vmem:[%s3836_s23 + $0x24] sm:$0xf]  ;;  %v634_v42 = vshrl.u32 %v3723_v35, 16  ;;  %v637_v43 = vshll.u32 %v3723_v35, 16 }
  0x14   : > { %v231_v22 = vrot.slane %v229_v18, 1  ;;  %v239_v30 = vrot.slane %v237_v26, 1  ;;  %v2996_v31 = vcombine.low %v181_v27, %v184_v28  ;;  %v3722_v36 = vld [vmem:[%s3836_s23 + $0x4] sm:$0xfe]   ;;  %v3726_v50 = vld [vmem:[%s3836_s23 + $0x14] sm:$0xff]   ;;  %v3725_v57 = vld [vmem:[%s3836_s23 + $0xc] sm:$0xff]  }
  0x15   : > { %v219_v16 = vor.u32 %v218_v13, %v214_v9  ;;  %v227_v21 = vor.u32 %v225_v17, %v223_v15  ;;  %v182_v39 = vld [vmem:[%s3836_s23 + $0x24] sm:$0x7]  ;;  %v626_v40 = vshrl.u32 %v3722_v36, 16  ;;  %v629_v41 = vshll.u32 %v3722_v36, 16  ;;  %v3728_v63 = vld [vmem:[%s3836_s23 + $0x1c] sm:$0xff]   ;;  %v3727_v11 = vld [vmem:[%s3836_s23 + $0x14] sm:$0xff]  }
  0x16   : > { %v235_v29 = vor.u32 %v233_v25, %v231_v22  ;;  %v245_v34 = vshll.u32 %v2996_v31, 16  ;;  %v243_v37 = vor.u32 %v241_v33, %v239_v30  ;;  %v3002_v45 = vcombine.low %v181_v27, %v182_v39  ;;  %v3724_v59 = vld [vmem:[%s3836_s23 + $0x4] sm:$0xfe]   ;;  %v873_v26 = vld [vmem:[%s3836_s23] sm:$0xf] }
  0x17   : > { %v224_v20 = vsel %vm212_vm3, %v219_v16, %v223_v15  ;;  %v232_v24 = vsel %vm212_vm3, %v227_v21, %v231_v22  ;;  %v628_v46 = vrot.slane %v626_v40, 1  ;;  %v631_v47 = vrot.slane %v629_v41, 2  ;;  %v874_v28 = vld [vmem:[%s3836_s23 + $0x4] sm:$0xf]  ;;  %v3733_v36 = vld [vmem:[%s3836_s23 + $0x8] sm:$0xff]  }
  0x18   : > { %3355 = vmatmul.mubr.msk.bf16.vlgmr.msra.gmra.mxu0 %vm252_vm2, %v224_v20  ;;  %v240_v32 = vsel %vm212_vm3, %v235_v29, %v239_v30  ;;  %v247_v38 = vrot.slane %v245_v34, 1  ;;  %v636_v48 = vrot.slane %v634_v42, 1  ;;  %v639_v49 = vrot.slane %v637_v43, 2  ;;  %v3731_v30 = vld [vmem:[%s3836_s23 + $0x24] sm:$0xff]   ;;  %v3060_v58 = vld [vmem:[%s4660_s1 + $0x18] sm:$0xf] }
  0x19   : > { %3397 = vmatpush3.bf16.msra.mxu0 %v498_v19  ;;  %3381 = vmatmul.mubr.msk.bf16.gmra.mxu1 %vm252_vm2, %v3717_v8  ;;  %v249_v51 = vshrl.u32 %v2996_v31, 16  ;;  %v632_v52 = vor.u32 %v631_v47, %v628_v46  ;;  %v643_v54 = vshrl.u32 %v3726_v50, 16  ;;  %v646_v55 = vshll.u32 %v3726_v50, 16  ;;  %v3730_v8 = vld [vmem:[%s3836_s23 + $0x24] sm:$0xff]   ;;  %v3729_v19 = vld [vmem:[%s3836_s23 + $0x1c] sm:$0xff]   ;;  %v3736_v46 = vld [vmem:[%s3836_s23 + $0x10] sm:$0xff]  }
  0x1a   : > { %3358 = vmatprep.mubr.msk.bf16.mxu0 %vm3782_vm1, %v3781_v1  ;;  %3384 = vmatprep.mubr.msk.bf16.mxu1 %vm3782_vm1, %v3781_v1  ;;  %v248_v44 = vsel %vm212_vm3, %v243_v37, %v247_v38  ;;  %v640_v53 = vor.u32 %v639_v49, %v636_v48  ;;  %v473_v2 = vrot.slane %v3724_v59, 1  ;;  %v474_v3 = vrot.slane %v3725_v57, 1  ;;  %v3072_v47 = vld [vmem:[%s4660_s1 + $0x1c] sm:$0xf] }
  0x1b   : > { %3440 = vmatprep.subr.bf16.mxu0 %v3781_v1  ;;  %v251_v56 = vor.u32 %v249_v51, %v247_v38  ;;  %v645_v61 = vrot.slane %v643_v54, 1  ;;  %v648_v62 = vrot.slane %v646_v55, 2  ;;  %v652_v6 = vshrl.u32 %v3728_v63, 16  ;;  %v3737_v57 = vld [vmem:[%s3836_s23 + $0x18] sm:$0xff]  }
  0x1c   : > { %v641_v60 = vsel %vm624_vm4, %v632_v52, %v640_v53  ;;  %v655_v7 = vshll.u32 %v3728_v63, 16  ;;  %v475_v9 = vsel %vm472_vm5, %v473_v2, %v474_v3  ;;  %v938_v10 = vsel %vm268_vm0, %v3043_v4, 0  ;;  %v3738_v4 = vld [vmem:[%s3836_s23 + $0x20] sm:$0xff]  }
  0x1d   : > { %v649_v5 = vor.u32 %v648_v62, %v645_v61  ;;  %v654_v13 = vrot.slane %v652_v6, 1  ;;  %v661_v15 = vshrl.u32 %v3730_v8, 16  ;;  %v664_v16 = vshll.u32 %v3730_v8, 16 }
  0x1e   : > { %v657_v14 = vrot.slane %v655_v7, 2  ;;  %v476_v17 = vrot.slane %v3727_v11, 1  ;;  %v478_v25 = vrot.slane %v3729_v19, 1  ;;  %v3054_v33 = vcombine.low %v873_v26, %v874_v28 }
  0x1f   : > { %v663_v20 = vrot.slane %v661_v15, 1  ;;  %v666_v21 = vrot.slane %v664_v16, 2  ;;  %v480_v34 = vrot.slane %v3731_v30, 1  ;;  %v1024_v42 = vshll.u32 %v3733_v36, 16  ;;  %v1146_v16 = vld [vmem:[%s3836_s23 + $0x4] sm:$0xe] }
  0x20   : > { %3359 = vmatmul.mubr.msk.bf16.gmra.mxu0 %vm252_vm2, %v232_v24  ;;  %v658_v18 = vor.u32 %v657_v14, %v654_v13  ;;  %v477_v22 = vsel %vm472_vm5, %v474_v3, %v476_v17  ;;  %v3732_v24 = vld [vmem:[%s3836_s23 + $0x2c] ss:$0 sps:$4 sm:$0x11]   ;;  %v479_v29 = vsel %vm472_vm5, %v476_v17, %v478_v25  ;;  %v1019_v37 = vshll.u32 %v3054_v33, 16  ;;  %v1147_v17 = vld [vmem:[%s3836_s23 + $0x8] sm:$0xf] }
  0x21   : > { %3385 = vmatmul.mubr.msk.bf16.gmra.mxu1 %vm252_vm2, %v3718_v12  ;;  %3362 = vmatprep.mubr.msk.bf16.mxu0 %vm3782_vm1, %v3781_v1  ;;  %v650_v12 = vsel %vm624_vm4, %v640_v53, %v649_v5  ;;  %v667_v27 = vor.u32 %v666_v21, %v663_v20  ;;  %v481_v38 = vsel %vm472_vm5, %v478_v25, %v480_v34  ;;  %v1017_v40 = vshrl.u32 %v3054_v33, 16  ;;  %v3099_v30 = vld [vmem:[%s4660_s1 + $0x20] sm:$0xf] }
  0x22   : > { %3388 = vmatprep.mubr.msk.bf16.mxu1 %vm3782_vm1, %v3781_v1  ;;  %v1021_v41 = vrot.slane %v1019_v37, 1  ;;  %v1028_v50 = vshrl.u32 %v3733_v36, 16  ;;  %v1032_v51 = vshll.u32 %v3736_v46, 16  ;;  %v1371_v52 = vsel %vm268_vm0, %v3072_v47, 0  ;;  %v3743_v47 = vld [vmem:[%s3836_s23 + $0x1c] sm:$0xff]  }
  0x23   : > { %v668_v31 = vsel %vm624_vm4, %v658_v18, %v667_v27  ;;  %v914_v54 = vrot.slane %v3733_v36, 1  ;;  %v1036_v62 = vshrl.u32 %v3736_v46, 16  ;;  %v1040_v63 = vshll.u32 %v3737_v57, 16 }
  0x24   : > { %v1022_v43 = vor.u32 %v1021_v41, %v1017_v40  ;;  %v1044_v7 = vshrl.u32 %v3737_v57, 16  ;;  %v1048_v8 = vshll.u32 %v3738_v4, 16  ;;  %v920_v14 = vrot.slane %v3738_v4, 1 }
  0x25   : > { %v1042_v3 = vrot.slane %v1040_v63, 1  ;;  %v1052_v15 = vshrl.u32 %v3738_v4, 16  ;;  %v3061_v21 = vcombine.low %v1146_v16, %v1147_v17  ;;  %v1755_v37 = vsel %vm268_vm0, %v3099_v30, 0  ;;  %v3745_v4 = vld [vmem:[%s3836_s23 + $0x2c] ss:$0 sps:$4 sm:$0x11]  }
  0x26   : > { %v1050_v11 = vrot.slane %v1048_v8, 1 }
  0x27   : > { %v1191_v25 = vshll.u32 %v3061_v21, 16 }
  0x28   : > { %3363 = vmatmul.mubr.msk.bf16.gmra.mxu0 %vm252_vm2, %v240_v32  ;;  %v670_v32 = vshll.u32 %v3732_v24, 16  ;;  %v1054_v20 = vor.u32 %v1052_v15, %v1050_v11  ;;  %v1188_v24 = vshrl.u32 %v3061_v21, 16 }
  0x29   : > { %3389 = vmatmul.mubr.msk.bf16.gmra.mxu1 %vm252_vm2, %v3719_v23  ;;  %3366 = vmatprep.mubr.msk.bf16.mxu0 %vm3782_vm1, %v3781_v1  ;;  %v659_v23 = vsel %vm624_vm4, %v649_v5, %v658_v18  ;;  %v1337_v18 = vld [vmem:[%s3836_s23 + $0x4] sm:$0xc] }
  0x2a   : > { %3392 = vmatprep.mubr.msk.bf16.mxu1 %vm3782_vm1, %v3781_v1  ;;  %v672_v35 = vrot.slane %v670_v32, 2  ;;  %v1193_v32 = vrot.slane %v1191_v25, 2  ;;  %v3748_v25 = vld [vmem:[%s3836_s23 + $0x14] sm:$0xff]  }
  0x2b   : > { %v1608_v30 = vshrl.u32 %v3748_v25, 16 }
  0x2c   : > { %v673_v39 = vsel %vm624_vm4, %v667_v27, %v672_v35  ;;  %v3742_v35 = vld [vmem:[%s3836_s23 + $0x14] sm:$0xff]  }
  0x2d   : > { %v1205_v40 = vshrl.u32 %v3742_v35, 16  ;;  %v1208_v41 = vshll.u32 %v3742_v35, 16 }
  0x30   : > { %3367 = vmatmul.mubr.msk.bf16.gmra.mxu0 %vm252_vm2, %v248_v44  ;;  %v1026_v44 = vrot.slane %v1024_v42, 1  ;;  %v1347_v42 = vrot.slane %v3742_v35, 2  ;;  %v1610_v35 = vrot.slane %v1608_v30, 1 }
  0x31   : > { %3393 = vmatmul.mubr.msk.bf16.gmra.mxu1 %vm252_vm2, %v3002_v45  ;;  %3370 = vmatprep.mubr.msk.bf16.mxu0 %vm3782_vm1, %v3781_v1  ;;  %v885_v45 = vld [vmem:[%s3836_s23] sm:$0xe] }
  0x32   : > { %3420 = vmatprep.mubr.msk.bf16.mxu1 %vm3782_vm1, %v3781_v1  ;;  %v3044_v48 = vcombine.low %v885_v45, %v874_v28  ;;  %v1027_v49 = vsel %vm212_vm3, %v1022_v43, %v1026_v44  ;;  %v1030_v55 = vor.u32 %v1028_v50, %v1026_v44  ;;  %v3100_v43 = vld [vmem:[%s4660_s1 + $0x24] sm:$0xf]  ;;  %v1207_v45 = vrot.slane %v1205_v40, 1 }
  0x34   : > { %v913_v53 = vrot.slane %v3044_v48, 1  ;;  %v1655_v48 = vsel %vm268_vm0, %v3100_v43, 0 }
  0x36   : > { %v915_v59 = vsel %vm472_vm5, %v913_v53, %v914_v54  ;;  %v1349_v53 = vrot.slane %v3743_v47, 2 }
  0x38   : > { %3371 = vmatmul.mubr.msk.bf16.gmra.mxu0 %vm252_vm2, %v251_v56  ;;  %v1034_v56 = vrot.slane %v1032_v51, 1  ;;  %v1214_v51 = vshrl.u32 %v3743_v47, 16 }
  0x39   : > { %3421 = vmatmul.mubr.msk.bf16.vlgmr.msra.gmra.mxu1 %vm252_vm2, %v641_v60  ;;  %3398 = vmatprep.mubr.msk.bf16.mxu0 %vm3782_vm1, %v3781_v1  ;;  %v1252_v60 = vsel %vm268_vm0, %v3060_v58, 0  ;;  %v1350_v58 = vsel %vm1343_vm6, %v1347_v42, %v1349_v53 }
  0x3a   : > { %3463 = vmatpush3.bf16.msra.mxu1 %v1071_v0  ;;  %3424 = vmatprep.mubr.msk.bf16.mxu1 %vm3782_vm1, %v3781_v1  ;;  %v1035_v61 = vsel %vm212_vm3, %v1030_v55, %v1034_v56  ;;  %v916_v0 = vrot.slane %v3736_v46, 1  ;;  %v1038_v2 = vor.u32 %v1036_v62, %v1034_v56  ;;  %v1210_v46 = vrot.slane %v1208_v41, 2 }
  0x3b   : > { %3506 = vmatprep.subr.bf16.mxu1 %v3781_v1  ;;  %v1216_v55 = vrot.slane %v1214_v51, 1 }
  0x3c   : > { %v917_v5 = vsel %vm472_vm5, %v914_v54, %v916_v0  ;;  %v1043_v6 = vsel %vm212_vm3, %v1038_v2, %v1042_v3  ;;  %v1211_v50 = vor.u32 %v1210_v46, %v1207_v45 }
  0x40   : > { %3399 = vmatmul.mubr.msk.bf16.vlgmr.msra.gmra.mxu0 %vm252_vm2, %v475_v9  ;;  %v918_v9 = vrot.slane %v3737_v57, 1  ;;  %v3744_v57 = vld [vmem:[%s3836_s23 + $0x24] sm:$0xff]  }
  0x41   : > { %3441 = vmatpush3.bf16.msra.mxu0 %v938_v10  ;;  %3425 = vmatmul.mubr.msk.bf16.gmra.mxu1 %vm252_vm2, %v650_v12  ;;  %v1046_v10 = vor.u32 %v1044_v7, %v1042_v3  ;;  %v1351_v62 = vrot.slane %v3744_v57, 2  ;;  %v3746_v7 = vld [vmem:[%s3836_s23 + $0x4] sm:$0xfe]  }
  0x42   : > { %3402 = vmatprep.mubr.msk.bf16.mxu0 %vm3782_vm1, %v3781_v1  ;;  %3428 = vmatprep.mubr.msk.bf16.mxu1 %vm3782_vm1, %v3781_v1  ;;  %v919_v12 = vsel %vm472_vm5, %v916_v0, %v918_v9  ;;  %v921_v19 = vsel %vm472_vm5, %v918_v9, %v920_v14  ;;  %v1232_v9 = vshll.u32 %v3745_v4, 16 }
  0x43   : > { %3484 = vmatprep.subr.bf16.mxu0 %v3781_v1  ;;  %v1051_v13 = vsel %vm212_vm3, %v1046_v10, %v1050_v11  ;;  %v1352_v3 = vsel %vm1343_vm6, %v1349_v53, %v1351_v62  ;;  %v3747_v10 = vld [vmem:[%s3836_s23 + $0xc] sm:$0xff]  }
  0x44   : > { %v1599_v15 = vshrl.u32 %v3747_v10, 16  ;;  %v1602_v16 = vshll.u32 %v3747_v10, 16 }
  0x48   : > { %3403 = vmatmul.mubr.msk.bf16.gmra.mxu0 %vm252_vm2, %v477_v22  ;;  %v3740_v22 = vld [vmem:[%s3836_s23 + $0xc] sm:$0xff]  }
  0x49   : > { %3429 = vmatmul.mubr.msk.bf16.gmra.mxu1 %vm252_vm2, %v659_v23  ;;  %3406 = vmatprep.mubr.msk.bf16.mxu0 %vm3782_vm1, %v3781_v1  ;;  %v3073_v23 = vcombine.low %v1337_v18, %v1147_v17  ;;  %v1196_v26 = vshrl.u32 %v3740_v22, 16  ;;  %v1199_v27 = vshll.u32 %v3740_v22, 16  ;;  %v1730_v17 = vrot.slane %v3746_v7, 1 }
  0x4a   : > { %3432 = vmatprep.mubr.msk.bf16.mxu1 %vm3782_vm1, %v3781_v1  ;;  %v1731_v18 = vrot.slane %v3747_v10, 1 }
  0x4b   : > { %v1344_v28 = vrot.slane %v3073_v23, 2  ;;  %v1198_v33 = vrot.slane %v1196_v26, 1  ;;  %v1601_v23 = vrot.slane %v1599_v15, 1 }
  0x4c   : > { %v1732_v26 = vsel %vm472_vm5, %v1730_v17, %v1731_v18 }
  0x50   : > { %3407 = vmatmul.mubr.msk.bf16.gmra.mxu0 %vm252_vm2, %v479_v29  ;;  %v1345_v29 = vrot.slane %v3740_v22, 2 }
  0x51   : > { %3433 = vmatmul.mubr.msk.bf16.gmra.mxu1 %vm252_vm2, %v668_v31  ;;  %3410 = vmatprep.mubr.msk.bf16.mxu0 %vm3782_vm1, %v3781_v1  ;;  %v1190_v31 = vrot.slane %v1188_v24, 1  ;;  %v1604_v24 = vrot.slane %v1602_v16, 2  ;;  %v3156_v16 = vld [vmem:[%s4660_s1 + $0x30] sm:$0xf] }
  0x52   : > { %3436 = vmatprep.mubr.msk.bf16.mxu1 %vm3782_vm1, %v3781_v1  ;;  %v1346_v36 = vsel %vm1343_vm6, %v1344_v28, %v1345_v29 }
  0x58   : > { %3411 = vmatmul.mubr.msk.bf16.gmra.mxu0 %vm252_vm2, %v481_v38  ;;  %v1194_v38 = vor.u32 %v1193_v32, %v1190_v31  ;;  %v1611_v31 = vshll.u32 %v3748_v25, 16  ;;  %v1733_v32 = vrot.slane %v3748_v25, 1 }
  0x59   : > { %3437 = vmatmul.mubr.msk.bf16.gmra.mxu1 %vm252_vm2, %v673_v39  ;;  %3414 = vmatprep.mubr.msk.bf16.mxu0 %vm3782_vm1, %v3781_v1 }
  0x5a   : > { %3464 = vmatprep.mubr.msk.bf16.mxu1 %vm3782_vm1, %v3781_v1 }
  0x60   : > { %3415 = vmatmul.mubr.msk.bf16.gmra.mxu0 %vm252_vm2, %v480_v34  ;;  %v1201_v34 = vrot.slane %v1199_v27, 2 }
  0x61   : > { %3465 = vmatmul.mubr.msk.bf16.vlgmr.msra.gmra.mxu1 %vm252_vm2, %v1027_v49  ;;  %3442 = vmatprep.mubr.msk.bf16.mxu0 %vm3782_vm1, %v3781_v1  ;;  %v1348_v49 = vsel %vm1343_vm6, %v1345_v29, %v1347_v42  ;;  %v1605_v29 = vor.u32 %v1604_v24, %v1601_v23  ;;  %v2449_v24 = vsel %vm268_vm0, %v3156_v16, 0 }
  0x62   : > { %3507 = vmatpush3.bf16.msra.mxu1 %v1371_v52  ;;  %3468 = vmatprep.mubr.msk.bf16.mxu1 %vm3782_vm1, %v3781_v1  ;;  %v1202_v39 = vor.u32 %v1201_v34, %v1198_v33  ;;  %v1217_v52 = vshll.u32 %v3743_v47, 16  ;;  %v3117_v33 = vld [vmem:[%s4660_s1 + $0x28] sm:$0xf] }
  0x63   : > { %3550 = vmatprep.subr.bf16.mxu1 %v3781_v1  ;;  %v3750_v47 = vld [vmem:[%s3836_s23 + $0x24] sm:$0xff]  }
  0x64   : > { %v1203_v44 = vsel %vm624_vm4, %v1194_v38, %v1202_v39  ;;  %v1212_v54 = vsel %vm624_vm4, %v1202_v39, %v1211_v50  ;;  %v1219_v56 = vrot.slane %v1217_v52, 2  ;;  %v1898_v38 = vsel %vm268_vm0, %v3117_v33, 0 }
  0x65   : > { %v1734_v39 = vsel %vm472_vm5, %v1731_v18, %v1733_v32  ;;  %v1629_v51 = vshll.u32 %v3750_v47, 16  ;;  %v1737_v52 = vrot.slane %v3750_v47, 1 }
  0x68   : > { %3443 = vmatmul.mubr.msk.bf16.vlgmr.msra.gmra.mxu0 %vm252_vm2, %v915_v59  ;;  %v1220_v59 = vor.u32 %v1219_v56, %v1216_v55  ;;  %v1631_v55 = vrot.slane %v1629_v51, 2 }
  0x69   : > { %3485 = vmatpush3.bf16.msra.mxu0 %v1252_v60  ;;  %3469 = vmatmul.mubr.msk.bf16.gmra.mxu1 %vm252_vm2, %v1035_v61  ;;  %v1223_v60 = vshrl.u32 %v3744_v57, 16  ;;  %v1226_v61 = vshll.u32 %v3744_v57, 16  ;;  %v3752_v57 = vld [vmem:[%s3836_s23 + $0x8] sm:$0xfc]  }
  0x6a   : > { %3446 = vmatprep.mubr.msk.bf16.mxu0 %vm3782_vm1, %v3781_v1  ;;  %3472 = vmatprep.mubr.msk.bf16.mxu1 %vm3782_vm1, %v3781_v1  ;;  %v1221_v63 = vsel %vm624_vm4, %v1211_v50, %v1220_v59  ;;  %v1626_v50 = vshrl.u32 %v3750_v47, 16 }
  0x6b   : > { %3528 = vmatprep.subr.bf16.mxu0 %v3781_v1  ;;  %v1225_v0 = vrot.slane %v1223_v60, 1  ;;  %v1228_v2 = vrot.slane %v1226_v61, 2  ;;  %v3751_v60 = vld [vmem:[%s3836_s23 + $0x2c] ss:$0 sps:$4 sm:$0x11]   ;;  %v1991_v61 = vshrl.u32 %v3752_v57, 16 }
  0x70   : > { %3447 = vmatmul.mubr.msk.bf16.gmra.mxu0 %vm252_vm2, %v917_v5  ;;  %v1229_v5 = vor.u32 %v1228_v2, %v1225_v0 }
  0x71   : > { %3473 = vmatmul.mubr.msk.bf16.gmra.mxu1 %vm252_vm2, %v1043_v6  ;;  %3450 = vmatprep.mubr.msk.bf16.mxu0 %vm3782_vm1, %v3781_v1  ;;  %v1353_v6 = vrot.slane %v3745_v4, 2  ;;  %v1993_v4 = vrot.slane %v1991_v61, 2 }
  0x72   : > { %3476 = vmatprep.mubr.msk.bf16.mxu1 %vm3782_vm1, %v3781_v1  ;;  %v1230_v8 = vsel %vm624_vm4, %v1220_v59, %v1229_v5 }
  0x73   : > { %v1354_v11 = vsel %vm1343_vm6, %v1351_v62, %v1353_v6  ;;  %v1994_v62 = vshll.u32 %v3752_v57, 16 }
  0x78   : > { %3451 = vmatmul.mubr.msk.bf16.gmra.mxu0 %vm252_vm2, %v919_v12  ;;  %v1591_v12 = vshrl.u32 %v3746_v7, 16 }
  0x79   : > { %3477 = vmatmul.mubr.msk.bf16.gmra.mxu1 %vm252_vm2, %v1051_v13  ;;  %3454 = vmatprep.mubr.msk.bf16.mxu0 %vm3782_vm1, %v3781_v1  ;;  %v1234_v13 = vrot.slane %v1232_v9, 2 }
  0x7a   : > { %3480 = vmatprep.mubr.msk.bf16.mxu1 %vm3782_vm1, %v3781_v1 }
  0x7b   : > { %v1235_v21 = vsel %vm624_vm4, %v1229_v5, %v1234_v13  ;;  %v1996_v5 = vrot.slane %v1994_v62, 3 }
  0x80   : > { %3455 = vmatmul.mubr.msk.bf16.gmra.mxu0 %vm252_vm2, %v921_v19  ;;  %v1593_v19 = vrot.slane %v1591_v12, 1 }
  0x81   : > { %3481 = vmatmul.mubr.msk.bf16.gmra.mxu1 %vm252_vm2, %v1054_v20  ;;  %3458 = vmatprep.mubr.msk.bf16.mxu0 %vm3782_vm1, %v3781_v1  ;;  %v3129_v20 = vld [vmem:[%s4660_s1 + $0x2c] sm:$0xf] }
  0x82   : > { %3508 = vmatprep.mubr.msk.bf16.mxu1 %vm3782_vm1, %v3781_v1  ;;  %v2059_v27 = vsel %vm268_vm0, %v3129_v20, 0 }
  0x88   : > { %3459 = vmatmul.mubr.msk.bf16.gmra.mxu0 %vm252_vm2, %v920_v14  ;;  %v1594_v14 = vshll.u32 %v3746_v7, 16 }
  0x89   : > { %3509 = vmatmul.mubr.msk.bf16.vlgmr.msra.gmra.mxu1 %vm252_vm2, %v1346_v36  ;;  %3486 = vmatprep.mubr.msk.bf16.mxu0 %vm3782_vm1, %v3781_v1  ;;  %v1613_v36 = vrot.slane %v1611_v31, 2 }
  0x8a   : > { %3551 = vmatpush3.bf16.msra.mxu1 %v1755_v37  ;;  %3512 = vmatprep.mubr.msk.bf16.mxu1 %vm3782_vm1, %v3781_v1  ;;  %v1596_v22 = vrot.slane %v1594_v14, 2  ;;  %v3749_v37 = vld [vmem:[%s3836_s23 + $0x1c] sm:$0xff]  }
  0x8b   : > { %3594 = vmatprep.subr.bf16.mxu1 %v3781_v1  ;;  %v1614_v40 = vor.u32 %v1613_v36, %v1610_v35  ;;  %v1617_v41 = vshrl.u32 %v3749_v37, 16  ;;  %v1620_v42 = vshll.u32 %v3749_v37, 16  ;;  %v1735_v43 = vrot.slane %v3749_v37, 1 }
  0x8c   : > { %v1597_v28 = vor.u32 %v1596_v22, %v1593_v19  ;;  %v4131_v22 = vld [vmem:[%s3836_s23 + $0x20] sm:$0xff]  }
  0x8d   : > { %v1619_v45 = vrot.slane %v1617_v41, 1  ;;  %v1622_v46 = vrot.slane %v1620_v42, 2  ;;  %v1738_v56 = vsel %vm472_vm5, %v1735_v43, %v1737_v52  ;;  %v2017_v31 = vshrl.u32 %v4131_v22, 16 }
  0x8e   : > { %v1606_v34 = vsel %vm624_vm4, %v1597_v28, %v1605_v29 }
  0x8f   : > { %v2019_v41 = vrot.slane %v2017_v31, 2 }
  0x90   : > { %3487 = vmatmul.mubr.msk.bf16.vlgmr.msra.gmra.mxu0 %vm252_vm2, %v1203_v44  ;;  %v1615_v44 = vsel %vm624_vm4, %v1605_v29, %v1614_v40 }
  0x91   : > { %3529 = vmatpush3.bf16.msra.mxu0 %v1655_v48  ;;  %3513 = vmatmul.mubr.msk.bf16.gmra.mxu1 %vm252_vm2, %v1348_v49  ;;  %v1736_v48 = vsel %vm472_vm5, %v1733_v32, %v1735_v43  ;;  %v1623_v49 = vor.u32 %v1622_v46, %v1619_v45  ;;  %v2020_v32 = vshll.u32 %v4131_v22, 16  ;;  %v4159_v43 = vld [vmem:[%s3836_s23 + $0x28] sm:$0xff]  }
  0x92   : > { %3490 = vmatprep.mubr.msk.bf16.mxu0 %vm3782_vm1, %v3781_v1  ;;  %3516 = vmatprep.mubr.msk.bf16.mxu1 %vm3782_vm1, %v3781_v1  ;;  %v2029_v51 = vshll.u32 %v4159_v43, 16 }
  0x93   : > { %3572 = vmatprep.subr.bf16.mxu0 %v3781_v1  ;;  %v1624_v53 = vsel %vm624_vm4, %v1614_v40, %v1623_v49  ;;  %v2022_v42 = vrot.slane %v2020_v32, 3 }
  0x98   : > { %3491 = vmatmul.mubr.msk.bf16.gmra.mxu0 %vm252_vm2, %v1212_v54  ;;  %v1628_v54 = vrot.slane %v1626_v50, 1  ;;  %v2026_v50 = vshrl.u32 %v4159_v43, 16 }
  0x99   : > { %3517 = vmatmul.mubr.msk.bf16.gmra.mxu1 %vm252_vm2, %v1350_v58  ;;  %3494 = vmatprep.mubr.msk.bf16.mxu0 %vm3782_vm1, %v3781_v1  ;;  %v4098_v58 = vld [vmem:[%s3836_s23 + $0x10] sm:$0xff]  }
  0x9a   : > { %3520 = vmatprep.mubr.msk.bf16.mxu1 %vm3782_vm1, %v3781_v1  ;;  %v1632_v59 = vor.u32 %v1631_v55, %v1628_v54  ;;  %v2002_v0 = vshll.u32 %v4098_v58, 16  ;;  %v1872_v28 = vrot.slane %v4098_v58, 2 }
  0x9c   : > { %v1633_v2 = vsel %vm624_vm4, %v1623_v49, %v1632_v59  ;;  %v2004_v7 = vrot.slane %v2002_v0, 3  ;;  %v2023_v49 = vor.u32 %v2022_v42, %v2019_v41  ;;  %v1876_v0 = vrot.slane %v4131_v22, 2 }
  0xa0   : > { %3495 = vmatmul.mubr.msk.bf16.gmra.mxu0 %vm252_vm2, %v1221_v63  ;;  %v1999_v63 = vshrl.u32 %v4098_v58, 16 }
  0xa1   : > { %3521 = vmatmul.mubr.msk.bf16.gmra.mxu1 %vm252_vm2, %v1352_v3  ;;  %3498 = vmatprep.mubr.msk.bf16.mxu0 %vm3782_vm1, %v3781_v1  ;;  %v1635_v3 = vshll.u32 %v3751_v60, 16  ;;  %v2031_v60 = vrot.slane %v2029_v51, 3 }
  0xa2   : > { %3524 = vmatprep.mubr.msk.bf16.mxu1 %vm3782_vm1, %v3781_v1  ;;  %v2001_v6 = vrot.slane %v1999_v63, 2 }
  0xa3   : > { %v1637_v10 = vrot.slane %v1635_v3, 2 }
  0xa4   : > { %v2005_v12 = vor.u32 %v2004_v7, %v2001_v6  ;;  %v2235_v7 = vld [vmem:[%s3836_s23 + $0x4] sm:$0xe] }
  0xa5   : > { %v1638_v18 = vsel %vm624_vm4, %v1632_v59, %v1637_v10  ;;  %v2028_v59 = vrot.slane %v2026_v50, 2 }
  0xa8   : > { %3499 = vmatmul.mubr.msk.bf16.gmra.mxu0 %vm252_vm2, %v1230_v8  ;;  %v4111_v8 = vld [vmem:[%s3836_s23 + $0x18] sm:$0xff]  }
  0xa9   : > { %3525 = vmatmul.mubr.msk.bf16.gmra.mxu1 %vm252_vm2, %v1354_v11  ;;  %3502 = vmatprep.mubr.msk.bf16.mxu0 %vm3782_vm1, %v3781_v1  ;;  %v1997_v11 = vor.u32 %v1996_v5, %v1993_v4  ;;  %v2008_v13 = vshrl.u32 %v4111_v8, 16  ;;  %v2011_v14 = vshll.u32 %v4111_v8, 16  ;;  %v1874_v47 = vrot.slane %v4111_v8, 2  ;;  %v4195_v8 = vld [vmem:[%s3836_s23 + $0x8] sm:$0xf] }
  0xaa   : > { %3552 = vmatprep.mubr.msk.bf16.mxu1 %vm3782_vm1, %v3781_v1  ;;  %v2032_v5 = vor.u32 %v2031_v60, %v2028_v59 }
  0xab   : > { %v2006_v19 = vsel %vm1989_vm7, %v1997_v11, %v2005_v12  ;;  %v2010_v20 = vrot.slane %v2008_v13, 2  ;;  %v1875_v55 = vsel %vm1343_vm6, %v1872_v28, %v1874_v47 }
  0xac   : > { %v2033_v16 = vsel %vm1989_vm7, %v2023_v49, %v2032_v5 }
  0xb0   : > { %3503 = vmatmul.mubr.msk.bf16.gmra.mxu0 %vm252_vm2, %v1235_v21  ;;  %v2013_v21 = vrot.slane %v2011_v14, 3 }
  0xb1   : > { %3553 = vmatmul.mubr.msk.bf16.vlgmr.msra.gmra.mxu1 %vm252_vm2, %v1732_v26  ;;  %3530 = vmatprep.mubr.msk.bf16.mxu0 %vm3782_vm1, %v3781_v1 }
  0xb2   : > { %3595 = vmatpush3.bf16.msra.mxu1 %v2059_v27  ;;  %3556 = vmatprep.mubr.msk.bf16.mxu1 %vm3782_vm1, %v3781_v1  ;;  %v1871_v27 = vrot.slane %v3752_v57, 2  ;;  %v2014_v30 = vor.u32 %v2013_v21, %v2010_v20 }
  0xb3   : > { %3638 = vmatprep.subr.bf16.mxu1 %v3781_v1 }
  0xb4   : > { %v1873_v37 = vsel %vm1343_vm6, %v1871_v27, %v1872_v28  ;;  %v2015_v40 = vsel %vm1989_vm7, %v2005_v12, %v2014_v30  ;;  %v2024_v58 = vsel %vm1989_vm7, %v2014_v30, %v2023_v49  ;;  %v1877_v12 = vsel %vm1343_vm6, %v1874_v47, %v1876_v0  ;;  %v4228_v47 = vld [vmem:[%s3836_s23 + $0x14] sm:$0xff]  }
  0xb5   : > { %v2405_v59 = vshll.u32 %v4228_v47, 16 }
  0xb8   : > { %3531 = vmatmul.mubr.msk.bf16.vlgmr.msra.gmra.mxu0 %vm252_vm2, %v1606_v34  ;;  %v3157_v34 = vld [vmem:[%s4660_s1 + $0x34] sm:$0xf] }
  0xb9   : > { %3573 = vmatpush3.bf16.msra.mxu0 %v1898_v38  ;;  %3557 = vmatmul.mubr.msk.bf16.gmra.mxu1 %vm252_vm2, %v1734_v39  ;;  %v2306_v39 = vsel %vm268_vm0, %v3157_v34, 0 }
  0xba   : > { %3534 = vmatprep.mubr.msk.bf16.mxu0 %vm3782_vm1, %v3781_v1  ;;  %3560 = vmatprep.mubr.msk.bf16.mxu1 %vm3782_vm1, %v3781_v1 }
  0xbb   : > { %3616 = vmatprep.subr.bf16.mxu0 %v3781_v1 }
  0xc0   : > { %3535 = vmatmul.mubr.msk.bf16.gmra.mxu0 %vm252_vm2, %v1615_v44 }
  0xc1   : > { %3561 = vmatmul.mubr.msk.bf16.gmra.mxu1 %vm252_vm2, %v1736_v48  ;;  %3538 = vmatprep.mubr.msk.bf16.mxu0 %vm3782_vm1, %v3781_v1 }
  0xc2   : > { %3564 = vmatprep.mubr.msk.bf16.mxu1 %vm3782_vm1, %v3781_v1 }
  0xc8   : > { %3539 = vmatmul.mubr.msk.bf16.gmra.mxu0 %vm252_vm2, %v1624_v53 }
  0xc9   : > { %3565 = vmatmul.mubr.msk.bf16.gmra.mxu1 %vm252_vm2, %v1738_v56  ;;  %3542 = vmatprep.mubr.msk.bf16.mxu0 %vm3782_vm1, %v3781_v1  ;;  %v3757_v56 = vld [vmem:[%s3836_s23 + $0x30] ss:$0 sps:$4 sm:$0x33]  }
  0xca   : > { %3568 = vmatprep.mubr.msk.bf16.mxu1 %vm3782_vm1, %v3781_v1  ;;  %v2038_v3 = vshll.u32 %v3757_v56, 16 }
  0xcc   : > { %v2040_v14 = vrot.slane %v2038_v3, 3 }
  0xd0   : > { %3543 = vmatmul.mubr.msk.bf16.gmra.mxu0 %vm252_vm2, %v1633_v2  ;;  %v2035_v2 = vshrl.u32 %v3757_v56, 16 }
  0xd1   : > { %v4114_v9 = vpop.f32.mrf.mxu1  ;;  %3569 = vmatmul.mubr.msk.bf16.gmra.mxu1 %vm252_vm2, %v1737_v52  ;;  %3546 = vmatprep.mubr.msk.bf16.mxu0 %vm3782_vm1, %v3781_v1 }
  0xd2   : > { %3596 = vmatprep.mubr.msk.bf16.mxu1 %vm3782_vm1, %v3781_v1  ;;  %v2037_v13 = vrot.slane %v2035_v2, 2 }
  0xd3   : > { %v3378_v15 = vpop.f32.mrf.mxu1 }
  0xd5   : > { %v4126_v17 = vpop.f32.mrf.mxu1 }
  0xd7   : > { %v3379_v23 = vpop.f32.mrf.mxu1 }
  0xd8   : > { %v4134_v25 = vpop.f32.mrf.mxu0  ;;  %3547 = vmatmul.mubr.msk.bf16.gmra.mxu0 %vm252_vm2, %v1638_v18  ;;  %v4204_v18 = vld [vmem:[%s3836_s23 + $0xc] sm:$0xff]   ;;  %v1878_v23 = vrot.slane %v4159_v43, 2 }
  0xd9   : > { %v4137_v26 = vpop.f32.mrf.mxu1  ;;  %3597 = vmatmul.mubr.msk.bf16.vlgmr.msra.gmra.mxu1 %vm252_vm2, %v2006_v19  ;;  %3574 = vmatprep.mubr.msk.bf16.mxu0 %vm3782_vm1, %v3781_v1  ;;  %v3169_v19 = vcombine.low %v2235_v7, %v4195_v8  ;;  %v2393_v30 = vshrl.u32 %v4204_v18, 16  ;;  %v2396_v31 = vshll.u32 %v4204_v18, 16 }
  0xda   : > { %v3356_v29 = vpop.f32.mrf.mxu0  ;;  %3639 = vmatpush3.bf16.msra.mxu1 %v2449_v24  ;;  %3600 = vmatprep.mubr.msk.bf16.mxu1 %vm3782_vm1, %v3781_v1  ;;  %v2041_v24 = vor.u32 %v2040_v14, %v2037_v13  ;;  %v4250_v13 = vld [vmem:[%s3836_s23 + $0x1c] sm:$0xff]   ;;  %v397_v14 = vadd.f32 %v4114_v9, %v4134_v25 }
  0xdb   : > { %v3382_v33 = vpop.f32.mrf.mxu1  ;;  %3682 = vmatprep.subr.bf16.mxu1 %v3781_v1  ;;  %v2385_v28 = vshrl.u32 %v3169_v19, 16  ;;  %v2388_v29 = vshll.u32 %v3169_v19, 16  ;;  %v2395_v43 = vrot.slane %v2393_v30, 1  ;;  %v4263_v9 = vld [vmem:[%s4661_s2] ss:$0 sm:$0xff] }
  0xdc   : > { %v4151_v35 = vpop.f32.mrf.mxu0 }
  0xdd   : > { %v4153_v36 = vpop.f32.mrf.mxu1  ;;  %v2387_v41 = vrot.slane %v2385_v28, 1  ;;  %v2390_v42 = vrot.slane %v2388_v29, 2  ;;  %v2411_v28 = vshrl.u32 %v4250_v13, 16  ;;  %v2414_v29 = vshll.u32 %v4250_v13, 16 }
  0xde   : > { %v3357_v38 = vpop.f32.mrf.mxu0  ;;  %v400_v30 = vadd.f32 %v4126_v17, %v4151_v35 }
  0xdf   : > { %v3383_v44 = vpop.f32.mrf.mxu1  ;;  %v2042_v38 = vsel %vm1989_vm7, %v2032_v5, %v2041_v24  ;;  %v2280_v24 = vrot.slane %v4204_v18, 2  ;;  %v2413_v17 = vrot.slane %v2411_v28, 1  ;;  %v2416_v35 = vrot.slane %v2414_v29, 2 }
  0xe0   : > { %v4161_v45 = vpop.f32.mrf.mxu0  ;;  %3575 = vmatmul.mubr.msk.bf16.vlgmr.msra.gmra.mxu0 %vm252_vm2, %v1873_v37  ;;  %v1879_v37 = vsel %vm1343_vm6, %v1876_v0, %v1878_v23  ;;  %v2398_v44 = vrot.slane %v2396_v31, 2  ;;  %v3187_v0 = vld [vmem:[%s4660_s1 + $0x3c] sm:$0xf] }
  0xe1   : > { %3617 = vmatpush3.bf16.msra.mxu0 %v2306_v39  ;;  %v4164_v46 = vpop.f32.mrf.mxu1  ;;  %3601 = vmatmul.mubr.msk.bf16.gmra.mxu1 %vm252_vm2, %v2015_v40  ;;  %v3758_v39 = vld [vmem:[%s3836_s23 + $0x30] ss:$0 sps:$4 sm:$0x11]  }
  0xe2   : > { %v3360_v48 = vpop.f32.mrf.mxu0  ;;  %3578 = vmatprep.mubr.msk.bf16.mxu0 %vm3782_vm1, %v3781_v1  ;;  %3604 = vmatprep.mubr.msk.bf16.mxu1 %vm3782_vm1, %v3781_v1  ;;  %v1880_v51 = vrot.slane %v3758_v39, 2  ;;  %v2399_v56 = vor.u32 %v2398_v44, %v2395_v43 }
  0xe3   : > { %v3386_v52 = vpop.f32.mrf.mxu1  ;;  %3660 = vmatprep.subr.bf16.mxu0 %v3781_v1 }
  0xe4   : > { %v4175_v53 = vpop.f32.mrf.mxu0  ;;  %v1881_v3 = vsel %vm1343_vm6, %v1878_v23, %v1880_v51 }
  0xe5   : > { %v4177_v54 = vpop.f32.mrf.mxu1 }
  0xe6   : > { %v3361_v57 = vpop.f32.mrf.mxu0 }
  0xe7   : > { %v3387_v61 = vpop.f32.mrf.mxu1  ;;  %v2248_v57 = vld [vmem:[%s3836_s23 + $0x4] sm:$0xc] }
  0xe8   : > { %v4182_v62 = vpop.f32.mrf.mxu0  ;;  %3579 = vmatmul.mubr.msk.bf16.gmra.mxu0 %vm252_vm2, %v1875_v55  ;;  %v2391_v55 = vor.u32 %v2390_v42, %v2387_v41 }
  0xe9   : > { %v4185_v63 = vpop.f32.mrf.mxu1  ;;  %3605 = vmatmul.mubr.msk.bf16.gmra.mxu1 %vm252_vm2, %v2024_v58  ;;  %3582 = vmatprep.mubr.msk.bf16.mxu0 %vm3782_vm1, %v3781_v1  ;;  %v2402_v58 = vshrl.u32 %v4228_v47, 16 }
  0xea   : > { %v3364_v4 = vpop.f32.mrf.mxu0  ;;  %3608 = vmatprep.mubr.msk.bf16.mxu1 %vm3782_vm1, %v3781_v1 }
  0xeb   : > { %v3390_v6 = vpop.f32.mrf.mxu1  ;;  %v3158_v4 = vcombine.low %v2248_v57, %v4195_v8  ;;  %v2404_v7 = vrot.slane %v2402_v58, 1 }
  0xec   : > { %v4197_v10 = vpop.f32.mrf.mxu0  ;;  %v2400_v6 = vsel %vm624_vm4, %v2391_v55, %v2399_v56 }
  0xed   : > { %v4199_v11 = vpop.f32.mrf.mxu1  ;;  %v2279_v8 = vrot.slane %v3158_v4, 2 }
  0xee   : > { %v3365_v15 = vpop.f32.mrf.mxu0 }
  0xef   : > { %v3391_v20 = vpop.f32.mrf.mxu1  ;;  %v2281_v41 = vsel %vm1343_vm6, %v2279_v8, %v2280_v24 }
  0xf0   : > { %v4207_v21 = vpop.f32.mrf.mxu0  ;;  %3583 = vmatmul.mubr.msk.bf16.gmra.mxu0 %vm252_vm2, %v1877_v12  ;;  %v2407_v12 = vrot.slane %v2405_v59, 2 }
  0xf1   : > { %v4210_v22 = vpop.f32.mrf.mxu1  ;;  %3609 = vmatmul.mubr.msk.bf16.gmra.mxu1 %vm252_vm2, %v2033_v16  ;;  %3586 = vmatprep.mubr.msk.bf16.mxu0 %vm3782_vm1, %v3781_v1  ;;  %v2753_v16 = vsel %vm268_vm0, %v3187_v0, 0 }
  0xf2   : > { %v3368_v27 = vpop.f32.mrf.mxu0  ;;  %3612 = vmatprep.mubr.msk.bf16.mxu1 %vm3782_vm1, %v3781_v1 }
  0xf3   : > { %v3394_v32 = vpop.f32.mrf.mxu1  ;;  %v2408_v27 = vor.u32 %v2407_v12, %v2404_v7 }
  0xf4   : > { %v4220_v33 = vpop.f32.mrf.mxu0  ;;  %v3175_v32 = vld [vmem:[%s4660_s1 + $0x38] sm:$0xf] }
  0xf5   : > { %v4222_v34 = vpop.f32.mrf.mxu1  ;;  %v2634_v43 = vsel %vm268_vm0, %v3175_v32, 0  ;;  %v2409_v44 = vsel %vm624_vm4, %v2399_v56, %v2408_v27  ;;  %vm2725_vm0 = vcmask 1044480  }
  0xf6   : > { %v3369_v40 = vpop.f32.mrf.mxu0 }
  0xf7   : > { %v3395_v48 = vpop.f32.mrf.mxu1 }
  0xf8   : > { %v4230_v49 = vpop.f32.mrf.mxu0  ;;  %3587 = vmatmul.mubr.msk.bf16.gmra.mxu0 %vm252_vm2, %v1879_v37  ;;  %v4280_v48 = vld [vmem:[%s3836_s23 + $0x24] sm:$0xff]  }
  0xf9   : > { %v726_v50 = vpop.f32.mrf.mxu1  ;;  %3613 = vmatmul.mubr.msk.bf16.gmra.mxu1 %vm252_vm2, %v2042_v38  ;;  %3590 = vmatprep.mubr.msk.bf16.mxu0 %vm3782_vm1, %v3781_v1  ;;  %v2423_v4 = vshll.u32 %v4280_v48, 16 }
  0xfa   : > { %v3372_v52 = vpop.f32.mrf.mxu0  ;;  %3640 = vmatprep.mubr.msk.bf16.mxu1 %vm3782_vm1, %v3781_v1 }
  0xfb   : > { %v3422_v60 = vpop.f32.mrf.mxu1 }
  0xfc   : > { %v4241_v61 = vpop.f32.mrf.mxu0 }
  0xfd   : > { %v729_v2 = vpop.f32.mrf.mxu1 }
  0xfe   : > { %v3373_v5 = vpop.f32.mrf.mxu0 }
  0xff   : > { %v3423_v15 = vpop.f32.mrf.mxu1  ;;  %v408_v5 = vadd.f32 %v4153_v36, %v4175_v53  ;;  %v2425_v53 = vrot.slane %v2423_v4, 2  ;;  %v2525_v4 = vld [vmem:[%s3836_s23 + $0xc] sm:$0xf] }
 0x100   : > { %v534_v19 = vpop.f32.mrf.mxu0  ;;  %3591 = vmatmul.mubr.msk.bf16.gmra.mxu0 %vm252_vm2, %v1881_v3  ;;  %v2420_v3 = vshrl.u32 %v4280_v48, 16 }
 0x101   : > { %v573_v20 = vadd.f32 %v534_v19, %v397_v14  ;;  %v734_v23 = vpop.f32.mrf.mxu1  ;;  %3641 = vmatmul.mubr.msk.bf16.vlgmr.msra.gmra.mxu1 %vm252_vm2, %v2400_v6  ;;  %3618 = vmatprep.mubr.msk.bf16.mxu0 %vm3782_vm1, %v3781_v1 }
 0x102   : > { %v3400_v25 = vpop.f32.mrf.mxu0  ;;  %3683 = vmatpush3.bf16.msra.mxu1 %v2753_v16  ;;  %3644 = vmatprep.mubr.msk.bf16.mxu1 %vm3782_vm1, %v3781_v1  ;;  %v2422_v36 = vrot.slane %v2420_v3, 1 }
 0x103   : > { %v765_v18 = vadd.f32 %v726_v50, %v573_v20  ;;  %v3426_v31 = vpop.f32.mrf.mxu1  ;;  %v405_v50 = vadd.f32 %v4137_v26, %v4161_v45  ;;  %v2282_v45 = vrot.slane %v4228_v47, 2 }
 0x104   : > { %v537_v37 = vpop.f32.mrf.mxu0 }
 0x105   : > { %v781_v38 = vadd.f32 %v4263_v9, %v765_v18  ;;  %v574_v39 = vadd.f32 %v537_v37, %v400_v30  ;;  %v737_v40 = vpop.f32.mrf.mxu1  ;;  %v2283_v20 = vsel %vm1343_vm6, %v2280_v24, %v2282_v45 }
 0x106   : > { %v3401_v42 = vpop.f32.mrf.mxu0 }
 0x107   : > { %vm791_vm8 = vcmp.ge.f32.partialorder %v781_v38, 0.0  ;;  %v801_v51 = vmul.f32 0.1, %v781_v38  ;;  %v766_v52 = vadd.f32 %v729_v2, %v574_v39  ;;  %v3427_v55 = vpop.f32.mrf.mxu1  ;;  %v2417_v2 = vor.u32 %v2416_v35, %v2413_v17 }
 0x108   : > { %v542_v57 = vpop.f32.mrf.mxu0  ;;  %3619 = vmatmul.mubr.msk.bf16.vlgmr.msra.gmra.mxu0 %vm252_vm2, %v2281_v41  ;;  %v2426_v39 = vor.u32 %v2425_v53, %v2422_v36  ;;  %v416_v41 = vadd.f32 %v4177_v54, %v4197_v10  ;;  %v421_v10 = vadd.f32 %v4185_v63, %v4207_v21  ;;  %v2286_v63 = vrot.slane %v4280_v48, 2  ;;  %v2524_v21 = vld [vmem:[%s3836_s23 + $0x8] sm:$0xc] }
 0x109   : > { %v811_v56 = vsel %vm791_vm8, %v781_v38, %v801_v51  ;;  %v782_v58 = vadd.f32 %v4263_v9, %v766_v52  ;;  %v575_v59 = vadd.f32 %v542_v57, %v405_v50  ;;  %3661 = vmatpush3.bf16.msra.mxu0 %v2634_v43  ;;  %v742_v26 = vpop.f32.mrf.mxu1  ;;  %3645 = vmatmul.mubr.msk.bf16.gmra.mxu1 %vm252_vm2, %v2409_v44 }
 0x10a   : > { %v3216_v60 = vpack.c.bf16 %v811_v56, %v811_v56  ;;  %v3404_v0 = vpop.f32.mrf.mxu0  ;;  %3622 = vmatprep.mubr.msk.bf16.mxu0 %vm3782_vm1, %v3781_v1  ;;  %3648 = vmatprep.mubr.msk.bf16.mxu1 %vm3782_vm1, %v3781_v1  ;;  %v2418_v28 = vsel %vm624_vm4, %v2408_v27, %v2417_v2  ;;  %v2427_v56 = vsel %vm624_vm4, %v2417_v2, %v2426_v39 }
 0x10b   : > { %vm792_vm10 = vcmp.ge.f32.partialorder %v782_v58, 0.0  ;;  %v802_v6 = vmul.f32 0.1, %v782_v58  ;;  %v767_v7 = vadd.f32 %v734_v23, %v575_v59  ;;  %v3430_v47 = vpop.f32.mrf.mxu1  ;;  %v413_v23 = vadd.f32 %v4164_v46, %v4182_v62 }
 0x10c   : > { %862 = vst.msk [vmem:[%s4288_s30] sm:$0xf] %vm861_vm9, %v3216_v60  ;;  %v545_v12 = vpop.f32.mrf.mxu0  ;;  %v2284_v46 = vrot.slane %v4250_v13, 2  ;;  %v424_v47 = vadd.f32 %v4199_v11, %v4220_v33 }
 0x10d   : > { %v812_v14 = vsel %vm792_vm10, %v782_v58, %v802_v6  ;;  %v783_v15 = vadd.f32 %v4263_v9, %v767_v7  ;;  %v576_v16 = vadd.f32 %v545_v12, %v408_v5  ;;  %v745_v19 = vpop.f32.mrf.mxu1 }
 0x10e   : > { %v3217_v8 = vpack.c.bf16 %v812_v14, %v812_v14  ;;  %v3405_v25 = vpop.f32.mrf.mxu0  ;;  %v2285_v52 = vsel %vm1343_vm6, %v2282_v45, %v2284_v46  ;;  %v2287_v11 = vsel %vm1343_vm6, %v2284_v46, %v2286_v63 }
 0x10f   : > { %vm793_vm11 = vcmp.ge.f32.partialorder %v783_v15, 0.0  ;;  %v803_v29 = vmul.f32 0.1, %v783_v15  ;;  %v768_v30 = vadd.f32 %v737_v40, %v576_v16  ;;  %v3431_v18 = vpop.f32.mrf.mxu1  ;;  %v4319_v40 = vld [vmem:[%s3836_s23 + $0x2c] ss:$0 sps:$4 sm:$0x11]  }
 0x110   : > { %863 = vst.msk [vmem:[%s4288_s30 + $0x4] sm:$0xf] %vm861_vm9, %v3217_v8  ;;  %v550_v31 = vpop.f32.mrf.mxu0  ;;  %3623 = vmatmul.mubr.msk.bf16.gmra.mxu0 %vm252_vm2, %v2283_v20  ;;  %v2429_v54 = vshll.u32 %v4319_v40, 16  ;;  %v2719_v16 = vld [vmem:[%s3836_s23 + $0x8] sm:$0x8]  ;;  %v3176_v20 = vcombine.low %v2524_v21, %v2525_v4  ;;  %v4349_v8 = vld [vmem:[%s3836_s23 + $0x10] sm:$0xff]   ;;  %v429_v18 = vadd.f32 %v4210_v22, %v4230_v49 }
 0x111   : > { %v813_v24 = vsel %vm793_vm11, %v783_v15, %v803_v29  ;;  %v784_v32 = vadd.f32 %v4263_v9, %v768_v30  ;;  %v577_v27 = vadd.f32 %v550_v31, %v413_v23  ;;  %v750_v37 = vpop.f32.mrf.mxu1  ;;  %3649 = vmatmul.mubr.msk.bf16.gmra.mxu1 %vm252_vm2, %v2418_v28  ;;  %3626 = vmatprep.mubr.msk.bf16.mxu0 %vm3782_vm1, %v3781_v1  ;;  %v2574_v46 = vshrl.u32 %v4349_v8, 16 }
 0x112   : > { %v3218_v62 = vpack.c.bf16 %v813_v24, %v813_v24  ;;  %v3408_v38 = vpop.f32.mrf.mxu0  ;;  %3652 = vmatprep.mubr.msk.bf16.mxu1 %vm3782_vm1, %v3781_v1  ;;  %v2431_v7 = vrot.slane %v2429_v54, 2  ;;  %v3188_v30 = vcombine.low %v2719_v16, %v2525_v4  ;;  %v2288_v49 = vrot.slane %v4319_v40, 2 }
 0x113   : > { %vm794_vm12 = vcmp.ge.f32.partialorder %v784_v32, 0.0  ;;  %v804_v42 = vmul.f32 0.1, %v784_v32  ;;  %v769_v43 = vadd.f32 %v742_v26, %v577_v27  ;;  %v3434_v44 = vpop.f32.mrf.mxu1  ;;  %v2577_v38 = vshll.u32 %v4349_v8, 16 }
 0x114   : > { %864 = vst.msk [vmem:[%s4288_s30 + $0x8] sm:$0xf] %vm861_vm9, %v3218_v62  ;;  %v553_v17 = vpop.f32.mrf.mxu0  ;;  %v2432_v29 = vsel %vm624_vm4, %v2426_v39, %v2431_v7  ;;  %v2569_v62 = vshll.u32 %v3176_v20, 16 }
 0x115   : > { %v814_v13 = vsel %vm794_vm12, %v784_v32, %v804_v42  ;;  %v785_v35 = vadd.f32 %v4263_v9, %v769_v43  ;;  %v578_v50 = vadd.f32 %v553_v17, %v416_v41  ;;  %v753_v51 = vpop.f32.mrf.mxu1  ;;  %v2726_v17 = vrot.slane %v3188_v30, 3 }
 0x116   : > { %v3219_v55 = vpack.c.bf16 %v814_v13, %v814_v13  ;;  %v3409_v57 = vpop.f32.mrf.mxu0  ;;  %v2727_v13 = vrot.slane %v4349_v8, 3  ;;  %v2579_v54 = vrot.slane %v2577_v38, 3 }
 0x117   : > { %vm795_vm13 = vcmp.ge.f32.partialorder %v785_v35, 0.0  ;;  %v805_v58 = vmul.f32 0.1, %v785_v35  ;;  %v770_v59 = vadd.f32 %v745_v19, %v578_v50  ;;  %v3435_v26 = vpop.f32.mrf.mxu1  ;;  %v2571_v57 = vrot.slane %v2569_v62, 3 }
 0x118   : > { %865 = vst.msk [vmem:[%s4288_s30 + $0xc] sm:$0xf] %vm861_vm9, %v3219_v55  ;;  %v558_v60 = vpop.f32.mrf.mxu0  ;;  %3627 = vmatmul.mubr.msk.bf16.gmra.mxu0 %vm252_vm2, %v2285_v52 }
 0x119   : > { %v815_v45 = vsel %vm795_vm13, %v785_v35, %v805_v58  ;;  %v786_v0 = vadd.f32 %v4263_v9, %v770_v59  ;;  %v579_v2 = vadd.f32 %v558_v60, %v421_v10  ;;  %v758_v3 = vpop.f32.mrf.mxu1  ;;  %3653 = vmatmul.mubr.msk.bf16.gmra.mxu1 %vm252_vm2, %v2427_v56  ;;  %3630 = vmatprep.mubr.msk.bf16.mxu0 %vm3782_vm1, %v3781_v1  ;;  %v2576_v56 = vrot.slane %v2574_v46, 2 }
 0x11a   : > { %v3220_v5 = vpack.c.bf16 %v815_v45, %v815_v45  ;;  %v3412_v6 = vpop.f32.mrf.mxu0  ;;  %3656 = vmatprep.mubr.msk.bf16.mxu1 %vm3782_vm1, %v3781_v1  ;;  %v432_v35 = vadd.f32 %v4222_v34, %v4241_v61  ;;  %v2289_v34 = vsel %vm1343_vm6, %v2286_v63, %v2288_v49  ;;  %v3768_v61 = vld [vmem:[%s3836_s23 + $0x18] sm:$0xff]   ;;  %vm871_vm6 = vcmask 26624  }
 0x11b   : > { %vm796_vm14 = vcmp.ge.f32.partialorder %v786_v0, 0.0  ;;  %v806_v12 = vmul.f32 0.1, %v786_v0  ;;  %v771_v14 = vadd.f32 %v750_v37, %v579_v2  ;;  %v3438_v15 = vpop.f32.mrf.mxu1  ;;  %v2566_v37 = vshrl.u32 %v3176_v20, 16 }
 0x11c   : > { %866 = vst.msk [vmem:[%s4288_s30 + $0x10] sm:$0xf] %vm861_vm9, %v3220_v5  ;;  %v561_v19 = vpop.f32.mrf.mxu0  ;;  %v2580_v48 = vor.u32 %v2579_v54, %v2576_v56  ;;  %v2729_v16 = vrot.slane %v3768_v61, 3 }
 0x11d   : > { %v816_v25 = vsel %vm796_vm14, %v786_v0, %v806_v12  ;;  %v787_v28 = vadd.f32 %v4263_v9, %v771_v14  ;;  %v580_v36 = vadd.f32 %v561_v19, %v424_v47  ;;  %v761_v53 = vpop.f32.mrf.mxu1  ;;  %v2568_v55 = vrot.slane %v2566_v37, 2 }
 0x11e   : > { %v3221_v33 = vpack.c.bf16 %v816_v25, %v816_v25  ;;  %v3413_v23 = vpop.f32.mrf.mxu0  ;;  %v2728_v0 = vsel %vm2725_vm0, %v2726_v17, %v2727_v13  ;;  %v2583_v47 = vshrl.u32 %v3768_v61, 16  ;;  %v2586_v12 = vshll.u32 %v3768_v61, 16 }
 0x11f   : > { %vm797_vm15 = vcmp.ge.f32.partialorder %v787_v28, 0.0  ;;  %v807_v31 = vmul.f32 0.1, %v787_v28  ;;  %v772_v24 = vadd.f32 %v753_v51, %v580_v36  ;;  %v3439_v32 = vpop.f32.mrf.mxu1  ;;  %v2572_v5 = vor.u32 %v2571_v57, %v2568_v55 }
 0x120   : > { %867 = vst.msk [vmem:[%s4288_s30 + $0x14] sm:$0xf] %vm861_vm9, %v3221_v33  ;;  %v566_v27 = vpop.f32.mrf.mxu0  ;;  %3631 = vmatmul.mubr.msk.bf16.gmra.mxu0 %vm252_vm2, %v2287_v11  ;;  %v2588_v11 = vrot.slane %v2586_v12, 3  ;;  %v3769_v33 = vld [vmem:[%s3836_s23 + $0x20] sm:$0xff]   ;;  %v2730_v30 = vsel %vm2725_vm0, %v2727_v13, %v2729_v16 }
 0x121   : > { %v817_v39 = vsel %vm797_vm15, %v787_v28, %v807_v31  ;;  %v788_v41 = vadd.f32 %v4263_v9, %v772_v24  ;;  %v581_v42 = vadd.f32 %v566_v27, %v429_v18  ;;  %v4364_v22 = vpop.f32.mrf.mxu1  ;;  %3657 = vmatmul.mubr.msk.bf16.gmra.mxu1 %vm252_vm2, %v2432_v29  ;;  %3634 = vmatprep.mubr.msk.bf16.mxu0 %vm3782_vm1, %v3781_v1  ;;  %v2592_v27 = vshrl.u32 %v3769_v33, 16 }
 0x122   : > { %v3222_v43 = vpack.c.bf16 %v817_v39, %v817_v39  ;;  %v3416_v44 = vpop.f32.mrf.mxu0  ;;  %3684 = vmatprep.mubr.msk.bf16.mxu1 %vm3782_vm1, %v3781_v1  ;;  %v2581_v36 = vsel %vm1989_vm7, %v2572_v5, %v2580_v48  ;;  %v2595_v37 = vshll.u32 %v3769_v33, 16  ;;  %v2731_v46 = vrot.slane %v3769_v33, 3 }
 0x123   : > { %vm798_vm3 = vcmp.ge.f32.partialorder %v788_v41, 0.0  ;;  %v808_v50 = vmul.f32 0.1, %v788_v41  ;;  %v773_v51 = vadd.f32 %v758_v3, %v581_v42  ;;  %v3466_v52 = vpop.f32.mrf.mxu1  ;;  %v2594_v49 = vrot.slane %v2592_v27, 2  ;;  %v3770_v44 = vld [vmem:[%s3836_s23 + $0x28] sm:$0xff]  }
 0x124   : > { %868 = vst.msk [vmem:[%s4288_s30 + $0x18] sm:$0xf] %vm861_vm9, %v3222_v43  ;;  %v569_v40 = vpop.f32.mrf.mxu0  ;;  %v2597_v43 = vrot.slane %v2595_v37, 3  ;;  %v2732_v13 = vsel %vm2725_vm0, %v2729_v16, %v2731_v46  ;;  %v2604_v55 = vshll.u32 %v3770_v44, 16  ;;  %v2733_v56 = vrot.slane %v3770_v44, 3 }
 0x125   : > { %v818_v10 = vsel %vm798_vm3, %v788_v41, %v808_v50  ;;  %v789_v58 = vadd.f32 %v4263_v9, %v773_v51  ;;  %v582_v59 = vadd.f32 %v569_v40, %v432_v35  ;;  %v4378_v26 = vpop.f32.mrf.mxu1  ;;  %v2601_v40 = vshrl.u32 %v3770_v44, 16 }
 0x126   : > { %v3223_v60 = vpack.c.bf16 %v818_v10, %v818_v10  ;;  %v3417_v45 = vpop.f32.mrf.mxu0  ;;  %v2598_v52 = vor.u32 %v2597_v43, %v2594_v49  ;;  %v2606_v61 = vrot.slane %v2604_v55, 3 }
 0x127   : > { %vm799_vm4 = vcmp.ge.f32.partialorder %v789_v58, 0.0  ;;  %v809_v2 = vmul.f32 0.1, %v789_v58  ;;  %v774_v3 = vadd.f32 %v761_v53, %v582_v59  ;;  %v3467_v21 = vpop.f32.mrf.mxu1  ;;  %v2585_v53 = vrot.slane %v2583_v47, 2 }
 0x128   : > { %869 = vst.msk [vmem:[%s4288_s30 + $0x1c] sm:$0xf] %vm861_vm9, %v3223_v60  ;;  %v4387_v4 = vpop.f32.mrf.mxu0  ;;  %3635 = vmatmul.mubr.msk.bf16.gmra.mxu0 %vm252_vm2, %v2289_v34  ;;  %v2603_v34 = vrot.slane %v2601_v40, 2  ;;  %v3771_v60 = vld [vmem:[%s3836_s23 + $0x30] ss:$0 sps:$4 sm:$0x33]  }
 0x129   : > { %v819_v6 = vsel %vm799_vm4, %v789_v58, %v809_v2  ;;  %v790_v63 = vadd.f32 %v4263_v9, %v774_v3  ;;  %v4391_v7 = vpop.f32.mrf.mxu1  ;;  %3685 = vmatmul.mubr.msk.bf16.vlgmr.msra.gmra.mxu1 %vm252_vm2, %v2728_v0  ;;  %3662 = vmatprep.mubr.msk.bf16.mxu0 %vm3782_vm1, %v3781_v1  ;;  %v2589_v32 = vor.u32 %v2588_v11, %v2585_v53  ;;  %v2735_v47 = vrot.slane %v3771_v60, 3 }
 0x12a   : > { %v3224_v14 = vpack.c.bf16 %v819_v6, %v819_v6  ;;  %v3444_v15 = vpop.f32.mrf.mxu0  ;;  %3688 = vmatprep.mubr.msk.bf16.mxu1 %vm3782_vm1, %v3781_v1  ;;  %v2734_v0 = vsel %vm2725_vm0, %v2731_v46, %v2733_v56  ;;  %v2607_v5 = vor.u32 %v2606_v61, %v2603_v34  ;;  %v2613_v6 = vshll.u32 %v3771_v60, 16 }
 0x12b   : > { %vm800_vm5 = vcmp.ge.f32.partialorder %v790_v63, 0.0  ;;  %v810_v19 = vmul.f32 0.1, %v790_v63  ;;  %v3470_v20 = vpop.f32.mrf.mxu1  ;;  %v2590_v42 = vsel %vm1989_vm7, %v2580_v48, %v2589_v32  ;;  %v2599_v59 = vsel %vm1989_vm7, %v2589_v32, %v2598_v52 }
 0x12c   : > { %870 = vst.msk [vmem:[%s4288_s30 + $0x20] sm:$0xf] %vm861_vm9, %v3224_v14  ;;  %v4400_v8 = vpop.f32.mrf.mxu0  ;;  %v2610_v48 = vshrl.u32 %v3771_v60, 16  ;;  %v2608_v16 = vsel %vm1989_vm7, %v2598_v52, %v2607_v5  ;;  %v2615_v20 = vrot.slane %v2613_v6, 3 }
 0x12d   : > { %v820_v25 = vsel %vm800_vm5, %v790_v63, %v810_v19  ;;  %v4402_v28 = vpop.f32.mrf.mxu1 }
 0x12e   : > { %v3225_v23 = vpack.c.bf16 %v820_v25, %v820_v25  ;;  %v3445_v29 = vpop.f32.mrf.mxu0  ;;  %v2612_v19 = vrot.slane %v2610_v48, 2 }
 0x12f   : > { %v3471_v18 = vpop.f32.mrf.mxu1 }
 0x130   : > { %872 = vst.msk [vmem:[%s4288_s30 + $0x24] sm:$0x7] %vm871_vm6, %v3225_v23  ;;  %v4409_v31 = vpop.f32.mrf.mxu0  ;;  %3663 = vmatmul.mubr.msk.bf16.vlgmr.msra.gmra.mxu0 %vm252_vm2, %v2581_v36  ;;  %v2736_v36 = vsel %vm2725_vm0, %v2733_v56, %v2735_v47  ;;  %v2616_v23 = vor.u32 %v2615_v20, %v2612_v19 }
 0x131   : > { %v4412_v24 = vpop.f32.mrf.mxu1  ;;  %3689 = vmatmul.mubr.msk.bf16.gmra.mxu1 %vm252_vm2, %v2730_v30  ;;  %3666 = vmatprep.mubr.msk.bf16.mxu0 %vm3782_vm1, %v3781_v1 }
 0x132   : > { %v3448_v62 = vpop.f32.mrf.mxu0  ;;  %3692 = vmatprep.mubr.msk.bf16.mxu1 %vm3782_vm1, %v3781_v1  ;;  %v2617_v27 = vsel %vm1989_vm7, %v2607_v5, %v2616_v23 }
 0x133   : > { %v3474_v38 = vpop.f32.mrf.mxu1  ;;  %v1108_v62 = vadd.f32 %v4364_v22, %v4387_v4  ;;  %v1116_v22 = vadd.f32 %v4391_v7, %v4409_v31 }
 0x134   : > { %v4419_v39 = vpop.f32.mrf.mxu0 }
 0x135   : > { %v4421_v41 = vpop.f32.mrf.mxu1 }
 0x136   : > { %v3449_v17 = vpop.f32.mrf.mxu0 }
 0x137   : > { %v3475_v35 = vpop.f32.mrf.mxu1 }
 0x138   : > { %v4426_v50 = vpop.f32.mrf.mxu0  ;;  %3667 = vmatmul.mubr.msk.bf16.gmra.mxu0 %vm252_vm2, %v2590_v42 }
 0x139   : > { %v4429_v51 = vpop.f32.mrf.mxu1  ;;  %3693 = vmatmul.mubr.msk.bf16.gmra.mxu1 %vm252_vm2, %v2732_v13  ;;  %3670 = vmatprep.mubr.msk.bf16.mxu0 %vm3782_vm1, %v3781_v1 }
 0x13a   : > { %v3452_v57 = vpop.f32.mrf.mxu0  ;;  %3696 = vmatprep.mubr.msk.bf16.mxu1 %vm3782_vm1, %v3781_v1 }
 0x13b   : > { %v3478_v54 = vpop.f32.mrf.mxu1 }
 0x13c   : > { %v4436_v10 = vpop.f32.mrf.mxu0 }
 0x13d   : > { %v4438_v58 = vpop.f32.mrf.mxu1 }
 0x13e   : > { %v3453_v45 = vpop.f32.mrf.mxu0 }
 0x13f   : > { %v3479_v2 = vpop.f32.mrf.mxu1  ;;  %v1119_v45 = vadd.f32 %v4402_v28, %v4419_v39 }
 0x140   : > { %v4443_v3 = vpop.f32.mrf.mxu0  ;;  %3671 = vmatmul.mubr.msk.bf16.gmra.mxu0 %vm252_vm2, %v2599_v59 }
 0x141   : > { %v4446_v21 = vpop.f32.mrf.mxu1  ;;  %3697 = vmatmul.mubr.msk.bf16.gmra.mxu1 %vm252_vm2, %v2734_v0  ;;  %3674 = vmatprep.mubr.msk.bf16.mxu0 %vm3782_vm1, %v3781_v1 }
 0x142   : > { %v3456_v63 = vpop.f32.mrf.mxu0  ;;  %3700 = vmatprep.mubr.msk.bf16.mxu1 %vm3782_vm1, %v3781_v1 }
 0x143   : > { %v3482_v12 = vpop.f32.mrf.mxu1 }
 0x144   : > { %v4453_v14 = vpop.f32.mrf.mxu0 }
 0x145   : > { %v4455_v15 = vpop.f32.mrf.mxu1 }
 0x146   : > { %v3457_v25 = vpop.f32.mrf.mxu0 }
 0x147   : > { %v3483_v53 = vpop.f32.mrf.mxu1 }
 0x148   : > { %v4459_v11 = vpop.f32.mrf.mxu0  ;;  %3675 = vmatmul.mubr.msk.bf16.gmra.mxu0 %vm252_vm2, %v2608_v16  ;;  %v1124_v16 = vadd.f32 %v4412_v24, %v4426_v50 }
 0x149   : > { %v1407_v33 = vpop.f32.mrf.mxu1  ;;  %3701 = vmatmul.mubr.msk.bf16.gmra.mxu1 %vm252_vm2, %v2736_v36  ;;  %3678 = vmatprep.mubr.msk.bf16.mxu0 %vm3782_vm1, %v3781_v1  ;;  %v1111_v1 = vadd.f32 %v4378_v26, %v4400_v8 }
 0x14a   : > { %v3460_v29 = vpop.f32.mrf.mxu0 }
 0x14b   : > { %v3510_v30 = vpop.f32.mrf.mxu1 }
 0x14c   : > { %v4465_v18 = vpop.f32.mrf.mxu0  ;;  %v1127_v30 = vadd.f32 %v4421_v41, %v4436_v10 }
 0x14d   : > { %v1410_v32 = vpop.f32.mrf.mxu1 }
 0x14e   : > { %v3461_v37 = vpop.f32.mrf.mxu0 }
 0x14f   : > { %v3511_v46 = vpop.f32.mrf.mxu1 }
 0x150   : > { %v1288_v38 = vpop.f32.mrf.mxu0  ;;  %3679 = vmatmul.mubr.msk.bf16.gmra.mxu0 %vm252_vm2, %v2617_v27 }
 0x151   : > { %v1327_v42 = vadd.f32 %v1288_v38, %v1108_v62  ;;  %v1415_v49 = vpop.f32.mrf.mxu1 }
 0x152   : > { %v3488_v43 = vpop.f32.mrf.mxu0 }
 0x153   : > { %v1446_v44 = vadd.f32 %v1407_v33, %v1327_v42  ;;  %v3514_v17 = vpop.f32.mrf.mxu1  ;;  %v1132_v43 = vadd.f32 %v4429_v51, %v4443_v3 }
 0x154   : > { %v1291_v13 = vpop.f32.mrf.mxu0 }
 0x155   : > { %v1456_v35 = vadd.f32 %v4263_v9, %v1446_v44  ;;  %v1328_v52 = vadd.f32 %v1291_v13, %v1111_v1  ;;  %v1418_v40 = vpop.f32.mrf.mxu1 }
 0x156   : > { %v3489_v55 = vpop.f32.mrf.mxu0 }
 0x157   : > { %vm1466_vm1 = vcmp.ge.f32.partialorder %v1456_v35, 0.0  ;;  %v1476_v4 = vmul.f32 0.1, %v1456_v35  ;;  %v1447_v57 = vadd.f32 %v1410_v32, %v1328_v52  ;;  %v3515_v56 = vpop.f32.mrf.mxu1 }
 0x158   : > { %v1296_v54 = vpop.f32.mrf.mxu0 }
 0x159   : > { %v1486_v59 = vsel %vm1466_vm1, %v1456_v35, %v1476_v4  ;;  %v1457_v26 = vadd.f32 %v4263_v9, %v1447_v57  ;;  %v1329_v8 = vadd.f32 %v1296_v54, %v1116_v22  ;;  %v1423_v34 = vpop.f32.mrf.mxu1  ;;  %v1135_v22 = vadd.f32 %v4438_v58, %v4453_v14 }
 0x15a   : > { %v3226_v61 = vpack.c.bf16 %v1486_v59, %v1486_v59  ;;  %v3492_v60 = vpop.f32.mrf.mxu0 }
 0x15b   : > { %vm1467_vm2 = vcmp.ge.f32.partialorder %v1457_v26, 0.0  ;;  %v1477_v0 = vmul.f32 0.1, %v1457_v26  ;;  %v1448_v7 = vadd.f32 %v1415_v49, %v1329_v8  ;;  %v3518_v31 = vpop.f32.mrf.mxu1 }
 0x15c   : > { %3089 = vst.msk [vmem:[%s4288_s30 + $0x28] sm:$0xf] %vm861_vm9, %v3226_v61  ;;  %v1299_v2 = vpop.f32.mrf.mxu0  ;;  %v1140_v61 = vadd.f32 %v4446_v21, %v4459_v11 }
 0x15d   : > { %v1487_v5 = vsel %vm1467_vm2, %v1457_v26, %v1477_v0  ;;  %v1458_v48 = vadd.f32 %v4263_v9, %v1448_v7  ;;  %v1330_v6 = vadd.f32 %v1299_v2, %v1119_v45  ;;  %v1426_v63 = vpop.f32.mrf.mxu1 }
 0x15e   : > { %v3227_v47 = vpack.c.bf16 %v1487_v5, %v1487_v5  ;;  %v3493_v12 = vpop.f32.mrf.mxu0 }
 0x15f   : > { %vm1468_vm7 = vcmp.ge.f32.partialorder %v1458_v48, 0.0  ;;  %v1478_v28 = vmul.f32 0.1, %v1458_v48  ;;  %v1449_v39 = vadd.f32 %v1418_v40, %v1330_v6  ;;  %v3519_v19 = vpop.f32.mrf.mxu1  ;;  %v1143_v6 = vadd.f32 %v4455_v15, %v4465_v18 }
 0x160   : > { %3090 = vst.msk [vmem:[%s4288_s30 + $0x2c] sm:$0xf] %vm861_vm9, %v3227_v47  ;;  %v1304_v20 = vpop.f32.mrf.mxu0 }
 0x161   : > { %v1488_v25 = vsel %vm1468_vm7, %v1458_v48, %v1478_v28  ;;  %v1459_v36 = vadd.f32 %v4263_v9, %v1449_v39  ;;  %v1331_v53 = vadd.f32 %v1304_v20, %v1124_v16  ;;  %v1431_v33 = vpop.f32.mrf.mxu1 }
 0x162   : > { %v3228_v23 = vpack.c.bf16 %v1488_v25, %v1488_v25  ;;  %v3496_v29 = vpop.f32.mrf.mxu0 }
 0x163   : > { %vm1469_vm8 = vcmp.ge.f32.partialorder %v1459_v36, 0.0  ;;  %v1479_v24 = vmul.f32 0.1, %v1459_v36  ;;  %v1450_v50 = vadd.f32 %v1423_v34, %v1331_v53  ;;  %v3522_v32 = vpop.f32.mrf.mxu1 }
 0x164   : > { %3091 = vst.msk [vmem:[%s4288_s30 + $0x30] sm:$0xf] %vm861_vm9, %v3228_v23  ;;  %v1307_v27 = vpop.f32.mrf.mxu0 }
 0x165   : > { %v1489_v37 = vsel %vm1469_vm8, %v1459_v36, %v1479_v24  ;;  %v1460_v62 = vadd.f32 %v4263_v9, %v1450_v50  ;;  %v1332_v46 = vadd.f32 %v1307_v27, %v1127_v30  ;;  %v1434_v38 = vpop.f32.mrf.mxu1 }
 0x166   : > { %v3229_v42 = vpack.c.bf16 %v1489_v37, %v1489_v37  ;;  %v3497_v49 = vpop.f32.mrf.mxu0 }
 0x167   : > { %vm1470_vm10 = vcmp.ge.f32.partialorder %v1460_v62, 0.0  ;;  %v1480_v41 = vmul.f32 0.1, %v1460_v62  ;;  %v1451_v10 = vadd.f32 %v1426_v63, %v1332_v46  ;;  %v3523_v1 = vpop.f32.mrf.mxu1 }
 0x168   : > { %3092 = vst.msk [vmem:[%s4288_s30 + $0x34] sm:$0xf] %vm861_vm9, %v3229_v42  ;;  %v1312_v44 = vpop.f32.mrf.mxu0 }
 0x169   : > { %v1490_v17 = vsel %vm1470_vm10, %v1460_v62, %v1480_v41  ;;  %v1461_v13 = vadd.f32 %v4263_v9, %v1451_v10  ;;  %v1333_v35 = vadd.f32 %v1312_v44, %v1132_v43  ;;  %v1439_v52 = vpop.f32.mrf.mxu1 }
 0x16a   : > { %v3230_v40 = vpack.c.bf16 %v1490_v17, %v1490_v17  ;;  %v3500_v55 = vpop.f32.mrf.mxu0 }
 0x16b   : > { %vm1471_vm11 = vcmp.ge.f32.partialorder %v1461_v13, 0.0  ;;  %v1481_v51 = vmul.f32 0.1, %v1461_v13  ;;  %v1452_v3 = vadd.f32 %v1431_v33, %v1333_v35  ;;  %v3526_v4 = vpop.f32.mrf.mxu1 }
 0x16c   : > { %3093 = vst.msk [vmem:[%s4288_s30 + $0x38] sm:$0xf] %vm861_vm9, %v3230_v40  ;;  %v1315_v57 = vpop.f32.mrf.mxu0 }
 0x16d   : > { %v1491_v56 = vsel %vm1471_vm11, %v1461_v13, %v1481_v51  ;;  %v1462_v54 = vadd.f32 %v4263_v9, %v1452_v3  ;;  %v1334_v59 = vadd.f32 %v1315_v57, %v1135_v22  ;;  %v1442_v26 = vpop.f32.mrf.mxu1 }
 0x16e   : > { %v3231_v8 = vpack.c.bf16 %v1491_v56, %v1491_v56  ;;  %v3501_v34 = vpop.f32.mrf.mxu0 }
 0x16f   : > { %vm1472_vm12 = vcmp.ge.f32.partialorder %v1462_v54, 0.0  ;;  %v1482_v58 = vmul.f32 0.1, %v1462_v54  ;;  %v1453_v14 = vadd.f32 %v1434_v38, %v1334_v59  ;;  %v3527_v60 = vpop.f32.mrf.mxu1 }
 0x170   : > { %3094 = vst.msk [vmem:[%s4288_s30 + $0x3c] sm:$0xf] %vm861_vm9, %v3231_v8  ;;  %v1320_v45 = vpop.f32.mrf.mxu0 }
 0x171   : > { %v1492_v0 = vsel %vm1472_vm12, %v1462_v54, %v1482_v58  ;;  %v1463_v7 = vadd.f32 %v4263_v9, %v1453_v14  ;;  %v1335_v31 = vadd.f32 %v1320_v45, %v1140_v61  ;;  %v4507_v2 = vpop.f32.mrf.mxu1 }
 0x172   : > { %v3232_v5 = vpack.c.bf16 %v1492_v0, %v1492_v0  ;;  %v3504_v48 = vpop.f32.mrf.mxu0 }
 0x173   : > { %vm1473_vm13 = vcmp.ge.f32.partialorder %v1463_v7, 0.0  ;;  %v1483_v21 = vmul.f32 0.1, %v1463_v7  ;;  %v1454_v11 = vadd.f32 %v1439_v52, %v1335_v31  ;;  %v3554_v63 = vpop.f32.mrf.mxu1 }
 0x174   : > { %3095 = vst.msk [vmem:[%s4288_s30 + $0x40] sm:$0xf] %vm861_vm9, %v3232_v5  ;;  %v1323_v47 = vpop.f32.mrf.mxu0 }
 0x175   : > { %v1493_v12 = vsel %vm1473_vm13, %v1463_v7, %v1483_v21  ;;  %v1464_v16 = vadd.f32 %v4263_v9, %v1454_v11  ;;  %v1336_v28 = vadd.f32 %v1323_v47, %v1143_v6  ;;  %v1794_v39 = vpop.f32.mrf.mxu1 }
 0x176   : > { %v3233_v19 = vpack.c.bf16 %v1493_v12, %v1493_v12  ;;  %v3505_v20 = vpop.f32.mrf.mxu0 }
 0x177   : > { %vm1474_vm14 = vcmp.ge.f32.partialorder %v1464_v16, 0.0  ;;  %v1484_v25 = vmul.f32 0.1, %v1464_v16  ;;  %v1455_v36 = vadd.f32 %v1442_v26, %v1336_v28  ;;  %v3555_v15 = vpop.f32.mrf.mxu1 }
 0x178   : > { %3096 = vst.msk [vmem:[%s4288_s30 + $0x44] sm:$0xf] %vm861_vm9, %v3233_v19  ;;  %v1691_v18 = vpop.f32.mrf.mxu0 }
 0x179   : > { %v1494_v53 = vsel %vm1474_vm14, %v1464_v16, %v1484_v25  ;;  %v1465_v33 = vadd.f32 %v4263_v9, %v1455_v36  ;;  %v1799_v23 = vpop.f32.mrf.mxu1  ;;  %v1792_v31 = vadd.f32 %v4507_v2, %v1691_v18 }
 0x17a   : > { %v3234_v29 = vpack.c.bf16 %v1494_v53, %v1494_v53  ;;  %v3532_v30 = vpop.f32.mrf.mxu0 }
 0x17b   : > { %vm1475_vm15 = vcmp.ge.f32.partialorder %v1465_v33, 0.0  ;;  %v1485_v24 = vmul.f32 0.1, %v1465_v33  ;;  %v3558_v50 = vpop.f32.mrf.mxu1 }
 0x17c   : > { %3097 = vst.msk [vmem:[%s4288_s30 + $0x48] sm:$0xf] %vm861_vm9, %v3234_v29  ;;  %v1694_v32 = vpop.f32.mrf.mxu0 }
 0x17d   : > { %v1495_v27 = vsel %vm1475_vm15, %v1465_v33, %v1485_v24  ;;  %v1802_v37 = vpop.f32.mrf.mxu1  ;;  %v1795_v63 = vadd.f32 %v1794_v39, %v1694_v32 }
 0x17e   : > { %v3235_v62 = vpack.c.bf16 %v1495_v27, %v1495_v27  ;;  %v3533_v46 = vpop.f32.mrf.mxu0 }
 0x17f   : > { %v3559_v38 = vpop.f32.mrf.mxu1 }
 0x180   : > { %3098 = vst.msk [vmem:[%s4288_s30 + $0x4c] sm:$0x7] %vm871_vm6, %v3235_v62  ;;  %v1699_v42 = vpop.f32.mrf.mxu0 }
 0x181   : > { %v4521_v49 = vpop.f32.mrf.mxu1  ;;  %v1800_v36 = vadd.f32 %v1799_v23, %v1699_v42 }
 0x182   : > { %v3536_v43 = vpop.f32.mrf.mxu0 }
 0x183   : > { %v3562_v41 = vpop.f32.mrf.mxu1 }
 0x184   : > { %v1702_v10 = vpop.f32.mrf.mxu0 }
 0x185   : > { %v4523_v1 = vpop.f32.mrf.mxu1  ;;  %v1803_v32 = vadd.f32 %v1802_v37, %v1702_v10 }
 0x186   : > { %v3537_v44 = vpop.f32.mrf.mxu0 }
 0x187   : > { %v3563_v17 = vpop.f32.mrf.mxu1 }
 0x188   : > { %v1707_v13 = vpop.f32.mrf.mxu0 }
 0x189   : > { %v4525_v35 = vpop.f32.mrf.mxu1 }
 0x18a   : > { %v3540_v52 = vpop.f32.mrf.mxu0 }
 0x18b   : > { %v3566_v40 = vpop.f32.mrf.mxu1  ;;  %v1808_v52 = vadd.f32 %v4521_v49, %v1707_v13 }
 0x18c   : > { %v4527_v55 = vpop.f32.mrf.mxu0 }
 0x18d   : > { %v4529_v22 = vpop.f32.mrf.mxu1  ;;  %v1811_v13 = vadd.f32 %v4523_v1, %v4527_v55 }
 0x18e   : > { %v3541_v51 = vpop.f32.mrf.mxu0 }
 0x18f   : > { %v3567_v3 = vpop.f32.mrf.mxu1 }
 0x190   : > { %v4531_v4 = vpop.f32.mrf.mxu0 }
 0x191   : > { %v4533_v57 = vpop.f32.mrf.mxu1 }
 0x192   : > { %v3544_v56 = vpop.f32.mrf.mxu0 }
 0x193   : > { %v3570_v54 = vpop.f32.mrf.mxu1  ;;  %v4555_v56 = vld [vmem:[%s4661_s2] ss:$0 sm:$0xff] }
 0x194   : > { %v4535_v59 = vpop.f32.mrf.mxu0 }
 0x195   : > { %v4537_v26 = vpop.f32.mrf.mxu1 }
 0x196   : > { %v3545_v8 = vpop.f32.mrf.mxu0 }
 0x197   : > { %v3571_v34 = vpop.f32.mrf.mxu1 }
 0x198   : > { %v4539_v61 = vpop.f32.mrf.mxu0 }
 0x199   : > { %v2095_v58 = vpop.f32.mrf.mxu1 }
 0x19a   : > { %v3548_v14 = vpop.f32.mrf.mxu0 }
 0x19b   : > { %v3598_v60 = vpop.f32.mrf.mxu1 }
 0x19c   : > { %v4541_v45 = vpop.f32.mrf.mxu0 }
 0x19d   : > { %v2098_v0 = vpop.f32.mrf.mxu1 }
 0x19e   : > { %v3549_v7 = vpop.f32.mrf.mxu0 }
 0x19f   : > { %v3599_v5 = vpop.f32.mrf.mxu1 }
 0x1a0   : > { %v1934_v48 = vpop.f32.mrf.mxu0 }
 0x1a1   : > { %v1973_v6 = vadd.f32 %v1934_v48, %v1792_v31  ;;  %v2103_v21 = vpop.f32.mrf.mxu1 }
 0x1a2   : > { %v3576_v11 = vpop.f32.mrf.mxu0 }
 0x1a3   : > { %v2134_v47 = vadd.f32 %v2095_v58, %v1973_v6  ;;  %v3602_v12 = vpop.f32.mrf.mxu1  ;;  %v1816_v11 = vadd.f32 %v4525_v35, %v4531_v4 }
 0x1a4   : > { %v1937_v16 = vpop.f32.mrf.mxu0 }
 0x1a5   : > { %v2144_v28 = vadd.f32 %v4263_v9, %v2134_v47  ;;  %v1974_v19 = vadd.f32 %v1937_v16, %v1795_v63  ;;  %v2106_v20 = vpop.f32.mrf.mxu1 }
 0x1a6   : > { %v3577_v25 = vpop.f32.mrf.mxu0 }
 0x1a7   : > { %vm2154_vm0 = vcmp.ge.f32.partialorder %v2144_v28, 0.0  ;;  %v2164_v15 = vmul.f32 0.1, %v2144_v28  ;;  %v2135_v53 = vadd.f32 %v2098_v0, %v1974_v19  ;;  %v3603_v2 = vpop.f32.mrf.mxu1 }
 0x1a8   : > { %v1942_v18 = vpop.f32.mrf.mxu0 }
 0x1a9   : > { %v2174_v33 = vsel %vm2154_vm0, %v2144_v28, %v2164_v15  ;;  %v2145_v29 = vadd.f32 %v4263_v9, %v2135_v53  ;;  %v1975_v30 = vadd.f32 %v1942_v18, %v1800_v36  ;;  %v2111_v39 = vpop.f32.mrf.mxu1  ;;  %v1819_v36 = vadd.f32 %v4529_v22, %v4535_v59 }
 0x1aa   : > { %v3236_v24 = vpack.c.bf16 %v2174_v33, %v2174_v33  ;;  %v3580_v50 = vpop.f32.mrf.mxu0 }
 0x1ab   : > { %vm2155_vm3 = vcmp.ge.f32.partialorder %v2145_v29, 0.0  ;;  %v2165_v27 = vmul.f32 0.1, %v2145_v29  ;;  %v2136_v62 = vadd.f32 %v2103_v21, %v1975_v30  ;;  %v3606_v46 = vpop.f32.mrf.mxu1 }
 0x1ac   : > { %3146 = vst.msk [vmem:[%s4288_s30 + $0x50] sm:$0xf] %vm861_vm9, %v3236_v24  ;;  %v1945_v23 = vpop.f32.mrf.mxu0  ;;  %v1824_v24 = vadd.f32 %v4533_v57, %v4539_v61 }
 0x1ad   : > { %v2175_v38 = vsel %vm2155_vm3, %v2145_v29, %v2165_v27  ;;  %v2146_v42 = vadd.f32 %v4263_v9, %v2136_v62  ;;  %v1976_v43 = vadd.f32 %v1945_v23, %v1803_v32  ;;  %v2114_v41 = vpop.f32.mrf.mxu1 }
 0x1ae   : > { %v3237_v44 = vpack.c.bf16 %v2175_v38, %v2175_v38  ;;  %v3581_v17 = vpop.f32.mrf.mxu0 }
 0x1af   : > { %vm2156_vm4 = vcmp.ge.f32.partialorder %v2146_v42, 0.0  ;;  %v2166_v40 = vmul.f32 0.1, %v2146_v42  ;;  %v2137_v37 = vadd.f32 %v2106_v20, %v1976_v43  ;;  %v3607_v10 = vpop.f32.mrf.mxu1  ;;  %v1827_v43 = vadd.f32 %v4537_v26, %v4541_v45 }
 0x1b0   : > { %3147 = vst.msk [vmem:[%s4288_s30 + $0x54] sm:$0xf] %vm861_vm9, %v3237_v44  ;;  %v1950_v51 = vpop.f32.mrf.mxu0 }
 0x1b1   : > { %v2176_v3 = vsel %vm2156_vm4, %v2146_v42, %v2166_v40  ;;  %v2147_v9 = vadd.f32 %v4555_v56, %v2137_v37  ;;  %v1977_v54 = vadd.f32 %v1950_v51, %v1808_v52  ;;  %v2119_v8 = vpop.f32.mrf.mxu1 }
 0x1b2   : > { %v3238_v34 = vpack.c.bf16 %v2176_v3, %v2176_v3  ;;  %v3584_v49 = vpop.f32.mrf.mxu0 }
 0x1b3   : > { %vm2157_vm5 = vcmp.ge.f32.partialorder %v2147_v9, 0.0  ;;  %v2167_v58 = vmul.f32 0.1, %v2147_v9  ;;  %v2138_v14 = vadd.f32 %v2111_v39, %v1977_v54  ;;  %v3610_v60 = vpop.f32.mrf.mxu1 }
 0x1b4   : > { %3148 = vst.msk [vmem:[%s4288_s30 + $0x58] sm:$0xf] %vm861_vm9, %v3238_v34  ;;  %v1953_v0 = vpop.f32.mrf.mxu0 }
 0x1b5   : > { %v2177_v7 = vsel %vm2157_vm5, %v2147_v9, %v2167_v58  ;;  %v2148_v31 = vadd.f32 %v4555_v56, %v2138_v14  ;;  %v1978_v5 = vadd.f32 %v1953_v0, %v1811_v13  ;;  %v2122_v48 = vpop.f32.mrf.mxu1 }
 0x1b6   : > { %v3239_v6 = vpack.c.bf16 %v2177_v7, %v2177_v7  ;;  %v3585_v21 = vpop.f32.mrf.mxu0 }
 0x1b7   : > { %vm2158_vm1 = vcmp.ge.f32.partialorder %v2148_v31, 0.0  ;;  %v2168_v1 = vmul.f32 0.1, %v2148_v31  ;;  %v2139_v55 = vadd.f32 %v2114_v41, %v1978_v5  ;;  %v3611_v63 = vpop.f32.mrf.mxu1 }
 0x1b8   : > { %3149 = vst.msk [vmem:[%s4288_s30 + $0x5c] sm:$0xf] %vm861_vm9, %v3239_v6  ;;  %v1958_v47 = vpop.f32.mrf.mxu0 }
 0x1b9   : > { %v2178_v12 = vsel %vm2158_vm1, %v2148_v31, %v2168_v1  ;;  %v2149_v16 = vadd.f32 %v4555_v56, %v2139_v55  ;;  %v1979_v28 = vadd.f32 %v1958_v47, %v1816_v11  ;;  %v2127_v19 = vpop.f32.mrf.mxu1 }
 0x1ba   : > { %v3240_v20 = vpack.c.bf16 %v2178_v12, %v2178_v12  ;;  %v3588_v25 = vpop.f32.mrf.mxu0 }
 0x1bb   : > { %vm2159_vm2 = vcmp.ge.f32.partialorder %v2149_v16, 0.0  ;;  %v2169_v35 = vmul.f32 0.1, %v2149_v16  ;;  %v2140_v4 = vadd.f32 %v2119_v8, %v1979_v28  ;;  %v3614_v15 = vpop.f32.mrf.mxu1 }
 0x1bc   : > { %3150 = vst.msk [vmem:[%s4288_s30 + $0x60] sm:$0xf] %vm861_vm9, %v3240_v20  ;;  %v1961_v53 = vpop.f32.mrf.mxu0 }
 0x1bd   : > { %v2179_v2 = vsel %vm2159_vm2, %v2149_v16, %v2169_v35  ;;  %v2150_v18 = vadd.f32 %v4555_v56, %v2140_v4  ;;  %v1980_v33 = vadd.f32 %v1961_v53, %v1819_v36  ;;  %v2130_v29 = vpop.f32.mrf.mxu1 }
 0x1be   : > { %v3241_v30 = vpack.c.bf16 %v2179_v2, %v2179_v2  ;;  %v3589_v39 = vpop.f32.mrf.mxu0 }
 0x1bf   : > { %vm2160_vm7 = vcmp.ge.f32.partialorder %v2150_v18, 0.0  ;;  %v2170_v22 = vmul.f32 0.1, %v2150_v18  ;;  %v2141_v59 = vadd.f32 %v2122_v48, %v1980_v33  ;;  %v3615_v50 = vpop.f32.mrf.mxu1 }
 0x1c0   : > { %3151 = vst.msk [vmem:[%s4288_s30 + $0x64] sm:$0xf] %vm861_vm9, %v3241_v30  ;;  %v1966_v32 = vpop.f32.mrf.mxu0 }
 0x1c1   : > { %v2180_v27 = vsel %vm2160_vm7, %v2150_v18, %v2170_v22  ;;  %v2151_v62 = vadd.f32 %v4555_v56, %v2141_v59  ;;  %v1981_v46 = vadd.f32 %v1966_v32, %v1824_v24  ;;  %v4578_v23 = vpop.f32.mrf.mxu1 }
 0x1c2   : > { %v3242_v38 = vpack.c.bf16 %v2180_v27, %v2180_v27  ;;  %v3592_v42 = vpop.f32.mrf.mxu0 }
 0x1c3   : > { %vm2161_vm8 = vcmp.ge.f32.partialorder %v2151_v62, 0.0  ;;  %v2171_v57 = vmul.f32 0.1, %v2151_v62  ;;  %v2142_v61 = vadd.f32 %v2127_v19, %v1981_v46  ;;  %v3642_v41 = vpop.f32.mrf.mxu1 }
 0x1c4   : > { %3152 = vst.msk [vmem:[%s4288_s30 + $0x68] sm:$0xf] %vm861_vm9, %v3242_v38  ;;  %v1969_v44 = vpop.f32.mrf.mxu0 }
 0x1c5   : > { %v2181_v17 = vsel %vm2161_vm8, %v2151_v62, %v2171_v57  ;;  %v2152_v52 = vadd.f32 %v4555_v56, %v2142_v61  ;;  %v1982_v40 = vadd.f32 %v1969_v44, %v1827_v43  ;;  %v2488_v37 = vpop.f32.mrf.mxu1 }
 0x1c6   : > { %v3243_v10 = vpack.c.bf16 %v2181_v17, %v2181_v17  ;;  %v3593_v51 = vpop.f32.mrf.mxu0 }
 0x1c7   : > { %vm2162_vm10 = vcmp.ge.f32.partialorder %v2152_v52, 0.0  ;;  %v2172_v3 = vmul.f32 0.1, %v2152_v52  ;;  %v2143_v9 = vadd.f32 %v2130_v29, %v1982_v40  ;;  %v3643_v26 = vpop.f32.mrf.mxu1 }
 0x1c8   : > { %3153 = vst.msk [vmem:[%s4288_s30 + $0x6c] sm:$0xf] %vm861_vm9, %v3243_v10  ;;  %v2342_v45 = vpop.f32.mrf.mxu0 }
 0x1c9   : > { %v2182_v54 = vsel %vm2162_vm10, %v2152_v52, %v2172_v3  ;;  %v2153_v8 = vadd.f32 %v4555_v56, %v2143_v9  ;;  %v2493_v34 = vpop.f32.mrf.mxu1  ;;  %v2486_v46 = vadd.f32 %v4578_v23, %v2342_v45 }
 0x1ca   : > { %v3244_v49 = vpack.c.bf16 %v2182_v54, %v2182_v54  ;;  %v3620_v13 = vpop.f32.mrf.mxu0 }
 0x1cb   : > { %vm2163_vm11 = vcmp.ge.f32.partialorder %v2153_v8, 0.0  ;;  %v2173_v58 = vmul.f32 0.1, %v2153_v8  ;;  %v3646_v14 = vpop.f32.mrf.mxu1 }
 0x1cc   : > { %3154 = vst.msk [vmem:[%s4288_s30 + $0x70] sm:$0xf] %vm861_vm9, %v3244_v49  ;;  %v2345_v60 = vpop.f32.mrf.mxu0 }
 0x1cd   : > { %v2183_v0 = vsel %vm2163_vm11, %v2153_v8, %v2173_v58  ;;  %v2496_v7 = vpop.f32.mrf.mxu1  ;;  %v2489_v41 = vadd.f32 %v2488_v37, %v2345_v60 }
 0x1ce   : > { %v3245_v31 = vpack.c.bf16 %v2183_v0, %v2183_v0  ;;  %v3621_v5 = vpop.f32.mrf.mxu0 }
 0x1cf   : > { %v3647_v48 = vpop.f32.mrf.mxu1 }
 0x1d0   : > { %3155 = vst.msk [vmem:[%s4288_s30 + $0x74] sm:$0x7] %vm871_vm6, %v3245_v31  ;;  %v2350_v6 = vpop.f32.mrf.mxu0 }
 0x1d1   : > { %v4592_v21 = vpop.f32.mrf.mxu1  ;;  %v2494_v9 = vadd.f32 %v2493_v34, %v2350_v6 }
 0x1d2   : > { %v3624_v11 = vpop.f32.mrf.mxu0 }
 0x1d3   : > { %v3650_v1 = vpop.f32.mrf.mxu1 }
 0x1d4   : > { %v2353_v55 = vpop.f32.mrf.mxu0 }
 0x1d5   : > { %v4594_v63 = vpop.f32.mrf.mxu1  ;;  %v2497_v60 = vadd.f32 %v2496_v7, %v2353_v55 }
 0x1d6   : > { %v3625_v47 = vpop.f32.mrf.mxu0 }
 0x1d7   : > { %v3651_v12 = vpop.f32.mrf.mxu1 }
 0x1d8   : > { %v2358_v16 = vpop.f32.mrf.mxu0 }
 0x1d9   : > { %v4596_v28 = vpop.f32.mrf.mxu1 }
 0x1da   : > { %v3628_v19 = vpop.f32.mrf.mxu0 }
 0x1db   : > { %v3654_v20 = vpop.f32.mrf.mxu1  ;;  %v2502_v19 = vadd.f32 %v4592_v21, %v2358_v16 }
 0x1dc   : > { %v4598_v25 = vpop.f32.mrf.mxu0 }
 0x1dd   : > { %v4600_v36 = vpop.f32.mrf.mxu1 }
 0x1de   : > { %v3629_v35 = vpop.f32.mrf.mxu0 }
 0x1df   : > { %v3655_v4 = vpop.f32.mrf.mxu1 }
 0x1e0   : > { %v4602_v15 = vpop.f32.mrf.mxu0 }
 0x1e1   : > { %v4604_v53 = vpop.f32.mrf.mxu1 }
 0x1e2   : > { %v3632_v2 = vpop.f32.mrf.mxu0 }
 0x1e3   : > { %v3658_v18 = vpop.f32.mrf.mxu1 }
 0x1e4   : > { %v4606_v33 = vpop.f32.mrf.mxu0 }
 0x1e5   : > { %v4608_v29 = vpop.f32.mrf.mxu1 }
 0x1e6   : > { %v3633_v30 = vpop.f32.mrf.mxu0 }
 0x1e7   : > { %v3659_v39 = vpop.f32.mrf.mxu1 }
 0x1e8   : > { %v4610_v24 = vpop.f32.mrf.mxu0 }
 0x1e9   : > { %v2789_v22 = vpop.f32.mrf.mxu1 }
 0x1ea   : > { %v3636_v59 = vpop.f32.mrf.mxu0 }
 0x1eb   : > { %v3686_v50 = vpop.f32.mrf.mxu1  ;;  %v2505_v59 = vadd.f32 %v4594_v63, %v4598_v25 }
 0x1ec   : > { %v4612_v32 = vpop.f32.mrf.mxu0 }
 0x1ed   : > { %v2792_v27 = vpop.f32.mrf.mxu1 }
 0x1ee   : > { %v3637_v62 = vpop.f32.mrf.mxu0 }
 0x1ef   : > { %v3687_v38 = vpop.f32.mrf.mxu1 }
 0x1f0   : > { %v2670_v42 = vpop.f32.mrf.mxu0 }
 0x1f1   : > { %v2709_v43 = vadd.f32 %v2670_v42, %v2486_v46  ;;  %v2797_v57 = vpop.f32.mrf.mxu1 }
 0x1f2   : > { %v3664_v61 = vpop.f32.mrf.mxu0 }
 0x1f3   : > { %v2828_v44 = vadd.f32 %v2789_v22, %v2709_v43  ;;  %v3690_v17 = vpop.f32.mrf.mxu1  ;;  %v2510_v61 = vadd.f32 %v4596_v28, %v4602_v15 }
 0x1f4   : > { %v2673_v52 = vpop.f32.mrf.mxu0 }
 0x1f5   : > { %v2838_v40 = vadd.f32 %v4555_v56, %v2828_v44  ;;  %v2710_v10 = vadd.f32 %v2673_v52, %v2489_v41  ;;  %v2800_v51 = vpop.f32.mrf.mxu1 }
 0x1f6   : > { %v3665_v3 = vpop.f32.mrf.mxu0 }
 0x1f7   : > { %vm2848_vm12 = vcmp.ge.f32.partialorder %v2838_v40, 0.0  ;;  %v2858_v26 = vmul.f32 0.1, %v2838_v40  ;;  %v2829_v54 = vadd.f32 %v2792_v27, %v2710_v10  ;;  %v3691_v23 = vpop.f32.mrf.mxu1 }
 0x1f8   : > { %v2678_v45 = vpop.f32.mrf.mxu0 }
 0x1f9   : > { %v2868_v8 = vsel %vm2848_vm12, %v2838_v40, %v2858_v26  ;;  %v2839_v49 = vadd.f32 %v4555_v56, %v2829_v54  ;;  %v2711_v13 = vadd.f32 %v2678_v45, %v2494_v9  ;;  %v2805_v37 = vpop.f32.mrf.mxu1  ;;  %v2513_v9 = vadd.f32 %v4600_v36, %v4606_v33 }
 0x1fa   : > { %v3246_v58 = vpack.c.bf16 %v2868_v8, %v2868_v8  ;;  %v3668_v14 = vpop.f32.mrf.mxu0 }
 0x1fb   : > { %vm2849_vm13 = vcmp.ge.f32.partialorder %v2839_v49, 0.0  ;;  %v2859_v0 = vmul.f32 0.1, %v2839_v49  ;;  %v2830_v31 = vadd.f32 %v2797_v57, %v2711_v13  ;;  %v3694_v5 = vpop.f32.mrf.mxu1 }
 0x1fc   : > { %3204 = vst.msk [vmem:[%s4288_s30 + $0x78] sm:$0xf] %vm861_vm9, %v3246_v58  ;;  %v2681_v34 = vpop.f32.mrf.mxu0  ;;  %v2518_v58 = vadd.f32 %v4604_v53, %v4610_v24 }
 0x1fd   : > { %v2869_v48 = vsel %vm2849_vm13, %v2839_v49, %v2859_v0  ;;  %v2840_v6 = vadd.f32 %v4555_v56, %v2830_v31  ;;  %v2712_v11 = vadd.f32 %v2681_v34, %v2497_v60  ;;  %v2808_v1 = vpop.f32.mrf.mxu1 }
 0x1fe   : > { %v3247_v47 = vpack.c.bf16 %v2869_v48, %v2869_v48  ;;  %v3669_v12 = vpop.f32.mrf.mxu0 }
 0x1ff   : > { %vm2850_vm14 = vcmp.ge.f32.partialorder %v2840_v6, 0.0  ;;  %v2860_v20 = vmul.f32 0.1, %v2840_v6  ;;  %v2831_v7 = vadd.f32 %v2800_v51, %v2712_v11  ;;  %v3695_v55 = vpop.f32.mrf.mxu1 }
 0x200   : > { %3205 = vst.msk [vmem:[%s4288_s30 + $0x7c] sm:$0xf] %vm861_vm9, %v3247_v47  ;;  %v2686_v35 = vpop.f32.mrf.mxu0 }
 0x201   : > { %v2870_v4 = vsel %vm2850_vm14, %v2840_v6, %v2860_v20  ;;  %v2841_v2 = vadd.f32 %v4555_v56, %v2831_v7  ;;  %v2713_v18 = vadd.f32 %v2686_v35, %v2502_v19  ;;  %v2813_v30 = vpop.f32.mrf.mxu1  ;;  %v2521_v6 = vadd.f32 %v4608_v29, %v4612_v32 }
 0x202   : > { %v3248_v39 = vpack.c.bf16 %v2870_v4, %v2870_v4  ;;  %v3672_v22 = vpop.f32.mrf.mxu0 }
 0x203   : > { %vm2851_vm15 = vcmp.ge.f32.partialorder %v2841_v2, 0.0  ;;  %v2861_v21 = vmul.f32 0.1, %v2841_v2  ;;  %v2832_v16 = vadd.f32 %v2805_v37, %v2713_v18  ;;  %v3698_v50 = vpop.f32.mrf.mxu1 }
 0x204   : > { %3206 = vst.msk [vmem:[%s4288_s30 + $0x80] sm:$0xf] %vm861_vm9, %v3248_v39  ;;  %v2689_v27 = vpop.f32.mrf.mxu0 }
 0x205   : > { %v2871_v62 = vsel %vm2851_vm15, %v2841_v2, %v2861_v21  ;;  %v2842_v46 = vadd.f32 %v4555_v56, %v2832_v16  ;;  %v2714_v38 = vadd.f32 %v2689_v27, %v2505_v59  ;;  %v2816_v42 = vpop.f32.mrf.mxu1 }
 0x206   : > { %v3249_v43 = vpack.c.bf16 %v2871_v62, %v2871_v62  ;;  %v3673_v57 = vpop.f32.mrf.mxu0 }
 0x207   : > { %vm2852_vm0 = vcmp.ge.f32.partialorder %v2842_v46, 0.0  ;;  %v2862_v63 = vmul.f32 0.1, %v2842_v46  ;;  %v2833_v25 = vadd.f32 %v2808_v1, %v2714_v38  ;;  %v3699_v41 = vpop.f32.mrf.mxu1 }
 0x208   : > { %3207 = vst.msk [vmem:[%s4288_s30 + $0x84] sm:$0xf] %vm861_vm9, %v3249_v43  ;;  %v2694_v44 = vpop.f32.mrf.mxu0 }
 0x209   : > { %v2872_v17 = vsel %vm2852_vm0, %v2842_v46, %v2862_v63  ;;  %v2843_v52 = vadd.f32 %v4555_v56, %v2833_v25  ;;  %v2715_v40 = vadd.f32 %v2694_v44, %v2510_v61  ;;  %v2821_v10 = vpop.f32.mrf.mxu1 }
 0x20a   : > { %v3250_v51 = vpack.c.bf16 %v2872_v17, %v2872_v17  ;;  %v3676_v3 = vpop.f32.mrf.mxu0 }
 0x20b   : > { %vm2853_vm3 = vcmp.ge.f32.partialorder %v2843_v52, 0.0  ;;  %v2863_v28 = vmul.f32 0.1, %v2843_v52  ;;  %v2834_v15 = vadd.f32 %v2813_v30, %v2715_v40  ;;  %v3702_v26 = vpop.f32.mrf.mxu1 }
 0x20c   : > { %3208 = vst.msk [vmem:[%s4288_s30 + $0x88] sm:$0xf] %vm861_vm9, %v3250_v51  ;;  %v2697_v54 = vpop.f32.mrf.mxu0 }
 0x20d   : > { %v2873_v23 = vsel %vm2853_vm3, %v2843_v52, %v2863_v28  ;;  %v2844_v45 = vadd.f32 %v4555_v56, %v2834_v15  ;;  %v2716_v8 = vadd.f32 %v2697_v54, %v2513_v9  ;;  %v2824_v49 = vpop.f32.mrf.mxu1 }
 0x20e   : > { %v3251_v13 = vpack.c.bf16 %v2873_v23, %v2873_v23  ;;  %v3677_v37 = vpop.f32.mrf.mxu0 }
 0x20f   : > { %vm2854_vm4 = vcmp.ge.f32.partialorder %v2844_v45, 0.0  ;;  %v2864_v36 = vmul.f32 0.1, %v2844_v45  ;;  %v2835_v33 = vadd.f32 %v2816_v42, %v2716_v8  ;;  %v3703_v14 = vpop.f32.mrf.mxu1 }
 0x210   : > { %3209 = vst.msk [vmem:[%s4288_s30 + $0x8c] sm:$0xf] %vm861_vm9, %v3251_v13  ;;  %v2702_v60 = vpop.f32.mrf.mxu0 }
 0x211   : > { %v2874_v0 = vsel %vm2854_vm4, %v2844_v45, %v2864_v36  ;;  %v2845_v31 = vadd.f32 %v4555_v56, %v2835_v33  ;;  %v2717_v5 = vadd.f32 %v2702_v60, %v2518_v58 }
 0x212   : > { %v3252_v34 = vpack.c.bf16 %v2874_v0, %v2874_v0  ;;  %v3680_v48 = vpop.f32.mrf.mxu0 }
 0x213   : > { %vm2855_vm5 = vcmp.ge.f32.partialorder %v2845_v31, 0.0  ;;  %v2865_v53 = vmul.f32 0.1, %v2845_v31  ;;  %v2836_v24 = vadd.f32 %v2821_v10, %v2717_v5 }
 0x214   : > { %3210 = vst.msk [vmem:[%s4288_s30 + $0x90] sm:$0xf] %vm861_vm9, %v3252_v34  ;;  %v2705_v11 = vpop.f32.mrf.mxu0 }
 0x215   : > { %v2875_v1 = vsel %vm2855_vm5, %v2845_v31, %v2865_v53  ;;  %v2846_v47 = vadd.f32 %v4555_v56, %v2836_v24  ;;  %v2718_v12 = vadd.f32 %v2705_v11, %v2521_v6 }
 0x216   : > { %v3253_v19 = vpack.c.bf16 %v2875_v1, %v2875_v1  ;;  %v3681_v20 = vpop.f32.mrf.mxu0 }
 0x217   : > { %vm2856_vm1 = vcmp.ge.f32.partialorder %v2846_v47, 0.0  ;;  %v2866_v7 = vmul.f32 0.1, %v2846_v47  ;;  %v2837_v55 = vadd.f32 %v2824_v49, %v2718_v12 }
 0x218   : > { %3211 = vst.msk [vmem:[%s4288_s30 + $0x94] sm:$0xf] %vm861_vm9, %v3253_v19 }
 0x219   : > { %v2876_v29 = vsel %vm2856_vm1, %v2846_v47, %v2866_v7  ;;  %v2847_v32 = vadd.f32 %v4555_v56, %v2837_v55 }
 0x21a   : > { %v3254_v35 = vpack.c.bf16 %v2876_v29, %v2876_v29 }
 0x21b   : > { %vm2857_vm2 = vcmp.ge.f32.partialorder %v2847_v32, 0.0  ;;  %v2867_v4 = vmul.f32 0.1, %v2847_v32 }
 0x21c   : > { %3212 = vst.msk [vmem:[%s4288_s30 + $0x98] sm:$0xf] %vm861_vm9, %v3254_v35 }
 0x21d   : > { %v2877_v2 = vsel %vm2857_vm2, %v2847_v32, %v2867_v4 }
 0x21e   : > { %v3255_v18 = vpack.c.bf16 %v2877_v2, %v2877_v2 }
 0x220   : > { %3213 = vst.msk [vmem:[%s4288_s30 + $0x9c] sm:$0x7] %vm871_vm6, %v3255_v18 }
 0x221 PF: > { %s13_s12 = sadd.s32 1, %s3779_s12  }
 0x222   : > { %p10_p4 = scmp.ge.s32.totalorder %s13_s12, 4  }
 0x224   :  { %12 = sbr.rel (!%p10_p4) target bundleno = 1 (0x1), region = 80 }

// kernel: unet2d_forward.13
= control target key start
LH: loop header
LB: loop body
LE: loop exit
PB: predicated region body
PF: predicated region fallthrough
CT: control target
= control target key end

     0   :  { %s4767_s12 = smov 0   ;;  %s6194_s0 = inlined_call_operand.vmem [shape: bf16[2,1,324,8], index: 0, kind: input, shape index: {}]   ;;  %s6195_s1 = inlined_call_operand.vmem [shape: bf16[9,8,4], index: 1, kind: input, shape index: {}]   ;;  %s6196_s2 = inlined_call_operand.vmem [shape: f32[1,4], index: 2, kind: input, shape index: {}]   ;;  %s6197_s3 = inlined_call_operand.vmem [shape: f32[2,286,4], index: 3, kind: output, shape index: {}]  }
   0x1 LB: > { %s3866_s13 = sadd.s32 4294967295, %s4745_s12   ;;  %p3870_p0 = scmp.ge.s32.totalorder %s4745_s12, 1  ;;  %s4745_s12 = sphi %s4767_s12, %s13_s12  }
   0x2   : > { %p137_p1 = scmp.lt.s32.totalorder %s4745_s12, 3 }
   0x4   : > { %p138_p2 = pnand %p3870_p0, %p137_p1 }
   0x6   : > { %141 = sbr.rel (%p138_p2) target bundleno = 552 (0x228), region = 32 }
   0xb   : > { %v3873_v0 = vld [vmem:[%s6195_s1 + $0x4] sm:$0xf]  ;;  %vm501_vm0 = vcmask 1043456   ;;  %p161_p3 = scmp.lt.s32.totalorder %s3866_s13, 1  ;;  %v3929_v2 = vld [vmem:[%s6195_s1 + $0x8] sm:$0xf] }
   0xc   : > { %4640 = vmatprep.subr.msk.bf16.mxu0 %vm501_vm0, %v3873_v0  ;;  %4641 = vmatprep.subr.msk.bf16.mxu1 %vm501_vm0, %v3873_v0  ;;  %v503_v1 = vsel %vm501_vm0, %v3873_v0, 0  ;;  %v208_v3 = vld [vmem:[%s6195_s1] sm:$0xf]  ;;  %vm302_vm1 = vsmask.f32 7424  ;;  %vm446_vm2 = vcmask 64512  }
   0xd   : > { %4297 = vmatpush3.bf16.msra.mxu0 %v503_v1  ;;  %4639 = vmatpush3.bf16.msra.mxu1 %v503_v1  ;;  %s6237_s13 = smov (!%p161_p3, %s3866_s13), 1  ;;  %v999_v8 = vsel %vm501_vm0, %v3929_v2, 0  ;;  %v723_v16 = vsel %vm501_vm0, %v208_v3, 0  ;;  %v4840_v33 = vld [vmem:[%s6195_s1 + $0x10] sm:$0xf]  ;;  %vm908_vm3 = vcmask 1046528  }
   0xe   : > { %4643 = vmatprep.subr.msk.bf16.mxu0 %vm501_vm0, %v3929_v2  ;;  %4642 = vmatprep.subr.msk.bf16.mxu1 %vm501_vm0, %v208_v3  ;;  %s4650_s20 = smul.u32 164, %s6237_s13  ;;  %v4860_v45 = vld [vmem:[%s6195_s1 + $0xc] sm:$0xf]  ;;  %vm2222_vm4 = vcmask 1045504   ;;  %vm1779_vm5 = vsmask.f32 6400 }
   0xf   : > { %vm3422_vm6 = vcmask 1044480   ;;  %vm2975_vm7 = vsmask.f32 5376  ;;  %s4651_s9 = smul.u32 288, %s6237_s13  ;;  %vm3773_vm8 = vcmask 31744   ;;  %vm3809_vm9 = vcmask 29696  }
  0x10   : > { %s4795_s23 = scalar_lea.vmem %s6194_s0, %s4650_s20 }
  0x11   : > { %v172_v4 = vld [vmem:[%s4795_s23] sm:$0xf]  ;;  %v4799_v5 = vld [vmem:[%s4795_s23 + $0x4] sm:$0xf]  ;;  %v4805_v7 = vld [vmem:[%s4795_s23 + $0x8] sm:$0xff]   ;;  %s6048_s16 = scalar_lea.vmem %s6197_s3, %s4651_s9 }
  0x12   : > { %v4802_v6 = vcombine.low %v172_v4, %v4799_v5  ;;  %v311_v11 = vshll.u32 %v4805_v7, 16  ;;  %v315_v12 = vshrl.u32 %v4805_v7, 16  ;;  %v4813_v13 = vld [vmem:[%s4795_s23 + $0x50] sm:$0xff]   ;;  %v4816_v14 = vld [vmem:[%s4795_s23 + $0x58] sm:$0xff]   ;;  %v4828_v24 = vld [vmem:[%s4795_s23 + $0x60] sm:$0xff]  }
  0x13   : > { %v4819_v15 = vld [vmem:[%s4795_s23 + $0x10] sm:$0xff]   ;;  %v383_v19 = vshll.u32 %v4813_v13, 16  ;;  %v387_v20 = vshrl.u32 %v4813_v13, 16  ;;  %v391_v21 = vshll.u32 %v4816_v14, 16  ;;  %v395_v22 = vshrl.u32 %v4816_v14, 16  ;;  %v4833_v28 = vld [vmem:[%s4795_s23 + $0x18] sm:$0xff]  }
  0x14   : > { %v304_v9 = vshrl.u32 %v4802_v6, 16  ;;  %v306_v10 = vshll.u32 %v4802_v6, 16  ;;  %v313_v18 = vrot.slane %v311_v11, 1  ;;  %v319_v23 = vshll.u32 %v4819_v15, 16  ;;  %v4846_v37 = vld [vmem:[%s4795_s23 + $0x68] sm:$0xff]   ;;  %v4850_v39 = vld [vmem:[%s4795_s23 + $0x20] sm:$0xff]  }
  0x15   : > { %v4830_v27 = vrot.slane %v383_v19, 1  ;;  %v393_v29 = vrot.slane %v391_v21, 1  ;;  %v399_v31 = vshll.u32 %v4828_v24, 16  ;;  %v323_v32 = vshrl.u32 %v4819_v15, 16  ;;  %v4855_v44 = vld [vmem:[%s4795_s23 + $0x70] sm:$0xff]   ;;  %v4867_v50 = vld [vmem:[%s4795_s23 + $0x28] sm:$0xff]  }
  0x16   : > { %v308_v17 = vrot.slane %v306_v10, 1  ;;  %v317_v26 = vor.u32 %v315_v12, %v313_v18  ;;  %v321_v30 = vrot.slane %v319_v23, 1  ;;  %v327_v36 = vshll.u32 %v4833_v28, 16  ;;  %v4882_v62 = vld [vmem:[%s4795_s23 + $0x78] sm:$0xff]   ;;  %v4892_v10 = vld [vmem:[%s4795_s23 + $0x30] sm:$0xff]   ;;  %v4895_v11 = vld [vmem:[%s4795_s23 + $0x80] sm:$0xff]  }
  0x17   : > { %v389_v35 = vor.u32 %v387_v20, %v4830_v27  ;;  %v403_v38 = vshrl.u32 %v4828_v24, 16  ;;  %v397_v40 = vor.u32 %v395_v22, %v393_v29  ;;  %v401_v42 = vrot.slane %v399_v31, 1  ;;  %v4904_v23 = vld [vmem:[%s4795_s23 + $0x38] sm:$0xff]  }
  0x18   : > { %v309_v25 = vor.u32 %v308_v17, %v304_v9  ;;  %v322_v41 = vsel %vm302_vm1, %v317_v26, %v321_v30  ;;  %v325_v43 = vor.u32 %v323_v32, %v321_v30  ;;  %v329_v47 = vrot.slane %v327_v36, 1  ;;  %v4909_v26 = vld [vmem:[%s4795_s23 + $0x88] sm:$0xf] }
  0x19   : > { %v394_v46 = vsel %vm302_vm1, %v389_v35, %v393_v29  ;;  %v407_v48 = vshll.u32 %v4846_v37, 16  ;;  %v331_v49 = vshrl.u32 %v4833_v28, 16  ;;  %v402_v51 = vsel %vm302_vm1, %v397_v40, %v401_v42  ;;  %v209_v29 = vld [vmem:[%s4795_s23 + $0x8c] sm:$0xf]  ;;  %v4921_v40 = vld [vmem:[%s4795_s23 + $0x40] sm:$0xff]  }
  0x1a   : > { %v314_v34 = vsel %vm302_vm1, %v309_v25, %v313_v18  ;;  %4318 = vmatprep.mubr.msk.bf16.mxu1 %vm446_vm2, %v394_v46  ;;  %v405_v52 = vor.u32 %v403_v38, %v401_v42  ;;  %v335_v53 = vshll.u32 %v4850_v39, 16  ;;  %v411_v54 = vshrl.u32 %v4846_v37, 16 }
  0x1b   : > { %4298 = vmatprep.mubr.msk.bf16.mxu0 %vm446_vm2, %v314_v34  ;;  %4319 = vmatmul.mubr.msk.bf16.vlgmr.msra.gmra.mxu1 %vm446_vm2, %v402_v51  ;;  %v330_v55 = vsel %vm302_vm1, %v325_v43, %v329_v47  ;;  %v409_v56 = vrot.slane %v407_v48, 1  ;;  %v333_v57 = vor.u32 %v331_v49, %v329_v47  ;;  %v415_v58 = vshll.u32 %v4855_v44, 16 }
  0x1c   : > { %4299 = vmatmul.mubr.msk.bf16.vlgmr.msra.gmra.mxu0 %vm446_vm2, %v322_v41  ;;  %4335 = vmatpush3.bf16.msra.mxu1 %v723_v16  ;;  %v337_v59 = vrot.slane %v335_v53, 1  ;;  %v339_v60 = vshrl.u32 %v4850_v39, 16  ;;  %v343_v61 = vshll.u32 %v4867_v50, 16  ;;  %v419_v2 = vshrl.u32 %v4855_v44, 16  ;;  %v4924_v41 = vld [vmem:[%s4795_s23 + $0x48] sm:$0xff]  }
  0x1d   : > { %4373 = vmatpush3.bf16.msra.mxu0 %v999_v8  ;;  %4302 = vmatprep.mubr.msk.bf16.mxu0 %vm446_vm2, %v330_v55  ;;  %v410_v63 = vsel %vm302_vm1, %v405_v52, %v409_v56  ;;  %v413_v0 = vor.u32 %v411_v54, %v409_v56  ;;  %v417_v1 = vrot.slane %v415_v58, 1  ;;  %v423_v9 = vshll.u32 %v4882_v62, 16 }
  0x1e   : > { %4645 = vmatprep.subr.msk.bf16.mxu0 %vm501_vm0, %v4840_v33  ;;  %4644 = vmatprep.subr.msk.bf16.mxu1 %vm501_vm0, %v4860_v45  ;;  %v338_v3 = vsel %vm302_vm1, %v333_v57, %v337_v59  ;;  %v341_v4 = vor.u32 %v339_v60, %v337_v59  ;;  %v345_v8 = vrot.slane %v343_v61, 1  ;;  %v347_v17 = vshrl.u32 %v4867_v50, 16 }
  0x1f   : > { %4322 = vmatprep.mubr.msk.bf16.mxu1 %vm446_vm2, %v410_v63  ;;  %v418_v12 = vsel %vm302_vm1, %v413_v0, %v417_v1  ;;  %v421_v16 = vor.u32 %v419_v2, %v417_v1  ;;  %v427_v18 = vshrl.u32 %v4882_v62, 16  ;;  %v425_v20 = vrot.slane %v423_v9, 1  ;;  %v902_v1 = vld [vmem:[%s4795_s23] sm:$0xe] }
  0x20   : > { %v346_v19 = vsel %vm302_vm1, %v341_v4, %v345_v8  ;;  %v351_v21 = vshll.u32 %v4892_v10, 16  ;;  %v431_v22 = vshll.u32 %v4895_v11, 16  ;;  %v355_v25 = vshrl.u32 %v4892_v10, 16 }
  0x21   : > { %v435_v30 = vshrl.u32 %v4895_v11, 16  ;;  %v426_v31 = vsel %vm302_vm1, %v421_v16, %v425_v20  ;;  %v349_v32 = vor.u32 %v347_v17, %v345_v8  ;;  %v359_v36 = vshll.u32 %v4904_v23, 16 }
  0x22   : > { %v353_v34 = vrot.slane %v351_v21, 1  ;;  %v433_v35 = vrot.slane %v431_v22, 1  ;;  %v4918_v38 = vcombine.low %v4909_v26, %v209_v29  ;;  %v429_v42 = vor.u32 %v427_v18, %v425_v20  ;;  %v4972_v29 = vld [vmem:[%s6195_s1 + $0x14] sm:$0xf] }
  0x23   : > { %4323 = vmatmul.mubr.msk.bf16.gmra.mxu1 %vm446_vm2, %v418_v12  ;;  %v361_v46 = vrot.slane %v359_v36, 1  ;;  %v367_v49 = vshll.u32 %v4921_v40, 16  ;;  %v363_v52 = vshrl.u32 %v4904_v23, 16  ;;  %v371_v53 = vshrl.u32 %v4921_v40, 16 }
  0x24   : > { %4303 = vmatmul.mubr.msk.bf16.gmra.mxu0 %vm446_vm2, %v338_v3  ;;  %4326 = vmatprep.mubr.msk.bf16.mxu1 %vm446_vm2, %v426_v31  ;;  %v357_v43 = vor.u32 %v355_v25, %v353_v34  ;;  %v437_v47 = vor.u32 %v435_v30, %v433_v35  ;;  %v439_v48 = vshll.u32 %v4918_v38, 16  ;;  %v354_v51 = vsel %vm302_vm1, %v349_v32, %v353_v34 }
  0x25   : > { %4306 = vmatprep.mubr.msk.bf16.mxu0 %vm446_vm2, %v346_v19  ;;  %v375_v56 = vshll.u32 %v4924_v41, 16  ;;  %v434_v57 = vsel %vm302_vm1, %v429_v42, %v433_v35  ;;  %v369_v59 = vrot.slane %v367_v49, 1  ;;  %v365_v60 = vor.u32 %v363_v52, %v361_v46  ;;  %v5022_v42 = vld [vmem:[%s4795_s23 + $0xc] sm:$0xf] }
  0x26   : > { %v362_v54 = vsel %vm302_vm1, %v357_v43, %v361_v46  ;;  %v441_v55 = vrot.slane %v439_v48, 1  ;;  %v443_v61 = vshrl.u32 %v4918_v38, 16  ;;  %v379_v3 = vshrl.u32 %v4924_v41, 16  ;;  %v5025_v43 = vld [vmem:[%s4795_s23 + $0x10] sm:$0xff]   ;;  %v2216_v46 = vld [vmem:[%s4795_s23 + $0x8] sm:$0xc] }
  0x27   : > { %v373_v63 = vor.u32 %v371_v53, %v369_v59  ;;  %v377_v0 = vrot.slane %v375_v56, 1  ;;  %v370_v2 = vsel %vm302_vm1, %v365_v60, %v369_v59  ;;  %v3930_v9 = vcombine.low %v902_v1, %v4799_v5  ;;  %v5030_v48 = vld [vmem:[%s4795_s23 + $0x18] sm:$0xff]   ;;  %v5046_v56 = vld [vmem:[%s4795_s23 + $0x28] sm:$0xff]   ;;  %v5057_v59 = vld [vmem:[%s4795_s23 + $0x30] sm:$0xff]  }
  0x28   : > { %v442_v58 = vsel %vm302_vm1, %v437_v47, %v441_v55  ;;  %v445_v4 = vor.u32 %v443_v61, %v441_v55  ;;  %v940_v12 = vrot.slane %v4895_v11, 1  ;;  %v942_v16 = vrot.slane %v4918_v38, 1  ;;  %v5063_v61 = vld [vmem:[%s4795_s23 + $0x38] sm:$0xff]  }
  0x29   : > { %v378_v8 = vsel %vm302_vm1, %v373_v63, %v377_v0  ;;  %v381_v17 = vor.u32 %v379_v3, %v377_v0  ;;  %v909_v18 = vrot.slane %v3930_v9, 1  ;;  %v910_v19 = vrot.slane %v4805_v7, 1  ;;  %v5068_v0 = vld [vmem:[%s4795_s23 + $0x40] sm:$0xff]   ;;  %v5073_v3 = vld [vmem:[%s4795_s23 + $0x48] sm:$0xff]   ;;  %v5211_v38 = vld [vmem:[%s6195_s1 + $0x1c] sm:$0xf] }
  0x2a   : > { %v4957_v5 = vsel %vm908_vm3, %v940_v12, %v942_v16  ;;  %v1432_v22 = vsel %vm501_vm0, %v4860_v45, 0  ;;  %v912_v25 = vrot.slane %v4819_v15, 1  ;;  %v2001_v45 = vsel %vm501_vm0, %v4840_v33, 0 }
  0x2b   : > { %4327 = vmatmul.mubr.msk.bf16.gmra.mxu1 %vm446_vm2, %v434_v57  ;;  %v386_v20 = vsel %vm302_vm1, %v381_v17, %v4830_v27  ;;  %v911_v21 = vsel %vm908_vm3, %v909_v18, %v910_v19  ;;  %v918_v31 = vrot.slane %v4867_v50, 1  ;;  %v920_v34 = vrot.slane %v4892_v10, 1 }
  0x2c   : > { %4307 = vmatmul.mubr.msk.bf16.gmra.mxu0 %vm446_vm2, %v354_v51  ;;  %4330 = vmatprep.mubr.msk.bf16.mxu1 %vm446_vm2, %v442_v58  ;;  %v913_v27 = vsel %vm908_vm3, %v910_v19, %v912_v25  ;;  %v924_v36 = vrot.slane %v4921_v40, 1  ;;  %v4025_v49 = vcombine.low %v2216_v46, %v5022_v42  ;;  %v2226_v52 = vrot.slane %v5030_v48, 2 }
  0x2d   : > { %4310 = vmatprep.mubr.msk.bf16.mxu0 %vm446_vm2, %v362_v54  ;;  %v928_v53 = vrot.slane %v4813_v13, 1  ;;  %v930_v55 = vrot.slane %v4816_v14, 1  ;;  %v2232_v1 = vrot.slane %v5057_v59, 2  ;;  %v2236_v9 = vrot.slane %v5068_v0, 2 }
  0x2e   : > { %v2223_v51 = vrot.slane %v4025_v49, 2  ;;  %v2238_v18 = vrot.slane %v5073_v3, 2  ;;  %v932_v19 = vrot.slane %v4828_v24, 1 }
  0x33   : > { %4331 = vmatmul.mubr.msk.bf16.gmra.mxu1 %vm446_vm2, %v445_v4  ;;  %v2234_v4 = vrot.slane %v5063_v61, 2 }
  0x34   : > { %4311 = vmatmul.mubr.msk.bf16.gmra.mxu0 %vm446_vm2, %v370_v2  ;;  %4336 = vmatprep.mubr.msk.bf16.mxu1 %vm446_vm2, %v4802_v6  ;;  %v914_v6 = vrot.slane %v4833_v28, 1  ;;  %v931_v2 = vsel %vm908_vm3, %v928_v53, %v930_v55 }
  0x35   : > { %4314 = vmatprep.mubr.msk.bf16.mxu0 %vm446_vm2, %v378_v8  ;;  %v5085_v17 = vsel %vm2222_vm4, %v2232_v1, %v2234_v4 }
  0x36   : > { %v915_v30 = vsel %vm908_vm3, %v912_v25, %v914_v6  ;;  %v5100_v25 = vsel %vm2222_vm4, %v2236_v9, %v2238_v18 }
  0x3b   : > { %4337 = vmatmul.mubr.msk.bf16.vlgmr.msra.gmra.mxu1 %vm446_vm2, %v4805_v7  ;;  %v4988_v7 = vld [vmem:[%s6195_s1 + $0x18] sm:$0xf] }
  0x3c   : > { %4315 = vmatmul.mubr.msk.bf16.gmra.mxu0 %vm446_vm2, %v386_v20  ;;  %4411 = vmatpush3.bf16.msra.mxu1 %v1432_v22  ;;  %v934_v20 = vrot.slane %v4846_v37, 1  ;;  %v5097_v22 = vld [vmem:[%s4795_s23 + $0x50] sm:$0xff]  }
  0x3d   : > { %4374 = vmatprep.mubr.msk.bf16.mxu0 %vm446_vm2, %v911_v21  ;;  %4340 = vmatprep.mubr.msk.bf16.mxu1 %vm446_vm2, %v4819_v15  ;;  %v916_v15 = vrot.slane %v4850_v39, 1  ;;  %v5092_v21 = vsel %vm2222_vm4, %v2234_v4, %v2236_v9 }
  0x3e   : > { %4646 = vmatprep.subr.msk.bf16.mxu1 %vm501_vm0, %v4972_v29 }
  0x3f   : > { %v917_v33 = vsel %vm908_vm3, %v914_v6, %v916_v15  ;;  %v919_v32 = vsel %vm908_vm3, %v916_v15, %v918_v31  ;;  %v933_v6 = vsel %vm908_vm3, %v930_v55, %v932_v19  ;;  %v936_v15 = vrot.slane %v4855_v44, 1  ;;  %v5155_v55 = vld [vmem:[%s4795_s23 + $0x70] sm:$0xff]  }
  0x40   : > { %v2248_v9 = vrot.slane %v5155_v55, 2 }
  0x43   : > { %4341 = vmatmul.mubr.msk.bf16.gmra.mxu1 %vm446_vm2, %v4833_v28  ;;  %v922_v28 = vrot.slane %v4904_v23, 1 }
  0x44   : > { %4375 = vmatmul.mubr.msk.bf16.vlgmr.msra.gmra.mxu0 %vm446_vm2, %v913_v27  ;;  %4344 = vmatprep.mubr.msk.bf16.mxu1 %vm446_vm2, %v4850_v39  ;;  %v921_v39 = vsel %vm908_vm3, %v918_v31, %v920_v34  ;;  %v5106_v27 = vld [vmem:[%s4795_s23 + $0x58] sm:$0xff]  }
  0x45   : > { %4449 = vmatpush3.bf16.msra.mxu0 %v2001_v45  ;;  %4378 = vmatprep.mubr.msk.bf16.mxu0 %vm446_vm2, %v915_v30  ;;  %v923_v35 = vsel %vm908_vm3, %v920_v34, %v922_v28  ;;  %v935_v45 = vsel %vm908_vm3, %v932_v19, %v934_v20  ;;  %v2240_v30 = vrot.slane %v5097_v22, 2  ;;  %v5127_v34 = vld [vmem:[%s4795_s23 + $0x60] sm:$0xff]  }
  0x46   : > { %4647 = vmatprep.subr.msk.bf16.mxu0 %vm501_vm0, %v4988_v7 }
  0x47   : > { %v5114_v31 = vsel %vm2222_vm4, %v2238_v18, %v2240_v30  ;;  %v4682_v18 = vld [vmem:[%s4795_s23 + $0x18] sm:$0xff]  }
  0x4b   : > { %4345 = vmatmul.mubr.msk.bf16.gmra.mxu1 %vm446_vm2, %v4867_v50  ;;  %v926_v50 = vrot.slane %v4924_v41, 1 }
  0x4c   : > { %4379 = vmatmul.mubr.msk.bf16.gmra.mxu0 %vm446_vm2, %v917_v33  ;;  %4348 = vmatprep.mubr.msk.bf16.mxu1 %vm446_vm2, %v4892_v10  ;;  %v925_v10 = vsel %vm908_vm3, %v922_v28, %v924_v36  ;;  %v938_v33 = vrot.slane %v4882_v62, 1  ;;  %v937_v28 = vsel %vm908_vm3, %v934_v20, %v936_v15 }
  0x4d   : > { %4382 = vmatprep.mubr.msk.bf16.mxu0 %vm446_vm2, %v919_v32  ;;  %v927_v47 = vsel %vm908_vm3, %v924_v36, %v926_v50  ;;  %v929_v63 = vsel %vm908_vm3, %v926_v50, %v928_v53  ;;  %v1647_v32 = vld [vmem:[%s4795_s23 + $0x8] sm:$0xe]  ;;  %v2244_v50 = vrot.slane %v5127_v34, 2 }
  0x4e   : > { %v3987_v36 = vcombine.low %v1647_v32, %v5022_v42  ;;  %v207_v42 = vld [vmem:[%s4795_s23 + $0x8c] sm:$0x7] }
  0x53   : > { %4349 = vmatmul.mubr.msk.bf16.gmra.mxu1 %vm446_vm2, %v4904_v23  ;;  %v5034_v23 = vld [vmem:[%s4795_s23 + $0x20] sm:$0xff]  }
  0x54   : > { %4383 = vmatmul.mubr.msk.bf16.gmra.mxu0 %vm446_vm2, %v921_v39  ;;  %4352 = vmatprep.mubr.msk.bf16.mxu1 %vm446_vm2, %v4921_v40  ;;  %v2224_v40 = vrot.slane %v5025_v43, 2  ;;  %v2228_v54 = vrot.slane %v5034_v23, 2  ;;  %v5131_v39 = vld [vmem:[%s4795_s23 + $0x68] sm:$0xff]  }
  0x55   : > { %4386 = vmatprep.mubr.msk.bf16.mxu0 %vm446_vm2, %v923_v35  ;;  %v939_v35 = vsel %vm908_vm3, %v936_v15, %v938_v33  ;;  %v1807_v15 = vshrl.u32 %v5034_v23, 16 }
  0x56   : > { %v5049_v57 = vsel %vm2222_vm4, %v2223_v51, %v2224_v40  ;;  %v5052_v58 = vsel %vm2222_vm4, %v2224_v40, %v2226_v52  ;;  %v5060_v60 = vsel %vm2222_vm4, %v2226_v52, %v2228_v54  ;;  %v1781_v40 = vshrl.u32 %v3987_v36, 16 }
  0x57   : > { %v1784_v51 = vshll.u32 %v3987_v36, 16  ;;  %v1792_v52 = vshll.u32 %v5025_v43, 16  ;;  %v5188_v36 = vld [vmem:[%s4795_s23 + $0x88] sm:$0xff]  }
  0x59   : > { %v1786_v4 = vrot.slane %v1784_v51, 2 }
  0x5b   : > { %4353 = vmatmul.mubr.msk.bf16.gmra.mxu1 %vm446_vm2, %v4924_v41  ;;  %v2230_v41 = vrot.slane %v5046_v56, 2 }
  0x5c   : > { %4387 = vmatmul.mubr.msk.bf16.gmra.mxu0 %vm446_vm2, %v925_v10  ;;  %4356 = vmatprep.mubr.msk.bf16.mxu1 %vm446_vm2, %v4813_v13  ;;  %v4681_v10 = vld [vmem:[%s4795_s23 + $0x10] sm:$0xff]  }
  0x5d   : > { %4390 = vmatprep.mubr.msk.bf16.mxu0 %vm446_vm2, %v927_v47  ;;  %v5076_v13 = vsel %vm2222_vm4, %v2228_v54, %v2230_v41  ;;  %v5080_v8 = vsel %vm2222_vm4, %v2230_v41, %v2232_v1  ;;  %v1789_v47 = vshrl.u32 %v5025_v43, 16  ;;  %v1343_v54 = vrot.slane %v4681_v10, 1  ;;  %v5162_v1 = vld [vmem:[%s4795_s23 + $0x78] sm:$0xff]  }
  0x5e   : > { %v3910_v41 = vcombine.low %v4909_v26, %v207_v42  ;;  %v1794_v43 = vrot.slane %v1792_v52, 2  ;;  %v2250_v19 = vrot.slane %v5162_v1, 2  ;;  %v4683_v26 = vld [vmem:[%s4795_s23 + $0x20] sm:$0xff]   ;;  %v2254_v42 = vrot.slane %v5188_v36, 2  ;;  %v4688_v52 = vld [vmem:[%s4795_s23 + $0x30] sm:$0xff]  }
  0x5f   : > { %v1347_v32 = vrot.slane %v4683_v26, 1 }
  0x63   : > { %4357 = vmatmul.mubr.msk.bf16.gmra.mxu1 %vm446_vm2, %v4816_v14  ;;  %v2242_v14 = vrot.slane %v5106_v27, 2 }
  0x64   : > { %4391 = vmatmul.mubr.msk.bf16.gmra.mxu0 %vm446_vm2, %v929_v63  ;;  %4360 = vmatprep.mubr.msk.bf16.mxu1 %vm446_vm2, %v4828_v24  ;;  %v1791_v63 = vrot.slane %v1789_v47, 1  ;;  %v4686_v47 = vld [vmem:[%s4795_s23 + $0x28] sm:$0xff]  }
  0x65   : > { %4394 = vmatprep.mubr.msk.bf16.mxu0 %vm446_vm2, %v931_v2  ;;  %v5118_v24 = vsel %vm2222_vm4, %v2240_v30, %v2242_v14  ;;  %v5141_v46 = vsel %vm2222_vm4, %v2242_v14, %v2244_v50  ;;  %v1783_v2 = vrot.slane %v1781_v40, 1  ;;  %v2315_v40 = vsel %vm501_vm0, %v4972_v29, 0 }
  0x66   : > { %v1795_v14 = vor.u32 %v1794_v43, %v1791_v63  ;;  %v1825_v63 = vshrl.u32 %v5057_v59, 16  ;;  %v5221_v43 = vld [vmem:[%s4795_s23 + $0x90] sm:$0xff]  }
  0x67   : > { %v1787_v30 = vor.u32 %v1786_v4, %v1783_v2  ;;  %v1828_v2 = vshll.u32 %v5057_v59, 16  ;;  %v1351_v4 = vrot.slane %v4688_v52, 1  ;;  %v5229_v59 = vld [vmem:[%s4795_s23 + $0x98] ss:$0 sps:$4 sm:$0x11]  }
  0x6b   : > { %4361 = vmatmul.mubr.msk.bf16.gmra.mxu1 %vm446_vm2, %v4846_v37  ;;  %v2246_v37 = vrot.slane %v5131_v39, 2 }
  0x6c   : > { %4395 = vmatmul.mubr.msk.bf16.gmra.mxu0 %vm446_vm2, %v933_v6  ;;  %4364 = vmatprep.mubr.msk.bf16.mxu1 %vm446_vm2, %v4855_v44  ;;  %v4680_v44 = vld [vmem:[%s4795_s23 + $0x8] sm:$0xfe]   ;;  %v1801_v6 = vshll.u32 %v5030_v48, 16 }
  0x6d   : > { %4398 = vmatprep.mubr.msk.bf16.mxu0 %vm446_vm2, %v935_v45  ;;  %v5146_v49 = vsel %vm2222_vm4, %v2244_v50, %v2246_v37  ;;  %v1342_v53 = vrot.slane %v4680_v44, 1  ;;  %v5178_v45 = vsel %vm2222_vm4, %v2248_v9, %v2250_v19  ;;  %v1796_v50 = vsel %vm1779_vm5, %v1787_v30, %v1795_v14 }
  0x6e   : > { %v2256_v30 = vrot.slane %v5221_v43, 2 }
  0x6f   : > { %v1344_v20 = vsel %vm908_vm3, %v1342_v53, %v1343_v54 }
  0x73   : > { %4365 = vmatmul.mubr.msk.bf16.gmra.mxu1 %vm446_vm2, %v4882_v62  ;;  %v941_v62 = vsel %vm908_vm3, %v938_v33, %v940_v12  ;;  %v1798_v12 = vshrl.u32 %v5030_v48, 16  ;;  %v1810_v33 = vshll.u32 %v5034_v23, 16 }
  0x74   : > { %4399 = vmatmul.mubr.msk.bf16.gmra.mxu0 %vm446_vm2, %v937_v28  ;;  %4368 = vmatprep.mubr.msk.bf16.mxu1 %vm446_vm2, %v4895_v11  ;;  %v5171_v11 = vsel %vm2222_vm4, %v2246_v37, %v2248_v9  ;;  %v5185_v28 = vld [vmem:[%s4795_s23 + $0x80] sm:$0xff]   ;;  %v1809_v37 = vrot.slane %v1807_v15, 1 }
  0x75   : > { %4402 = vmatprep.mubr.msk.bf16.mxu0 %vm446_vm2, %v939_v35  ;;  %v1800_v48 = vrot.slane %v1798_v12, 1  ;;  %v1803_v35 = vrot.slane %v1801_v6, 2  ;;  %v1812_v44 = vrot.slane %v1810_v33, 2  ;;  %v2252_v10 = vrot.slane %v5185_v28, 2  ;;  %v4690_v33 = vld [vmem:[%s4795_s23 + $0x38] sm:$0xff]  }
  0x76   : > { %v1827_v12 = vrot.slane %v1825_v63, 1  ;;  %v1830_v6 = vrot.slane %v1828_v2, 2  ;;  %v4694_v2 = vld [vmem:[%s4795_s23 + $0x48] sm:$0xff]  }
  0x77   : > { %v5203_v53 = vsel %vm2222_vm4, %v2250_v19, %v2252_v10  ;;  %v1813_v29 = vor.u32 %v1812_v44, %v1809_v37  ;;  %v1837_v37 = vshll.u32 %v5063_v61, 16 }
  0x79   : > { %v1839_v52 = vrot.slane %v1837_v37, 2 }
  0x7b   : > { %4369 = vmatmul.mubr.msk.bf16.gmra.mxu1 %vm446_vm2, %v3910_v41  ;;  %v1816_v41 = vshrl.u32 %v5046_v56, 16 }
  0x7c   : > { %4403 = vmatmul.mubr.msk.bf16.gmra.mxu0 %vm446_vm2, %v941_v62  ;;  %4412 = vmatprep.mubr.msk.bf16.mxu1 %vm446_vm2, %v1344_v20  ;;  %v1819_v62 = vshll.u32 %v5046_v56, 16  ;;  %v1349_v56 = vrot.slane %v4686_v47, 1  ;;  %v1846_v47 = vshll.u32 %v5068_v0, 16 }
  0x7d   : > { %4406 = vmatprep.mubr.msk.bf16.mxu0 %vm446_vm2, %v4957_v5  ;;  %v1345_v5 = vrot.slane %v4682_v18, 1  ;;  %v2754_v18 = vsel %vm501_vm0, %v4988_v7, 0  ;;  %v1818_v19 = vrot.slane %v1816_v41, 1  ;;  %v2258_v7 = vrot.slane %v5229_v59, 2 }
  0x7e   : > { %v1821_v20 = vrot.slane %v1819_v62, 2  ;;  %v1350_v15 = vsel %vm908_vm3, %v1347_v32, %v1349_v56  ;;  %v1848_v62 = vrot.slane %v1846_v47, 2 }
  0x7f   : > { %v1346_v23 = vsel %vm908_vm3, %v1343_v54, %v1345_v5  ;;  %v1348_v51 = vsel %vm908_vm3, %v1345_v5, %v1347_v32  ;;  %v1804_v54 = vor.u32 %v1803_v35, %v1800_v48  ;;  %v1352_v5 = vsel %vm908_vm3, %v1349_v56, %v1351_v4  ;;  %v4692_v48 = vld [vmem:[%s4795_s23 + $0x40] sm:$0xff]   ;;  %v4696_v56 = vld [vmem:[%s4795_s23 + $0x50] sm:$0xff]  }
  0x80   : > { %v5245_v35 = vsel %vm2222_vm4, %v2254_v42, %v2256_v30  ;;  %v1822_v32 = vor.u32 %v1821_v20, %v1818_v19  ;;  %v5251_v44 = vsel %vm2222_vm4, %v2256_v30, %v2258_v7  ;;  %v1864_v20 = vshll.u32 %v5097_v22, 16  ;;  %v3416_v30 = vld [vmem:[%s4795_s23 + $0x10] sm:$0x8]  ;;  %v5279_v7 = vld [vmem:[%s4795_s23 + $0x18] sm:$0xff]  }
  0x81   : > { %v1805_v9 = vsel %vm1779_vm5, %v1795_v14, %v1804_v54  ;;  %v1814_v26 = vsel %vm1779_vm5, %v1804_v54, %v1813_v29  ;;  %v5238_v14 = vld [vmem:[%s6195_s1 + $0x20] sm:$0xf] }
  0x83   : > { %4413 = vmatmul.mubr.msk.bf16.vlgmr.msra.gmra.mxu1 %vm446_vm2, %v1346_v23  ;;  %v1843_v23 = vshrl.u32 %v5068_v0, 16 }
  0x84   : > { %4407 = vmatmul.mubr.msk.bf16.gmra.mxu0 %vm446_vm2, %v942_v16  ;;  %v5214_v16 = vsel %vm2222_vm4, %v2252_v10, %v2254_v42  ;;  %4487 = vmatpush3.bf16.msra.mxu1 %v2315_v40  ;;  %v1831_v10 = vor.u32 %v1830_v6, %v1827_v12  ;;  %v1353_v42 = vrot.slane %v4690_v33, 1  ;;  %v1355_v40 = vrot.slane %v4692_v48, 1  ;;  %v5274_v6 = vld [vmem:[%s4795_s23 + $0x14] sm:$0xf] }
  0x85   : > { %4450 = vmatprep.mubr.msk.bf16.mxu0 %vm446_vm2, %v1796_v50  ;;  %4416 = vmatprep.mubr.msk.bf16.mxu1 %vm446_vm2, %v1348_v51  ;;  %v1834_v50 = vshrl.u32 %v5063_v61, 16  ;;  %v1823_v61 = vsel %vm1779_vm5, %v1813_v29, %v1822_v32  ;;  %v1845_v41 = vrot.slane %v1843_v23, 1  ;;  %v1359_v12 = vrot.slane %v4696_v56, 1  ;;  %v4698_v23 = vld [vmem:[%s4795_s23 + $0x58] sm:$0xff]  }
  0x86   : > { %4648 = vmatprep.subr.msk.bf16.mxu1 %vm501_vm0, %v5211_v38  ;;  %v1832_v54 = vsel %vm1779_vm5, %v1822_v32, %v1831_v10  ;;  %v1354_v63 = vsel %vm908_vm3, %v1351_v4, %v1353_v42  ;;  %v1356_v0 = vsel %vm908_vm3, %v1353_v42, %v1355_v40  ;;  %v1861_v4 = vshrl.u32 %v5097_v22, 16 }
  0x87   : > { %v1836_v51 = vrot.slane %v1834_v50, 1  ;;  %v1849_v19 = vor.u32 %v1848_v62, %v1845_v41  ;;  %v1866_v32 = vrot.slane %v1864_v20, 2  ;;  %v5284_v50 = vld [vmem:[%s4795_s23 + $0x20] sm:$0xff]   ;;  %v3424_v42 = vrot.slane %v5279_v7, 3 }
  0x88   : > { %v1863_v22 = vrot.slane %v1861_v4, 1  ;;  %v1873_v41 = vshll.u32 %v5106_v27, 16 }
  0x89   : > { %v1840_v29 = vor.u32 %v1839_v52, %v1836_v51  ;;  %v6198_v51 = vrot.slane %v5284_v50, 3 }
  0x8a   : > { %v1867_v62 = vor.u32 %v1866_v32, %v1863_v22  ;;  %v1900_v22 = vshll.u32 %v5155_v55, 16 }
  0x8b   : > { %4417 = vmatmul.mubr.msk.bf16.gmra.mxu1 %vm446_vm2, %v1350_v15  ;;  %v1841_v15 = vsel %vm1779_vm5, %v1831_v10, %v1840_v29  ;;  %v1850_v48 = vsel %vm1779_vm5, %v1840_v29, %v1849_v19 }
  0x8c   : > { %4451 = vmatmul.mubr.msk.bf16.vlgmr.msra.gmra.mxu0 %vm446_vm2, %v1805_v9  ;;  %4420 = vmatprep.mubr.msk.bf16.mxu1 %vm446_vm2, %v1352_v5  ;;  %v1852_v9 = vshrl.u32 %v5073_v3, 16  ;;  %v4103_v5 = vcombine.low %v3416_v30, %v5274_v6 }
  0x8d   : > { %4525 = vmatpush3.bf16.msra.mxu0 %v2754_v18  ;;  %4454 = vmatprep.mubr.msk.bf16.mxu0 %vm446_vm2, %v1814_v26  ;;  %v1855_v18 = vshll.u32 %v5073_v3, 16  ;;  %v1357_v26 = vrot.slane %v4694_v2, 1  ;;  %v1882_v2 = vshll.u32 %v5127_v34, 16 }
  0x8e   : > { %4649 = vmatprep.subr.msk.bf16.mxu0 %vm501_vm0, %v5238_v14  ;;  %v1854_v3 = vrot.slane %v1852_v9, 1  ;;  %v3423_v47 = vrot.slane %v4103_v5, 3  ;;  %v1888_v5 = vshrl.u32 %v5131_v39, 16 }
  0x8f   : > { %v1857_v33 = vrot.slane %v1855_v18, 2  ;;  %v1358_v37 = vsel %vm908_vm3, %v1355_v40, %v1357_v26  ;;  %v1360_v10 = vsel %vm908_vm3, %v1357_v26, %v1359_v12  ;;  %v1875_v18 = vrot.slane %v1873_v41, 2 }
  0x90   : > { %v5297_v40 = vsel %vm3422_vm6, %v3423_v47, %v3424_v42  ;;  %v1884_v26 = vrot.slane %v1882_v2, 2  ;;  %v1890_v47 = vrot.slane %v1888_v5, 1  ;;  %v1906_v2 = vshrl.u32 %v5162_v1, 16 }
  0x91   : > { %v1858_v52 = vor.u32 %v1857_v33, %v1854_v3  ;;  %v4704_v3 = vld [vmem:[%s4795_s23 + $0x70] sm:$0xff]  }
  0x93   : > { %4421 = vmatmul.mubr.msk.bf16.gmra.mxu1 %vm446_vm2, %v1354_v63  ;;  %v1879_v63 = vshrl.u32 %v5127_v34, 16  ;;  %v1859_v29 = vsel %vm1779_vm5, %v1849_v19, %v1858_v52  ;;  %v1868_v4 = vsel %vm1779_vm5, %v1858_v52, %v1867_v62  ;;  %v4702_v34 = vld [vmem:[%s4795_s23 + $0x68] sm:$0xff]   ;;  %v1891_v19 = vshll.u32 %v5131_v39, 16 }
  0x94   : > { %4455 = vmatmul.mubr.msk.bf16.gmra.mxu0 %vm446_vm2, %v1823_v61  ;;  %4424 = vmatprep.mubr.msk.bf16.mxu1 %vm446_vm2, %v1356_v0  ;;  %v4700_v61 = vld [vmem:[%s4795_s23 + $0x60] sm:$0xff]   ;;  %v5305_v0 = vsel %vm3422_vm6, %v3424_v42, %v6198_v51  ;;  %v1365_v32 = vrot.slane %v4702_v34, 1  ;;  %v1902_v39 = vrot.slane %v1900_v22, 2  ;;  %v1933_v22 = vshrl.u32 %v5221_v43, 16 }
  0x95   : > { %4458 = vmatprep.mubr.msk.bf16.mxu0 %vm446_vm2, %v1832_v54  ;;  %v1870_v54 = vshrl.u32 %v5106_v27, 16  ;;  %v1361_v27 = vrot.slane %v4698_v23, 1  ;;  %v1363_v56 = vrot.slane %v4700_v61, 1  ;;  %v1881_v20 = vrot.slane %v1879_v63, 1 }
  0x96   : > { %v1893_v42 = vrot.slane %v1891_v19, 2  ;;  %v1924_v19 = vshrl.u32 %v5188_v36, 16 }
  0x97   : > { %v1872_v9 = vrot.slane %v1870_v54, 1  ;;  %v1362_v30 = vsel %vm908_vm3, %v1359_v12, %v1361_v27  ;;  %v1897_v12 = vshrl.u32 %v5155_v55, 16  ;;  %v1366_v52 = vsel %vm908_vm3, %v1363_v56, %v1365_v32  ;;  %v4706_v54 = vld [vmem:[%s4795_s23 + $0x78] sm:$0xff]   ;;  %v4708_v55 = vld [vmem:[%s4795_s23 + $0x80] sm:$0xff]  }
  0x98   : > { %v1894_v63 = vor.u32 %v1893_v42, %v1890_v47  ;;  %v1926_v42 = vrot.slane %v1924_v19, 1 }
  0x99   : > { %v1876_v33 = vor.u32 %v1875_v18, %v1872_v9  ;;  %v1899_v61 = vrot.slane %v1897_v12, 1  ;;  %v1369_v9 = vrot.slane %v4706_v54, 1  ;;  %v1371_v18 = vrot.slane %v4708_v55, 1  ;;  %v2530_v55 = vld [vmem:[%s4795_s23 + $0x10] sm:$0xc] }
  0x9b   : > { %4425 = vmatmul.mubr.msk.bf16.gmra.mxu1 %vm446_vm2, %v1358_v37  ;;  %v1367_v37 = vrot.slane %v4704_v3, 1  ;;  %v1877_v23 = vsel %vm1779_vm5, %v1867_v62, %v1876_v33  ;;  %v1909_v62 = vshll.u32 %v5162_v1, 16  ;;  %v4710_v3 = vld [vmem:[%s4795_s23 + $0x88] sm:$0xff]  }
  0x9c   : > { %4459 = vmatmul.mubr.msk.bf16.gmra.mxu0 %vm446_vm2, %v1841_v15  ;;  %4428 = vmatprep.mubr.msk.bf16.mxu1 %vm446_vm2, %v1360_v10  ;;  %v1364_v15 = vsel %vm908_vm3, %v1361_v27, %v1363_v56  ;;  %v1903_v27 = vor.u32 %v1902_v39, %v1899_v61  ;;  %v1915_v56 = vshrl.u32 %v5185_v28, 16  ;;  %v1935_v39 = vrot.slane %v1933_v22, 1 }
  0x9d   : > { %4462 = vmatprep.mubr.msk.bf16.mxu0 %vm446_vm2, %v1850_v48  ;;  %v1885_v48 = vor.u32 %v1884_v26, %v1881_v20  ;;  %v1368_v41 = vsel %vm908_vm3, %v1365_v32, %v1367_v37  ;;  %v1908_v20 = vrot.slane %v1906_v2, 1  ;;  %v1911_v26 = vrot.slane %v1909_v62, 2 }
  0x9e   : > { %v1917_v34 = vrot.slane %v1915_v56, 1  ;;  %v1936_v32 = vshll.u32 %v5221_v43, 16  ;;  %v1942_v2 = vshll.u32 %v5229_v59, 16 }
  0x9f   : > { %v1886_v10 = vsel %vm1779_vm5, %v1876_v33, %v1885_v48  ;;  %v1372_v33 = vsel %vm908_vm3, %v1369_v9, %v1371_v18  ;;  %v1912_v5 = vor.u32 %v1911_v26, %v1908_v20  ;;  %v2665_v20 = vrot.slane %v5284_v50, 2 }
  0xa0   : > { %v1944_v56 = vrot.slane %v1942_v2, 2  ;;  %v5473_v2 = vld [vmem:[%s4795_s23 + $0x68] sm:$0xff]  }
  0xa1   : > { %v1913_v47 = vsel %vm1779_vm5, %v1903_v27, %v1912_v5 }
  0xa3   : > { %4429 = vmatmul.mubr.msk.bf16.gmra.mxu1 %vm446_vm2, %v1362_v30  ;;  %v1904_v30 = vsel %vm1779_vm5, %v1894_v63, %v1903_v27  ;;  %v5363_v27 = vcombine.low %v2530_v55, %v5274_v6 }
  0xa4   : > { %4463 = vmatmul.mubr.msk.bf16.gmra.mxu0 %vm446_vm2, %v1859_v29  ;;  %4432 = vmatprep.mubr.msk.bf16.mxu1 %vm446_vm2, %v1364_v15  ;;  %v1918_v29 = vshll.u32 %v5185_v28, 16  ;;  %v1370_v15 = vsel %vm908_vm3, %v1367_v37, %v1369_v9  ;;  %v4712_v28 = vld [vmem:[%s4795_s23 + $0x90] sm:$0xff]   ;;  %v1373_v37 = vrot.slane %v4710_v3, 1  ;;  %v2663_v9 = vrot.slane %v5279_v7, 2 }
  0xa5   : > { %4466 = vmatprep.mubr.msk.bf16.mxu0 %vm446_vm2, %v1868_v4  ;;  %v1895_v4 = vsel %vm1779_vm5, %v1885_v48, %v1894_v63  ;;  %v1927_v48 = vshll.u32 %v5188_v36, 16  ;;  %v1938_v36 = vrot.slane %v1936_v32, 2  ;;  %v5433_v32 = vld [vmem:[%s4795_s23 + $0x50] sm:$0xff]  }
  0xa6   : > { %v1920_v1 = vrot.slane %v1918_v29, 2  ;;  %v2662_v29 = vrot.slane %v5363_v27, 2  ;;  %v2666_v26 = vsel %vm2222_vm4, %v2663_v9, %v2665_v20 }
  0xa8   : > { %v1921_v12 = vor.u32 %v1920_v1, %v1917_v34  ;;  %v2664_v6 = vsel %vm2222_vm4, %v2662_v29, %v2663_v9  ;;  %v5395_v1 = vld [vmem:[%s4795_s23 + $0x38] sm:$0xff]  }
  0xaa   : > { %v1922_v61 = vsel %vm1779_vm5, %v1912_v5, %v1921_v12 }
  0xab   : > { %4433 = vmatmul.mubr.msk.bf16.gmra.mxu1 %vm446_vm2, %v1366_v52  ;;  %v1374_v52 = vsel %vm908_vm3, %v1371_v18, %v1373_v37  ;;  %v5375_v18 = vld [vmem:[%s4795_s23 + $0x28] sm:$0xff]  }
  0xac   : > { %4467 = vmatmul.mubr.msk.bf16.gmra.mxu0 %vm446_vm2, %v1877_v23  ;;  %4436 = vmatprep.mubr.msk.bf16.mxu1 %vm446_vm2, %v1368_v41  ;;  %v1375_v23 = vrot.slane %v4712_v28, 1  ;;  %v1939_v41 = vor.u32 %v1938_v36, %v1935_v39 }
  0xad   : > { %4470 = vmatprep.mubr.msk.bf16.mxu0 %vm446_vm2, %v1886_v10  ;;  %v1929_v10 = vrot.slane %v1927_v48, 2 }
  0xae   : > { %v1376_v54 = vsel %vm908_vm3, %v1373_v37, %v1375_v23  ;;  %v1945_v59 = vsel %vm1779_vm5, %v1939_v41, %v1944_v56 }
  0xaf   : > { %v1930_v43 = vor.u32 %v1929_v10, %v1926_v42  ;;  %v2677_v10 = vrot.slane %v5433_v32, 2 }
  0xb1   : > { %v1931_v63 = vsel %vm1779_vm5, %v1921_v12, %v1930_v43  ;;  %v1940_v62 = vsel %vm1779_vm5, %v1930_v43, %v1939_v41  ;;  %v5465_v41 = vld [vmem:[%s4795_s23 + $0x60] sm:$0xff]  }
  0xb2   : > { %v2681_v56 = vrot.slane %v5465_v41, 2 }
  0xb3   : > { %4437 = vmatmul.mubr.msk.bf16.gmra.mxu1 %vm446_vm2, %v1370_v15  ;;  %v5407_v15 = vld [vmem:[%s4795_s23 + $0x40] sm:$0xff]  }
  0xb4   : > { %4471 = vmatmul.mubr.msk.bf16.gmra.mxu0 %vm446_vm2, %v1895_v4  ;;  %4440 = vmatprep.mubr.msk.bf16.mxu1 %vm446_vm2, %v1372_v33  ;;  %v3201_v4 = vsel %vm501_vm0, %v5211_v38, 0  ;;  %v3515_v38 = vsel %vm501_vm0, %v5238_v14, 0  ;;  %v5411_v33 = vld [vmem:[%s4795_s23 + $0x48] sm:$0xff]  }
  0xb5   : > { %4474 = vmatprep.mubr.msk.bf16.mxu0 %vm446_vm2, %v1904_v30  ;;  %v5389_v30 = vld [vmem:[%s4795_s23 + $0x30] sm:$0xff]   ;;  %v2675_v19 = vrot.slane %v5411_v33, 2 }
  0xb7   : > { %v2678_v43 = vsel %vm2222_vm4, %v2675_v19, %v2677_v10 }
  0xbb   : > { %4441 = vmatmul.mubr.msk.bf16.gmra.mxu1 %vm446_vm2, %v1374_v52 }
  0xbc   : > { %4475 = vmatmul.mubr.msk.bf16.gmra.mxu0 %vm446_vm2, %v1913_v47  ;;  %4444 = vmatprep.mubr.msk.bf16.mxu1 %vm446_vm2, %v1376_v54  ;;  %v5441_v47 = vld [vmem:[%s4795_s23 + $0x58] sm:$0xff]  }
  0xbd   : > { %4478 = vmatprep.mubr.msk.bf16.mxu0 %vm446_vm2, %v1922_v61  ;;  %v2679_v36 = vrot.slane %v5441_v47, 2 }
  0xc3   : > { %4445 = vmatmul.mubr.msk.bf16.gmra.mxu1 %vm446_vm2, %v1375_v23 }
  0xc4   : > { %4479 = vmatmul.mubr.msk.bf16.gmra.mxu0 %vm446_vm2, %v1931_v63  ;;  %4488 = vmatprep.mubr.msk.bf16.mxu1 %vm446_vm2, %v5049_v57  ;;  %v2667_v57 = vrot.slane %v5375_v18, 2 }
  0xc5   : > { %4482 = vmatprep.mubr.msk.bf16.mxu0 %vm446_vm2, %v1940_v62 }
  0xc6   : > { %v2668_v34 = vsel %vm2222_vm4, %v2665_v20, %v2667_v57  ;;  %v2682_v20 = vsel %vm2222_vm4, %v2679_v36, %v2681_v56 }
  0xcb   : > { %4489 = vmatmul.mubr.msk.bf16.vlgmr.msra.gmra.mxu1 %vm446_vm2, %v5052_v58  ;;  %v2669_v58 = vrot.slane %v5389_v30, 2 }
  0xcc   : > { %4483 = vmatmul.mubr.msk.bf16.gmra.mxu0 %vm446_vm2, %v1945_v59  ;;  %4563 = vmatpush3.bf16.msra.mxu1 %v3201_v4  ;;  %v2683_v59 = vrot.slane %v5473_v2, 2 }
  0xcd   : > { %4526 = vmatprep.mubr.msk.bf16.mxu0 %vm446_vm2, %v2664_v6  ;;  %4492 = vmatprep.mubr.msk.bf16.mxu1 %vm446_vm2, %v5060_v60  ;;  %v2671_v60 = vrot.slane %v5395_v1, 2  ;;  %v2670_v14 = vsel %vm2222_vm4, %v2667_v57, %v2669_v58  ;;  %v5497_v57 = vld [vmem:[%s4795_s23 + $0x70] sm:$0xff]  }
  0xcf   : > { %v2672_v3 = vsel %vm2222_vm4, %v2669_v58, %v2671_v60 }
  0xd3   : > { %4493 = vmatmul.mubr.msk.bf16.gmra.mxu1 %vm446_vm2, %v5076_v13  ;;  %v2673_v13 = vrot.slane %v5407_v15, 2 }
  0xd4   : > { %4527 = vmatmul.mubr.msk.bf16.vlgmr.msra.gmra.mxu0 %vm446_vm2, %v2666_v26  ;;  %4496 = vmatprep.mubr.msk.bf16.mxu1 %vm446_vm2, %v5080_v8 }
  0xd5   : > { %4601 = vmatpush3.bf16.msra.mxu0 %v3515_v38  ;;  %4530 = vmatprep.mubr.msk.bf16.mxu0 %vm446_vm2, %v2668_v34  ;;  %v2674_v22 = vsel %vm2222_vm4, %v2671_v60, %v2673_v13  ;;  %v5505_v34 = vld [vmem:[%s4795_s23 + $0x78] sm:$0xff]   ;;  %v2685_v60 = vrot.slane %v5497_v57, 2 }
  0xdb   : > { %v5418_v5 = vpop.f32.mrf.mxu1  ;;  %4497 = vmatmul.mubr.msk.bf16.gmra.mxu1 %vm446_vm2, %v5085_v17  ;;  %v2676_v17 = vsel %vm2222_vm4, %v2673_v13, %v2675_v19  ;;  %v2687_v13 = vrot.slane %v5505_v34, 2 }
  0xdc   : > { %v5413_v28 = vpop.f32.mrf.mxu0  ;;  %4531 = vmatmul.mubr.msk.bf16.gmra.mxu0 %vm446_vm2, %v2670_v14  ;;  %4500 = vmatprep.mubr.msk.bf16.mxu1 %vm446_vm2, %v5092_v21 }
  0xdd   : > { %4534 = vmatprep.mubr.msk.bf16.mxu0 %vm446_vm2, %v2672_v3  ;;  %v5427_v48 = vpop.f32.mrf.mxu1 }
  0xde   : > { %v5422_v8 = vpop.f32.mrf.mxu0 }
  0xdf   : > { %v5435_v37 = vpop.f32.mrf.mxu1 }
  0xe0   : > { %v5429_v12 = vpop.f32.mrf.mxu0 }
  0xe1   : > { %v5443_v42 = vpop.f32.mrf.mxu1 }
  0xe2   : > { %v5437_v23 = vpop.f32.mrf.mxu0 }
  0xe3   : > { %v5450_v61 = vpop.f32.mrf.mxu1  ;;  %4501 = vmatmul.mubr.msk.bf16.gmra.mxu1 %vm446_vm2, %v5100_v25  ;;  %v2680_v25 = vsel %vm2222_vm4, %v2677_v10, %v2679_v36  ;;  %v5529_v10 = vld [vmem:[%s4795_s23 + $0x80] sm:$0xff]  }
  0xe4   : > { %v5445_v21 = vpop.f32.mrf.mxu0  ;;  %4535 = vmatmul.mubr.msk.bf16.gmra.mxu0 %vm446_vm2, %v2674_v22  ;;  %4504 = vmatprep.mubr.msk.bf16.mxu1 %vm446_vm2, %v5114_v31  ;;  %6213 = vst [vmem:[#allocation10_spill] sm:$0xff] %v5529_v10 }
  0xe5   : > { %4538 = vmatprep.mubr.msk.bf16.mxu0 %vm446_vm2, %v2676_v17  ;;  %v5459_v52 = vpop.f32.mrf.mxu1  ;;  %v2686_v17 = vsel %vm2222_vm4, %v2683_v59, %v2685_v60 }
  0xe6   : > { %v5454_v39 = vpop.f32.mrf.mxu0 }
  0xe7   : > { %v5467_v55 = vpop.f32.mrf.mxu1 }
  0xe8   : > { %v5461_v54 = vpop.f32.mrf.mxu0  ;;  %6205 = vst [vmem:[#allocation2_spill] sm:$0xff] %v5467_v55 }
  0xe9   : > { %v5475_v62 = vpop.f32.mrf.mxu1 }
  0xea   : > { %v5469_v63 = vpop.f32.mrf.mxu0  ;;  %6206 = vst [vmem:[#allocation3_spill] sm:$0xff] %v5475_v62 }
  0xeb   : > { %v5482_v29 = vpop.f32.mrf.mxu1  ;;  %4505 = vmatmul.mubr.msk.bf16.gmra.mxu1 %vm446_vm2, %v5118_v24  ;;  %v2684_v24 = vsel %vm2222_vm4, %v2681_v56, %v2683_v59 }
  0xec   : > { %v5477_v31 = vpop.f32.mrf.mxu0  ;;  %4539 = vmatmul.mubr.msk.bf16.gmra.mxu0 %vm446_vm2, %v2678_v43  ;;  %6207 = vst [vmem:[#allocation4_spill] sm:$0xff] %v5482_v29  ;;  %4508 = vmatprep.mubr.msk.bf16.mxu1 %vm446_vm2, %v5141_v46 }
  0xed   : > { %4542 = vmatprep.mubr.msk.bf16.mxu0 %vm446_vm2, %v2680_v25  ;;  %v5491_v6 = vpop.f32.mrf.mxu1  ;;  %v5537_v25 = vld [vmem:[%s4795_s23 + $0x88] sm:$0xff]  }
  0xee   : > { %v5486_v9 = vpop.f32.mrf.mxu0  ;;  %6208 = vst [vmem:[#allocation5_spill] sm:$0xff] %v5491_v6  ;;  %6215 = vst [vmem:[#allocation12_spill] sm:$0xff] %v5537_v25  ;;  %v5569_v6 = vld [vmem:[%s4795_s23 + $0x98] sm:$0xff]  }
  0xef   : > { %v5499_v26 = vpop.f32.mrf.mxu1  ;;  %6217 = vst [vmem:[#allocation14_spill] sm:$0xff] %v5569_v6 }
  0xf0   : > { %v5493_v4 = vpop.f32.mrf.mxu0  ;;  %6209 = vst [vmem:[#allocation6_spill] sm:$0xff] %v5499_v26  ;;  %v5563_v26 = vld [vmem:[%s4795_s23 + $0x90] sm:$0xff]  }
  0xf1   : > { %v5507_v58 = vpop.f32.mrf.mxu1 }
  0xf2   : > { %v5501_v38 = vpop.f32.mrf.mxu0  ;;  %6210 = vst [vmem:[#allocation7_spill] sm:$0xff] %v5507_v58 }
  0xf3   : > { %v5514_v14 = vpop.f32.mrf.mxu1  ;;  %4509 = vmatmul.mubr.msk.bf16.gmra.mxu1 %vm446_vm2, %v5146_v49  ;;  %v2688_v49 = vsel %vm2222_vm4, %v2685_v60, %v2687_v13  ;;  %v2691_v60 = vrot.slane %v5537_v25, 2 }
  0xf4   : > { %v5509_v46 = vpop.f32.mrf.mxu0  ;;  %4543 = vmatmul.mubr.msk.bf16.gmra.mxu0 %vm446_vm2, %v2682_v20  ;;  %6211 = vst [vmem:[#allocation8_spill] sm:$0xff] %v5514_v14  ;;  %4512 = vmatprep.mubr.msk.bf16.mxu1 %vm446_vm2, %v5171_v11  ;;  %v2689_v11 = vrot.slane %v5529_v10, 2 }
  0xf5   : > { %4546 = vmatprep.mubr.msk.bf16.mxu0 %vm446_vm2, %v2684_v24  ;;  %v5523_v19 = vpop.f32.mrf.mxu1 }
  0xf6   : > { %v5518_v3 = vpop.f32.mrf.mxu0  ;;  %6212 = vst [vmem:[#allocation9_spill] sm:$0xff] %v5523_v19  ;;  %v2985_v19 = vshrl.u32 %v5279_v7, 16  ;;  %v2690_v58 = vsel %vm2222_vm4, %v2687_v13, %v2689_v11 }
  0xf7   : > { %v5531_v36 = vpop.f32.mrf.mxu1 }
  0xf8   : > { %v5525_v22 = vpop.f32.mrf.mxu0  ;;  %6214 = vst [vmem:[#allocation11_spill] sm:$0xff] %v5531_v36  ;;  %v2980_v36 = vshll.u32 %v5363_v27, 16 }
  0xf9   : > { %v5539_v56 = vpop.f32.mrf.mxu1 }
  0xfa   : > { %v5533_v43 = vpop.f32.mrf.mxu0  ;;  %6216 = vst [vmem:[#allocation13_spill] sm:$0xff] %v5539_v56  ;;  %v2982_v25 = vrot.slane %v2980_v36, 3 }
  0xfb   : > { %v4338_v59 = vpop.f32.mrf.mxu1  ;;  %4513 = vmatmul.mubr.msk.bf16.gmra.mxu1 %vm446_vm2, %v5178_v45  ;;  %v2988_v45 = vshll.u32 %v5279_v7, 16 }
  0xfc   : > { %v5541_v20 = vpop.f32.mrf.mxu0  ;;  %4547 = vmatmul.mubr.msk.bf16.gmra.mxu0 %vm446_vm2, %v2686_v17  ;;  %v768_v51 = vadd.f32 %v4338_v59, %v5413_v28  ;;  %4516 = vmatprep.mubr.msk.bf16.mxu1 %vm446_vm2, %v5203_v53  ;;  %v2692_v53 = vsel %vm2222_vm4, %v2689_v11, %v2691_v60  ;;  %v2693_v11 = vrot.slane %v5563_v26, 2 }
  0xfd   : > { %4550 = vmatprep.mubr.msk.bf16.mxu0 %vm446_vm2, %v2688_v49  ;;  %v759_v17 = vpop.f32.mrf.mxu1  ;;  %v2977_v49 = vshrl.u32 %v5363_v27, 16 }
  0xfe   : > { %v5548_v24 = vpop.f32.mrf.mxu0  ;;  %v760_v14 = vadd.f32 %v759_v17, %v5422_v8  ;;  %v2987_v8 = vrot.slane %v2985_v19, 2  ;;  %v2990_v17 = vrot.slane %v2988_v45, 3 }
  0xff   : > { %v4339_v28 = vpop.f32.mrf.mxu1  ;;  %v2979_v7 = vrot.slane %v2977_v49, 2 }
 0x100   : > { %v5554_v56 = vpop.f32.mrf.mxu0  ;;  %v771_v29 = vadd.f32 %v4339_v28, %v5429_v12  ;;  %v2695_v28 = vrot.slane %v5569_v6, 2  ;;  %v2991_v45 = vor.u32 %v2990_v17, %v2987_v8 }
 0x101   : > { %v762_v27 = vpop.f32.mrf.mxu1  ;;  %v2983_v49 = vor.u32 %v2982_v25, %v2979_v7 }
 0x102   : > { %v5565_v59 = vpop.f32.mrf.mxu0  ;;  %v763_v13 = vadd.f32 %v762_v27, %v5437_v23  ;;  %v2997_v23 = vshll.u32 %v5284_v50, 16 }
 0x103   : > { %v4342_v55 = vpop.f32.mrf.mxu1  ;;  %4517 = vmatmul.mubr.msk.bf16.gmra.mxu1 %vm446_vm2, %v5214_v16  ;;  %v3003_v16 = vshrl.u32 %v5375_v18, 16 }
 0x104   : > { %v4376_v62 = vpop.f32.mrf.mxu0  ;;  %4551 = vmatmul.mubr.msk.bf16.gmra.mxu0 %vm446_vm2, %v2690_v58  ;;  %v784_v58 = vadd.f32 %v4342_v55, %v5445_v21  ;;  %4520 = vmatprep.mubr.msk.bf16.mxu1 %vm446_vm2, %v5245_v35  ;;  %v2694_v55 = vsel %vm2222_vm4, %v2691_v60, %v2693_v11  ;;  %v4736_v35 = vld [vmem:[%s4795_s23 + $0xa0] ss:$0 sps:$4 sm:$0x11]   ;;  %v2999_v8 = vrot.slane %v2997_v23, 3  ;;  %v3015_v23 = vshll.u32 %v5389_v30, 16 }
 0x105   : > { %v5574_v10 = vadd.f32 %v4376_v62, %v768_v51  ;;  %4554 = vmatprep.mubr.msk.bf16.mxu0 %vm446_vm2, %v2692_v53  ;;  %v2994_v51 = vshrl.u32 %v5284_v50, 16  ;;  %v775_v62 = vpop.f32.mrf.mxu1  ;;  %v3006_v53 = vshll.u32 %v5375_v18, 16 }
 0x106   : > { %v1035_v12 = vpop.f32.mrf.mxu0  ;;  %v776_v27 = vadd.f32 %v775_v62, %v5454_v39  ;;  %v2992_v39 = vsel %vm2975_vm7, %v2983_v49, %v2991_v45 }
 0x107   : > { %6218 = vst [vmem:[#allocation15_spill] sm:$0xff] %v5574_v10  ;;  %v5582_v19 = vadd.f32 %v1035_v12, %v760_v14  ;;  %v4343_v14 = vpop.f32.mrf.mxu1  ;;  %v2996_v7 = vrot.slane %v2994_v51, 2  ;;  %v3008_v60 = vrot.slane %v3006_v53, 3  ;;  %v3012_v51 = vshrl.u32 %v5389_v30, 16 }
 0x108   : > { %v4377_v36 = vpop.f32.mrf.mxu0  ;;  %v787_v10 = vadd.f32 %v4343_v14, %v5461_v54  ;;  %v3021_v53 = vshrl.u32 %v5395_v1, 16 }
 0x109   : > { %6219 = vst [vmem:[#allocation16_spill] sm:$0xff] %v5582_v19  ;;  %v5591_v21 = vadd.f32 %v4377_v36, %v771_v29  ;;  %v2696_v19 = vsel %vm2222_vm4, %v2693_v11, %v2695_v28  ;;  %v778_v17 = vpop.f32.mrf.mxu1  ;;  %v3005_v29 = vrot.slane %v3003_v16, 2  ;;  %v2697_v11 = vrot.slane %v4736_v35, 2 }
 0x10a   : > { %v1038_v12 = vpop.f32.mrf.mxu0  ;;  %v779_v62 = vadd.f32 %v778_v17, %v5469_v63  ;;  %v3000_v63 = vor.u32 %v2999_v8, %v2996_v7  ;;  %v3017_v17 = vrot.slane %v3015_v23, 3 }
 0x10b   : > { %v5597_v25 = vadd.f32 %v1038_v12, %v763_v13  ;;  %v4346_v54 = vpop.f32.mrf.mxu1  ;;  %4521 = vmatmul.mubr.msk.bf16.gmra.mxu1 %vm446_vm2, %v5251_v44  ;;  %v2698_v14 = vsel %vm2222_vm4, %v2695_v28, %v2697_v11 }
 0x10c   : > { %v4380_v6 = vpop.f32.mrf.mxu0  ;;  %4555 = vmatmul.mubr.msk.bf16.gmra.mxu0 %vm446_vm2, %v2694_v55  ;;  %v800_v49 = vadd.f32 %v4346_v54, %v5477_v31  ;;  %4564 = vmatprep.mubr.msk.bf16.mxu1 %vm446_vm2, %v2992_v39  ;;  %v3024_v55 = vshll.u32 %v5395_v1, 16  ;;  %v3001_v8 = vsel %vm2975_vm7, %v2991_v45, %v3000_v63 }
 0x10d   : > { %v5602_v36 = vadd.f32 %v4380_v6, %v784_v58  ;;  %4558 = vmatprep.mubr.msk.bf16.mxu0 %vm446_vm2, %v2696_v19  ;;  %v791_v6 = vpop.f32.mrf.mxu1  ;;  %v3009_v19 = vor.u32 %v3008_v60, %v3005_v29 }
 0x10e   : > { %v1051_v13 = vpop.f32.mrf.mxu0  ;;  %v792_v44 = vadd.f32 %v791_v6, %v5486_v9  ;;  %v3026_v54 = vrot.slane %v3024_v55, 3 }
 0x10f   : > { %v5610_v16 = vadd.f32 %v1051_v13, %v776_v27  ;;  %v4347_v12 = vpop.f32.mrf.mxu1  ;;  %v3014_v27 = vrot.slane %v3012_v51, 2  ;;  %v3010_v9 = vsel %vm2975_vm7, %v3000_v63, %v3009_v19  ;;  %v3428_v13 = vrot.slane %v5375_v18, 3 }
 0x110   : > { %v4381_v58 = vpop.f32.mrf.mxu0  ;;  %v803_v39 = vadd.f32 %v4347_v12, %v5493_v4  ;;  %v6220_v12 = vrot.slane %v5284_v50, 3 }
 0x111   : > { %v5616_v35 = vadd.f32 %v4381_v58, %v787_v10  ;;  %v794_v29 = vpop.f32.mrf.mxu1  ;;  %v3023_v10 = vrot.slane %v3021_v53, 2  ;;  %v3018_v45 = vor.u32 %v3017_v17, %v3014_v27  ;;  %v3039_v58 = vshrl.u32 %v5411_v33, 16 }
 0x112   : > { %v1054_v31 = vpop.f32.mrf.mxu0  ;;  %v795_v28 = vadd.f32 %v794_v29, %v5501_v38  ;;  %v3030_v38 = vshrl.u32 %v5407_v15, 16  ;;  %v3042_v53 = vshll.u32 %v5411_v33, 16 }
 0x113   : > { %v5620_v7 = vadd.f32 %v1054_v31, %v779_v62  ;;  %v4350_v4 = vpop.f32.mrf.mxu1  ;;  %4565 = vmatmul.mubr.msk.bf16.vlgmr.msra.gmra.mxu1 %vm446_vm2, %v3001_v8  ;;  %v3429_v31 = vsel %vm3422_vm6, %v6220_v12, %v3428_v13 }
 0x114   : > { %v4384_v60 = vpop.f32.mrf.mxu0  ;;  %4559 = vmatmul.mubr.msk.bf16.gmra.mxu0 %vm446_vm2, %v2698_v14  ;;  %v816_v51 = vadd.f32 %v4350_v4, %v5509_v46  ;;  %4568 = vmatprep.mubr.msk.bf16.mxu1 %vm446_vm2, %v3010_v9  ;;  %v3019_v14 = vsel %vm2975_vm7, %v3009_v19, %v3018_v45  ;;  %v3032_v8 = vrot.slane %v3030_v38, 2  ;;  %v3432_v4 = vrot.slane %v5395_v1, 3 }
 0x115   : > { %v5626_v11 = vadd.f32 %v4384_v60, %v800_v49  ;;  %4602 = vmatprep.mubr.msk.bf16.mxu0 %vm446_vm2, %v5297_v40  ;;  %v3033_v49 = vshll.u32 %v5407_v15, 16  ;;  %v807_v63 = vpop.f32.mrf.mxu1  ;;  %v3027_v40 = vor.u32 %v3026_v54, %v3023_v10  ;;  %v3044_v10 = vrot.slane %v3042_v53, 3 }
 0x116   : > { %v1067_v62 = vpop.f32.mrf.mxu0  ;;  %v808_v55 = vadd.f32 %v807_v63, %v5518_v3  ;;  %v3057_v63 = vshrl.u32 %v5441_v47, 16 }
 0x117   : > { %v5633_v23 = vadd.f32 %v1067_v62, %v792_v44  ;;  %v4351_v46 = vpop.f32.mrf.mxu1  ;;  %v3035_v29 = vrot.slane %v3033_v49, 3  ;;  %v3028_v3 = vsel %vm2975_vm7, %v3018_v45, %v3027_v40  ;;  %v3051_v62 = vshll.u32 %v5433_v32, 16 }
 0x118   : > { %v4385_v6 = vpop.f32.mrf.mxu0  ;;  %v819_v27 = vadd.f32 %v4351_v46, %v5525_v22  ;;  %v3430_v22 = vrot.slane %v5389_v30, 3 }
 0x119   : > { %v5641_v18 = vadd.f32 %v4385_v6, %v803_v39  ;;  %v810_v60 = vpop.f32.mrf.mxu1  ;;  %v3041_v39 = vrot.slane %v3039_v58, 2  ;;  %v3060_v6 = vshll.u32 %v5441_v47, 16 }
 0x11a   : > { %v1070_v44 = vpop.f32.mrf.mxu0  ;;  %v811_v19 = vadd.f32 %v810_v60, %v5533_v43  ;;  %v3036_v43 = vor.u32 %v3035_v29, %v3032_v8  ;;  %v3431_v53 = vsel %vm3422_vm6, %v3428_v13, %v3430_v22 }
 0x11b   : > { %v5648_v17 = vadd.f32 %v1070_v44, %v795_v28  ;;  %v4354_v54 = vpop.f32.mrf.mxu1  ;;  %4569 = vmatmul.mubr.msk.bf16.gmra.mxu1 %vm446_vm2, %v3019_v14  ;;  %v3045_v30 = vor.u32 %v3044_v10, %v3041_v39  ;;  %v3053_v14 = vrot.slane %v3051_v62, 3  ;;  %v3062_v13 = vrot.slane %v3060_v6, 3 }
 0x11c   : > { %v4388_v9 = vpop.f32.mrf.mxu0  ;;  %4603 = vmatmul.mubr.msk.bf16.vlgmr.msra.gmra.mxu0 %vm446_vm2, %v5305_v0  ;;  %v3048_v0 = vshrl.u32 %v5433_v32, 16  ;;  %v832_v45 = vadd.f32 %v4354_v54, %v5541_v20  ;;  %4572 = vmatprep.mubr.msk.bf16.mxu1 %vm446_vm2, %v3028_v3  ;;  %v3037_v8 = vsel %vm2975_vm7, %v3027_v40, %v3036_v43  ;;  %v3066_v54 = vshrl.u32 %v5465_v41, 16 }
 0x11d   : > { %v5654_v50 = vadd.f32 %v4388_v9, %v816_v51  ;;  %4606 = vmatprep.mubr.msk.bf16.mxu0 %vm446_vm2, %v3429_v31  ;;  %v823_v51 = vpop.f32.mrf.mxu1 }
 0x11e   : > { %v1083_v28 = vpop.f32.mrf.mxu0  ;;  %v824_v1 = vadd.f32 %v823_v51, %v5548_v24  ;;  %v3050_v44 = vrot.slane %v3048_v0, 2  ;;  %v3046_v24 = vsel %vm2975_vm7, %v3036_v43, %v3045_v30 }
 0x11f   : > { %v5663_v38 = vadd.f32 %v1083_v28, %v808_v55  ;;  %v4355_v46 = vpop.f32.mrf.mxu1  ;;  %v3433_v55 = vsel %vm3422_vm6, %v3430_v22, %v3432_v4 }
 0x120   : > { %v4389_v49 = vpop.f32.mrf.mxu0  ;;  %v835_v12 = vadd.f32 %v4355_v46, %v5554_v56  ;;  %v3434_v56 = vrot.slane %v5407_v15, 3  ;;  %v3054_v10 = vor.u32 %v3053_v14, %v3050_v44  ;;  %v3075_v15 = vshrl.u32 %v5473_v2, 16 }
 0x121   : > { %v5669_v58 = vadd.f32 %v4389_v49, %v819_v27  ;;  %v826_v29 = vpop.f32.mrf.mxu1  ;;  %v3059_v27 = vrot.slane %v3057_v63, 2  ;;  %v3068_v46 = vrot.slane %v3066_v54, 2  ;;  %v3096_v54 = vshll.u32 %v5505_v34, 16 }
 0x122   : > { %v1086_v20 = vpop.f32.mrf.mxu0  ;;  %v827_v9 = vadd.f32 %v826_v29, %v5565_v59  ;;  %v3069_v59 = vshll.u32 %v5465_v41, 16  ;;  %v3435_v51 = vsel %vm3422_vm6, %v3432_v4, %v3434_v56  ;;  %v3055_v63 = vsel %vm2975_vm7, %v3045_v30, %v3054_v10 }
 0x123   : > { %v5674_v31 = vadd.f32 %v1086_v20, %v811_v19  ;;  %v4358_v39 = vpop.f32.mrf.mxu1  ;;  %4573 = vmatmul.mubr.msk.bf16.gmra.mxu1 %vm446_vm2, %v3037_v8  ;;  %v3436_v19 = vrot.slane %v5411_v33, 3  ;;  %v3063_v62 = vor.u32 %v3062_v13, %v3059_v27  ;;  %v3084_v27 = vshrl.u32 %v5497_v57, 16 }
 0x124   : > { %v4392_v60 = vpop.f32.mrf.mxu0  ;;  %4607 = vmatmul.mubr.msk.bf16.gmra.mxu0 %vm446_vm2, %v3431_v53  ;;  %4576 = vmatprep.mubr.msk.bf16.mxu1 %vm446_vm2, %v3046_v24  ;;  %v3071_v20 = vrot.slane %v3069_v59, 3  ;;  %v3440_v24 = vrot.slane %v5441_v47, 3  ;;  %v3087_v13 = vshll.u32 %v5497_v57, 16 }
 0x125   : > { %v5680_v3 = vadd.f32 %v4392_v60, %v832_v45  ;;  %4610 = vmatprep.mubr.msk.bf16.mxu0 %vm446_vm2, %v3433_v55  ;;  %v839_v28 = vpop.f32.mrf.mxu1  ;;  %v3078_v45 = vshll.u32 %v5473_v2, 16  ;;  %v3437_v6 = vsel %vm3422_vm6, %v3434_v56, %v3436_v19  ;;  %v3064_v14 = vsel %vm2975_vm7, %v3054_v10, %v3063_v62 }
 0x126   : > { %v1099_v40 = vpop.f32.mrf.mxu0  ;;  %v840_v8 = vadd.f32 %v839_v28, %v5427_v48  ;;  %v3072_v48 = vor.u32 %v3071_v20, %v3068_v46  ;;  %v3093_v10 = vshrl.u32 %v5505_v34, 16 }
 0x127   : > { %v5686_v22 = vadd.f32 %v1099_v40, %v824_v1  ;;  %v4359_v33 = vpop.f32.mrf.mxu1  ;;  %v848_v1 = vadd.f32 %v4358_v39, %v5418_v5  ;;  %v3080_v4 = vrot.slane %v3078_v45, 3  ;;  %v3438_v5 = vrot.slane %v5433_v32, 3 }
 0x128   : > { %v4393_v0 = vpop.f32.mrf.mxu0  ;;  %v3086_v45 = vrot.slane %v3084_v27, 2  ;;  %v3095_v46 = vrot.slane %v3093_v10, 2 }
 0x129   : > { %v5693_v43 = vadd.f32 %v4393_v0, %v835_v12  ;;  %v842_v55 = vpop.f32.mrf.mxu1  ;;  %v3077_v12 = vrot.slane %v3075_v15, 2  ;;  %v3439_v28 = vsel %vm3422_vm6, %v3436_v19, %v3438_v5  ;;  %v3441_v15 = vsel %vm3422_vm6, %v3438_v5, %v3440_v24 }
 0x12a   : > { %v1102_v49 = vpop.f32.mrf.mxu0  ;;  %v843_v47 = vadd.f32 %v842_v55, %v5443_v42  ;;  %v3098_v19 = vrot.slane %v3096_v54, 3 }
 0x12b   : > { %v5699_v53 = vadd.f32 %v1102_v49, %v827_v9  ;;  %v4362_v30 = vpop.f32.mrf.mxu1  ;;  %4577 = vmatmul.mubr.msk.bf16.gmra.mxu1 %vm446_vm2, %v3055_v63  ;;  %v851_v9 = vadd.f32 %v4359_v33, %v5435_v37  ;;  %v3081_v32 = vor.u32 %v3080_v4, %v3077_v12  ;;  %v3073_v63 = vsel %vm2975_vm7, %v3063_v62, %v3072_v48  ;;  %v6221_v4 = vld [vmem:[#allocation2_spill] sm:$0xff] }
 0x12c   : > { %v4396_v44 = vpop.f32.mrf.mxu0  ;;  %4611 = vmatmul.mubr.msk.bf16.gmra.mxu0 %vm446_vm2, %v3435_v51  ;;  %4580 = vmatprep.mubr.msk.bf16.mxu1 %vm446_vm2, %v3064_v14  ;;  %v3089_v51 = vrot.slane %v3087_v13, 3  ;;  %v864_v33 = vadd.f32 %v4362_v30, %v5450_v61  ;;  %v3442_v61 = vrot.slane %v5465_v41, 3  ;;  %v3444_v12 = vrot.slane %v5473_v2, 3 }
 0x12d   : > { %v5704_v29 = vadd.f32 %v4396_v44, %v848_v1  ;;  %4614 = vmatprep.mubr.msk.bf16.mxu0 %vm446_vm2, %v3437_v6  ;;  %v855_v39 = vpop.f32.mrf.mxu1  ;;  %v3082_v42 = vsel %vm2975_vm7, %v3072_v48, %v3081_v32  ;;  %v3099_v41 = vor.u32 %v3098_v19, %v3095_v46  ;;  %v6226_v19 = vld [vmem:[#allocation5_spill] sm:$0xff] }
 0x12e   : > { %v1115_v60 = vpop.f32.mrf.mxu0  ;;  %v856_v20 = vadd.f32 %v855_v39, %v5459_v52  ;;  %v3090_v14 = vor.u32 %v3089_v51, %v3086_v45  ;;  %v6222_v52 = vld [vmem:[#allocation10_spill] sm:$0xff]  ;;  %v3443_v54 = vsel %vm3422_vm6, %v3440_v24, %v3442_v61 }
 0x12f   : > { %v5713_v56 = vadd.f32 %v1115_v60, %v840_v8  ;;  %v4363_v0 = vpop.f32.mrf.mxu1  ;;  %v3102_v30 = vshrl.u32 %v6222_v52, 16  ;;  %v3105_v60 = vshll.u32 %v6222_v52, 16 }
 0x130   : > { %v4397_v40 = vpop.f32.mrf.mxu0  ;;  %v867_v8 = vadd.f32 %v4363_v0, %v6221_v4  ;;  %v3091_v0 = vsel %vm2975_vm7, %v3081_v32, %v3090_v14  ;;  %v3446_v32 = vrot.slane %v5497_v57, 3  ;;  %v3448_v4 = vrot.slane %v5505_v34, 3  ;;  %v6229_v34 = vld [vmem:[#allocation7_spill] sm:$0xff] }
 0x131   : > { %v5719_v59 = vadd.f32 %v4397_v40, %v851_v9  ;;  %v858_v6 = vpop.f32.mrf.mxu1  ;;  %v6223_v9 = vld [vmem:[#allocation12_spill] sm:$0xff]  ;;  %v6224_v40 = vld [vmem:[#allocation3_spill] sm:$0xff] }
 0x132   : > { %v1118_v37 = vpop.f32.mrf.mxu0  ;;  %v3111_v48 = vshrl.u32 %v6223_v9, 16  ;;  %v3114_v39 = vshll.u32 %v6223_v9, 16  ;;  %v859_v10 = vadd.f32 %v858_v6, %v6224_v40  ;;  %v3100_v6 = vsel %vm2975_vm7, %v3090_v14, %v3099_v41  ;;  %v6228_v40 = vld [vmem:[#allocation14_spill] sm:$0xff] }
 0x133   : > { %v5724_v49 = vadd.f32 %v1118_v37, %v843_v47  ;;  %v4366_v44 = vpop.f32.mrf.mxu1  ;;  %4581 = vmatmul.mubr.msk.bf16.gmra.mxu1 %vm446_vm2, %v3073_v63  ;;  %v3445_v37 = vsel %vm3422_vm6, %v3442_v61, %v3444_v12  ;;  %v3107_v63 = vrot.slane %v3105_v60, 3  ;;  %v3123_v14 = vshll.u32 %v5563_v26, 16 }
 0x134   : > { %v4400_v1 = vpop.f32.mrf.mxu0  ;;  %4615 = vmatmul.mubr.msk.bf16.gmra.mxu0 %vm446_vm2, %v3439_v28  ;;  %4584 = vmatprep.mubr.msk.bf16.mxu1 %vm446_vm2, %v3082_v42  ;;  %v3113_v46 = vrot.slane %v3111_v48, 2  ;;  %v3116_v24 = vrot.slane %v3114_v39, 3 }
 0x135   : > { %v5730_v55 = vadd.f32 %v4400_v1, %v864_v33  ;;  %4618 = vmatprep.mubr.msk.bf16.mxu0 %vm446_vm2, %v3441_v15  ;;  %v871_v27 = vpop.f32.mrf.mxu1  ;;  %v6225_v15 = vld [vmem:[#allocation4_spill] sm:$0xff]  ;;  %v3104_v33 = vrot.slane %v3102_v30, 2  ;;  %v6227_v30 = vld [vmem:[#allocation6_spill] sm:$0xff] }
 0x136   : > { %v1131_v62 = vpop.f32.mrf.mxu0  ;;  %v880_v45 = vadd.f32 %v4366_v44, %v6225_v15  ;;  %v3117_v39 = vor.u32 %v3116_v24, %v3113_v46 }
 0x137   : > { %v5737_v5 = vadd.f32 %v1131_v62, %v856_v20  ;;  %v4367_v47 = vpop.f32.mrf.mxu1  ;;  %v872_v20 = vadd.f32 %v871_v27, %v6226_v19  ;;  %v3108_v27 = vor.u32 %v3107_v63, %v3104_v33  ;;  %v5776_v33 = vld [vmem:[%s4795_s23 + $0xa0] ss:$0 sps:$4 sm:$0x33]   ;;  %v6230_v63 = vld [vmem:[#allocation8_spill] sm:$0xff] }
 0x138   : > { %v4401_v13 = vpop.f32.mrf.mxu0  ;;  %v883_v60 = vadd.f32 %v4367_v47, %v6227_v30 }
 0x139   : > { %v5745_v2 = vadd.f32 %v4401_v13, %v867_v8  ;;  %v874_v1 = vpop.f32.mrf.mxu1  ;;  %v3120_v8 = vshrl.u32 %v5563_v26, 16  ;;  %v3109_v19 = vsel %vm2975_vm7, %v3099_v41, %v3108_v27 }
 0x13a   : > { %v1134_v28 = vpop.f32.mrf.mxu0 }
 0x13b   : > { %v5751_v51 = vadd.f32 %v1134_v28, %v859_v10  ;;  %v4370_v61 = vpop.f32.mrf.mxu1  ;;  %4585 = vmatmul.mubr.msk.bf16.gmra.mxu1 %vm446_vm2, %v3091_v0  ;;  %v3129_v10 = vshrl.u32 %v6228_v40, 16  ;;  %v875_v28 = vadd.f32 %v874_v1, %v6229_v34  ;;  %v3452_v34 = vrot.slane %v6223_v9, 3 }
 0x13c   : > { %v4404_v42 = vpop.f32.mrf.mxu0  ;;  %4619 = vmatmul.mubr.msk.bf16.gmra.mxu0 %vm446_vm2, %v3443_v54  ;;  %4588 = vmatprep.mubr.msk.bf16.mxu1 %vm446_vm2, %v3100_v6  ;;  %v3132_v54 = vshll.u32 %v6228_v40, 16  ;;  %v3125_v6 = vrot.slane %v3123_v14, 3  ;;  %v896_v46 = vadd.f32 %v4370_v61, %v6230_v63  ;;  %v3450_v61 = vrot.slane %v6222_v52, 3 }
 0x13d   : > { %v5756_v62 = vadd.f32 %v4404_v42, %v880_v45  ;;  %4622 = vmatprep.mubr.msk.bf16.mxu0 %vm446_vm2, %v3445_v37  ;;  %v887_v48 = vpop.f32.mrf.mxu1  ;;  %v3447_v37 = vsel %vm3422_vm6, %v3444_v12, %v3446_v32  ;;  %v3449_v45 = vsel %vm3422_vm6, %v3446_v32, %v3448_v4  ;;  %v3122_v42 = vrot.slane %v3120_v8, 2 }
 0x13e   : > { %v1147_v44 = vpop.f32.mrf.mxu0  ;;  %v3118_v12 = vsel %vm2975_vm7, %v3108_v27, %v3117_v39  ;;  %v3134_v30 = vrot.slane %v3132_v54, 3  ;;  %v6232_v27 = vld [vmem:[#allocation11_spill] sm:$0xff] }
 0x13f   : > { %v5765_v13 = vadd.f32 %v1147_v44, %v872_v20  ;;  %v4371_v47 = vpop.f32.mrf.mxu1  ;;  %v3131_v44 = vrot.slane %v3129_v10, 2  ;;  %v6233_v54 = vld [vmem:[#allocation15_spill] sm:$0xff] }
 0x140   : > { %v4405_v57 = vpop.f32.mrf.mxu0  ;;  %v899_v10 = vadd.f32 %v4371_v47, %v6232_v27 }
 0x141   : > { %v5771_v0 = vadd.f32 %v4405_v57, %v883_v60  ;;  %v890_v20 = vpop.f32.mrf.mxu1  ;;  %v6231_v60 = vld [vmem:[#allocation9_spill] sm:$0xff]  ;;  %v3126_v57 = vor.u32 %v3125_v6, %v3122_v42  ;;  %v3135_v63 = vor.u32 %v3134_v30, %v3131_v44  ;;  %v6235_v42 = vld [vmem:[#allocation16_spill] sm:$0xff] }
 0x142   : > { %v1150_v15 = vpop.f32.mrf.mxu0  ;;  %v888_v32 = vadd.f32 %v887_v48, %v6231_v60 }
 0x143   : > { %v5779_v24 = vadd.f32 %v1150_v15, %v875_v28  ;;  %v4414_v14 = vpop.f32.mrf.mxu1  ;;  %4589 = vmatmul.mubr.msk.bf16.gmra.mxu1 %vm446_vm2, %v3109_v19  ;;  %v3138_v28 = vshrl.u32 %v5776_v33, 16  ;;  %v3141_v15 = vshll.u32 %v5776_v33, 16 }
 0x144   : > { %v4408_v1 = vpop.f32.mrf.mxu0  ;;  %4623 = vmatmul.mubr.msk.bf16.gmra.mxu0 %vm446_vm2, %v3447_v37  ;;  %v1613_v37 = vadd.f32 %v4414_v14, %v6233_v54  ;;  %4592 = vmatprep.mubr.msk.bf16.mxu1 %vm446_vm2, %v3118_v12  ;;  %v3453_v14 = vsel %vm3422_vm6, %v3450_v61, %v3452_v34 }
 0x145   : > { %v5785_v8 = vadd.f32 %v4408_v1, %v896_v46  ;;  %4626 = vmatprep.mubr.msk.bf16.mxu0 %vm446_vm2, %v3449_v45  ;;  %v1468_v52 = vpop.f32.mrf.mxu1  ;;  %v6234_v46 = vld [vmem:[#allocation13_spill] sm:$0xff]  ;;  %v3451_v1 = vsel %vm3422_vm6, %v3448_v4, %v3450_v61  ;;  %v3140_v27 = vrot.slane %v3138_v28, 2  ;;  %v3143_v44 = vrot.slane %v3141_v15, 3 }
 0x146   : > { %v1163_v41 = vpop.f32.mrf.mxu0  ;;  %v891_v19 = vadd.f32 %v890_v20, %v6234_v46  ;;  %v1611_v6 = vadd.f32 %v1468_v52, %v6235_v42  ;;  %v3456_v28 = vrot.slane %v6228_v40, 3 }
 0x147   : > { %v5794_v48 = vadd.f32 %v1163_v41, %v888_v32  ;;  %v4415_v47 = vpop.f32.mrf.mxu1  ;;  %v3127_v32 = vsel %vm2975_vm7, %v3117_v39, %v3126_v57  ;;  %v3454_v39 = vrot.slane %v5563_v26, 3 }
 0x148   : > { %v4409_v45 = vpop.f32.mrf.mxu0  ;;  %v1614_v12 = vadd.f32 %v4415_v47, %v5591_v21 }
 0x149   : > { %v5800_v9 = vadd.f32 %v4409_v45, %v899_v10  ;;  %v1471_v30 = vpop.f32.mrf.mxu1  ;;  %v3136_v10 = vsel %vm2975_vm7, %v3126_v57, %v3135_v63  ;;  %v3144_v57 = vor.u32 %v3143_v44, %v3140_v27  ;;  %v3455_v26 = vsel %vm3422_vm6, %v3452_v34, %v3454_v39 }
 0x14a   : > { %v1166_v60 = vpop.f32.mrf.mxu0  ;;  %v1612_v4 = vadd.f32 %v1471_v30, %v5597_v25  ;;  %v3458_v34 = vrot.slane %v5776_v33, 3 }
 0x14b   : > { %v5806_v41 = vadd.f32 %v1166_v60, %v891_v19  ;;  %v4418_v61 = vpop.f32.mrf.mxu1  ;;  %4593 = vmatmul.mubr.msk.bf16.gmra.mxu1 %vm446_vm2, %v3127_v32 }
 0x14c   : > { %v4452_v20 = vpop.f32.mrf.mxu0  ;;  %4627 = vmatmul.mubr.msk.bf16.gmra.mxu0 %vm446_vm2, %v3451_v1  ;;  %v1617_v15 = vadd.f32 %v4418_v61, %v5602_v36  ;;  %4596 = vmatprep.mubr.msk.bf16.mxu1 %vm446_vm2, %v3136_v10  ;;  %v3457_v1 = vsel %vm3422_vm6, %v3454_v39, %v3456_v28 }
 0x14d   : > { %v5811_v54 = vadd.f32 %v4452_v20, %v1613_v37  ;;  %4630 = vmatprep.mubr.msk.bf16.mxu0 %vm446_vm2, %v3453_v14  ;;  %v1484_v25 = vpop.f32.mrf.mxu1 }
 0x14e   : > { %v2037_v21 = vpop.f32.mrf.mxu0  ;;  %v1615_v45 = vadd.f32 %v1484_v25, %v5610_v16 }
 0x14f   : > { %v5818_v52 = vadd.f32 %v2037_v21, %v1611_v6  ;;  %v4419_v19 = vpop.f32.mrf.mxu1  ;;  %v3145_v6 = vsel %vm2975_vm7, %v3135_v63, %v3144_v57 }
 0x150   : > { %v4453_v37 = vpop.f32.mrf.mxu0  ;;  %v1618_v40 = vadd.f32 %v4419_v19, %v5616_v35 }
 0x151   : > { %v5822_v46 = vadd.f32 %v4453_v37, %v1614_v12  ;;  %v1487_v47 = vpop.f32.mrf.mxu1 }
 0x152   : > { %v2040_v42 = vpop.f32.mrf.mxu0  ;;  %v1616_v16 = vadd.f32 %v1487_v47, %v5620_v7  ;;  %v3459_v7 = vsel %vm3422_vm6, %v3456_v28, %v3458_v34 }
 0x153   : > { %v5827_v36 = vadd.f32 %v2040_v42, %v1612_v4  ;;  %v4422_v14 = vpop.f32.mrf.mxu1  ;;  %4597 = vmatmul.mubr.msk.bf16.gmra.mxu1 %vm446_vm2, %v3145_v6 }
 0x154   : > { %v4456_v60 = vpop.f32.mrf.mxu0  ;;  %4631 = vmatmul.mubr.msk.bf16.gmra.mxu0 %vm446_vm2, %v3455_v26  ;;  %v1621_v12 = vadd.f32 %v4422_v14, %v5626_v11 }
 0x155   : > { %v5832_v32 = vadd.f32 %v4456_v60, %v1617_v15  ;;  %4634 = vmatprep.mubr.msk.bf16.mxu0 %vm446_vm2, %v3457_v1  ;;  %v1500_v63 = vpop.f32.mrf.mxu1 }
 0x156   : > { %v2053_v35 = vpop.f32.mrf.mxu0  ;;  %v1619_v30 = vadd.f32 %v1500_v63, %v5633_v23 }
 0x157   : > { %v5838_v27 = vadd.f32 %v2053_v35, %v1615_v45  ;;  %v4423_v10 = vpop.f32.mrf.mxu1 }
 0x158   : > { %v4457_v44 = vpop.f32.mrf.mxu0  ;;  %v1622_v33 = vadd.f32 %v4423_v10, %v5641_v18 }
 0x159   : > { %v5841_v20 = vadd.f32 %v4457_v44, %v1618_v40  ;;  %v1503_v61 = vpop.f32.mrf.mxu1 }
 0x15a   : > { %v2056_v4 = vpop.f32.mrf.mxu0  ;;  %v1620_v11 = vadd.f32 %v1503_v61, %v5648_v17 }
 0x15b   : > { %v5845_v39 = vadd.f32 %v2056_v4, %v1616_v16  ;;  %v4426_v57 = vpop.f32.mrf.mxu1 }
 0x15c   : > { %v4460_v21 = vpop.f32.mrf.mxu0  ;;  %4635 = vmatmul.mubr.msk.bf16.gmra.mxu0 %vm446_vm2, %v3459_v7  ;;  %v1625_v25 = vadd.f32 %v4426_v57, %v5654_v50 }
 0x15d   : > { %v5849_v15 = vadd.f32 %v4460_v21, %v1621_v12  ;;  %v1516_v28 = vpop.f32.mrf.mxu1 }
 0x15e   : > { %v2069_v23 = vpop.f32.mrf.mxu0  ;;  %v1623_v18 = vadd.f32 %v1516_v28, %v5663_v38 }
 0x15f   : > { %v5852_v37 = vadd.f32 %v2069_v23, %v1619_v30  ;;  %v4427_v19 = vpop.f32.mrf.mxu1 }
 0x160   : > { %v4461_v45 = vpop.f32.mrf.mxu0  ;;  %v1626_v1 = vadd.f32 %v4427_v19, %v5669_v58 }
 0x161   : > { %v5855_v26 = vadd.f32 %v4461_v45, %v1622_v33  ;;  %v1519_v17 = vpop.f32.mrf.mxu1 }
 0x162   : > { %v2072_v42 = vpop.f32.mrf.mxu0  ;;  %v1624_v47 = vadd.f32 %v1519_v17, %v5674_v31 }
 0x163   : > { %v5858_v40 = vadd.f32 %v2072_v42, %v1620_v11  ;;  %v4430_v50 = vpop.f32.mrf.mxu1 }
 0x164   : > { %v4464_v6 = vpop.f32.mrf.mxu0  ;;  %v1629_v34 = vadd.f32 %v4430_v50, %v5680_v3 }
 0x165   : > { %v5861_v60 = vadd.f32 %v4464_v6, %v1625_v25  ;;  %v1532_v38 = vpop.f32.mrf.mxu1 }
 0x166   : > { %v2085_v16 = vpop.f32.mrf.mxu0  ;;  %v1627_v12 = vadd.f32 %v1532_v38, %v5686_v22 }
 0x167   : > { %v5864_v14 = vadd.f32 %v2085_v16, %v1623_v18  ;;  %v4431_v58 = vpop.f32.mrf.mxu1 }
 0x168   : > { %v4465_v35 = vpop.f32.mrf.mxu0  ;;  %v1630_v30 = vadd.f32 %v4431_v58, %v5693_v43 }
 0x169   : > { %v5867_v63 = vadd.f32 %v4465_v35, %v1626_v1  ;;  %v1535_v31 = vpop.f32.mrf.mxu1 }
 0x16a   : > { %v2088_v44 = vpop.f32.mrf.mxu0  ;;  %v1628_v4 = vadd.f32 %v1535_v31, %v5699_v53 }
 0x16b   : > { %v5870_v7 = vadd.f32 %v2088_v44, %v1624_v47  ;;  %v4434_v3 = vpop.f32.mrf.mxu1 }
 0x16c   : > { %v4468_v10 = vpop.f32.mrf.mxu0  ;;  %v1633_v21 = vadd.f32 %v4434_v3, %v5704_v29 }
 0x16d   : > { %v5873_v33 = vadd.f32 %v4468_v10, %v1629_v34  ;;  %v1548_v22 = vpop.f32.mrf.mxu1 }
 0x16e   : > { %v2101_v61 = vpop.f32.mrf.mxu0  ;;  %v1631_v23 = vadd.f32 %v1548_v22, %v5713_v56 }
 0x16f   : > { %v5876_v11 = vadd.f32 %v2101_v61, %v1627_v12  ;;  %v4435_v43 = vpop.f32.mrf.mxu1 }
 0x170   : > { %v4469_v57 = vpop.f32.mrf.mxu0  ;;  %v1634_v45 = vadd.f32 %v4435_v43, %v5719_v59 }
 0x171   : > { %v5879_v25 = vadd.f32 %v4469_v57, %v1630_v30  ;;  %v1551_v53 = vpop.f32.mrf.mxu1 }
 0x172   : > { %v2104_v28 = vpop.f32.mrf.mxu0  ;;  %v1632_v42 = vadd.f32 %v1551_v53, %v5724_v49 }
 0x173   : > { %v5882_v18 = vadd.f32 %v2104_v28, %v1628_v4  ;;  %v4438_v29 = vpop.f32.mrf.mxu1 }
 0x174   : > { %v4472_v19 = vpop.f32.mrf.mxu0  ;;  %v1637_v6 = vadd.f32 %v4438_v29, %v5730_v55 }
 0x175   : > { %v5885_v1 = vadd.f32 %v4472_v19, %v1633_v21  ;;  %v1564_v56 = vpop.f32.mrf.mxu1 }
 0x176   : > { %v2117_v17 = vpop.f32.mrf.mxu0  ;;  %v1635_v16 = vadd.f32 %v1564_v56, %v5737_v5 }
 0x177   : > { %v5888_v47 = vadd.f32 %v2117_v17, %v1631_v23  ;;  %v4439_v59 = vpop.f32.mrf.mxu1 }
 0x178   : > { %v4473_v50 = vpop.f32.mrf.mxu0  ;;  %v1638_v35 = vadd.f32 %v4439_v59, %v5745_v2 }
 0x179   : > { %v5891_v34 = vadd.f32 %v4473_v50, %v1634_v45  ;;  %v1567_v49 = vpop.f32.mrf.mxu1 }
 0x17a   : > { %v2120_v38 = vpop.f32.mrf.mxu0  ;;  %v1636_v44 = vadd.f32 %v1567_v49, %v5751_v51 }
 0x17b   : > { %v5894_v12 = vadd.f32 %v2120_v38, %v1632_v42  ;;  %v4442_v55 = vpop.f32.mrf.mxu1 }
 0x17c   : > { %v4476_v58 = vpop.f32.mrf.mxu0  ;;  %v1641_v10 = vadd.f32 %v4442_v55, %v5756_v62 }
 0x17d   : > { %v5897_v30 = vadd.f32 %v4476_v58, %v1637_v6  ;;  %v1580_v5 = vpop.f32.mrf.mxu1 }
 0x17e   : > { %v2133_v31 = vpop.f32.mrf.mxu0  ;;  %v1639_v61 = vadd.f32 %v1580_v5, %v5765_v13 }
 0x17f   : > { %v5900_v4 = vadd.f32 %v2133_v31, %v1635_v16  ;;  %v4443_v2 = vpop.f32.mrf.mxu1 }
 0x180   : > { %v4477_v3 = vpop.f32.mrf.mxu0  ;;  %v1642_v57 = vadd.f32 %v4443_v2, %v5771_v0 }
 0x181   : > { %v5903_v21 = vadd.f32 %v4477_v3, %v1638_v35  ;;  %v1583_v51 = vpop.f32.mrf.mxu1 }
 0x182   : > { %v2136_v22 = vpop.f32.mrf.mxu0  ;;  %v1640_v28 = vadd.f32 %v1583_v51, %v5779_v24 }
 0x183   : > { %v5906_v23 = vadd.f32 %v2136_v22, %v1636_v44  ;;  %v4446_v62 = vpop.f32.mrf.mxu1 }
 0x184   : > { %v4480_v43 = vpop.f32.mrf.mxu0  ;;  %v1645_v19 = vadd.f32 %v4446_v62, %v5785_v8 }
 0x185   : > { %v5909_v45 = vadd.f32 %v4480_v43, %v1641_v10  ;;  %v1596_v13 = vpop.f32.mrf.mxu1 }
 0x186   : > { %v2149_v53 = vpop.f32.mrf.mxu0  ;;  %v1643_v17 = vadd.f32 %v1596_v13, %v5794_v48 }
 0x187   : > { %v5912_v42 = vadd.f32 %v2149_v53, %v1639_v61  ;;  %v4447_v0 = vpop.f32.mrf.mxu1 }
 0x188   : > { %v4481_v29 = vpop.f32.mrf.mxu0  ;;  %v1646_v50 = vadd.f32 %v4447_v0, %v5800_v9 }
 0x189   : > { %v5915_v6 = vadd.f32 %v4481_v29, %v1642_v57  ;;  %v1599_v24 = vpop.f32.mrf.mxu1 }
 0x18a   : > { %v2152_v56 = vpop.f32.mrf.mxu0  ;;  %v1644_v38 = vadd.f32 %v1599_v24, %v5806_v41 }
 0x18b   : > { %v5918_v16 = vadd.f32 %v2152_v56, %v1640_v28  ;;  %v4490_v8 = vpop.f32.mrf.mxu1 }
 0x18c   : > { %v4484_v59 = vpop.f32.mrf.mxu0  ;;  %v2496_v58 = vadd.f32 %v4490_v8, %v5811_v54 }
 0x18d   : > { %v5921_v35 = vadd.f32 %v4484_v59, %v1645_v19  ;;  %v2351_v48 = vpop.f32.mrf.mxu1 }
 0x18e   : > { %v2165_v49 = vpop.f32.mrf.mxu0  ;;  %v2494_v31 = vadd.f32 %v2351_v48, %v5818_v52 }
 0x18f   : > { %v5924_v44 = vadd.f32 %v2165_v49, %v1643_v17  ;;  %v4491_v9 = vpop.f32.mrf.mxu1 }
 0x190   : > { %v4485_v55 = vpop.f32.mrf.mxu0  ;;  %v2497_v3 = vadd.f32 %v4491_v9, %v5822_v46 }
 0x191   : > { %v5927_v10 = vadd.f32 %v4485_v55, %v1646_v50  ;;  %v2354_v41 = vpop.f32.mrf.mxu1 }
 0x192   : > { %v2168_v5 = vpop.f32.mrf.mxu0  ;;  %v2495_v22 = vadd.f32 %v2354_v41, %v5827_v36 }
 0x193   : > { %v5930_v61 = vadd.f32 %v2168_v5, %v1644_v38  ;;  %v4494_v54 = vpop.f32.mrf.mxu1 }
 0x194   : > { %v4528_v2 = vpop.f32.mrf.mxu0  ;;  %v2500_v43 = vadd.f32 %v4494_v54, %v5832_v32 }
 0x195   : > { %v5933_v57 = vadd.f32 %v4528_v2, %v2496_v58  ;;  %v2367_v52 = vpop.f32.mrf.mxu1 }
 0x196   : > { %v2790_v51 = vpop.f32.mrf.mxu0  ;;  %v2498_v53 = vadd.f32 %v2367_v52, %v5838_v27 }
 0x197   : > { %v5936_v28 = vadd.f32 %v2790_v51, %v2494_v31  ;;  %v4495_v46 = vpop.f32.mrf.mxu1 }
 0x198   : > { %v4529_v62 = vpop.f32.mrf.mxu0  ;;  %v2501_v29 = vadd.f32 %v4495_v46, %v5841_v20 }
 0x199   : > { %v5939_v19 = vadd.f32 %v4529_v62, %v2497_v3  ;;  %v2370_v36 = vpop.f32.mrf.mxu1 }
 0x19a   : > { %v2793_v13 = vpop.f32.mrf.mxu0  ;;  %v2499_v56 = vadd.f32 %v2370_v36, %v5845_v39 }
 0x19b   : > { %v5942_v17 = vadd.f32 %v2793_v13, %v2495_v22  ;;  %v4498_v32 = vpop.f32.mrf.mxu1 }
 0x19c   : > { %v4532_v0 = vpop.f32.mrf.mxu0  ;;  %v2504_v59 = vadd.f32 %v4498_v32, %v5849_v15 }
 0x19d   : > { %v5945_v50 = vadd.f32 %v4532_v0, %v2500_v43  ;;  %v2383_v27 = vpop.f32.mrf.mxu1 }
 0x19e   : > { %v2806_v24 = vpop.f32.mrf.mxu0  ;;  %v2502_v49 = vadd.f32 %v2383_v27, %v5852_v37 }
 0x19f   : > { %v5948_v38 = vadd.f32 %v2806_v24, %v2498_v53  ;;  %v4499_v20 = vpop.f32.mrf.mxu1 }
 0x1a0   : > { %v4533_v8 = vpop.f32.mrf.mxu0  ;;  %v2505_v55 = vadd.f32 %v4499_v20, %v5855_v26 }
 0x1a1   : > { %v5951_v58 = vadd.f32 %v4533_v8, %v2501_v29  ;;  %v2386_v39 = vpop.f32.mrf.mxu1 }
 0x1a2   : > { %v2809_v48 = vpop.f32.mrf.mxu0  ;;  %v2503_v5 = vadd.f32 %v2386_v39, %v5858_v40 }
 0x1a3   : > { %v5954_v31 = vadd.f32 %v2809_v48, %v2499_v56  ;;  %v4502_v15 = vpop.f32.mrf.mxu1 }
 0x1a4   : > { %v4536_v9 = vpop.f32.mrf.mxu0  ;;  %v2508_v2 = vadd.f32 %v4502_v15, %v5861_v60 }
 0x1a5   : > { %v5957_v3 = vadd.f32 %v4536_v9, %v2504_v59  ;;  %v2399_v37 = vpop.f32.mrf.mxu1 }
 0x1a6   : > { %v2822_v41 = vpop.f32.mrf.mxu0  ;;  %v2506_v51 = vadd.f32 %v2399_v37, %v5864_v14 }
 0x1a7   : > { %v5960_v22 = vadd.f32 %v2822_v41, %v2502_v49  ;;  %v4503_v26 = vpop.f32.mrf.mxu1 }
 0x1a8   : > { %v4537_v54 = vpop.f32.mrf.mxu0  ;;  %v2509_v62 = vadd.f32 %v4503_v26, %v5867_v63 }
 0x1a9   : > { %v5963_v43 = vadd.f32 %v4537_v54, %v2505_v55  ;;  %v2402_v40 = vpop.f32.mrf.mxu1 }
 0x1aa   : > { %v2825_v52 = vpop.f32.mrf.mxu0  ;;  %v2507_v13 = vadd.f32 %v2402_v40, %v5870_v7 }
 0x1ab   : > { %v5966_v53 = vadd.f32 %v2825_v52, %v2503_v5  ;;  %v4506_v60 = vpop.f32.mrf.mxu1 }
 0x1ac   : > { %v4540_v46 = vpop.f32.mrf.mxu0  ;;  %v2512_v0 = vadd.f32 %v4506_v60, %v5873_v33 }
 0x1ad   : > { %v5969_v29 = vadd.f32 %v4540_v46, %v2508_v2  ;;  %v2415_v14 = vpop.f32.mrf.mxu1 }
 0x1ae   : > { %v2838_v36 = vpop.f32.mrf.mxu0  ;;  %v2510_v24 = vadd.f32 %v2415_v14, %v5876_v11 }
 0x1af   : > { %v5972_v56 = vadd.f32 %v2838_v36, %v2506_v51  ;;  %v4507_v63 = vpop.f32.mrf.mxu1 }
 0x1b0   : > { %v4541_v32 = vpop.f32.mrf.mxu0  ;;  %v2513_v8 = vadd.f32 %v4507_v63, %v5879_v25 }
 0x1b1   : > { %v5975_v59 = vadd.f32 %v4541_v32, %v2509_v62  ;;  %v2418_v7 = vpop.f32.mrf.mxu1 }
 0x1b2   : > { %v2841_v27 = vpop.f32.mrf.mxu0  ;;  %v2511_v48 = vadd.f32 %v2418_v7, %v5882_v18 }
 0x1b3   : > { %v5978_v49 = vadd.f32 %v2841_v27, %v2507_v13  ;;  %v4510_v33 = vpop.f32.mrf.mxu1 }
 0x1b4   : > { %v4544_v20 = vpop.f32.mrf.mxu0  ;;  %v2516_v9 = vadd.f32 %v4510_v33, %v5885_v1 }
 0x1b5   : > { %v5981_v55 = vadd.f32 %v4544_v20, %v2512_v0  ;;  %v2431_v11 = vpop.f32.mrf.mxu1 }
 0x1b6   : > { %v2854_v39 = vpop.f32.mrf.mxu0  ;;  %v2514_v41 = vadd.f32 %v2431_v11, %v5888_v47 }
 0x1b7   : > { %v5984_v5 = vadd.f32 %v2854_v39, %v2510_v24  ;;  %v4511_v25 = vpop.f32.mrf.mxu1 }
 0x1b8   : > { %v4545_v15 = vpop.f32.mrf.mxu0  ;;  %v2517_v54 = vadd.f32 %v4511_v25, %v5891_v34 }
 0x1b9   : > { %v5987_v2 = vadd.f32 %v4545_v15, %v2513_v8  ;;  %v2434_v18 = vpop.f32.mrf.mxu1 }
 0x1ba   : > { %v2857_v37 = vpop.f32.mrf.mxu0  ;;  %v2515_v52 = vadd.f32 %v2434_v18, %v5894_v12 }
 0x1bb   : > { %v5990_v51 = vadd.f32 %v2857_v37, %v2511_v48  ;;  %v4514_v1 = vpop.f32.mrf.mxu1 }
 0x1bc   : > { %v4548_v26 = vpop.f32.mrf.mxu0  ;;  %v2520_v46 = vadd.f32 %v4514_v1, %v5897_v30 }
 0x1bd   : > { %v5993_v62 = vadd.f32 %v4548_v26, %v2516_v9  ;;  %v2447_v47 = vpop.f32.mrf.mxu1 }
 0x1be   : > { %v2870_v40 = vpop.f32.mrf.mxu0  ;;  %v2518_v36 = vadd.f32 %v2447_v47, %v5900_v4 }
 0x1bf   : > { %v5996_v13 = vadd.f32 %v2870_v40, %v2514_v41  ;;  %v4515_v34 = vpop.f32.mrf.mxu1 }
 0x1c0   : > { %v4549_v60 = vpop.f32.mrf.mxu0  ;;  %v2521_v32 = vadd.f32 %v4515_v34, %v5903_v21 }
 0x1c1   : > { %v5999_v0 = vadd.f32 %v4549_v60, %v2517_v54  ;;  %v2450_v12 = vpop.f32.mrf.mxu1 }
 0x1c2   : > { %v2873_v14 = vpop.f32.mrf.mxu0  ;;  %v2519_v27 = vadd.f32 %v2450_v12, %v5906_v23 }
 0x1c3   : > { %v6002_v24 = vadd.f32 %v2873_v14, %v2515_v52  ;;  %v4518_v30 = vpop.f32.mrf.mxu1 }
 0x1c4   : > { %v4552_v63 = vpop.f32.mrf.mxu0  ;;  %v2524_v20 = vadd.f32 %v4518_v30, %v5909_v45 }
 0x1c5   : > { %v6005_v8 = vadd.f32 %v4552_v63, %v2520_v46  ;;  %v2463_v4 = vpop.f32.mrf.mxu1 }
 0x1c6   : > { %v2886_v7 = vpop.f32.mrf.mxu0  ;;  %v2522_v39 = vadd.f32 %v2463_v4, %v5912_v42 }
 0x1c7   : > { %v6008_v48 = vadd.f32 %v2886_v7, %v2518_v36  ;;  %v4519_v21 = vpop.f32.mrf.mxu1 }
 0x1c8   : > { %v4553_v33 = vpop.f32.mrf.mxu0  ;;  %v2525_v15 = vadd.f32 %v4519_v21, %v5915_v6 }
 0x1c9   : > { %v6011_v9 = vadd.f32 %v4553_v33, %v2521_v32  ;;  %v2466_v23 = vpop.f32.mrf.mxu1 }
 0x1ca   : > { %v2889_v11 = vpop.f32.mrf.mxu0  ;;  %v2523_v37 = vadd.f32 %v2466_v23, %v5918_v16 }
 0x1cb   : > { %v6014_v41 = vadd.f32 %v2889_v11, %v2519_v27  ;;  %v4522_v45 = vpop.f32.mrf.mxu1 }
 0x1cc   : > { %v4556_v25 = vpop.f32.mrf.mxu0  ;;  %v2528_v26 = vadd.f32 %v4522_v45, %v5921_v35 }
 0x1cd   : > { %v6017_v54 = vadd.f32 %v4556_v25, %v2524_v20  ;;  %v2479_v42 = vpop.f32.mrf.mxu1 }
 0x1ce   : > { %v2902_v18 = vpop.f32.mrf.mxu0  ;;  %v2526_v40 = vadd.f32 %v2479_v42, %v5924_v44 }
 0x1cf   : > { %v6020_v52 = vadd.f32 %v2902_v18, %v2522_v39  ;;  %v4523_v6 = vpop.f32.mrf.mxu1 }
 0x1d0   : > { %v4557_v1 = vpop.f32.mrf.mxu0  ;;  %v2529_v60 = vadd.f32 %v4523_v6, %v5927_v10 }
 0x1d1   : > { %v6023_v46 = vadd.f32 %v4557_v1, %v2525_v15  ;;  %v2482_v36 = vpop.f32.mrf.mxu1 }
 0x1d2   : > { %v2905_v47 = vpop.f32.mrf.mxu0  ;;  %v2527_v14 = vadd.f32 %v2482_v36, %v5930_v61  ;;  %v6042_v61 = vld [vmem:[%s6196_s2] ss:$0 sm:$0xff] }
 0x1d3   : > { %v6026_v16 = vadd.f32 %v2905_v47, %v2523_v37  ;;  %v4566_v32 = vpop.f32.mrf.mxu1 }
 0x1d4   : > { %v4560_v34 = vpop.f32.mrf.mxu0  ;;  %v3382_v10 = vadd.f32 %v4566_v32, %v5933_v57 }
 0x1d5   : > { %v6029_v35 = vadd.f32 %v4560_v34, %v2528_v26  ;;  %v3237_v44 = vpop.f32.mrf.mxu1 }
 0x1d6   : > { %v2918_v12 = vpop.f32.mrf.mxu0  ;;  %v3380_v21 = vadd.f32 %v3237_v44, %v5936_v28 }
 0x1d7   : > { %v6031_v63 = vadd.f32 %v2918_v12, %v2526_v40  ;;  %v4567_v7 = vpop.f32.mrf.mxu1 }
 0x1d8   : > { %v4561_v27 = vpop.f32.mrf.mxu0  ;;  %v3383_v23 = vadd.f32 %v4567_v7, %v5939_v19 }
 0x1d9   : > { %v6033_v30 = vadd.f32 %v4561_v27, %v2529_v60  ;;  %v3240_v33 = vpop.f32.mrf.mxu1 }
 0x1da   : > { %v2921_v20 = vpop.f32.mrf.mxu0  ;;  %v3381_v28 = vadd.f32 %v3240_v33, %v5942_v17 }
 0x1db   : > { %v6037_v4 = vadd.f32 %v2921_v20, %v2527_v14  ;;  %v4570_v15 = vpop.f32.mrf.mxu1 }
 0x1dc   : > { %v4604_v39 = vpop.f32.mrf.mxu0  ;;  %v3386_v6 = vadd.f32 %v4570_v15, %v5945_v50 }
 0x1dd   : > { %v3696_v11 = vadd.f32 %v4604_v39, %v3382_v10  ;;  %v3253_v45 = vpop.f32.mrf.mxu1 }
 0x1de   : > { %v3551_v57 = vpop.f32.mrf.mxu0  ;;  %v3384_v17 = vadd.f32 %v3253_v45, %v5948_v38 }
 0x1df   : > { %v3739_v25 = vadd.f32 %v6042_v61, %v3696_v11  ;;  %v3694_v37 = vadd.f32 %v3551_v57, %v3380_v21  ;;  %v4571_v1 = vpop.f32.mrf.mxu1 }
 0x1e0   : > { %v4605_v18 = vpop.f32.mrf.mxu0  ;;  %v3387_v50 = vadd.f32 %v4571_v1, %v5951_v58 }
 0x1e1   : > { %3776 = vst.msk [vmem:[%s6048_s16 + $0x10] sm:$0xff] %vm3773_vm8, %v3739_v25  ;;  %v3737_v26 = vadd.f32 %v6042_v61, %v3694_v37  ;;  %v3697_v42 = vadd.f32 %v4605_v18, %v3383_v23  ;;  %v3256_v60 = vpop.f32.mrf.mxu1 }
 0x1e2   : > { %v3554_v40 = vpop.f32.mrf.mxu0  ;;  %v3385_v38 = vadd.f32 %v3256_v60, %v5954_v31 }
 0x1e3   : > { %3774 = vst.msk [vmem:[%s6048_s16] sm:$0xff] %vm3773_vm8, %v3737_v26  ;;  %v3740_v19 = vadd.f32 %v6042_v61, %v3697_v42  ;;  %v3695_v47 = vadd.f32 %v3554_v40, %v3381_v28  ;;  %v4574_v32 = vpop.f32.mrf.mxu1 }
 0x1e4   : > { %v4608_v36 = vpop.f32.mrf.mxu0  ;;  %v3390_v58 = vadd.f32 %v4574_v32, %v5957_v3 }
 0x1e5   : > { %3777 = vst.msk [vmem:[%s6048_s16 + $0x18] sm:$0xff] %vm3773_vm8, %v3740_v19  ;;  %v3738_v34 = vadd.f32 %v6042_v61, %v3695_v47  ;;  %v3700_v14 = vadd.f32 %v4608_v36, %v3386_v6  ;;  %v3269_v7 = vpop.f32.mrf.mxu1 }
 0x1e6   : > { %v3567_v12 = vpop.f32.mrf.mxu0  ;;  %v3388_v31 = vadd.f32 %v3269_v7, %v5960_v22 }
 0x1e7   : > { %3775 = vst.msk [vmem:[%s6048_s16 + $0x8] sm:$0xff] %vm3773_vm8, %v3738_v34  ;;  %v3743_v44 = vadd.f32 %v6042_v61, %v3700_v14  ;;  %v3698_v27 = vadd.f32 %v3567_v12, %v3384_v17  ;;  %v4575_v39 = vpop.f32.mrf.mxu1 }
 0x1e8   : > { %v4609_v20 = vpop.f32.mrf.mxu0  ;;  %v3391_v3 = vadd.f32 %v4575_v39, %v5963_v43 }
 0x1e9   : > { %3780 = vst.msk [vmem:[%s6048_s16 + $0x30] sm:$0xff] %vm3773_vm8, %v3743_v44  ;;  %v3741_v10 = vadd.f32 %v6042_v61, %v3698_v27  ;;  %v3701_v33 = vadd.f32 %v4609_v20, %v3387_v50  ;;  %v3272_v57 = vpop.f32.mrf.mxu1 }
 0x1ea   : > { %v3570_v21 = vpop.f32.mrf.mxu0  ;;  %v3389_v22 = vadd.f32 %v3272_v57, %v5966_v53 }
 0x1eb   : > { %3778 = vst.msk [vmem:[%s6048_s16 + $0x20] sm:$0xff] %vm3773_vm8, %v3741_v10  ;;  %v3744_v11 = vadd.f32 %v6042_v61, %v3701_v33  ;;  %v3699_v15 = vadd.f32 %v3570_v21, %v3385_v38  ;;  %v4578_v45 = vpop.f32.mrf.mxu1 }
 0x1ec   : > { %v4612_v23 = vpop.f32.mrf.mxu0  ;;  %v3394_v43 = vadd.f32 %v4578_v45, %v5969_v29 }
 0x1ed   : > { %3781 = vst.msk [vmem:[%s6048_s16 + $0x38] sm:$0xff] %vm3773_vm8, %v3744_v11  ;;  %v3742_v25 = vadd.f32 %v6042_v61, %v3699_v15  ;;  %v3704_v37 = vadd.f32 %v4612_v23, %v3390_v58  ;;  %v3285_v42 = vpop.f32.mrf.mxu1 }
 0x1ee   : > { %v3583_v18 = vpop.f32.mrf.mxu0  ;;  %v3392_v53 = vadd.f32 %v3285_v42, %v5972_v56 }
 0x1ef   : > { %3779 = vst.msk [vmem:[%s6048_s16 + $0x28] sm:$0xff] %vm3773_vm8, %v3742_v25  ;;  %v3747_v28 = vadd.f32 %v6042_v61, %v3704_v37  ;;  %v3702_v26 = vadd.f32 %v3583_v18, %v3388_v31  ;;  %v4579_v19 = vpop.f32.mrf.mxu1 }
 0x1f0   : > { %v4613_v1 = vpop.f32.mrf.mxu0  ;;  %v3395_v29 = vadd.f32 %v4579_v19, %v5975_v59 }
 0x1f1   : > { %3784 = vst.msk [vmem:[%s6048_s16 + $0x50] sm:$0xff] %vm3773_vm8, %v3747_v28  ;;  %v3745_v40 = vadd.f32 %v6042_v61, %v3702_v26  ;;  %v3705_v6 = vadd.f32 %v4613_v1, %v3391_v3  ;;  %v3288_v17 = vpop.f32.mrf.mxu1 }
 0x1f2   : > { %v3586_v47 = vpop.f32.mrf.mxu0  ;;  %v3393_v56 = vadd.f32 %v3288_v17, %v5978_v49 }
 0x1f3   : > { %3782 = vst.msk [vmem:[%s6048_s16 + $0x40] sm:$0xff] %vm3773_vm8, %v3745_v40  ;;  %v3748_v60 = vadd.f32 %v6042_v61, %v3705_v6  ;;  %v3703_v36 = vadd.f32 %v3586_v47, %v3389_v22  ;;  %v4582_v12 = vpop.f32.mrf.mxu1 }
 0x1f4   : > { %v4616_v34 = vpop.f32.mrf.mxu0  ;;  %v3398_v59 = vadd.f32 %v4582_v12, %v5981_v55 }
 0x1f5   : > { %3785 = vst.msk [vmem:[%s6048_s16 + $0x58] sm:$0xff] %vm3773_vm8, %v3748_v60  ;;  %v3746_v14 = vadd.f32 %v6042_v61, %v3703_v36  ;;  %v3708_v32 = vadd.f32 %v4616_v34, %v3394_v43  ;;  %v3301_v7 = vpop.f32.mrf.mxu1 }
 0x1f6   : > { %v3599_v50 = vpop.f32.mrf.mxu0  ;;  %v3396_v49 = vadd.f32 %v3301_v7, %v5984_v5 }
 0x1f7   : > { %3783 = vst.msk [vmem:[%s6048_s16 + $0x48] sm:$0xff] %vm3773_vm8, %v3746_v14  ;;  %v3751_v44 = vadd.f32 %v6042_v61, %v3708_v32  ;;  %v3706_v27 = vadd.f32 %v3599_v50, %v3392_v53  ;;  %v4583_v33 = vpop.f32.mrf.mxu1 }
 0x1f8   : > { %v4617_v20 = vpop.f32.mrf.mxu0  ;;  %v3399_v55 = vadd.f32 %v4583_v33, %v5987_v2 }
 0x1f9   : > { %3788 = vst.msk [vmem:[%s6048_s16 + $0x70] sm:$0xff] %vm3773_vm8, %v3751_v44  ;;  %v3749_v38 = vadd.f32 %v6042_v61, %v3706_v27  ;;  %v3709_v10 = vadd.f32 %v4617_v20, %v3395_v29  ;;  %v3304_v11 = vpop.f32.mrf.mxu1 }
 0x1fa   : > { %v3602_v39 = vpop.f32.mrf.mxu0  ;;  %v3397_v5 = vadd.f32 %v3304_v11, %v5990_v51 }
 0x1fb   : > { %3786 = vst.msk [vmem:[%s6048_s16 + $0x60] sm:$0xff] %vm3773_vm8, %v3749_v38  ;;  %v3752_v21 = vadd.f32 %v6042_v61, %v3709_v10  ;;  %v3707_v58 = vadd.f32 %v3602_v39, %v3393_v56  ;;  %v4586_v31 = vpop.f32.mrf.mxu1 }
 0x1fc   : > { %v4620_v15 = vpop.f32.mrf.mxu0  ;;  %v3402_v2 = vadd.f32 %v4586_v31, %v5993_v62 }
 0x1fd   : > { %3789 = vst.msk [vmem:[%s6048_s16 + $0x78] sm:$0xff] %vm3773_vm8, %v3752_v21  ;;  %v3750_v57 = vadd.f32 %v6042_v61, %v3707_v58  ;;  %v3712_v23 = vadd.f32 %v4620_v15, %v3398_v59  ;;  %v3317_v18 = vpop.f32.mrf.mxu1 }
 0x1fe   : > { %v3615_v25 = vpop.f32.mrf.mxu0  ;;  %v3400_v51 = vadd.f32 %v3317_v18, %v5996_v13 }
 0x1ff   : > { %3787 = vst.msk [vmem:[%s6048_s16 + $0x68] sm:$0xff] %vm3773_vm8, %v3750_v57  ;;  %v3755_v37 = vadd.f32 %v6042_v61, %v3712_v23  ;;  %v3710_v45 = vadd.f32 %v3615_v25, %v3396_v49  ;;  %v4587_v42 = vpop.f32.mrf.mxu1 }
 0x200   : > { %v4621_v3 = vpop.f32.mrf.mxu0  ;;  %v3403_v62 = vadd.f32 %v4587_v42, %v5999_v0 }
 0x201   : > { %3792 = vst.msk [vmem:[%s6048_s16 + $0x90] sm:$0xff] %vm3773_vm8, %v3755_v37  ;;  %v3753_v28 = vadd.f32 %v6042_v61, %v3710_v45  ;;  %v3713_v26 = vadd.f32 %v4621_v3, %v3399_v55  ;;  %v3320_v6 = vpop.f32.mrf.mxu1 }
 0x202   : > { %v3618_v1 = vpop.f32.mrf.mxu0  ;;  %v3401_v13 = vadd.f32 %v3320_v6, %v6002_v24 }
 0x203   : > { %3790 = vst.msk [vmem:[%s6048_s16 + $0x80] sm:$0xff] %vm3773_vm8, %v3753_v28  ;;  %v3756_v22 = vadd.f32 %v6042_v61, %v3713_v26  ;;  %v3711_v40 = vadd.f32 %v3618_v1, %v3397_v5  ;;  %v4590_v60 = vpop.f32.mrf.mxu1 }
 0x204   : > { %v4624_v19 = vpop.f32.mrf.mxu0  ;;  %v3406_v0 = vadd.f32 %v4590_v60, %v6005_v8 }
 0x205   : > { %3793 = vst.msk [vmem:[%s6048_s16 + $0x98] sm:$0xff] %vm3773_vm8, %v3756_v22  ;;  %v3754_v47 = vadd.f32 %v6042_v61, %v3711_v40  ;;  %v3716_v43 = vadd.f32 %v4624_v19, %v3402_v2  ;;  %v3333_v53 = vpop.f32.mrf.mxu1 }
 0x206   : > { %v3631_v36 = vpop.f32.mrf.mxu0  ;;  %v3404_v24 = vadd.f32 %v3333_v53, %v6008_v48 }
 0x207   : > { %3791 = vst.msk [vmem:[%s6048_s16 + $0x88] sm:$0xff] %vm3773_vm8, %v3754_v47  ;;  %v3759_v17 = vadd.f32 %v6042_v61, %v3716_v43  ;;  %v3714_v34 = vadd.f32 %v3631_v36, %v3400_v51  ;;  %v4591_v50 = vpop.f32.mrf.mxu1 }
 0x208   : > { %v4625_v14 = vpop.f32.mrf.mxu0  ;;  %v3407_v8 = vadd.f32 %v4591_v50, %v6011_v9 }
 0x209   : > { %3796 = vst.msk [vmem:[%s6048_s16 + $0xb0] sm:$0xff] %vm3773_vm8, %v3759_v17  ;;  %v3757_v32 = vadd.f32 %v6042_v61, %v3714_v34  ;;  %v3717_v12 = vadd.f32 %v4625_v14, %v3403_v62  ;;  %v3336_v7 = vpop.f32.mrf.mxu1 }
 0x20a   : > { %v3634_v29 = vpop.f32.mrf.mxu0  ;;  %v3405_v48 = vadd.f32 %v3336_v7, %v6014_v41 }
 0x20b   : > { %3794 = vst.msk [vmem:[%s6048_s16 + $0xa0] sm:$0xff] %vm3773_vm8, %v3757_v32  ;;  %v3760_v44 = vadd.f32 %v6042_v61, %v3717_v12  ;;  %v3715_v27 = vadd.f32 %v3634_v29, %v3401_v13  ;;  %v4594_v10 = vpop.f32.mrf.mxu1 }
 0x20c   : > { %v4628_v20 = vpop.f32.mrf.mxu0  ;;  %v3410_v9 = vadd.f32 %v4594_v10, %v6017_v54 }
 0x20d   : > { %3797 = vst.msk [vmem:[%s6048_s16 + $0xb8] sm:$0xff] %vm3773_vm8, %v3760_v44  ;;  %v3758_v56 = vadd.f32 %v6042_v61, %v3715_v27  ;;  %v3720_v38 = vadd.f32 %v4628_v20, %v3406_v0  ;;  %v3349_v21 = vpop.f32.mrf.mxu1 }
 0x20e   : > { %v3647_v33 = vpop.f32.mrf.mxu0  ;;  %v3408_v41 = vadd.f32 %v3349_v21, %v6020_v52 }
 0x20f   : > { %3795 = vst.msk [vmem:[%s6048_s16 + $0xa8] sm:$0xff] %vm3773_vm8, %v3758_v56  ;;  %v3763_v39 = vadd.f32 %v6042_v61, %v3720_v38  ;;  %v3718_v59 = vadd.f32 %v3647_v33, %v3404_v24  ;;  %v4595_v49 = vpop.f32.mrf.mxu1 }
 0x210   : > { %v4629_v58 = vpop.f32.mrf.mxu0  ;;  %v3411_v54 = vadd.f32 %v4595_v49, %v6023_v46 }
 0x211   : > { %3800 = vst.msk [vmem:[%s6048_s16 + $0xd0] sm:$0xff] %vm3773_vm8, %v3763_v39  ;;  %v3761_v11 = vadd.f32 %v6042_v61, %v3718_v59  ;;  %v3721_v15 = vadd.f32 %v4629_v58, %v3407_v8  ;;  %v3352_v25 = vpop.f32.mrf.mxu1 }
 0x212   : > { %v3650_v57 = vpop.f32.mrf.mxu0  ;;  %v3409_v52 = vadd.f32 %v3352_v25, %v6026_v16 }
 0x213   : > { %3798 = vst.msk [vmem:[%s6048_s16 + $0xc0] sm:$0xff] %vm3773_vm8, %v3761_v11  ;;  %v3764_v23 = vadd.f32 %v6042_v61, %v3721_v15  ;;  %v3719_v31 = vadd.f32 %v3650_v57, %v3405_v48  ;;  %v4598_v18 = vpop.f32.mrf.mxu1 }
 0x214   : > { %v4632_v55 = vpop.f32.mrf.mxu0  ;;  %v3414_v46 = vadd.f32 %v4598_v18, %v6029_v35 }
 0x215   : > { %3801 = vst.msk [vmem:[%s6048_s16 + $0xd8] sm:$0xff] %vm3773_vm8, %v3764_v23  ;;  %v3762_v37 = vadd.f32 %v6042_v61, %v3719_v31  ;;  %v3724_v45 = vadd.f32 %v4632_v55, %v3410_v9  ;;  %v3365_v26 = vpop.f32.mrf.mxu1 }
 0x216   : > { %v3663_v3 = vpop.f32.mrf.mxu0  ;;  %v3412_v47 = vadd.f32 %v3365_v26, %v6031_v63 }
 0x217   : > { %3799 = vst.msk [vmem:[%s6048_s16 + $0xc8] sm:$0xff] %vm3773_vm8, %v3762_v37  ;;  %v3767_v5 = vadd.f32 %v6042_v61, %v3724_v45  ;;  %v3722_v28 = vadd.f32 %v3663_v3, %v3408_v41  ;;  %v4599_v22 = vpop.f32.mrf.mxu1 }
 0x218   : > { %v4633_v42 = vpop.f32.mrf.mxu0  ;;  %v3415_v35 = vadd.f32 %v4599_v22, %v6033_v30 }
 0x219   : > { %3804 = vst.msk [vmem:[%s6048_s16 + $0xf0] sm:$0xff] %vm3773_vm8, %v3767_v5  ;;  %v3765_v1 = vadd.f32 %v6042_v61, %v3722_v28  ;;  %v3725_v2 = vadd.f32 %v4633_v42, %v3411_v54  ;;  %v3368_v60 = vpop.f32.mrf.mxu1 }
 0x21a   : > { %v3666_v40 = vpop.f32.mrf.mxu0  ;;  %v3413_v63 = vadd.f32 %v3368_v60, %v6037_v4 }
 0x21b   : > { %3802 = vst.msk [vmem:[%s6048_s16 + $0xe0] sm:$0xff] %vm3773_vm8, %v3765_v1  ;;  %v3768_v6 = vadd.f32 %v6042_v61, %v3725_v2  ;;  %v3723_v19 = vadd.f32 %v3666_v40, %v3409_v52 }
 0x21c   : > { %v4636_v51 = vpop.f32.mrf.mxu0 }
 0x21d   : > { %3805 = vst.msk [vmem:[%s6048_s16 + $0xf8] sm:$0xff] %vm3773_vm8, %v3768_v6  ;;  %v3766_v16 = vadd.f32 %v6042_v61, %v3723_v19  ;;  %v3728_v43 = vadd.f32 %v4636_v51, %v3414_v46 }
 0x21e   : > { %v3679_v36 = vpop.f32.mrf.mxu0 }
 0x21f   : > { %3803 = vst.msk [vmem:[%s6048_s16 + $0xe8] sm:$0xff] %vm3773_vm8, %v3766_v16  ;;  %v3771_v62 = vadd.f32 %v6042_v61, %v3728_v43  ;;  %v3726_v17 = vadd.f32 %v3679_v36, %v3412_v47 }
 0x220   : > { %v4637_v34 = vpop.f32.mrf.mxu0 }
 0x221   : > { %3808 = vst.msk [vmem:[%s6048_s16 + $0x110] sm:$0xff] %vm3773_vm8, %v3771_v62  ;;  %v3769_v53 = vadd.f32 %v6042_v61, %v3726_v17  ;;  %v3729_v14 = vadd.f32 %v4637_v34, %v3415_v35 }
 0x222   : > { %v3682_v13 = vpop.f32.mrf.mxu0 }
 0x223   : > { %3806 = vst.msk [vmem:[%s6048_s16 + $0x100] sm:$0xff] %vm3773_vm8, %v3769_v53  ;;  %v3772_v30 = vadd.f32 %v6042_v61, %v3729_v14  ;;  %v3727_v32 = vadd.f32 %v3682_v13, %v3413_v63 }
 0x225   : > { %3810 = vst.msk [vmem:[%s6048_s16 + $0x118] sm:$0x3f] %vm3809_vm9, %v3772_v30  ;;  %v3770_v12 = vadd.f32 %v6042_v61, %v3727_v32 }
 0x227   : > { %3807 = vst.msk [vmem:[%s6048_s16 + $0x108] sm:$0xff] %vm3773_vm8, %v3770_v12 }
 0x228 PF: > { %s13_s12 = sadd.s32 1, %s4745_s12  }
 0x229   : > { %p10_p4 = scmp.ge.s32.totalorder %s13_s12, 4  }
 0x22b   :  { %12 = sbr.rel (!%p10_p4) target bundleno = 1 (0x1), region = 70 }

</bundles_post_ra>
